<compile_context>
chip_gen: v5e
topology: v5e:2x2
jax: 0.10.0
libtpu: 0.0.40
codegen_flags: <defaults>
</compile_context>

<pallas_src>
import functools

import jax
import jax.numpy as jnp
from jax import lax
from jax.experimental import pallas as pl
from jax.experimental.pallas import tpu as pltpu


# ----------------------------------------------------------------------------
# Helpers
# ----------------------------------------------------------------------------
def _gelu(x):
    # tanh-approx GELU: tanh goes to the EUP slot -> nearly free inside the
    # matmul kernel. (Small documented numerical change vs. exact-erf GELU.)
    c = 0.7978845608028654  # sqrt(2/pi)
    return 0.5 * x * (1.0 + jnp.tanh(c * (x + 0.044715 * x * x * x)))


# ----------------------------------------------------------------------------
# Pallas kernels
# ----------------------------------------------------------------------------
def _make_linear_kernel(fuse_gelu: bool, has_residual: bool):
    """y = x @ w + b (+ residual) (+ gelu).  Blocks: x (1,N,Cin), out (1,N,Cout)."""
    if has_residual:
        def kernel(x_ref, w_ref, b_ref, r_ref, o_ref):
            x = x_ref[0].astype(jnp.bfloat16)          # (N, Cin) bf16
            acc = jnp.dot(x, w_ref[...], preferred_element_type=jnp.float32)
            acc = acc + b_ref[...] + r_ref[0]
            if fuse_gelu:
                acc = _gelu(acc)
            o_ref[0] = acc
    else:
        def kernel(x_ref, w_ref, b_ref, o_ref):
            x = x_ref[0].astype(jnp.bfloat16)
            acc = jnp.dot(x, w_ref[...], preferred_element_type=jnp.float32)
            acc = acc + b_ref[...]
            if fuse_gelu:
                acc = _gelu(acc)
            o_ref[0] = acc
    return kernel


def _head_kernel(x_ref, w1_ref, b1_ref, w2_ref, b2_ref, o_ref):
    # Fused fc1 -> gelu -> fc2.  Intermediate (N, 128) stays in VMEM/vregs.
    x = x_ref[0].astype(jnp.bfloat16)                  # (N, width)
    h = jnp.dot(x, w1_ref[...], preferred_element_type=jnp.float32)
    h = _gelu(h + b1_ref[...])
    o = jnp.dot(h.astype(jnp.bfloat16), w2_ref[...],
                preferred_element_type=jnp.float32)
    o_ref[0] = o + b2_ref[...]


def _spectral_mul_kernel(a_ref, w_ref, o_ref):
    # Batched (per-mode) MXU contraction over the minor (lane) channel axis:
    #   a: (tm, B, 2Ci) bf16 ; w: (tm, 2Co, 2Ci) bf16 ; out: (tm, B, 2Co) f32
    #   out[m, b, n] = sum_k a[m, b, k] * w[m, n, k]
    o_ref[...] = lax.dot_general(
        a_ref[...], w_ref[...],
        dimension_numbers=(((2,), (2,)), ((0,), (0,))),
        preferred_element_type=jnp.float32)


# ----------------------------------------------------------------------------
# Pallas wrappers
# ----------------------------------------------------------------------------
def pallas_linear(x, w, b, residual=None, fuse_gelu=False):
    """x: (B, N, Cin) f32; w: (Cin, Cout) bf16; b: (Cout,) f32.

    Optional residual: (B, N, Cout) f32 (fused add).  Optional fused GELU.
    Grid = (B,) -> block == full (N, C) slab per batch element; no padding or
    per-call copies, and >=2 parallel steps for v7x's two TensorCores.
    """
    B, N, Cin = x.shape
    Cout = w.shape[1]
    b2 = b.reshape(1, Cout)

    in_specs = [
        pl.BlockSpec((1, N, Cin), lambda i: (i, 0, 0)),
        pl.BlockSpec((Cin, Cout), lambda i: (0, 0)),
        pl.BlockSpec((1, Cout), lambda i: (0, 0)),
    ]
    args = [x, w, b2]
    if residual is not None:
        in_specs.append(pl.BlockSpec((1, N, Cout), lambda i: (i, 0, 0)))
        args.append(residual)

    kernel = _make_linear_kernel(fuse_gelu, residual is not None)
    return pl.pallas_call(
        kernel,
        out_shape=jax.ShapeDtypeStruct((B, N, Cout), jnp.float32),
        grid=(B,),
        in_specs=in_specs,
        out_specs=pl.BlockSpec((1, N, Cout), lambda i: (i, 0, 0)),
        compiler_params=pltpu.CompilerParams(dimension_semantics=("parallel",)),
    )(*args)


def pallas_head(x, w1, b1, w2, b2):
    """Fused fc1 -> gelu -> fc2.  x: (B, N, width) f32 -> (B, N, out) f32."""
    B, N, Cin = x.shape
    Ch = w1.shape[1]
    Cout = w2.shape[1]
    return pl.pallas_call(
        _head_kernel,
        out_shape=jax.ShapeDtypeStruct((B, N, Cout), jnp.float32),
        grid=(B,),
        in_specs=[
            pl.BlockSpec((1, N, Cin), lambda i: (i, 0, 0)),
            pl.BlockSpec((Cin, Ch), lambda i: (0, 0)),
            pl.BlockSpec((1, Ch), lambda i: (0, 0)),
            pl.BlockSpec((Ch, Cout), lambda i: (0, 0)),
            pl.BlockSpec((1, Cout), lambda i: (0, 0)),
        ],
        out_specs=pl.BlockSpec((1, N, Cout), lambda i: (i, 0, 0)),
        compiler_params=pltpu.CompilerParams(dimension_semantics=("parallel",)),
    )(x, w1, b1.reshape(1, Ch), w2, b2.reshape(1, Cout))


def pallas_spectral_mul(a_cat, wc, tile_m):
    """Per-mode complex channel contraction on the MXU.

    a_cat: (M, B, 2Ci) bf16   real|imag concatenated on the channel (lane) axis.
    wc:    (M, 2Co, 2Ci) bf16 kernel-ready packed complex weights.
    Returns (M, B, 2Co) f32 = real|imag of the output modes.
    """
    M, B, K = a_cat.shape
    N = wc.shape[1]
    assert M % tile_m == 0
    return pl.pallas_call(
        _spectral_mul_kernel,
        out_shape=jax.ShapeDtypeStruct((M, B, N), jnp.float32),
        grid=(M // tile_m,),
        in_specs=[
            pl.BlockSpec((tile_m, B, K), lambda i: (i, 0, 0)),
            pl.BlockSpec((tile_m, N, K), lambda i: (i, 0, 0)),
        ],
        out_specs=pl.BlockSpec((tile_m, B, N), lambda i: (i, 0, 0)),
        compiler_params=pltpu.CompilerParams(dimension_semantics=("parallel",)),
    )(a_cat, wc)


# ----------------------------------------------------------------------------
# SpectralConv2d (FFT glue in plain JAX, channel contraction in Pallas)
# ----------------------------------------------------------------------------
def spectral_conv2d(x, wc, modes1, modes2):
    """x: (B, H, W, Ci) f32.  wc: (M=2*m1*m2, 2Co, 2Ci) bf16 (pre-packed)."""
    # TODO(synk): rfft2/irfft2 have no Pallas equivalent; they stay in plain JAX.
    B, H, W, Ci = x.shape
    Co = wc.shape[1] // 2
    M = 2 * modes1 * modes2

    x_ft = jnp.fft.rfft2(x, axes=(1, 2))                  # (B, H, W//2+1, Ci) c64
    low = x_ft[:, :modes1, :modes2, :]
    high = x_ft[:, H - modes1:, :modes2, :]
    a = jnp.concatenate([low, high], axis=1).reshape(B, M, Ci)
    a = jnp.transpose(a, (1, 0, 2))                       # (M, B, Ci)
    a_cat = jnp.concatenate(
        [jnp.real(a), jnp.imag(a)], axis=-1).astype(jnp.bfloat16)  # (M, B, 2Ci)

    out = pallas_spectral_mul(a_cat, wc, tile_m=M // 2)   # (M, B, 2Co) f32
    out = jnp.transpose(out, (1, 0, 2))                   # (B, M, 2Co)
    out_c = (out[..., :Co] + 1j * out[..., Co:]).astype(jnp.complex64)
    out_c = out_c.reshape(B, 2 * modes1, modes2, Co)

    out_ft = jnp.zeros((B, H, W // 2 + 1, Co), jnp.complex64)
    out_ft = out_ft.at[:, :modes1, :modes2, :].set(out_c[:, :modes1])
    out_ft = out_ft.at[:, H - modes1:, :modes2, :].set(out_c[:, modes1:])
    y = jnp.fft.irfft2(out_ft, s=(H, W), axes=(1, 2))     # (B, H, W, Co) f32
    return y.astype(jnp.float32)


# ----------------------------------------------------------------------------
# Full FNO2d forward
# ----------------------------------------------------------------------------
def fno2d_forward(params, x, *, modes1, modes2, padding):
    """x: (B, S1, S2, in_channels) -> (B, S1, S2, outsize[1])."""
    B, S1, S2, Cin = x.shape
    width = params["fc0_w"].shape[1]

    # fc0: lift to channel width
    h = pallas_linear(x.reshape(B, S1 * S2, Cin), params["fc0_w"], params["fc0_b"])
    h = h.reshape(B, S1, S2, width)

    # F.pad(x, [0, pad, 0, pad]) on NCHW == pad bottom of H and right of W
    h = jnp.pad(h, ((0, 0), (0, padding), (0, padding), (0, 0)))
    H1, H2 = S1 + padding, S2 + padding
    N = H1 * H2

    for layer in range(4):
        x1 = spectral_conv2d(h, params[f"conv{layer}_wc"], modes1, modes2)
        # 1x1 conv + residual add + (for layers 0..2) GELU, fused in one kernel
        h = pallas_linear(
            h.reshape(B, N, width),
            params[f"w{layer}_w"],
            params[f"w{layer}_b"],
            residual=x1.reshape(B, N, width),
            fuse_gelu=(layer < 3),
        )
        h = h.reshape(B, H1, H2, width)

    # crop the padding, then fused fc1 -> gelu -> fc2
    h = h[:, :S1, :S2, :]
    out = pallas_head(h.reshape(B, S1 * S2, width),
                      params["fc1_w"], params["fc1_b"],
                      params["fc2_w"], params["fc2_b"])
    return out.reshape(B, S1, S2, -1)


# ----------------------------------------------------------------------------
# Parameter init (synthetic, deterministic; shapes match the PyTorch module).
# Spectral weights are packed ONCE here into the kernel-ready layout.
# ----------------------------------------------------------------------------
def _prep_spectral_weight(w1, w2):
    """w1/w2: (m1, m2, Ci, Co, 2) f32 -> (M, 2Co, 2Ci) bf16.

    Packs the complex multiply  out = a_r@Wr - a_i@Wi , a_r@Wi + a_i@Wr  as a
    single real matmul with LHS [a_r | a_i] and RHS^T blocks
    [[Wr^T, -Wi^T], [Wi^T, Wr^T]]  (contraction over the minor/lane axis).
    """
    m1, m2, Ci, Co, _ = w1.shape
    w = jnp.concatenate([w1, w2], axis=0).reshape(2 * m1 * m2, Ci, Co, 2)
    wr = jnp.transpose(w[..., 0], (0, 2, 1))   # (M, Co, Ci)
    wi = jnp.transpose(w[..., 1], (0, 2, 1))
    top = jnp.concatenate([wr, -wi], axis=-1)  # rows n <  Co -> real part
    bot = jnp.concatenate([wi, wr], axis=-1)   # rows n >= Co -> imag part
    return jnp.concatenate([top, bot], axis=1).astype(jnp.bfloat16)


def init_params(key, *, modes1, modes2, width, in_channels, outsize):
    keys = iter(jax.random.split(key, 40))
    scale = 1.0 / (width * width)
    p = {}
    p["fc0_w"] = (0.1 * jax.random.normal(
        next(keys), (in_channels, width), jnp.float32)).astype(jnp.bfloat16)
    p["fc0_b"] = 0.01 * jax.random.normal(next(keys), (width,), jnp.float32)
    for l in range(4):
        w1 = scale * jax.random.uniform(
            next(keys), (modes1, modes2, width, width, 2), jnp.float32)
        w2 = scale * jax.random.uniform(
            next(keys), (modes1, modes2, width, width, 2), jnp.float32)
        p[f"conv{l}_wc"] = _prep_spectral_weight(w1, w2)
        p[f"w{l}_w"] = ((1.0 / width) ** 0.5 * jax.random.normal(
            next(keys), (width, width), jnp.float32)).astype(jnp.bfloat16)
        p[f"w{l}_b"] = 0.01 * jax.random.normal(next(keys), (width,), jnp.float32)
    p["fc1_w"] = ((1.0 / width) ** 0.5 * jax.random.normal(
        next(keys), (width, outsize[0]), jnp.float32)).astype(jnp.bfloat16)
    p["fc1_b"] = 0.01 * jax.random.normal(next(keys), (outsize[0],), jnp.float32)
    p["fc2_w"] = ((1.0 / outsize[0]) ** 0.5 * jax.random.normal(
        next(keys), (outsize[0], outsize[1]), jnp.float32)).astype(jnp.bfloat16)
    p["fc2_b"] = 0.01 * jax.random.normal(next(keys), (outsize[1],), jnp.float32)
    return p


if __name__ == "__main__":
    MODES1 = MODES2 = 12
    WIDTH = 32
    PADDING = 9
    IN_CHANNELS = 3
    OUTSIZE = (128, 2)
    B, S = 2, 16   # padded spatial = 25, rfft width = 13 >= modes2

    key = jax.random.PRNGKey(0)
    pkey, xkey = jax.random.split(key)
    params = init_params(pkey, modes1=MODES1, modes2=MODES2, width=WIDTH,
                         in_channels=IN_CHANNELS, outsize=OUTSIZE)
    x = jax.random.normal(xkey, (B, S, S, IN_CHANNELS), jnp.float32)

    fwd = jax.jit(functools.partial(
        fno2d_forward, modes1=MODES1, modes2=MODES2, padding=PADDING))
    y = fwd(params, x)
    jax.block_until_ready(y)
    assert y.shape == (B, S, S, OUTSIZE[1]), y.shape
    assert bool(jnp.all(jnp.isfinite(y)))
    print("KERNEL_OK")
</pallas_src>

<mosaic_0001>
module attributes {stable_mosaic.version = 11 : i64} {
  func.func @kernel(%arg0: i32, %arg1: memref<1x256x3xf32, #tpu.memory_space<vmem>>, %arg2: memref<3x32xbf16, #tpu.memory_space<vmem>>, %arg3: memref<1x32xf32, #tpu.memory_space<vmem>>, %arg4: memref<1x256x32xf32, #tpu.memory_space<vmem>>) attributes {dimension_semantics = [#tpu.dimension_semantics<parallel>], iteration_bounds = array<i64: 2>, scalar_prefetch = 0 : i64, scratch_operands = 0 : i64, tpu.core_type = #tpu.core_type<tc>, window_params = [{transform_indices = @transform_0, window_bounds = array<i64: 1, 256, 3>}, {pipeline_mode = #tpu.pipeline_mode<synchronous>, transform_indices = @transform_1, window_bounds = array<i64: 3, 32>}, {pipeline_mode = #tpu.pipeline_mode<synchronous>, transform_indices = @transform_2, window_bounds = array<i64: 1, 32>}, {transform_indices = @transform_3, window_bounds = array<i64: 1, 256, 32>}]} {
    %c0 = arith.constant 0 : index
    %c0_0 = arith.constant 0 : index
    %c0_1 = arith.constant 0 : index
    %0 = vector.load %arg1[%c0, %c0_0, %c0_1] : memref<1x256x3xf32, #tpu.memory_space<vmem>>, vector<1x256x3xf32>
    %1 = vector.shape_cast %0 : vector<1x256x3xf32> to vector<256x3xf32>
    %2 = arith.truncf %1 : vector<256x3xf32> to vector<256x3xbf16>
    %c0_2 = arith.constant 0 : index
    %c0_3 = arith.constant 0 : index
    %3 = vector.load %arg2[%c0_2, %c0_3] : memref<3x32xbf16, #tpu.memory_space<vmem>>, vector<3x32xbf16>
    %cst = arith.constant dense<0.000000e+00> : vector<256x32xf32>
    %4 = tpu.matmul %2, %3, %cst {dimension_numbers = #tpu.dot_dimension_numbers<[1], [0], [0], [1], [0, 0, 1, 1], [], []>} : vector<256x3xbf16>, vector<3x32xbf16>, vector<256x32xf32> -> vector<256x32xf32>
    %c0_4 = arith.constant 0 : index
    %c0_5 = arith.constant 0 : index
    %5 = vector.load %arg3[%c0_4, %c0_5] : memref<1x32xf32, #tpu.memory_space<vmem>>, vector<1x32xf32>
    %6 = vector.broadcast %5 : vector<1x32xf32> to vector<256x32xf32>
    %7 = arith.addf %4, %6 : vector<256x32xf32>
    %c0_6 = arith.constant 0 : index
    %c0_7 = arith.constant 0 : index
    %c0_8 = arith.constant 0 : index
    %8 = vector.load %arg4[%c0_6, %c0_7, %c0_8] : memref<1x256x32xf32, #tpu.memory_space<vmem>>, vector<1x256x32xf32>
    %9 = vector.shape_cast %8 : vector<1x256x32xf32> to vector<256x32xf32>
    %10 = vector.shape_cast %7 : vector<256x32xf32> to vector<1x256x32xf32>
    tpu.vector_store %arg4[%c0_6, %c0_7, %c0_8], %10 {strides = array<i32>} : memref<1x256x32xf32, #tpu.memory_space<vmem>>, vector<1x256x32xf32>,
    return
  }
  func.func @transform_0(%arg0: i32) -> (i32, i32, i32) {
    %c0_i32 = arith.constant 0 : i32
    %c0_i32_0 = arith.constant 0 : i32
    %c0_i32_1 = arith.constant 0 : i32
    return %arg0, %c0_i32, %c0_i32_0 : i32, i32, i32
  }
  func.func @transform_1(%arg0: i32) -> (i32, i32) {
    %c0_i32 = arith.constant 0 : i32
    %c0_i32_0 = arith.constant 0 : i32
    %c0_i32_1 = arith.constant 0 : i32
    return %c0_i32, %c0_i32_0 : i32, i32
  }
  func.func @transform_2(%arg0: i32) -> (i32, i32) {
    %c0_i32 = arith.constant 0 : i32
    %c0_i32_0 = arith.constant 0 : i32
    %c0_i32_1 = arith.constant 0 : i32
    return %c0_i32, %c0_i32_0 : i32, i32
  }
  func.func @transform_3(%arg0: i32) -> (i32, i32, i32) {
    %c0_i32 = arith.constant 0 : i32
    %c0_i32_0 = arith.constant 0 : i32
    %c0_i32_1 = arith.constant 0 : i32
    return %arg0, %c0_i32, %c0_i32_0 : i32, i32, i32
  }
}

module attributes {stable_mosaic.version = 11 : i64} {
  func.func @_spectral_mul_kernel(%arg0: i32, %arg1: memref<144x2x64xbf16, #tpu.memory_space<vmem>>, %arg2: memref<144x64x64xbf16, #tpu.memory_space<vmem>>, %arg3: memref<144x2x64xf32, #tpu.memory_space<vmem>>) attributes {dimension_semantics = [#tpu.dimension_semantics<parallel>], iteration_bounds = array<i64: 2>, scalar_prefetch = 0 : i64, scratch_operands = 0 : i64, tpu.core_type = #tpu.core_type<tc>, window_params = [{transform_indices = @transform_0, window_bounds = array<i64: 144, 2, 64>}, {transform_indices = @transform_1, window_bounds = array<i64: 144, 64, 64>}, {transform_indices = @transform_2, window_bounds = array<i64: 144, 2, 64>}]} {
    %c0 = arith.constant 0 : index
    %c0_0 = arith.constant 0 : index
    %c0_1 = arith.constant 0 : index
    %0 = vector.load %arg1[%c0, %c0_0, %c0_1] : memref<144x2x64xbf16, #tpu.memory_space<vmem>>, vector<144x2x64xbf16>
    %c0_2 = arith.constant 0 : index
    %c0_3 = arith.constant 0 : index
    %c0_4 = arith.constant 0 : index
    %1 = vector.load %arg2[%c0_2, %c0_3, %c0_4] : memref<144x64x64xbf16, #tpu.memory_space<vmem>>, vector<144x64x64xbf16>
    %cst = arith.constant dense<0.000000e+00> : vector<144x2x64xf32>
    %2 = tpu.matmul %0, %1, %cst {dimension_numbers = #tpu.dot_dimension_numbers<[2], [2], [1], [1], [0, 0, 0, 1, 1, 1], [0], [0]>} : vector<144x2x64xbf16>, vector<144x64x64xbf16>, vector<144x2x64xf32> -> vector<144x2x64xf32>
    %c0_5 = arith.constant 0 : index
    %c0_6 = arith.constant 0 : index
    %c0_7 = arith.constant 0 : index
    %3 = vector.load %arg3[%c0_5, %c0_6, %c0_7] : memref<144x2x64xf32, #tpu.memory_space<vmem>>, vector<144x2x64xf32>
    tpu.vector_store %arg3[%c0_5, %c0_6, %c0_7], %2 {strides = array<i32>} : memref<144x2x64xf32, #tpu.memory_space<vmem>>, vector<144x2x64xf32>,
    return
  }
  func.func @transform_0(%arg0: i32) -> (i32, i32, i32) {
    %c0_i32 = arith.constant 0 : i32
    %c0_i32_0 = arith.constant 0 : i32
    %c0_i32_1 = arith.constant 0 : i32
    return %arg0, %c0_i32, %c0_i32_0 : i32, i32, i32
  }
  func.func @transform_1(%arg0: i32) -> (i32, i32, i32) {
    %c0_i32 = arith.constant 0 : i32
    %c0_i32_0 = arith.constant 0 : i32
    %c0_i32_1 = arith.constant 0 : i32
    return %arg0, %c0_i32, %c0_i32_0 : i32, i32, i32
  }
  func.func @transform_2(%arg0: i32) -> (i32, i32, i32) {
    %c0_i32 = arith.constant 0 : i32
    %c0_i32_0 = arith.constant 0 : i32
    %c0_i32_1 = arith.constant 0 : i32
    return %arg0, %c0_i32, %c0_i32_0 : i32, i32, i32
  }
}

module attributes {stable_mosaic.version = 11 : i64} {
  func.func @kernel(%arg0: i32, %arg1: memref<1x625x32xf32, #tpu.memory_space<vmem>>, %arg2: memref<32x32xbf16, #tpu.memory_space<vmem>>, %arg3: memref<1x32xf32, #tpu.memory_space<vmem>>, %arg4: memref<1x625x32xf32, #tpu.memory_space<vmem>>, %arg5: memref<1x625x32xf32, #tpu.memory_space<vmem>>) attributes {dimension_semantics = [#tpu.dimension_semantics<parallel>], iteration_bounds = array<i64: 2>, scalar_prefetch = 0 : i64, scratch_operands = 0 : i64, tpu.core_type = #tpu.core_type<tc>, window_params = [{transform_indices = @transform_0, window_bounds = array<i64: 1, 625, 32>}, {pipeline_mode = #tpu.pipeline_mode<synchronous>, transform_indices = @transform_1, window_bounds = array<i64: 32, 32>}, {pipeline_mode = #tpu.pipeline_mode<synchronous>, transform_indices = @transform_2, window_bounds = array<i64: 1, 32>}, {transform_indices = @transform_3, window_bounds = array<i64: 1, 625, 32>}, {transform_indices = @transform_4, window_bounds = array<i64: 1, 625, 32>}]} {
    %c0 = arith.constant 0 : index
    %c0_0 = arith.constant 0 : index
    %c0_1 = arith.constant 0 : index
    %0 = vector.load %arg1[%c0, %c0_0, %c0_1] : memref<1x625x32xf32, #tpu.memory_space<vmem>>, vector<1x625x32xf32>
    %1 = vector.shape_cast %0 : vector<1x625x32xf32> to vector<625x32xf32>
    %2 = arith.truncf %1 : vector<625x32xf32> to vector<625x32xbf16>
    %c0_2 = arith.constant 0 : index
    %c0_3 = arith.constant 0 : index
    %3 = vector.load %arg2[%c0_2, %c0_3] : memref<32x32xbf16, #tpu.memory_space<vmem>>, vector<32x32xbf16>
    %cst = arith.constant dense<0.000000e+00> : vector<625x32xf32>
    %4 = tpu.matmul %2, %3, %cst {dimension_numbers = #tpu.dot_dimension_numbers<[1], [0], [0], [1], [0, 0, 1, 1], [], []>} : vector<625x32xbf16>, vector<32x32xbf16>, vector<625x32xf32> -> vector<625x32xf32>
    %c0_4 = arith.constant 0 : index
    %c0_5 = arith.constant 0 : index
    %5 = vector.load %arg3[%c0_4, %c0_5] : memref<1x32xf32, #tpu.memory_space<vmem>>, vector<1x32xf32>
    %6 = vector.broadcast %5 : vector<1x32xf32> to vector<625x32xf32>
    %7 = arith.addf %4, %6 : vector<625x32xf32>
    %c0_6 = arith.constant 0 : index
    %c0_7 = arith.constant 0 : index
    %c0_8 = arith.constant 0 : index
    %8 = vector.load %arg4[%c0_6, %c0_7, %c0_8] : memref<1x625x32xf32, #tpu.memory_space<vmem>>, vector<1x625x32xf32>
    %9 = vector.shape_cast %8 : vector<1x625x32xf32> to vector<625x32xf32>
    %10 = arith.addf %7, %9 : vector<625x32xf32>
    %cst_9 = arith.constant 5.000000e-01 : f32
    %11 = vector.broadcast %cst_9 : f32 to vector<625x32xf32>
    %12 = arith.mulf %11, %10 : vector<625x32xf32>
    %cst_10 = arith.constant 4.471500e-02 : f32
    %13 = vector.broadcast %cst_10 : f32 to vector<625x32xf32>
    %14 = arith.mulf %13, %10 : vector<625x32xf32>
    %15 = arith.mulf %14, %10 : vector<625x32xf32>
    %16 = arith.mulf %15, %10 : vector<625x32xf32>
    %17 = arith.addf %10, %16 : vector<625x32xf32>
    %cst_11 = arith.constant 0.797884583 : f32
    %18 = vector.broadcast %cst_11 : f32 to vector<625x32xf32>
    %19 = arith.mulf %18, %17 : vector<625x32xf32>
    %20 = math.tanh %19 : vector<625x32xf32>
    %cst_12 = arith.constant 1.000000e+00 : f32
    %21 = vector.broadcast %cst_12 : f32 to vector<625x32xf32>
    %22 = arith.addf %21, %20 : vector<625x32xf32>
    %23 = arith.mulf %12, %22 : vector<625x32xf32>
    %c0_13 = arith.constant 0 : index
    %c0_14 = arith.constant 0 : index
    %c0_15 = arith.constant 0 : index
    %24 = vector.load %arg5[%c0_13, %c0_14, %c0_15] : memref<1x625x32xf32, #tpu.memory_space<vmem>>, vector<1x625x32xf32>
    %25 = vector.shape_cast %24 : vector<1x625x32xf32> to vector<625x32xf32>
    %26 = vector.shape_cast %23 : vector<625x32xf32> to vector<1x625x32xf32>
    tpu.vector_store %arg5[%c0_13, %c0_14, %c0_15], %26 {strides = array<i32>} : memref<1x625x32xf32, #tpu.memory_space<vmem>>, vector<1x625x32xf32>,
    return
  }
  func.func @transform_0(%arg0: i32) -> (i32, i32, i32) {
    %c0_i32 = arith.constant 0 : i32
    %c0_i32_0 = arith.constant 0 : i32
    %c0_i32_1 = arith.constant 0 : i32
    return %arg0, %c0_i32, %c0_i32_0 : i32, i32, i32
  }
  func.func @transform_1(%arg0: i32) -> (i32, i32) {
    %c0_i32 = arith.constant 0 : i32
    %c0_i32_0 = arith.constant 0 : i32
    %c0_i32_1 = arith.constant 0 : i32
    return %c0_i32, %c0_i32_0 : i32, i32
  }
  func.func @transform_2(%arg0: i32) -> (i32, i32) {
    %c0_i32 = arith.constant 0 : i32
    %c0_i32_0 = arith.constant 0 : i32
    %c0_i32_1 = arith.constant 0 : i32
    return %c0_i32, %c0_i32_0 : i32, i32
  }
  func.func @transform_3(%arg0: i32) -> (i32, i32, i32) {
    %c0_i32 = arith.constant 0 : i32
    %c0_i32_0 = arith.constant 0 : i32
    %c0_i32_1 = arith.constant 0 : i32
    return %arg0, %c0_i32, %c0_i32_0 : i32, i32, i32
  }
  func.func @transform_4(%arg0: i32) -> (i32, i32, i32) {
    %c0_i32 = arith.constant 0 : i32
    %c0_i32_0 = arith.constant 0 : i32
    %c0_i32_1 = arith.constant 0 : i32
    return %arg0, %c0_i32, %c0_i32_0 : i32, i32, i32
  }
}

module attributes {stable_mosaic.version = 11 : i64} {
  func.func @kernel(%arg0: i32, %arg1: memref<1x625x32xf32, #tpu.memory_space<vmem>>, %arg2: memref<32x32xbf16, #tpu.memory_space<vmem>>, %arg3: memref<1x32xf32, #tpu.memory_space<vmem>>, %arg4: memref<1x625x32xf32, #tpu.memory_space<vmem>>, %arg5: memref<1x625x32xf32, #tpu.memory_space<vmem>>) attributes {dimension_semantics = [#tpu.dimension_semantics<parallel>], iteration_bounds = array<i64: 2>, scalar_prefetch = 0 : i64, scratch_operands = 0 : i64, tpu.core_type = #tpu.core_type<tc>, window_params = [{transform_indices = @transform_0, window_bounds = array<i64: 1, 625, 32>}, {pipeline_mode = #tpu.pipeline_mode<synchronous>, transform_indices = @transform_1, window_bounds = array<i64: 32, 32>}, {pipeline_mode = #tpu.pipeline_mode<synchronous>, transform_indices = @transform_2, window_bounds = array<i64: 1, 32>}, {transform_indices = @transform_3, window_bounds = array<i64: 1, 625, 32>}, {transform_indices = @transform_4, window_bounds = array<i64: 1, 625, 32>}]} {
    %c0 = arith.constant 0 : index
    %c0_0 = arith.constant 0 : index
    %c0_1 = arith.constant 0 : index
    %0 = vector.load %arg1[%c0, %c0_0, %c0_1] : memref<1x625x32xf32, #tpu.memory_space<vmem>>, vector<1x625x32xf32>
    %1 = vector.shape_cast %0 : vector<1x625x32xf32> to vector<625x32xf32>
    %2 = arith.truncf %1 : vector<625x32xf32> to vector<625x32xbf16>
    %c0_2 = arith.constant 0 : index
    %c0_3 = arith.constant 0 : index
    %3 = vector.load %arg2[%c0_2, %c0_3] : memref<32x32xbf16, #tpu.memory_space<vmem>>, vector<32x32xbf16>
    %cst = arith.constant dense<0.000000e+00> : vector<625x32xf32>
    %4 = tpu.matmul %2, %3, %cst {dimension_numbers = #tpu.dot_dimension_numbers<[1], [0], [0], [1], [0, 0, 1, 1], [], []>} : vector<625x32xbf16>, vector<32x32xbf16>, vector<625x32xf32> -> vector<625x32xf32>
    %c0_4 = arith.constant 0 : index
    %c0_5 = arith.constant 0 : index
    %5 = vector.load %arg3[%c0_4, %c0_5] : memref<1x32xf32, #tpu.memory_space<vmem>>, vector<1x32xf32>
    %6 = vector.broadcast %5 : vector<1x32xf32> to vector<625x32xf32>
    %7 = arith.addf %4, %6 : vector<625x32xf32>
    %c0_6 = arith.constant 0 : index
    %c0_7 = arith.constant 0 : index
    %c0_8 = arith.constant 0 : index
    %8 = vector.load %arg4[%c0_6, %c0_7, %c0_8] : memref<1x625x32xf32, #tpu.memory_space<vmem>>, vector<1x625x32xf32>
    %9 = vector.shape_cast %8 : vector<1x625x32xf32> to vector<625x32xf32>
    %10 = arith.addf %7, %9 : vector<625x32xf32>
    %c0_9 = arith.constant 0 : index
    %c0_10 = arith.constant 0 : index
    %c0_11 = arith.constant 0 : index
    %11 = vector.load %arg5[%c0_9, %c0_10, %c0_11] : memref<1x625x32xf32, #tpu.memory_space<vmem>>, vector<1x625x32xf32>
    %12 = vector.shape_cast %11 : vector<1x625x32xf32> to vector<625x32xf32>
    %13 = vector.shape_cast %10 : vector<625x32xf32> to vector<1x625x32xf32>
    tpu.vector_store %arg5[%c0_9, %c0_10, %c0_11], %13 {strides = array<i32>} : memref<1x625x32xf32, #tpu.memory_space<vmem>>, vector<1x625x32xf32>,
    return
  }
  func.func @transform_0(%arg0: i32) -> (i32, i32, i32) {
    %c0_i32 = arith.constant 0 : i32
    %c0_i32_0 = arith.constant 0 : i32
    %c0_i32_1 = arith.constant 0 : i32
    return %arg0, %c0_i32, %c0_i32_0 : i32, i32, i32
  }
  func.func @transform_1(%arg0: i32) -> (i32, i32) {
    %c0_i32 = arith.constant 0 : i32
    %c0_i32_0 = arith.constant 0 : i32
    %c0_i32_1 = arith.constant 0 : i32
    return %c0_i32, %c0_i32_0 : i32, i32
  }
  func.func @transform_2(%arg0: i32) -> (i32, i32) {
    %c0_i32 = arith.constant 0 : i32
    %c0_i32_0 = arith.constant 0 : i32
    %c0_i32_1 = arith.constant 0 : i32
    return %c0_i32, %c0_i32_0 : i32, i32
  }
  func.func @transform_3(%arg0: i32) -> (i32, i32, i32) {
    %c0_i32 = arith.constant 0 : i32
    %c0_i32_0 = arith.constant 0 : i32
    %c0_i32_1 = arith.constant 0 : i32
    return %arg0, %c0_i32, %c0_i32_0 : i32, i32, i32
  }
  func.func @transform_4(%arg0: i32) -> (i32, i32, i32) {
    %c0_i32 = arith.constant 0 : i32
    %c0_i32_0 = arith.constant 0 : i32
    %c0_i32_1 = arith.constant 0 : i32
    return %arg0, %c0_i32, %c0_i32_0 : i32, i32, i32
  }
}

module attributes {stable_mosaic.version = 11 : i64} {
  func.func @_head_kernel(%arg0: i32, %arg1: memref<1x256x32xf32, #tpu.memory_space<vmem>>, %arg2: memref<32x128xbf16, #tpu.memory_space<vmem>>, %arg3: memref<1x128xf32, #tpu.memory_space<vmem>>, %arg4: memref<128x2xbf16, #tpu.memory_space<vmem>>, %arg5: memref<1x2xf32, #tpu.memory_space<vmem>>, %arg6: memref<1x256x2xf32, #tpu.memory_space<vmem>>) attributes {dimension_semantics = [#tpu.dimension_semantics<parallel>], iteration_bounds = array<i64: 2>, scalar_prefetch = 0 : i64, scratch_operands = 0 : i64, tpu.core_type = #tpu.core_type<tc>, window_params = [{transform_indices = @transform_0, window_bounds = array<i64: 1, 256, 32>}, {pipeline_mode = #tpu.pipeline_mode<synchronous>, transform_indices = @transform_1, window_bounds = array<i64: 32, 128>}, {pipeline_mode = #tpu.pipeline_mode<synchronous>, transform_indices = @transform_2, window_bounds = array<i64: 1, 128>}, {pipeline_mode = #tpu.pipeline_mode<synchronous>, transform_indices = @transform_3, window_bounds = array<i64: 128, 2>}, {pipeline_mode = #tpu.pipeline_mode<synchronous>, transform_indices = @transform_4, window_bounds = array<i64: 1, 2>}, {transform_indices = @transform_5, window_bounds = array<i64: 1, 256, 2>}]} {
    %c0 = arith.constant 0 : index
    %c0_0 = arith.constant 0 : index
    %c0_1 = arith.constant 0 : index
    %0 = vector.load %arg1[%c0, %c0_0, %c0_1] : memref<1x256x32xf32, #tpu.memory_space<vmem>>, vector<1x256x32xf32>
    %1 = vector.shape_cast %0 : vector<1x256x32xf32> to vector<256x32xf32>
    %2 = arith.truncf %1 : vector<256x32xf32> to vector<256x32xbf16>
    %c0_2 = arith.constant 0 : index
    %c0_3 = arith.constant 0 : index
    %3 = vector.load %arg2[%c0_2, %c0_3] : memref<32x128xbf16, #tpu.memory_space<vmem>>, vector<32x128xbf16>
    %cst = arith.constant dense<0.000000e+00> : vector<256x128xf32>
    %4 = tpu.matmul %2, %3, %cst {dimension_numbers = #tpu.dot_dimension_numbers<[1], [0], [0], [1], [0, 0, 1, 1], [], []>} : vector<256x32xbf16>, vector<32x128xbf16>, vector<256x128xf32> -> vector<256x128xf32>
    %c0_4 = arith.constant 0 : index
    %c0_5 = arith.constant 0 : index
    %5 = vector.load %arg3[%c0_4, %c0_5] : memref<1x128xf32, #tpu.memory_space<vmem>>, vector<1x128xf32>
    %6 = vector.broadcast %5 : vector<1x128xf32> to vector<256x128xf32>
    %7 = arith.addf %4, %6 : vector<256x128xf32>
    %cst_6 = arith.constant 5.000000e-01 : f32
    %8 = vector.broadcast %cst_6 : f32 to vector<256x128xf32>
    %9 = arith.mulf %8, %7 : vector<256x128xf32>
    %cst_7 = arith.constant 4.471500e-02 : f32
    %10 = vector.broadcast %cst_7 : f32 to vector<256x128xf32>
    %11 = arith.mulf %10, %7 : vector<256x128xf32>
    %12 = arith.mulf %11, %7 : vector<256x128xf32>
    %13 = arith.mulf %12, %7 : vector<256x128xf32>
    %14 = arith.addf %7, %13 : vector<256x128xf32>
    %cst_8 = arith.constant 0.797884583 : f32
    %15 = vector.broadcast %cst_8 : f32 to vector<256x128xf32>
    %16 = arith.mulf %15, %14 : vector<256x128xf32>
    %17 = math.tanh %16 : vector<256x128xf32>
    %cst_9 = arith.constant 1.000000e+00 : f32
    %18 = vector.broadcast %cst_9 : f32 to vector<256x128xf32>
    %19 = arith.addf %18, %17 : vector<256x128xf32>
    %20 = arith.mulf %9, %19 : vector<256x128xf32>
    %21 = arith.truncf %20 : vector<256x128xf32> to vector<256x128xbf16>
    %c0_10 = arith.constant 0 : index
    %c0_11 = arith.constant 0 : index
    %22 = vector.load %arg4[%c0_10, %c0_11] : memref<128x2xbf16, #tpu.memory_space<vmem>>, vector<128x2xbf16>
    %cst_12 = arith.constant dense<0.000000e+00> : vector<256x2xf32>
    %23 = tpu.matmul %21, %22, %cst_12 {dimension_numbers = #tpu.dot_dimension_numbers<[1], [0], [0], [1], [0, 0, 1, 1], [], []>} : vector<256x128xbf16>, vector<128x2xbf16>, vector<256x2xf32> -> vector<256x2xf32>
    %c0_13 = arith.constant 0 : index
    %c0_14 = arith.constant 0 : index
    %24 = vector.load %arg5[%c0_13, %c0_14] : memref<1x2xf32, #tpu.memory_space<vmem>>, vector<1x2xf32>
    %25 = vector.broadcast %24 : vector<1x2xf32> to vector<256x2xf32>
    %26 = arith.addf %23, %25 : vector<256x2xf32>
    %c0_15 = arith.constant 0 : index
    %c0_16 = arith.constant 0 : index
    %c0_17 = arith.constant 0 : index
    %27 = vector.load %arg6[%c0_15, %c0_16, %c0_17] : memref<1x256x2xf32, #tpu.memory_space<vmem>>, vector<1x256x2xf32>
    %28 = vector.shape_cast %27 : vector<1x256x2xf32> to vector<256x2xf32>
    %29 = vector.shape_cast %26 : vector<256x2xf32> to vector<1x256x2xf32>
    tpu.vector_store %arg6[%c0_15, %c0_16, %c0_17], %29 {strides = array<i32>} : memref<1x256x2xf32, #tpu.memory_space<vmem>>, vector<1x256x2xf32>,
    return
  }
  func.func @transform_0(%arg0: i32) -> (i32, i32, i32) {
    %c0_i32 = arith.constant 0 : i32
    %c0_i32_0 = arith.constant 0 : i32
    %c0_i32_1 = arith.constant 0 : i32
    return %arg0, %c0_i32, %c0_i32_0 : i32, i32, i32
  }
  func.func @transform_1(%arg0: i32) -> (i32, i32) {
    %c0_i32 = arith.constant 0 : i32
    %c0_i32_0 = arith.constant 0 : i32
    %c0_i32_1 = arith.constant 0 : i32
    return %c0_i32, %c0_i32_0 : i32, i32
  }
  func.func @transform_2(%arg0: i32) -> (i32, i32) {
    %c0_i32 = arith.constant 0 : i32
    %c0_i32_0 = arith.constant 0 : i32
    %c0_i32_1 = arith.constant 0 : i32
    return %c0_i32, %c0_i32_0 : i32, i32
  }
  func.func @transform_3(%arg0: i32) -> (i32, i32) {
    %c0_i32 = arith.constant 0 : i32
    %c0_i32_0 = arith.constant 0 : i32
    %c0_i32_1 = arith.constant 0 : i32
    return %c0_i32, %c0_i32_0 : i32, i32
  }
  func.func @transform_4(%arg0: i32) -> (i32, i32) {
    %c0_i32 = arith.constant 0 : i32
    %c0_i32_0 = arith.constant 0 : i32
    %c0_i32_1 = arith.constant 0 : i32
    return %c0_i32, %c0_i32_0 : i32, i32
  }
  func.func @transform_5(%arg0: i32) -> (i32, i32, i32) {
    %c0_i32 = arith.constant 0 : i32
    %c0_i32_0 = arith.constant 0 : i32
    %c0_i32_1 = arith.constant 0 : i32
    return %arg0, %c0_i32, %c0_i32_0 : i32, i32, i32
  }
}

</mosaic_0001>

<bundles_post_ra>
// kernel: fno2d_forward.10
= control target key start
LH: loop header
LB: loop body
LE: loop exit
PB: predicated region body
PF: predicated region fallthrough
CT: control target
= control target key end

     0   :  { %8 = vsyncpa [#allocation3], 0  ;;  %s869_s0 = inlined_call_operand.vmem [shape: f32[2,256,3], index: 0, kind: input, shape index: {}]   ;;  %s870_s1 = inlined_call_operand.hbm [shape: bf16[3,32], index: 1, kind: input, shape index: {}]   ;;  %s871_s2 = inlined_call_operand.hbm [shape: f32[1,32], index: 2, kind: input, shape index: {}]   ;;  %s872_s3 = inlined_call_operand.vmem [shape: f32[2,256,32], index: 3, kind: output, shape index: {}]  }
   0x1   :  { %9 = vsyncpa [#allocation5], 0  ;;  %s676_s12 = smov 0  }
   0x2 LB: > { %s126_s15 = sshll.u32 %s870_s1, 4  ;;  %s510_s16 = sadd.s32 4294967295, %s651_s12   ;;  %s651_s12 = sphi %s676_s12, %s15_s12   ;;  %s127_s15 = int_to_ptr.hbm [resolvable:$true] %s126_s15 }
   0x3   : > { %p512_p0 = scmp.ge.s32.totalorder %s651_s12, 1  ;;  %p114_p1 = scmp.lt.s32.totalorder %s651_s12, 3 }
   0x4   : > { %p561_p2 = scmp.eq.s32.totalorder %s510_s16, 0  ;;  %s653_s18 = smov [#allocation2]  }
   0x5   : > { %p687_p3 = pnand %p512_p0, %p114_p1  ;;  %s128_s19 = sshll.u32 %s653_s18, 4  ;;  %s129_s19 = int_to_ptr.vmem [resolvable:$true] %s128_s19 }
   0x6   : > { %s138_s22 = sshll.u32 %s871_s2, 4  ;;  %s654_s23 = smov [#allocation4]   ;;  %s139_s22 = int_to_ptr.hbm [resolvable:$true] %s138_s22 }
   0x7   : > { %p554_p4 = pneg %p687_p3  ;;  %s140_s24 = sshll.u32 %s654_s23, 4  ;;  %s141_s24 = int_to_ptr.vmem [resolvable:$true] %s140_s24 }
   0x8   : > { %161 = sbr.rel (%p687_p3) target bundleno = 218 (0xda), region = 32 }
   0x9   : > { %p555_p5 = pnand %p561_p2, %p554_p4 }
   0xb   : > { %557 = dma.hbm_to_vmem [thread:$0]  (!%p555_p5), %s127_s15, 32, %s129_s19, [#allocation3]  }
   0xc   : > { %560 = dma.hbm_to_vmem [thread:$0]  (!%p555_p5), %s139_s22, 16, %s141_s24, [#allocation5]  }
   0xd   : > { %642 = dma.done.wait (%p561_p2), [#allocation3], 32  }
   0xe   : > { %644 = vsyncadd (%p561_p2), [#allocation3], 4294967264 }
   0xf   : > { %646 = dma.done.wait (%p561_p2), [#allocation5], 16  }
  0x10   : > { %648 = vsyncadd (%p561_p2), [#allocation5], 4294967280  ;;  %vm304_vm0 = vcmask 1040384   ;;  %p191_p6 = scmp.lt.s32.totalorder %s510_s16, 1  ;;  %vm305_vm1 = vcmask 1041408   ;;  %v655_v0 = vmov 65535  }
  0x11   : > { %v306_v1 = vsel %vm304_vm0, 4294967295, %v655_v0  ;;  %v250_v3 = vld [vmem:[#allocation2] sm:$0x3]  ;;  %vm255_vm2 = vcmask 23552   ;;  %v761_v53 = vld [vmem:[#allocation4] ss:$0 sm:$0xff] }
  0x12   : > { %s875_s16 = smov (!%p191_p6, %s510_s16), 1  ;;  %v307_v2 = vsel %vm305_vm1, %v306_v1, 0  ;;  %vm400_vm3 = vcmask 261120  }
  0x13   : > { %s541_s25 = sshll.u32 %s875_s16, 8  ;;  %v309_v6 = vand.u32 %v307_v2, %v250_v3 }
  0x14   : > { %s711_s28 = scalar_lea.vmem %s869_s0, %s541_s25  ;;  %s768_s4 = scalar_lea.vmem %s872_s3, %s541_s25 }
  0x15   : > { %v202_v4 = vld [vmem:[%s711_s28] sm:$0xff]  ;;  %v203_v5 = vld [vmem:[%s711_s28 + $0x8] sm:$0xff]  ;;  %318 = vmatpush.bf16.msra.mxu0 %v309_v6  ;;  %543 = vmatpush.bf16.msra.mxu1 %v309_v6  ;;  %v204_v17 = vld [vmem:[%s711_s28 + $0x10] sm:$0xff] }
  0x16   : > { %v210_v7 = vld [vmem:[%s711_s28 + $0x40] sm:$0xff]  ;;  %v211_v8 = vld [vmem:[%s711_s28 + $0x48] sm:$0xff]  ;;  %v234_v10 = vpack.c.bf16 %v203_v5, %v202_v4  ;;  %544 = vmatpush.bf16.msra.mxu2 %v309_v6  ;;  %545 = vmatpush.bf16.msra.mxu3 %v309_v6  ;;  %v205_v18 = vld [vmem:[%s711_s28 + $0x18] sm:$0xff] }
  0x17   : > { %v218_v9 = vld [vmem:[%s711_s28 + $0x80] sm:$0xff]  ;;  %v238_v11 = vpack.c.bf16 %v211_v8, %v210_v7  ;;  %v219_v12 = vld [vmem:[%s711_s28 + $0x88] sm:$0xff]  ;;  %v212_v19 = vld [vmem:[%s711_s28 + $0x50] sm:$0xff]  ;;  %v235_v25 = vpack.c.bf16 %v205_v18, %v204_v17 }
  0x18   : > { %v226_v13 = vld [vmem:[%s711_s28 + $0xc0] sm:$0xff]  ;;  %v227_v14 = vld [vmem:[%s711_s28 + $0xc8] sm:$0xff]  ;;  %v242_v15 = vpack.c.bf16 %v219_v12, %v218_v9  ;;  %523 = vmatmul.msk.bf16.vlgmr.msra.gmra.mxu0 %vm255_vm2, %v234_v10  ;;  %v213_v20 = vld [vmem:[%s711_s28 + $0x58] sm:$0xff] }
  0x19   : > { %v246_v16 = vpack.c.bf16 %v227_v14, %v226_v13  ;;  %527 = vmatmul.msk.bf16.vlgmr.msra.gmra.mxu1 %vm255_vm2, %v238_v11  ;;  %v220_v21 = vld [vmem:[%s711_s28 + $0x90] sm:$0xff]  ;;  %v221_v22 = vld [vmem:[%s711_s28 + $0x98] sm:$0xff]  ;;  %v239_v26 = vpack.c.bf16 %v213_v20, %v212_v19  ;;  %v206_v29 = vld [vmem:[%s711_s28 + $0x20] sm:$0xff] }
  0x1a   : > { %531 = vmatmul.msk.bf16.vlgmr.msra.gmra.mxu2 %vm255_vm2, %v242_v15  ;;  %v228_v23 = vld [vmem:[%s711_s28 + $0xd0] sm:$0xff]  ;;  %v229_v24 = vld [vmem:[%s711_s28 + $0xd8] sm:$0xff]  ;;  %v243_v27 = vpack.c.bf16 %v221_v22, %v220_v21  ;;  %v207_v30 = vld [vmem:[%s711_s28 + $0x28] sm:$0xff] }
  0x1b   : > { %535 = vmatmul.msk.bf16.vlgmr.msra.gmra.mxu3 %vm255_vm2, %v246_v16  ;;  %v247_v28 = vpack.c.bf16 %v229_v24, %v228_v23  ;;  %v214_v31 = vld [vmem:[%s711_s28 + $0x60] sm:$0xff]  ;;  %v215_v32 = vld [vmem:[%s711_s28 + $0x68] sm:$0xff]  ;;  %v236_v37 = vpack.c.bf16 %v207_v30, %v206_v29  ;;  %v208_v41 = vld [vmem:[%s711_s28 + $0x30] sm:$0xff] }
  0x1c   : > { %v222_v33 = vld [vmem:[%s711_s28 + $0xa0] sm:$0xff]  ;;  %v223_v34 = vld [vmem:[%s711_s28 + $0xa8] sm:$0xff]  ;;  %v240_v38 = vpack.c.bf16 %v215_v32, %v214_v31  ;;  %v209_v42 = vld [vmem:[%s711_s28 + $0x38] sm:$0xff] }
  0x1d   : > { %v230_v35 = vld [vmem:[%s711_s28 + $0xe0] sm:$0xff]  ;;  %v231_v36 = vld [vmem:[%s711_s28 + $0xe8] sm:$0xff]  ;;  %v244_v39 = vpack.c.bf16 %v223_v34, %v222_v33  ;;  %v216_v43 = vld [vmem:[%s711_s28 + $0x70] sm:$0xff]  ;;  %v237_v49 = vpack.c.bf16 %v209_v42, %v208_v41 }
  0x1e   : > { %v248_v40 = vpack.c.bf16 %v231_v36, %v230_v35  ;;  %v217_v44 = vld [vmem:[%s711_s28 + $0x78] sm:$0xff]  ;;  %v224_v45 = vld [vmem:[%s711_s28 + $0xb0] sm:$0xff] }
  0x1f   : > { %v225_v46 = vld [vmem:[%s711_s28 + $0xb8] sm:$0xff]  ;;  %v232_v47 = vld [vmem:[%s711_s28 + $0xf0] sm:$0xff]  ;;  %v241_v50 = vpack.c.bf16 %v217_v44, %v216_v43 }
  0x20   : > { %v233_v48 = vld [vmem:[%s711_s28 + $0xf8] sm:$0xff]  ;;  %v245_v51 = vpack.c.bf16 %v225_v46, %v224_v45 }
  0x21   : > { %v249_v52 = vpack.c.bf16 %v233_v48, %v232_v47 }
  0x28   : > { %524 = vmatmul.msk.bf16.gmra.mxu0 %vm255_vm2, %v235_v25 }
  0x29   : > { %528 = vmatmul.msk.bf16.gmra.mxu1 %vm255_vm2, %v239_v26 }
  0x2a   : > { %532 = vmatmul.msk.bf16.gmra.mxu2 %vm255_vm2, %v243_v27 }
  0x2b   : > { %536 = vmatmul.msk.bf16.gmra.mxu3 %vm255_vm2, %v247_v28 }
  0x38   : > { %525 = vmatmul.msk.bf16.gmra.mxu0 %vm255_vm2, %v236_v37 }
  0x39   : > { %529 = vmatmul.msk.bf16.gmra.mxu1 %vm255_vm2, %v240_v38 }
  0x3a   : > { %533 = vmatmul.msk.bf16.gmra.mxu2 %vm255_vm2, %v244_v39 }
  0x3b   : > { %537 = vmatmul.msk.bf16.gmra.mxu3 %vm255_vm2, %v248_v40 }
  0x48   : > { %526 = vmatmul.msk.bf16.gmra.mxu0 %vm255_vm2, %v237_v49 }
  0x49   : > { %530 = vmatmul.msk.bf16.gmra.mxu1 %vm255_vm2, %v241_v50 }
  0x4a   : > { %534 = vmatmul.msk.bf16.gmra.mxu2 %vm255_vm2, %v245_v51 }
  0x4b   : > { %538 = vmatmul.msk.bf16.gmra.mxu3 %vm255_vm2, %v249_v52 }
  0x95   : > { %v320_v54 = vpop.f32.mrf.mxu0 }
  0x96   : > { %v340_v55 = vpop.f32.mrf.mxu1  ;;  %v321_v56 = vadd.f32 %v761_v53, %v320_v54 }
  0x97   : > { %v341_v57 = vadd.f32 %v761_v53, %v340_v55 }
  0x98   : > { %401 = vst.msk [vmem:[%s768_s4] sm:$0xff] %vm400_vm3, %v321_v56 }
  0x99   : > { %409 = vst.msk [vmem:[%s768_s4 + $0x40] sm:$0xff] %vm400_vm3, %v341_v57 }
  0x9d   : > { %v360_v58 = vpop.f32.mrf.mxu2  ;;  %v322_v62 = vpop.f32.mrf.mxu0 }
  0x9e   : > { %v380_v59 = vpop.f32.mrf.mxu3  ;;  %v361_v60 = vadd.f32 %v761_v53, %v360_v58  ;;  %v342_v63 = vpop.f32.mrf.mxu1  ;;  %v323_v0 = vadd.f32 %v761_v53, %v322_v62 }
  0x9f   : > { %v381_v61 = vadd.f32 %v761_v53, %v380_v59  ;;  %v343_v1 = vadd.f32 %v761_v53, %v342_v63 }
  0xa0   : > { %417 = vst.msk [vmem:[%s768_s4 + $0x80] sm:$0xff] %vm400_vm3, %v361_v60 }
  0xa1   : > { %425 = vst.msk [vmem:[%s768_s4 + $0xc0] sm:$0xff] %vm400_vm3, %v381_v61 }
  0xa2   : > { %402 = vst.msk [vmem:[%s768_s4 + $0x8] sm:$0xff] %vm400_vm3, %v323_v0 }
  0xa3   : > { %410 = vst.msk [vmem:[%s768_s4 + $0x48] sm:$0xff] %vm400_vm3, %v343_v1 }
  0xa5   : > { %v362_v2 = vpop.f32.mrf.mxu2  ;;  %v325_v6 = vpop.f32.mrf.mxu0 }
  0xa6   : > { %v382_v3 = vpop.f32.mrf.mxu3  ;;  %v363_v4 = vadd.f32 %v761_v53, %v362_v2  ;;  %v345_v7 = vpop.f32.mrf.mxu1  ;;  %v326_v8 = vadd.f32 %v761_v53, %v325_v6 }
  0xa7   : > { %v383_v5 = vadd.f32 %v761_v53, %v382_v3  ;;  %v346_v9 = vadd.f32 %v761_v53, %v345_v7 }
  0xa8   : > { %418 = vst.msk [vmem:[%s768_s4 + $0x88] sm:$0xff] %vm400_vm3, %v363_v4 }
  0xa9   : > { %426 = vst.msk [vmem:[%s768_s4 + $0xc8] sm:$0xff] %vm400_vm3, %v383_v5 }
  0xaa   : > { %403 = vst.msk [vmem:[%s768_s4 + $0x10] sm:$0xff] %vm400_vm3, %v326_v8 }
  0xab   : > { %411 = vst.msk [vmem:[%s768_s4 + $0x50] sm:$0xff] %vm400_vm3, %v346_v9 }
  0xad   : > { %v365_v10 = vpop.f32.mrf.mxu2  ;;  %v327_v14 = vpop.f32.mrf.mxu0 }
  0xae   : > { %v385_v11 = vpop.f32.mrf.mxu3  ;;  %v366_v12 = vadd.f32 %v761_v53, %v365_v10  ;;  %v347_v15 = vpop.f32.mrf.mxu1  ;;  %v328_v16 = vadd.f32 %v761_v53, %v327_v14 }
  0xaf   : > { %v386_v13 = vadd.f32 %v761_v53, %v385_v11  ;;  %v348_v17 = vadd.f32 %v761_v53, %v347_v15 }
  0xb0   : > { %419 = vst.msk [vmem:[%s768_s4 + $0x90] sm:$0xff] %vm400_vm3, %v366_v12 }
  0xb1   : > { %427 = vst.msk [vmem:[%s768_s4 + $0xd0] sm:$0xff] %vm400_vm3, %v386_v13 }
  0xb2   : > { %404 = vst.msk [vmem:[%s768_s4 + $0x18] sm:$0xff] %vm400_vm3, %v328_v16 }
  0xb3   : > { %412 = vst.msk [vmem:[%s768_s4 + $0x58] sm:$0xff] %vm400_vm3, %v348_v17 }
  0xb5   : > { %v367_v18 = vpop.f32.mrf.mxu2  ;;  %v330_v22 = vpop.f32.mrf.mxu0 }
  0xb6   : > { %v387_v19 = vpop.f32.mrf.mxu3  ;;  %v368_v20 = vadd.f32 %v761_v53, %v367_v18  ;;  %v350_v23 = vpop.f32.mrf.mxu1  ;;  %v331_v24 = vadd.f32 %v761_v53, %v330_v22 }
  0xb7   : > { %v388_v21 = vadd.f32 %v761_v53, %v387_v19  ;;  %v351_v25 = vadd.f32 %v761_v53, %v350_v23 }
  0xb8   : > { %420 = vst.msk [vmem:[%s768_s4 + $0x98] sm:$0xff] %vm400_vm3, %v368_v20 }
  0xb9   : > { %428 = vst.msk [vmem:[%s768_s4 + $0xd8] sm:$0xff] %vm400_vm3, %v388_v21 }
  0xba   : > { %405 = vst.msk [vmem:[%s768_s4 + $0x20] sm:$0xff] %vm400_vm3, %v331_v24 }
  0xbb   : > { %413 = vst.msk [vmem:[%s768_s4 + $0x60] sm:$0xff] %vm400_vm3, %v351_v25 }
  0xbd   : > { %v370_v26 = vpop.f32.mrf.mxu2  ;;  %v332_v30 = vpop.f32.mrf.mxu0 }
  0xbe   : > { %v390_v27 = vpop.f32.mrf.mxu3  ;;  %v371_v28 = vadd.f32 %v761_v53, %v370_v26  ;;  %v352_v31 = vpop.f32.mrf.mxu1  ;;  %v333_v32 = vadd.f32 %v761_v53, %v332_v30 }
  0xbf   : > { %v391_v29 = vadd.f32 %v761_v53, %v390_v27  ;;  %v353_v33 = vadd.f32 %v761_v53, %v352_v31 }
  0xc0   : > { %421 = vst.msk [vmem:[%s768_s4 + $0xa0] sm:$0xff] %vm400_vm3, %v371_v28 }
  0xc1   : > { %429 = vst.msk [vmem:[%s768_s4 + $0xe0] sm:$0xff] %vm400_vm3, %v391_v29 }
  0xc2   : > { %406 = vst.msk [vmem:[%s768_s4 + $0x28] sm:$0xff] %vm400_vm3, %v333_v32 }
  0xc3   : > { %414 = vst.msk [vmem:[%s768_s4 + $0x68] sm:$0xff] %vm400_vm3, %v353_v33 }
  0xc5   : > { %v372_v34 = vpop.f32.mrf.mxu2  ;;  %v335_v38 = vpop.f32.mrf.mxu0 }
  0xc6   : > { %v392_v35 = vpop.f32.mrf.mxu3  ;;  %v373_v36 = vadd.f32 %v761_v53, %v372_v34  ;;  %v355_v39 = vpop.f32.mrf.mxu1  ;;  %v336_v40 = vadd.f32 %v761_v53, %v335_v38 }
  0xc7   : > { %v393_v37 = vadd.f32 %v761_v53, %v392_v35  ;;  %v356_v41 = vadd.f32 %v761_v53, %v355_v39 }
  0xc8   : > { %422 = vst.msk [vmem:[%s768_s4 + $0xa8] sm:$0xff] %vm400_vm3, %v373_v36 }
  0xc9   : > { %430 = vst.msk [vmem:[%s768_s4 + $0xe8] sm:$0xff] %vm400_vm3, %v393_v37 }
  0xca   : > { %407 = vst.msk [vmem:[%s768_s4 + $0x30] sm:$0xff] %vm400_vm3, %v336_v40 }
  0xcb   : > { %415 = vst.msk [vmem:[%s768_s4 + $0x70] sm:$0xff] %vm400_vm3, %v356_v41 }
  0xcd   : > { %v375_v42 = vpop.f32.mrf.mxu2  ;;  %v337_v46 = vpop.f32.mrf.mxu0 }
  0xce   : > { %v395_v43 = vpop.f32.mrf.mxu3  ;;  %v376_v44 = vadd.f32 %v761_v53, %v375_v42  ;;  %v357_v47 = vpop.f32.mrf.mxu1  ;;  %v338_v48 = vadd.f32 %v761_v53, %v337_v46 }
  0xcf   : > { %v396_v45 = vadd.f32 %v761_v53, %v395_v43  ;;  %v358_v49 = vadd.f32 %v761_v53, %v357_v47 }
  0xd0   : > { %423 = vst.msk [vmem:[%s768_s4 + $0xb0] sm:$0xff] %vm400_vm3, %v376_v44 }
  0xd1   : > { %431 = vst.msk [vmem:[%s768_s4 + $0xf0] sm:$0xff] %vm400_vm3, %v396_v45 }
  0xd2   : > { %408 = vst.msk [vmem:[%s768_s4 + $0x38] sm:$0xff] %vm400_vm3, %v338_v48 }
  0xd3   : > { %416 = vst.msk [vmem:[%s768_s4 + $0x78] sm:$0xff] %vm400_vm3, %v358_v49 }
  0xd5   : > { %v377_v50 = vpop.f32.mrf.mxu2 }
  0xd6   : > { %v397_v51 = vpop.f32.mrf.mxu3  ;;  %v378_v52 = vadd.f32 %v761_v53, %v377_v50 }
  0xd7   : > { %v398_v54 = vadd.f32 %v761_v53, %v397_v51 }
  0xd8   : > { %424 = vst.msk [vmem:[%s768_s4 + $0xb8] sm:$0xff] %vm400_vm3, %v378_v52 }
  0xd9   : > { %432 = vst.msk [vmem:[%s768_s4 + $0xf8] sm:$0xff] %vm400_vm3, %v398_v54 }
  0xda PF: > { %s15_s12 = sadd.s32 1, %s651_s12  }
  0xdb   : > { %p12_p7 = scmp.ge.s32.totalorder %s15_s12, 4  }
  0xdd   :  { %14 = sbr.rel (!%p12_p7) target bundleno = 2 (0x2), region = 71 }
  0xe2   :  { %454 = vsyncpa [#allocation3], 1 }
  0xe3   :  { %456 = vsyncpa [#allocation3 + $0x1], 1 }
  0xe4   :  { %457 = vsyncpa [#allocation5], 1 }

// kernel: fno2d_forward.11
= control target key start
LH: loop header
LB: loop body
LE: loop exit
PB: predicated region body
PF: predicated region fallthrough
CT: control target
= control target key end

     0   :  { %s11655_s9 = smov 0   ;;  %s13414_s0 = inlined_call_operand.vmem [shape: bf16[288,2,64], index: 0, kind: input, shape index: {}]   ;;  %s13415_s1 = inlined_call_operand.vmem [shape: bf16[288,64,64], index: 1, kind: input, shape index: {}]   ;;  %s13416_s2 = inlined_call_operand.vmem [shape: f32[288,2,64], index: 2, kind: output, shape index: {}]  }
   0x1 LB: > { %s8589_s10 = sadd.s32 4294967295, %s11638_s9   ;;  %p8593_p0 = scmp.ge.s32.totalorder %s11638_s9, 1  ;;  %s11638_s9 = sphi %s11655_s9, %s12_s9  }
   0x2   : > { %p124_p1 = scmp.lt.s32.totalorder %s11638_s9, 3 }
   0x4   : > { %p125_p2 = pnand %p8593_p0, %p124_p1 }
   0x5   : > { %s151_s11 = smul.u32 (!%p125_p2), 144, %s8589_s10 }
   0x6   : > { %128 = sbr.rel (%p125_p2) target bundleno = 1310 (0x51e), region = 28 }
   0x7   : > { %p152_p3 = scmp.lt.s32.totalorder (!%p125_p2), %s151_s11, 287 }
   0xb   : > { %s13418_s11 = smov (!%p152_p3, %s151_s11), 287  ;;  %vm1486_vm0 = vcmask 523264   ;;  %vm8379_vm1 = vcmask 517120  }
   0xc   : > { %s11047_s12 = sshll.u32 %s13418_s11, 5  ;;  %s11715_s18 = scalar_lea.vmem %s13414_s0, %s13418_s11 }
   0xd   : > { %s11669_s15 = scalar_lea.vmem %s13415_s1, %s11047_s12  ;;  %v170_v44 = vld [vmem:[%s11715_s18] sm:$0x1]  ;;  %v171_v45 = vld [vmem:[%s11715_s18 + $0x1] sm:$0x1]  ;;  %v172_v46 = vld [vmem:[%s11715_s18 + $0x2] sm:$0x1] }
   0xe   : > { %v11051_v0 = vld [vmem:[%s11669_s15 + $0x18] sm:$0xff]  ;;  %v11050_v8 = vld [vmem:[%s11669_s15 + $0x10] sm:$0xff]  ;;  %v11049_v16 = vld [vmem:[%s11669_s15 + $0x8] sm:$0xff]  ;;  %s8596_s19 = sshll.u32 %s13418_s11, 1 }
   0xf   : > { %v11055_v1 = vld [vmem:[%s11669_s15 + $0x38] sm:$0xff]  ;;  %v1500_v4 = vsel %vm1486_vm0, %v11051_v0, 0  ;;  %v11054_v9 = vld [vmem:[%s11669_s15 + $0x30] sm:$0xff]  ;;  %v1497_v12 = vsel %vm1486_vm0, %v11050_v8, 0  ;;  %v11053_v17 = vld [vmem:[%s11669_s15 + $0x28] sm:$0xff]  ;;  %v1494_v20 = vsel %vm1486_vm0, %v11049_v16, 0  ;;  %s11921_s22 = scalar_lea.vmem %s13416_s2, %s8596_s19 }
  0x10   : > { %v11059_v2 = vld [vmem:[%s11669_s15 + $0x58] sm:$0xff]  ;;  %v1548_v5 = vsel %vm1486_vm0, %v11055_v1, 0  ;;  %1506 = vmatpush.bf16.xpose.msra.mxu0 %v1500_v4  ;;  %v11058_v10 = vld [vmem:[%s11669_s15 + $0x50] sm:$0xff]  ;;  %v1545_v13 = vsel %vm1486_vm0, %v11054_v9, 0  ;;  %v11057_v18 = vld [vmem:[%s11669_s15 + $0x48] sm:$0xff]  ;;  %v1542_v21 = vsel %vm1486_vm0, %v11053_v17, 0 }
  0x11   : > { %v11063_v3 = vld [vmem:[%s11669_s15 + $0x78] sm:$0xff]  ;;  %v1596_v6 = vsel %vm1486_vm0, %v11059_v2, 0  ;;  %1554 = vmatpush.bf16.xpose.msra.mxu1 %v1548_v5  ;;  %v11062_v11 = vld [vmem:[%s11669_s15 + $0x70] sm:$0xff]  ;;  %v1593_v14 = vsel %vm1486_vm0, %v11058_v10, 0  ;;  %v11061_v19 = vld [vmem:[%s11669_s15 + $0x68] sm:$0xff]  ;;  %v1590_v22 = vsel %vm1486_vm0, %v11057_v18, 0 }
  0x12   : > { %v1644_v7 = vsel %vm1486_vm0, %v11063_v3, 0  ;;  %1602 = vmatpush.bf16.xpose.msra.mxu2 %v1596_v6  ;;  %v1641_v15 = vsel %vm1486_vm0, %v11062_v11, 0  ;;  %v1638_v23 = vsel %vm1486_vm0, %v11061_v19, 0  ;;  %v11048_v24 = vld [vmem:[%s11669_s15] sm:$0xff]  ;;  %v11067_v28 = vld [vmem:[%s11669_s15 + $0x98] sm:$0xff]  ;;  %v11066_v40 = vld [vmem:[%s11669_s15 + $0x90] sm:$0xff] }
  0x13   : > { %1650 = vmatpush.bf16.xpose.msra.mxu3 %v1644_v7  ;;  %v11052_v25 = vld [vmem:[%s11669_s15 + $0x20] sm:$0xff]  ;;  %v11071_v29 = vld [vmem:[%s11669_s15 + $0xb8] sm:$0xff]  ;;  %v1491_v32 = vsel %vm1486_vm0, %v11048_v24, 0  ;;  %v1692_v36 = vsel %vm1486_vm0, %v11067_v28, 0  ;;  %v11070_v41 = vld [vmem:[%s11669_s15 + $0xb0] sm:$0xff]  ;;  %v1689_v48 = vsel %vm1486_vm0, %v11066_v40, 0 }
  0x14   : > { %v11056_v26 = vld [vmem:[%s11669_s15 + $0x40] sm:$0xff]  ;;  %v11075_v30 = vld [vmem:[%s11669_s15 + $0xd8] sm:$0xff]  ;;  %v1539_v33 = vsel %vm1486_vm0, %v11052_v25, 0  ;;  %v1740_v37 = vsel %vm1486_vm0, %v11071_v29, 0  ;;  %v11074_v42 = vld [vmem:[%s11669_s15 + $0xd0] sm:$0xff]  ;;  %v1737_v49 = vsel %vm1486_vm0, %v11070_v41, 0 }
  0x15   : > { %v11060_v27 = vld [vmem:[%s11669_s15 + $0x60] sm:$0xff]  ;;  %v11079_v31 = vld [vmem:[%s11669_s15 + $0xf8] sm:$0xff]  ;;  %v1587_v34 = vsel %vm1486_vm0, %v11056_v26, 0  ;;  %v1788_v38 = vsel %vm1486_vm0, %v11075_v30, 0  ;;  %v11078_v43 = vld [vmem:[%s11669_s15 + $0xf0] sm:$0xff]  ;;  %v1785_v50 = vsel %vm1486_vm0, %v11074_v42, 0 }
  0x16   : > { %v1635_v35 = vsel %vm1486_vm0, %v11060_v27, 0  ;;  %v1836_v39 = vsel %vm1486_vm0, %v11079_v31, 0  ;;  %v173_v47 = vld [vmem:[%s11715_s18 + $0x3] sm:$0x1]  ;;  %v1833_v51 = vsel %vm1486_vm0, %v11078_v43, 0  ;;  %v11065_v52 = vld [vmem:[%s11669_s15 + $0x88] sm:$0xff] }
  0x17   : > { %v11069_v53 = vld [vmem:[%s11669_s15 + $0xa8] sm:$0xff]  ;;  %v1686_v56 = vsel %vm1486_vm0, %v11065_v52, 0  ;;  %v11064_v60 = vld [vmem:[%s11669_s15 + $0x80] sm:$0xff]  ;;  %v11083_v0 = vld [vmem:[%s11669_s15 + $0x118] sm:$0xff] }
  0x18   : > { %1507 = vmatpush.bf16.xpose.msra.mxu0 %v1497_v12  ;;  %v11073_v54 = vld [vmem:[%s11669_s15 + $0xc8] sm:$0xff]  ;;  %v1734_v57 = vsel %vm1486_vm0, %v11069_v53, 0  ;;  %v11068_v61 = vld [vmem:[%s11669_s15 + $0xa0] sm:$0xff]  ;;  %v11087_v1 = vld [vmem:[%s11669_s15 + $0x138] sm:$0xff]  ;;  %v1683_v4 = vsel %vm1486_vm0, %v11064_v60, 0  ;;  %v1884_v8 = vsel %vm1486_vm0, %v11083_v0, 0 }
  0x19   : > { %1555 = vmatpush.bf16.xpose.msra.mxu1 %v1545_v13  ;;  %v11077_v55 = vld [vmem:[%s11669_s15 + $0xe8] sm:$0xff]  ;;  %v1782_v58 = vsel %vm1486_vm0, %v11073_v54, 0  ;;  %v11072_v62 = vld [vmem:[%s11669_s15 + $0xc0] sm:$0xff]  ;;  %v11091_v2 = vld [vmem:[%s11669_s15 + $0x158] sm:$0xff]  ;;  %v1731_v5 = vsel %vm1486_vm0, %v11068_v61, 0  ;;  %v1932_v9 = vsel %vm1486_vm0, %v11087_v1, 0 }
  0x1a   : > { %1603 = vmatpush.bf16.xpose.msra.mxu2 %v1593_v14  ;;  %v1830_v59 = vsel %vm1486_vm0, %v11077_v55, 0  ;;  %v11076_v63 = vld [vmem:[%s11669_s15 + $0xe0] sm:$0xff]  ;;  %v11095_v3 = vld [vmem:[%s11669_s15 + $0x178] sm:$0xff]  ;;  %v1779_v6 = vsel %vm1486_vm0, %v11072_v62, 0  ;;  %v1980_v10 = vsel %vm1486_vm0, %v11091_v2, 0  ;;  %v11082_v12 = vld [vmem:[%s11669_s15 + $0x110] sm:$0xff] }
  0x1b   : > { %1651 = vmatpush.bf16.xpose.msra.mxu3 %v1641_v15  ;;  %v1827_v7 = vsel %vm1486_vm0, %v11076_v63, 0  ;;  %v2028_v11 = vsel %vm1486_vm0, %v11095_v3, 0  ;;  %v11086_v13 = vld [vmem:[%s11669_s15 + $0x130] sm:$0xff]  ;;  %v174_v16 = vld [vmem:[%s11715_s18 + $0x4] sm:$0x1]  ;;  %v11081_v24 = vld [vmem:[%s11669_s15 + $0x108] sm:$0xff] }
  0x1c   : > { %v11090_v14 = vld [vmem:[%s11669_s15 + $0x150] sm:$0xff]  ;;  %v175_v17 = vld [vmem:[%s11715_s18 + $0x5] sm:$0x1]  ;;  %v176_v18 = vld [vmem:[%s11715_s18 + $0x6] sm:$0x1]  ;;  %v1878_v28 = vsel %vm1486_vm0, %v11081_v24, 0 }
  0x1d   : > { %v11094_v15 = vld [vmem:[%s11669_s15 + $0x170] sm:$0xff]  ;;  %v177_v19 = vld [vmem:[%s11715_s18 + $0x7] sm:$0x1]  ;;  %v11085_v25 = vld [vmem:[%s11669_s15 + $0x128] sm:$0xff] }
  0x1e   : > { %v11089_v26 = vld [vmem:[%s11669_s15 + $0x148] sm:$0xff]  ;;  %v1926_v29 = vsel %vm1486_vm0, %v11085_v25, 0 }
  0x1f   : > { %v11093_v27 = vld [vmem:[%s11669_s15 + $0x168] sm:$0xff]  ;;  %v1974_v30 = vsel %vm1486_vm0, %v11089_v26, 0 }
  0x20   : > { %1508 = vmatpush.bf16.xpose.msra.mxu0 %v1494_v20  ;;  %v1881_v20 = vsel %vm1486_vm0, %v11082_v12, 0  ;;  %v2022_v31 = vsel %vm1486_vm0, %v11093_v27, 0  ;;  %v178_v52 = vld [vmem:[%s11715_s18 + $0x8] sm:$0x1]  ;;  %v179_v53 = vld [vmem:[%s11715_s18 + $0x9] sm:$0x1] }
  0x21   : > { %1556 = vmatpush.bf16.xpose.msra.mxu1 %v1542_v21  ;;  %v1929_v21 = vsel %vm1486_vm0, %v11086_v13, 0  ;;  %v180_v54 = vld [vmem:[%s11715_s18 + $0xa] sm:$0x1]  ;;  %v181_v55 = vld [vmem:[%s11715_s18 + $0xb] sm:$0x1] }
  0x22   : > { %1604 = vmatpush.bf16.xpose.msra.mxu2 %v1590_v22  ;;  %v1977_v22 = vsel %vm1486_vm0, %v11090_v14, 0  ;;  %v11097_v60 = vld [vmem:[%s11669_s15 + $0x188] sm:$0xff] }
  0x23   : > { %1652 = vmatpush.bf16.xpose.msra.mxu3 %v1638_v23  ;;  %v2025_v23 = vsel %vm1486_vm0, %v11094_v15, 0  ;;  %v11101_v61 = vld [vmem:[%s11669_s15 + $0x1a8] sm:$0xff]  ;;  %v2070_v0 = vsel %vm1486_vm0, %v11097_v60, 0  ;;  %v186_v60 = vld [vmem:[%s11715_s18 + $0x10] sm:$0x1] }
  0x24   : > { %v11105_v62 = vld [vmem:[%s11669_s15 + $0x1c8] sm:$0xff]  ;;  %v2118_v1 = vsel %vm1486_vm0, %v11101_v61, 0  ;;  %v187_v61 = vld [vmem:[%s11715_s18 + $0x11] sm:$0x1] }
  0x25   : > { %v11109_v63 = vld [vmem:[%s11669_s15 + $0x1e8] sm:$0xff]  ;;  %v2166_v2 = vsel %vm1486_vm0, %v11105_v62, 0  ;;  %v188_v62 = vld [vmem:[%s11715_s18 + $0x12] sm:$0x1] }
  0x26   : > { %v2214_v3 = vsel %vm1486_vm0, %v11109_v63, 0  ;;  %v182_v24 = vld [vmem:[%s11715_s18 + $0xc] sm:$0x1]  ;;  %v183_v25 = vld [vmem:[%s11715_s18 + $0xd] sm:$0x1] }
  0x27   : > { %v184_v26 = vld [vmem:[%s11715_s18 + $0xe] sm:$0x1]  ;;  %v185_v27 = vld [vmem:[%s11715_s18 + $0xf] sm:$0x1]  ;;  %v189_v63 = vld [vmem:[%s11715_s18 + $0x13] sm:$0x1] }
  0x28   : > { %1509 = vmatpush.bf16.xpose.msra.mxu0 %v1491_v32  ;;  %v11080_v32 = vld [vmem:[%s11669_s15 + $0x100] sm:$0xff] }
  0x29   : > { %1557 = vmatpush.bf16.xpose.msra.mxu1 %v1539_v33  ;;  %v11084_v33 = vld [vmem:[%s11669_s15 + $0x120] sm:$0xff]  ;;  %v1875_v40 = vsel %vm1486_vm0, %v11080_v32, 0  ;;  %v11113_v32 = vld [vmem:[%s11669_s15 + $0x208] sm:$0xff] }
  0x2a   : > { %1605 = vmatpush.bf16.xpose.msra.mxu2 %v1587_v34  ;;  %v11088_v34 = vld [vmem:[%s11669_s15 + $0x140] sm:$0xff]  ;;  %v1923_v41 = vsel %vm1486_vm0, %v11084_v33, 0  ;;  %v11117_v33 = vld [vmem:[%s11669_s15 + $0x228] sm:$0xff] }
  0x2b   : > { %1653 = vmatpush.bf16.xpose.msra.mxu3 %v1635_v35  ;;  %v11092_v35 = vld [vmem:[%s11669_s15 + $0x160] sm:$0xff]  ;;  %v1971_v42 = vsel %vm1486_vm0, %v11088_v34, 0  ;;  %v11121_v34 = vld [vmem:[%s11669_s15 + $0x248] sm:$0xff] }
  0x2c   : > { %v2019_v43 = vsel %vm1486_vm0, %v11092_v35, 0  ;;  %v11125_v35 = vld [vmem:[%s11669_s15 + $0x268] sm:$0xff] }
  0x2f   : > { %8613 = vmatmul.msk.bf16.vlgmr.msra.gmra.mxu0 %vm1486_vm0, %v170_v44 }
  0x30   : > { %1698 = vmatpush.bf16.xpose.msrb.mxu0 %v1692_v36  ;;  %8630 = vmatmul.msk.bf16.vlgmr.msra.gmra.mxu1 %vm1486_vm0, %v171_v45  ;;  %v11099_v36 = vld [vmem:[%s11669_s15 + $0x198] sm:$0xff] }
  0x31   : > { %1746 = vmatpush.bf16.xpose.msrb.mxu1 %v1740_v37  ;;  %8647 = vmatmul.msk.bf16.vlgmr.msra.gmra.mxu2 %vm1486_vm0, %v172_v46  ;;  %v11103_v37 = vld [vmem:[%s11669_s15 + $0x1b8] sm:$0xff]  ;;  %v2076_v44 = vsel %vm1486_vm0, %v11099_v36, 0  ;;  %v2262_v36 = vsel %vm1486_vm0, %v11113_v32, 0  ;;  %v11154_v32 = vld [vmem:[%s11669_s15 + $0x350] sm:$0xff] }
  0x32   : > { %1794 = vmatpush.bf16.xpose.msrb.mxu2 %v1788_v38  ;;  %8664 = vmatmul.msk.bf16.vlgmr.msra.gmra.mxu3 %vm1486_vm0, %v173_v47  ;;  %v11107_v38 = vld [vmem:[%s11669_s15 + $0x1d8] sm:$0xff]  ;;  %v2124_v45 = vsel %vm1486_vm0, %v11103_v37, 0  ;;  %v2310_v37 = vsel %vm1486_vm0, %v11117_v33, 0  ;;  %v11158_v33 = vld [vmem:[%s11669_s15 + $0x370] sm:$0xff] }
  0x33   : > { %1842 = vmatpush.bf16.xpose.msrb.mxu3 %v1836_v39  ;;  %v11111_v39 = vld [vmem:[%s11669_s15 + $0x1f8] sm:$0xff]  ;;  %v2172_v46 = vsel %vm1486_vm0, %v11107_v38, 0  ;;  %v2358_v38 = vsel %vm1486_vm0, %v11121_v34, 0  ;;  %v190_v34 = vld [vmem:[%s11715_s18 + $0x14] sm:$0x1] }
  0x34   : > { %v2220_v47 = vsel %vm1486_vm0, %v11111_v39, 0  ;;  %v2406_v39 = vsel %vm1486_vm0, %v11125_v35, 0  ;;  %v191_v35 = vld [vmem:[%s11715_s18 + $0x15] sm:$0x1] }
  0x38   : > { %1699 = vmatpush.bf16.xpose.msrb.mxu0 %v1689_v48  ;;  %v11098_v48 = vld [vmem:[%s11669_s15 + $0x190] sm:$0xff] }
  0x39   : > { %1747 = vmatpush.bf16.xpose.msrb.mxu1 %v1737_v49  ;;  %v11102_v49 = vld [vmem:[%s11669_s15 + $0x1b0] sm:$0xff] }
  0x3a   : > { %1795 = vmatpush.bf16.xpose.msrb.mxu2 %v1785_v50  ;;  %v11106_v50 = vld [vmem:[%s11669_s15 + $0x1d0] sm:$0xff] }
  0x3b   : > { %1843 = vmatpush.bf16.xpose.msrb.mxu3 %v1833_v51  ;;  %v11110_v51 = vld [vmem:[%s11669_s15 + $0x1f0] sm:$0xff] }
  0x40   : > { %1700 = vmatpush.bf16.xpose.msrb.mxu0 %v1686_v56  ;;  %v2073_v56 = vsel %vm1486_vm0, %v11098_v48, 0 }
  0x41   : > { %1748 = vmatpush.bf16.xpose.msrb.mxu1 %v1734_v57  ;;  %v2121_v57 = vsel %vm1486_vm0, %v11102_v49, 0 }
  0x42   : > { %1796 = vmatpush.bf16.xpose.msrb.mxu2 %v1782_v58  ;;  %v2169_v58 = vsel %vm1486_vm0, %v11106_v50, 0 }
  0x43   : > { %1844 = vmatpush.bf16.xpose.msrb.mxu3 %v1830_v59  ;;  %v2217_v59 = vsel %vm1486_vm0, %v11110_v51, 0 }
  0x48   : > { %1701 = vmatpush.bf16.xpose.msrb.mxu0 %v1683_v4  ;;  %v11096_v4 = vld [vmem:[%s11669_s15 + $0x180] sm:$0xff] }
  0x49   : > { %1749 = vmatpush.bf16.xpose.msrb.mxu1 %v1731_v5  ;;  %v11100_v5 = vld [vmem:[%s11669_s15 + $0x1a0] sm:$0xff]  ;;  %v2067_v12 = vsel %vm1486_vm0, %v11096_v4, 0  ;;  %v11129_v4 = vld [vmem:[%s11669_s15 + $0x288] sm:$0xff] }
  0x4a   : > { %1797 = vmatpush.bf16.xpose.msrb.mxu2 %v1779_v6  ;;  %v11104_v6 = vld [vmem:[%s11669_s15 + $0x1c0] sm:$0xff]  ;;  %v2115_v13 = vsel %vm1486_vm0, %v11100_v5, 0  ;;  %v11133_v5 = vld [vmem:[%s11669_s15 + $0x2a8] sm:$0xff] }
  0x4b   : > { %1845 = vmatpush.bf16.xpose.msrb.mxu3 %v1827_v7  ;;  %v11108_v7 = vld [vmem:[%s11669_s15 + $0x1e0] sm:$0xff]  ;;  %v2163_v14 = vsel %vm1486_vm0, %v11104_v6, 0  ;;  %v11137_v6 = vld [vmem:[%s11669_s15 + $0x2c8] sm:$0xff] }
  0x4c   : > { %v2211_v15 = vsel %vm1486_vm0, %v11108_v7, 0  ;;  %v11141_v7 = vld [vmem:[%s11669_s15 + $0x2e8] sm:$0xff] }
  0x4f   : > { %8681 = vmatmul.msk.bf16.vlgmr.msrb.gmra.mxu0 %vm1486_vm0, %v174_v16 }
  0x50   : > { %1890 = vmatpush.bf16.xpose.msra.mxu0 %v1884_v8  ;;  %8698 = vmatmul.msk.bf16.vlgmr.msrb.gmra.mxu1 %vm1486_vm0, %v175_v17  ;;  %v11115_v8 = vld [vmem:[%s11669_s15 + $0x218] sm:$0xff] }
  0x51   : > { %1938 = vmatpush.bf16.xpose.msra.mxu1 %v1932_v9  ;;  %8715 = vmatmul.msk.bf16.vlgmr.msrb.gmra.mxu2 %vm1486_vm0, %v176_v18  ;;  %v11119_v9 = vld [vmem:[%s11669_s15 + $0x238] sm:$0xff]  ;;  %v2268_v16 = vsel %vm1486_vm0, %v11115_v8, 0  ;;  %v2454_v8 = vsel %vm1486_vm0, %v11129_v4, 0 }
  0x52   : > { %1986 = vmatpush.bf16.xpose.msra.mxu2 %v1980_v10  ;;  %8732 = vmatmul.msk.bf16.vlgmr.msrb.gmra.mxu3 %vm1486_vm0, %v177_v19  ;;  %v11123_v10 = vld [vmem:[%s11669_s15 + $0x258] sm:$0xff]  ;;  %v2316_v17 = vsel %vm1486_vm0, %v11119_v9, 0  ;;  %v2502_v9 = vsel %vm1486_vm0, %v11133_v5, 0 }
  0x53   : > { %2034 = vmatpush.bf16.xpose.msra.mxu3 %v2028_v11  ;;  %v11127_v11 = vld [vmem:[%s11669_s15 + $0x278] sm:$0xff]  ;;  %v2364_v18 = vsel %vm1486_vm0, %v11123_v10, 0  ;;  %v2550_v10 = vsel %vm1486_vm0, %v11137_v6, 0 }
  0x54   : > { %v2412_v19 = vsel %vm1486_vm0, %v11127_v11, 0  ;;  %v2598_v11 = vsel %vm1486_vm0, %v11141_v7, 0 }
  0x58   : > { %1891 = vmatpush.bf16.xpose.msra.mxu0 %v1881_v20  ;;  %v11114_v20 = vld [vmem:[%s11669_s15 + $0x210] sm:$0xff] }
  0x59   : > { %1939 = vmatpush.bf16.xpose.msra.mxu1 %v1929_v21  ;;  %v11118_v21 = vld [vmem:[%s11669_s15 + $0x230] sm:$0xff] }
  0x5a   : > { %1987 = vmatpush.bf16.xpose.msra.mxu2 %v1977_v22  ;;  %v11122_v22 = vld [vmem:[%s11669_s15 + $0x250] sm:$0xff] }
  0x5b   : > { %2035 = vmatpush.bf16.xpose.msra.mxu3 %v2025_v23  ;;  %v11126_v23 = vld [vmem:[%s11669_s15 + $0x270] sm:$0xff] }
  0x60   : > { %1892 = vmatpush.bf16.xpose.msra.mxu0 %v1878_v28  ;;  %v2265_v28 = vsel %vm1486_vm0, %v11114_v20, 0 }
  0x61   : > { %1940 = vmatpush.bf16.xpose.msra.mxu1 %v1926_v29  ;;  %v2313_v29 = vsel %vm1486_vm0, %v11118_v21, 0 }
  0x62   : > { %1988 = vmatpush.bf16.xpose.msra.mxu2 %v1974_v30  ;;  %v2361_v30 = vsel %vm1486_vm0, %v11122_v22, 0 }
  0x63   : > { %2036 = vmatpush.bf16.xpose.msra.mxu3 %v2022_v31  ;;  %v2409_v31 = vsel %vm1486_vm0, %v11126_v23, 0 }
  0x68   : > { %1893 = vmatpush.bf16.xpose.msra.mxu0 %v1875_v40  ;;  %v11112_v40 = vld [vmem:[%s11669_s15 + $0x200] sm:$0xff] }
  0x69   : > { %1941 = vmatpush.bf16.xpose.msra.mxu1 %v1923_v41  ;;  %v11116_v41 = vld [vmem:[%s11669_s15 + $0x220] sm:$0xff]  ;;  %v2259_v48 = vsel %vm1486_vm0, %v11112_v40, 0  ;;  %v2745_v40 = vsel %vm1486_vm0, %v11154_v32, 0 }
  0x6a   : > { %1989 = vmatpush.bf16.xpose.msra.mxu2 %v1971_v42  ;;  %v11120_v42 = vld [vmem:[%s11669_s15 + $0x240] sm:$0xff]  ;;  %v2307_v49 = vsel %vm1486_vm0, %v11116_v41, 0  ;;  %v2793_v41 = vsel %vm1486_vm0, %v11158_v33, 0 }
  0x6b   : > { %2037 = vmatpush.bf16.xpose.msra.mxu3 %v2019_v43  ;;  %v11124_v43 = vld [vmem:[%s11669_s15 + $0x260] sm:$0xff]  ;;  %v2355_v50 = vsel %vm1486_vm0, %v11120_v42, 0 }
  0x6c   : > { %v2403_v51 = vsel %vm1486_vm0, %v11124_v43, 0 }
  0x6f   : > { %8749 = vmatmul.msk.bf16.vlgmr.msra.gmra.mxu0 %vm1486_vm0, %v178_v52 }
  0x70   : > { %2082 = vmatpush.bf16.xpose.msrb.mxu0 %v2076_v44  ;;  %8766 = vmatmul.msk.bf16.vlgmr.msra.gmra.mxu1 %vm1486_vm0, %v179_v53  ;;  %v11131_v44 = vld [vmem:[%s11669_s15 + $0x298] sm:$0xff] }
  0x71   : > { %2130 = vmatpush.bf16.xpose.msrb.mxu1 %v2124_v45  ;;  %8783 = vmatmul.msk.bf16.vlgmr.msra.gmra.mxu2 %vm1486_vm0, %v180_v54  ;;  %v11135_v45 = vld [vmem:[%s11669_s15 + $0x2b8] sm:$0xff]  ;;  %v2460_v52 = vsel %vm1486_vm0, %v11131_v44, 0 }
  0x72   : > { %2178 = vmatpush.bf16.xpose.msrb.mxu2 %v2172_v46  ;;  %8800 = vmatmul.msk.bf16.vlgmr.msra.gmra.mxu3 %vm1486_vm0, %v181_v55  ;;  %v11139_v46 = vld [vmem:[%s11669_s15 + $0x2d8] sm:$0xff]  ;;  %v2508_v53 = vsel %vm1486_vm0, %v11135_v45, 0 }
  0x73   : > { %2226 = vmatpush.bf16.xpose.msrb.mxu3 %v2220_v47  ;;  %v11143_v47 = vld [vmem:[%s11669_s15 + $0x2f8] sm:$0xff]  ;;  %v2556_v54 = vsel %vm1486_vm0, %v11139_v46, 0  ;;  %v11145_v46 = vld [vmem:[%s11669_s15 + $0x308] sm:$0xff] }
  0x74   : > { %v2604_v55 = vsel %vm1486_vm0, %v11143_v47, 0  ;;  %v11149_v47 = vld [vmem:[%s11669_s15 + $0x328] sm:$0xff] }
  0x78   : > { %2083 = vmatpush.bf16.xpose.msrb.mxu0 %v2073_v56  ;;  %v11130_v56 = vld [vmem:[%s11669_s15 + $0x290] sm:$0xff] }
  0x79   : > { %2131 = vmatpush.bf16.xpose.msrb.mxu1 %v2121_v57  ;;  %v11134_v57 = vld [vmem:[%s11669_s15 + $0x2b0] sm:$0xff] }
  0x7a   : > { %2179 = vmatpush.bf16.xpose.msrb.mxu2 %v2169_v58  ;;  %v11138_v58 = vld [vmem:[%s11669_s15 + $0x2d0] sm:$0xff] }
  0x7b   : > { %2227 = vmatpush.bf16.xpose.msrb.mxu3 %v2217_v59  ;;  %v11142_v59 = vld [vmem:[%s11669_s15 + $0x2f0] sm:$0xff] }
  0x80   : > { %2084 = vmatpush.bf16.xpose.msrb.mxu0 %v2070_v0  ;;  %v2457_v0 = vsel %vm1486_vm0, %v11130_v56, 0  ;;  %v11144_v56 = vld [vmem:[%s11669_s15 + $0x300] sm:$0xff] }
  0x81   : > { %2132 = vmatpush.bf16.xpose.msrb.mxu1 %v2118_v1  ;;  %v2505_v1 = vsel %vm1486_vm0, %v11134_v57, 0  ;;  %v11148_v57 = vld [vmem:[%s11669_s15 + $0x320] sm:$0xff] }
  0x82   : > { %2180 = vmatpush.bf16.xpose.msrb.mxu2 %v2166_v2  ;;  %v2553_v2 = vsel %vm1486_vm0, %v11138_v58, 0  ;;  %v11152_v58 = vld [vmem:[%s11669_s15 + $0x340] sm:$0xff] }
  0x83   : > { %2228 = vmatpush.bf16.xpose.msrb.mxu3 %v2214_v3  ;;  %v2601_v3 = vsel %vm1486_vm0, %v11142_v59, 0  ;;  %v11156_v59 = vld [vmem:[%s11669_s15 + $0x360] sm:$0xff] }
  0x88   : > { %2085 = vmatpush.bf16.xpose.msrb.mxu0 %v2067_v12  ;;  %v11128_v12 = vld [vmem:[%s11669_s15 + $0x280] sm:$0xff] }
  0x89   : > { %2133 = vmatpush.bf16.xpose.msrb.mxu1 %v2115_v13  ;;  %v11132_v13 = vld [vmem:[%s11669_s15 + $0x2a0] sm:$0xff]  ;;  %v2451_v20 = vsel %vm1486_vm0, %v11128_v12, 0  ;;  %v11170_v12 = vld [vmem:[%s11669_s15 + $0x3d0] sm:$0xff] }
  0x8a   : > { %2181 = vmatpush.bf16.xpose.msrb.mxu2 %v2163_v14  ;;  %v11136_v14 = vld [vmem:[%s11669_s15 + $0x2c0] sm:$0xff]  ;;  %v2499_v21 = vsel %vm1486_vm0, %v11132_v13, 0  ;;  %v11174_v13 = vld [vmem:[%s11669_s15 + $0x3f0] sm:$0xff] }
  0x8b   : > { %2229 = vmatpush.bf16.xpose.msrb.mxu3 %v2211_v15  ;;  %v11140_v15 = vld [vmem:[%s11669_s15 + $0x2e0] sm:$0xff]  ;;  %v2547_v22 = vsel %vm1486_vm0, %v11136_v14, 0  ;;  %v194_v14 = vld [vmem:[%s11715_s18 + $0x18] sm:$0x1] }
  0x8c   : > { %v2595_v23 = vsel %vm1486_vm0, %v11140_v15, 0  ;;  %v195_v15 = vld [vmem:[%s11715_s18 + $0x19] sm:$0x1] }
  0x8f   : > { %8817 = vmatmul.msk.bf16.vlgmr.msrb.gmra.mxu0 %vm1486_vm0, %v182_v24 }
  0x90   : > { %2274 = vmatpush.bf16.xpose.msra.mxu0 %v2268_v16  ;;  %8834 = vmatmul.msk.bf16.vlgmr.msrb.gmra.mxu1 %vm1486_vm0, %v183_v25  ;;  %v11147_v16 = vld [vmem:[%s11669_s15 + $0x318] sm:$0xff] }
  0x91   : > { %2322 = vmatpush.bf16.xpose.msra.mxu1 %v2316_v17  ;;  %8851 = vmatmul.msk.bf16.vlgmr.msrb.gmra.mxu2 %vm1486_vm0, %v184_v26  ;;  %v11151_v17 = vld [vmem:[%s11669_s15 + $0x338] sm:$0xff]  ;;  %v2652_v24 = vsel %vm1486_vm0, %v11147_v16, 0 }
  0x92   : > { %2370 = vmatpush.bf16.xpose.msra.mxu2 %v2364_v18  ;;  %8868 = vmatmul.msk.bf16.vlgmr.msrb.gmra.mxu3 %vm1486_vm0, %v185_v27  ;;  %v11155_v18 = vld [vmem:[%s11669_s15 + $0x358] sm:$0xff]  ;;  %v2700_v25 = vsel %vm1486_vm0, %v11151_v17, 0 }
  0x93   : > { %2418 = vmatpush.bf16.xpose.msra.mxu3 %v2412_v19  ;;  %v11159_v19 = vld [vmem:[%s11669_s15 + $0x378] sm:$0xff]  ;;  %v2748_v26 = vsel %vm1486_vm0, %v11155_v18, 0 }
  0x94   : > { %v2796_v27 = vsel %vm1486_vm0, %v11159_v19, 0  ;;  %v196_v16 = vld [vmem:[%s11715_s18 + $0x1a] sm:$0x1]  ;;  %v197_v17 = vld [vmem:[%s11715_s18 + $0x1b] sm:$0x1] }
  0x98   : > { %2275 = vmatpush.bf16.xpose.msra.mxu0 %v2265_v28  ;;  %v11146_v28 = vld [vmem:[%s11669_s15 + $0x310] sm:$0xff] }
  0x99   : > { %2323 = vmatpush.bf16.xpose.msra.mxu1 %v2313_v29 }
  0x9a   : > { %2371 = vmatpush.bf16.xpose.msra.mxu2 %v2361_v30 }
  0x9b   : > { %2419 = vmatpush.bf16.xpose.msra.mxu3 %v2409_v31  ;;  %v11150_v31 = vld [vmem:[%s11669_s15 + $0x330] sm:$0xff] }
  0xa0   : > { %2276 = vmatpush.bf16.xpose.msra.mxu0 %v2262_v36  ;;  %v192_v36 = vld [vmem:[%s11715_s18 + $0x16] sm:$0x1] }
  0xa1   : > { %2324 = vmatpush.bf16.xpose.msra.mxu1 %v2310_v37  ;;  %v193_v37 = vld [vmem:[%s11715_s18 + $0x17] sm:$0x1] }
  0xa2   : > { %2372 = vmatpush.bf16.xpose.msra.mxu2 %v2358_v38  ;;  %v2649_v38 = vsel %vm1486_vm0, %v11146_v28, 0  ;;  %v11169_v28 = vld [vmem:[%s11669_s15 + $0x3c8] sm:$0xff] }
  0xa3   : > { %2420 = vmatpush.bf16.xpose.msra.mxu3 %v2406_v39  ;;  %v2697_v39 = vsel %vm1486_vm0, %v11150_v31, 0  ;;  %v2934_v32 = vsel %vm1486_vm0, %v11169_v28, 0 }
  0xa8   : > { %2277 = vmatpush.bf16.xpose.msra.mxu0 %v2259_v48  ;;  %v11153_v48 = vld [vmem:[%s11669_s15 + $0x348] sm:$0xff] }
  0xa9   : > { %2325 = vmatpush.bf16.xpose.msra.mxu1 %v2307_v49  ;;  %v11157_v49 = vld [vmem:[%s11669_s15 + $0x368] sm:$0xff] }
  0xaa   : > { %2373 = vmatpush.bf16.xpose.msra.mxu2 %v2355_v50  ;;  %v2646_v50 = vsel %vm1486_vm0, %v11145_v46, 0 }
  0xab   : > { %2421 = vmatpush.bf16.xpose.msra.mxu3 %v2403_v51  ;;  %v2694_v51 = vsel %vm1486_vm0, %v11149_v47, 0 }
  0xac   : > { %v1511_v29 = vpop.f32.mrf.mxu0 }
  0xad   : > { %v1559_v30 = vpop.f32.mrf.mxu1  ;;  %8380 = vst.msk [vmem:[%s11921_s22] sm:$0x3] %vm8379_vm1, %v1511_v29  ;;  %v11173_v29 = vld [vmem:[%s11669_s15 + $0x3e8] sm:$0xff] }
  0xae   : > { %8381 = vst.msk [vmem:[%s11921_s22 + $0x2] sm:$0x3] %vm8379_vm1, %v1559_v30  ;;  %v2982_v33 = vsel %vm1486_vm0, %v11173_v29, 0 }
  0xaf   : > { %8885 = vmatmul.msk.bf16.vlgmr.msra.gmra.mxu0 %vm1486_vm0, %v186_v60  ;;  %v11163_v60 = vld [vmem:[%s11669_s15 + $0x398] sm:$0xff] }
  0xb0   : > { %2466 = vmatpush.bf16.xpose.msrb.mxu0 %v2460_v52  ;;  %8902 = vmatmul.msk.bf16.vlgmr.msra.gmra.mxu1 %vm1486_vm0, %v187_v61  ;;  %v2742_v52 = vsel %vm1486_vm0, %v11153_v48, 0  ;;  %v11167_v61 = vld [vmem:[%s11669_s15 + $0x3b8] sm:$0xff]  ;;  %v2844_v4 = vsel %vm1486_vm0, %v11163_v60, 0 }
  0xb1   : > { %2514 = vmatpush.bf16.xpose.msrb.mxu1 %v2508_v53  ;;  %8919 = vmatmul.msk.bf16.vlgmr.msra.gmra.mxu2 %vm1486_vm0, %v188_v62  ;;  %v2790_v53 = vsel %vm1486_vm0, %v11157_v49, 0  ;;  %v11171_v62 = vld [vmem:[%s11669_s15 + $0x3d8] sm:$0xff]  ;;  %v2892_v5 = vsel %vm1486_vm0, %v11167_v61, 0 }
  0xb2   : > { %2562 = vmatpush.bf16.xpose.msrb.mxu2 %v2556_v54  ;;  %8936 = vmatmul.msk.bf16.vlgmr.msra.gmra.mxu3 %vm1486_vm0, %v189_v63  ;;  %v11175_v63 = vld [vmem:[%s11669_s15 + $0x3f8] sm:$0xff]  ;;  %v2940_v6 = vsel %vm1486_vm0, %v11171_v62, 0 }
  0xb3   : > { %2610 = vmatpush.bf16.xpose.msrb.mxu3 %v2604_v55  ;;  %v2988_v7 = vsel %vm1486_vm0, %v11175_v63, 0  ;;  %v200_v60 = vld [vmem:[%s11715_s18 + $0x1e] sm:$0x1]  ;;  %v201_v61 = vld [vmem:[%s11715_s18 + $0x1f] sm:$0x1] }
  0xb4   : > { %v1607_v42 = vpop.f32.mrf.mxu2  ;;  %v1513_v44 = vpop.f32.mrf.mxu0 }
  0xb5   : > { %v1655_v43 = vpop.f32.mrf.mxu3  ;;  %8382 = vst.msk [vmem:[%s11921_s22 + $0x4] sm:$0x3] %vm8379_vm1, %v1607_v42  ;;  %v1561_v45 = vpop.f32.mrf.mxu1  ;;  %v11187_v42 = vld [vmem:[%s11669_s15 + $0x458] sm:$0xff] }
  0xb6   : > { %8383 = vst.msk [vmem:[%s11921_s22 + $0x6] sm:$0x3] %vm8379_vm1, %v1655_v43  ;;  %v11191_v43 = vld [vmem:[%s11669_s15 + $0x478] sm:$0xff] }
  0xb8   : > { %2467 = vmatpush.bf16.xpose.msrb.mxu0 %v2457_v0  ;;  %v2643_v0 = vsel %vm1486_vm0, %v11144_v56, 0  ;;  %v11186_v56 = vld [vmem:[%s11669_s15 + $0x450] sm:$0xff] }
  0xb9   : > { %2515 = vmatpush.bf16.xpose.msrb.mxu1 %v2505_v1  ;;  %v2691_v1 = vsel %vm1486_vm0, %v11148_v57, 0  ;;  %v11190_v57 = vld [vmem:[%s11669_s15 + $0x470] sm:$0xff] }
  0xba   : > { %2563 = vmatpush.bf16.xpose.msrb.mxu2 %v2553_v2  ;;  %v2739_v2 = vsel %vm1486_vm0, %v11152_v58, 0  ;;  %v198_v58 = vld [vmem:[%s11715_s18 + $0x1c] sm:$0x1] }
  0xbb   : > { %2611 = vmatpush.bf16.xpose.msrb.mxu3 %v2601_v3  ;;  %v2787_v3 = vsel %vm1486_vm0, %v11156_v59, 0  ;;  %v199_v59 = vld [vmem:[%s11715_s18 + $0x1d] sm:$0x1] }
  0xbc   : > { %v1609_v54 = vpop.f32.mrf.mxu2 }
  0xbd   : > { %v1657_v55 = vpop.f32.mrf.mxu3 }
  0xbe   : > { %v11182_v55 = vld [vmem:[%s11669_s15 + $0x430] sm:$0xff] }
  0xbf   : > { %v3081_v63 = vsel %vm1486_vm0, %v11182_v55, 0 }
  0xc0   : > { %2468 = vmatpush.bf16.xpose.msrb.mxu0 %v2454_v8  ;;  %v11162_v8 = vld [vmem:[%s11669_s15 + $0x390] sm:$0xff] }
  0xc1   : > { %2516 = vmatpush.bf16.xpose.msrb.mxu1 %v2502_v9  ;;  %v2841_v18 = vsel %vm1486_vm0, %v11162_v8, 0  ;;  %v11185_v8 = vld [vmem:[%s11669_s15 + $0x448] sm:$0xff] }
  0xc2   : > { %2564 = vmatpush.bf16.xpose.msrb.mxu2 %v2550_v10 }
  0xc3   : > { %2612 = vmatpush.bf16.xpose.msrb.mxu3 %v2598_v11  ;;  %v11166_v11 = vld [vmem:[%s11669_s15 + $0x3b0] sm:$0xff] }
  0xc4   : > { %v2889_v19 = vsel %vm1486_vm0, %v11166_v11, 0 }
  0xc8   : > { %2469 = vmatpush.bf16.xpose.msrb.mxu0 %v2451_v20  ;;  %v2937_v20 = vsel %vm1486_vm0, %v11170_v12, 0  ;;  %v3126_v12 = vsel %vm1486_vm0, %v11185_v8, 0 }
  0xc9   : > { %2517 = vmatpush.bf16.xpose.msrb.mxu1 %v2499_v21  ;;  %v2985_v21 = vsel %vm1486_vm0, %v11174_v13, 0 }
  0xca   : > { %2565 = vmatpush.bf16.xpose.msrb.mxu2 %v2547_v22 }
  0xcb   : > { %2613 = vmatpush.bf16.xpose.msrb.mxu3 %v2595_v23 }
  0xcc   : > { %v1703_v9 = vpop.f32.mrf.mxu0 }
  0xcd   : > { %v1751_v10 = vpop.f32.mrf.mxu1  ;;  %8384 = vst.msk [vmem:[%s11921_s22 + $0x8] sm:$0x3] %vm8379_vm1, %v1703_v9  ;;  %v11189_v9 = vld [vmem:[%s11669_s15 + $0x468] sm:$0xff] }
  0xce   : > { %8385 = vst.msk [vmem:[%s11921_s22 + $0xa] sm:$0x3] %vm8379_vm1, %v1751_v10  ;;  %v3174_v13 = vsel %vm1486_vm0, %v11189_v9, 0 }
  0xcf   : > { %8953 = vmatmul.msk.bf16.vlgmr.msrb.gmra.mxu0 %vm1486_vm0, %v190_v34 }
  0xd0   : > { %2658 = vmatpush.bf16.xpose.msra.mxu0 %v2652_v24  ;;  %8970 = vmatmul.msk.bf16.vlgmr.msrb.gmra.mxu1 %vm1486_vm0, %v191_v35 }
  0xd1   : > { %2706 = vmatpush.bf16.xpose.msra.mxu1 %v2700_v25  ;;  %8987 = vmatmul.msk.bf16.vlgmr.msrb.gmra.mxu2 %vm1486_vm0, %v192_v36  ;;  %v11160_v36 = vld [vmem:[%s11669_s15 + $0x380] sm:$0xff] }
  0xd2   : > { %2754 = vmatpush.bf16.xpose.msra.mxu2 %v2748_v26  ;;  %9004 = vmatmul.msk.bf16.vlgmr.msrb.gmra.mxu3 %vm1486_vm0, %v193_v37  ;;  %v11161_v26 = vld [vmem:[%s11669_s15 + $0x388] sm:$0xff]  ;;  %v11164_v37 = vld [vmem:[%s11669_s15 + $0x3a0] sm:$0xff]  ;;  %v2835_v44 = vsel %vm1486_vm0, %v11160_v36, 0  ;;  %v11202_v36 = vld [vmem:[%s11669_s15 + $0x4d0] sm:$0xff] }
  0xd3   : > { %2802 = vmatpush.bf16.xpose.msra.mxu3 %v2796_v27  ;;  %v11165_v27 = vld [vmem:[%s11669_s15 + $0x3a8] sm:$0xff]  ;;  %v2838_v30 = vsel %vm1486_vm0, %v11161_v26, 0  ;;  %v2883_v45 = vsel %vm1486_vm0, %v11164_v37, 0  ;;  %v11206_v37 = vld [vmem:[%s11669_s15 + $0x4f0] sm:$0xff] }
  0xd4   : > { %v1799_v22 = vpop.f32.mrf.mxu2  ;;  %v1705_v24 = vpop.f32.mrf.mxu0  ;;  %v2886_v31 = vsel %vm1486_vm0, %v11165_v27, 0 }
  0xd5   : > { %v1847_v23 = vpop.f32.mrf.mxu3  ;;  %8386 = vst.msk [vmem:[%s11921_s22 + $0xc] sm:$0x3] %vm8379_vm1, %v1799_v22  ;;  %v1753_v25 = vpop.f32.mrf.mxu1  ;;  %v11203_v22 = vld [vmem:[%s11669_s15 + $0x4d8] sm:$0xff] }
  0xd6   : > { %8387 = vst.msk [vmem:[%s11921_s22 + $0xe] sm:$0x3] %vm8379_vm1, %v1847_v23  ;;  %v11207_v23 = vld [vmem:[%s11669_s15 + $0x4f8] sm:$0xff] }
  0xd8   : > { %2659 = vmatpush.bf16.xpose.msra.mxu0 %v2649_v38  ;;  %v11168_v38 = vld [vmem:[%s11669_s15 + $0x3c0] sm:$0xff] }
  0xd9   : > { %2707 = vmatpush.bf16.xpose.msra.mxu1 %v2697_v39  ;;  %v11172_v39 = vld [vmem:[%s11669_s15 + $0x3e0] sm:$0xff]  ;;  %v2931_v46 = vsel %vm1486_vm0, %v11168_v38, 0 }
  0xda   : > { %2755 = vmatpush.bf16.xpose.msra.mxu2 %v2745_v40  ;;  %v11179_v40 = vld [vmem:[%s11669_s15 + $0x418] sm:$0xff]  ;;  %v2979_v47 = vsel %vm1486_vm0, %v11172_v39, 0  ;;  %v202_v38 = vld [vmem:[%s11715_s18 + $0x20] sm:$0x1]  ;;  %v203_v39 = vld [vmem:[%s11715_s18 + $0x21] sm:$0x1] }
  0xdb   : > { %2803 = vmatpush.bf16.xpose.msra.mxu3 %v2793_v41  ;;  %v11183_v41 = vld [vmem:[%s11669_s15 + $0x438] sm:$0xff]  ;;  %v3036_v48 = vsel %vm1486_vm0, %v11179_v40, 0  ;;  %v204_v40 = vld [vmem:[%s11715_s18 + $0x22] sm:$0x1] }
  0xdc   : > { %v1801_v34 = vpop.f32.mrf.mxu2  ;;  %v3084_v49 = vsel %vm1486_vm0, %v11183_v41, 0  ;;  %v205_v41 = vld [vmem:[%s11715_s18 + $0x23] sm:$0x1] }
  0xdd   : > { %v1849_v35 = vpop.f32.mrf.mxu3 }
  0xde   : > { %v11198_v35 = vld [vmem:[%s11669_s15 + $0x4b0] sm:$0xff] }
  0xe0   : > { %2660 = vmatpush.bf16.xpose.msra.mxu0 %v2646_v50  ;;  %v3132_v50 = vsel %vm1486_vm0, %v11187_v42, 0 }
  0xe1   : > { %2708 = vmatpush.bf16.xpose.msra.mxu1 %v2694_v51  ;;  %v3180_v51 = vsel %vm1486_vm0, %v11191_v43, 0  ;;  %v3273_v43 = vsel %vm1486_vm0, %v11198_v35, 0 }
  0xe2   : > { %2756 = vmatpush.bf16.xpose.msra.mxu2 %v2742_v52  ;;  %v11178_v52 = vld [vmem:[%s11669_s15 + $0x410] sm:$0xff] }
  0xe3   : > { %2804 = vmatpush.bf16.xpose.msra.mxu3 %v2790_v53  ;;  %v3033_v62 = vsel %vm1486_vm0, %v11178_v52, 0  ;;  %v11201_v52 = vld [vmem:[%s11669_s15 + $0x4c8] sm:$0xff] }
  0xe8   : > { %2661 = vmatpush.bf16.xpose.msra.mxu0 %v2643_v0  ;;  %v3129_v0 = vsel %vm1486_vm0, %v11186_v56, 0  ;;  %v3318_v56 = vsel %vm1486_vm0, %v11201_v52, 0 }
  0xe9   : > { %2709 = vmatpush.bf16.xpose.msra.mxu1 %v2691_v1  ;;  %v3177_v1 = vsel %vm1486_vm0, %v11190_v57, 0 }
  0xea   : > { %2757 = vmatpush.bf16.xpose.msra.mxu2 %v2739_v2 }
  0xeb   : > { %2805 = vmatpush.bf16.xpose.msra.mxu3 %v2787_v3 }
  0xec   : > { %v1895_v53 = vpop.f32.mrf.mxu0 }
  0xed   : > { %v1943_v54 = vpop.f32.mrf.mxu1  ;;  %8388 = vst.msk [vmem:[%s11921_s22 + $0x10] sm:$0x3] %vm8379_vm1, %v1895_v53  ;;  %v11205_v53 = vld [vmem:[%s11669_s15 + $0x4e8] sm:$0xff] }
  0xee   : > { %8389 = vst.msk [vmem:[%s11921_s22 + $0x12] sm:$0x3] %vm8379_vm1, %v1943_v54  ;;  %v3366_v57 = vsel %vm1486_vm0, %v11205_v53, 0 }
  0xef   : > { %9021 = vmatmul.msk.bf16.vlgmr.msra.gmra.mxu0 %vm1486_vm0, %v194_v14 }
  0xf0   : > { %2850 = vmatpush.bf16.xpose.msrb.mxu0 %v2844_v4  ;;  %9038 = vmatmul.msk.bf16.vlgmr.msra.gmra.mxu1 %vm1486_vm0, %v195_v15 }
  0xf1   : > { %2898 = vmatpush.bf16.xpose.msrb.mxu1 %v2892_v5  ;;  %9055 = vmatmul.msk.bf16.vlgmr.msra.gmra.mxu2 %vm1486_vm0, %v196_v16  ;;  %v11176_v16 = vld [vmem:[%s11669_s15 + $0x400] sm:$0xff] }
  0xf2   : > { %2946 = vmatpush.bf16.xpose.msrb.mxu2 %v2940_v6  ;;  %9072 = vmatmul.msk.bf16.vlgmr.msra.gmra.mxu3 %vm1486_vm0, %v197_v17  ;;  %v11177_v6 = vld [vmem:[%s11669_s15 + $0x408] sm:$0xff]  ;;  %v11180_v17 = vld [vmem:[%s11669_s15 + $0x420] sm:$0xff]  ;;  %v3027_v24 = vsel %vm1486_vm0, %v11176_v16, 0  ;;  %v11218_v16 = vld [vmem:[%s11669_s15 + $0x550] sm:$0xff] }
  0xf3   : > { %2994 = vmatpush.bf16.xpose.msrb.mxu3 %v2988_v7  ;;  %v11181_v7 = vld [vmem:[%s11669_s15 + $0x428] sm:$0xff]  ;;  %v3030_v10 = vsel %vm1486_vm0, %v11177_v6, 0  ;;  %v3075_v25 = vsel %vm1486_vm0, %v11180_v17, 0  ;;  %v11222_v17 = vld [vmem:[%s11669_s15 + $0x570] sm:$0xff] }
  0xf4   : > { %v1991_v2 = vpop.f32.mrf.mxu2  ;;  %v1897_v4 = vpop.f32.mrf.mxu0  ;;  %v3078_v11 = vsel %vm1486_vm0, %v11181_v7, 0 }
  0xf5   : > { %v2039_v3 = vpop.f32.mrf.mxu3  ;;  %8390 = vst.msk [vmem:[%s11921_s22 + $0x14] sm:$0x3] %vm8379_vm1, %v1991_v2  ;;  %v1945_v5 = vpop.f32.mrf.mxu1  ;;  %v11219_v2 = vld [vmem:[%s11669_s15 + $0x558] sm:$0xff] }
  0xf6   : > { %8391 = vst.msk [vmem:[%s11921_s22 + $0x16] sm:$0x3] %vm8379_vm1, %v2039_v3  ;;  %v11223_v3 = vld [vmem:[%s11669_s15 + $0x578] sm:$0xff] }
  0xf8   : > { %2851 = vmatpush.bf16.xpose.msrb.mxu0 %v2841_v18  ;;  %v11184_v18 = vld [vmem:[%s11669_s15 + $0x440] sm:$0xff] }
  0xf9   : > { %2899 = vmatpush.bf16.xpose.msrb.mxu1 %v2889_v19  ;;  %v11188_v19 = vld [vmem:[%s11669_s15 + $0x460] sm:$0xff]  ;;  %v3123_v26 = vsel %vm1486_vm0, %v11184_v18, 0 }
  0xfa   : > { %2947 = vmatpush.bf16.xpose.msrb.mxu2 %v2937_v20  ;;  %v11195_v20 = vld [vmem:[%s11669_s15 + $0x498] sm:$0xff]  ;;  %v3171_v27 = vsel %vm1486_vm0, %v11188_v19, 0  ;;  %v206_v18 = vld [vmem:[%s11715_s18 + $0x24] sm:$0x1]  ;;  %v207_v19 = vld [vmem:[%s11715_s18 + $0x25] sm:$0x1] }
  0xfb   : > { %2995 = vmatpush.bf16.xpose.msrb.mxu3 %v2985_v21  ;;  %v11199_v21 = vld [vmem:[%s11669_s15 + $0x4b8] sm:$0xff]  ;;  %v3228_v28 = vsel %vm1486_vm0, %v11195_v20, 0  ;;  %v208_v20 = vld [vmem:[%s11715_s18 + $0x26] sm:$0x1] }
  0xfc   : > { %v1993_v14 = vpop.f32.mrf.mxu2  ;;  %v3276_v29 = vsel %vm1486_vm0, %v11199_v21, 0  ;;  %v209_v21 = vld [vmem:[%s11715_s18 + $0x27] sm:$0x1] }
  0xfd   : > { %v2041_v15 = vpop.f32.mrf.mxu3 }
  0xfe   : > { %v11214_v15 = vld [vmem:[%s11669_s15 + $0x530] sm:$0xff] }
 0x100   : > { %2852 = vmatpush.bf16.xpose.msrb.mxu0 %v2838_v30  ;;  %v3324_v30 = vsel %vm1486_vm0, %v11203_v22, 0 }
 0x101   : > { %2900 = vmatpush.bf16.xpose.msrb.mxu1 %v2886_v31  ;;  %v3372_v31 = vsel %vm1486_vm0, %v11207_v23, 0  ;;  %v3465_v23 = vsel %vm1486_vm0, %v11214_v15, 0 }
 0x102   : > { %2948 = vmatpush.bf16.xpose.msrb.mxu2 %v2934_v32  ;;  %v11194_v32 = vld [vmem:[%s11669_s15 + $0x490] sm:$0xff] }
 0x103   : > { %2996 = vmatpush.bf16.xpose.msrb.mxu3 %v2982_v33  ;;  %v3225_v42 = vsel %vm1486_vm0, %v11194_v32, 0  ;;  %v11217_v32 = vld [vmem:[%s11669_s15 + $0x548] sm:$0xff] }
 0x108   : > { %2853 = vmatpush.bf16.xpose.msrb.mxu0 %v2835_v44  ;;  %v3321_v44 = vsel %vm1486_vm0, %v11202_v36, 0  ;;  %v3510_v36 = vsel %vm1486_vm0, %v11217_v32, 0 }
 0x109   : > { %2901 = vmatpush.bf16.xpose.msrb.mxu1 %v2883_v45  ;;  %v3369_v45 = vsel %vm1486_vm0, %v11206_v37, 0 }
 0x10a   : > { %2949 = vmatpush.bf16.xpose.msrb.mxu2 %v2931_v46 }
 0x10b   : > { %2997 = vmatpush.bf16.xpose.msrb.mxu3 %v2979_v47 }
 0x10c   : > { %v2087_v33 = vpop.f32.mrf.mxu0 }
 0x10d   : > { %v2135_v34 = vpop.f32.mrf.mxu1  ;;  %8392 = vst.msk [vmem:[%s11921_s22 + $0x18] sm:$0x3] %vm8379_vm1, %v2087_v33  ;;  %v11221_v33 = vld [vmem:[%s11669_s15 + $0x568] sm:$0xff] }
 0x10e   : > { %8393 = vst.msk [vmem:[%s11921_s22 + $0x1a] sm:$0x3] %vm8379_vm1, %v2135_v34  ;;  %v3558_v37 = vsel %vm1486_vm0, %v11221_v33, 0 }
 0x10f   : > { %9089 = vmatmul.msk.bf16.vlgmr.msrb.gmra.mxu0 %vm1486_vm0, %v198_v58 }
 0x110   : > { %3042 = vmatpush.bf16.xpose.msra.mxu0 %v3036_v48  ;;  %9106 = vmatmul.msk.bf16.vlgmr.msrb.gmra.mxu1 %vm1486_vm0, %v199_v59 }
 0x111   : > { %3090 = vmatpush.bf16.xpose.msra.mxu1 %v3084_v49  ;;  %9123 = vmatmul.msk.bf16.vlgmr.msrb.gmra.mxu2 %vm1486_vm0, %v200_v60  ;;  %v11192_v60 = vld [vmem:[%s11669_s15 + $0x480] sm:$0xff] }
 0x112   : > { %3138 = vmatpush.bf16.xpose.msra.mxu2 %v3132_v50  ;;  %9140 = vmatmul.msk.bf16.vlgmr.msrb.gmra.mxu3 %vm1486_vm0, %v201_v61  ;;  %v11193_v50 = vld [vmem:[%s11669_s15 + $0x488] sm:$0xff]  ;;  %v11196_v61 = vld [vmem:[%s11669_s15 + $0x4a0] sm:$0xff]  ;;  %v3219_v4 = vsel %vm1486_vm0, %v11192_v60, 0  ;;  %v11234_v60 = vld [vmem:[%s11669_s15 + $0x5d0] sm:$0xff] }
 0x113   : > { %3186 = vmatpush.bf16.xpose.msra.mxu3 %v3180_v51  ;;  %v11197_v51 = vld [vmem:[%s11669_s15 + $0x4a8] sm:$0xff]  ;;  %v3222_v54 = vsel %vm1486_vm0, %v11193_v50, 0  ;;  %v3267_v5 = vsel %vm1486_vm0, %v11196_v61, 0  ;;  %v11238_v61 = vld [vmem:[%s11669_s15 + $0x5f0] sm:$0xff] }
 0x114   : > { %v2183_v46 = vpop.f32.mrf.mxu2  ;;  %v2089_v48 = vpop.f32.mrf.mxu0  ;;  %v3270_v55 = vsel %vm1486_vm0, %v11197_v51, 0 }
 0x115   : > { %v2231_v47 = vpop.f32.mrf.mxu3  ;;  %8394 = vst.msk [vmem:[%s11921_s22 + $0x1c] sm:$0x3] %vm8379_vm1, %v2183_v46  ;;  %v2137_v49 = vpop.f32.mrf.mxu1  ;;  %v11235_v46 = vld [vmem:[%s11669_s15 + $0x5d8] sm:$0xff] }
 0x116   : > { %8395 = vst.msk [vmem:[%s11921_s22 + $0x1e] sm:$0x3] %vm8379_vm1, %v2231_v47  ;;  %v11239_v47 = vld [vmem:[%s11669_s15 + $0x5f8] sm:$0xff] }
 0x118   : > { %3043 = vmatpush.bf16.xpose.msra.mxu0 %v3033_v62  ;;  %v11200_v62 = vld [vmem:[%s11669_s15 + $0x4c0] sm:$0xff] }
 0x119   : > { %3091 = vmatpush.bf16.xpose.msra.mxu1 %v3081_v63  ;;  %v11204_v63 = vld [vmem:[%s11669_s15 + $0x4e0] sm:$0xff]  ;;  %v3315_v6 = vsel %vm1486_vm0, %v11200_v62, 0  ;;  %v210_v62 = vld [vmem:[%s11715_s18 + $0x28] sm:$0x1] }
 0x11a   : > { %3139 = vmatpush.bf16.xpose.msra.mxu2 %v3129_v0  ;;  %v11211_v0 = vld [vmem:[%s11669_s15 + $0x518] sm:$0xff]  ;;  %v3363_v7 = vsel %vm1486_vm0, %v11204_v63, 0  ;;  %v211_v63 = vld [vmem:[%s11715_s18 + $0x29] sm:$0x1] }
 0x11b   : > { %3187 = vmatpush.bf16.xpose.msra.mxu3 %v3177_v1  ;;  %v11215_v1 = vld [vmem:[%s11669_s15 + $0x538] sm:$0xff]  ;;  %v3420_v8 = vsel %vm1486_vm0, %v11211_v0, 0  ;;  %v212_v0 = vld [vmem:[%s11715_s18 + $0x2a] sm:$0x1] }
 0x11c   : > { %v2185_v58 = vpop.f32.mrf.mxu2  ;;  %v3468_v9 = vsel %vm1486_vm0, %v11215_v1, 0  ;;  %v213_v1 = vld [vmem:[%s11715_s18 + $0x2b] sm:$0x1] }
 0x11d   : > { %v2233_v59 = vpop.f32.mrf.mxu3 }
 0x11e   : > { %v11230_v59 = vld [vmem:[%s11669_s15 + $0x5b0] sm:$0xff] }
 0x120   : > { %3044 = vmatpush.bf16.xpose.msra.mxu0 %v3030_v10  ;;  %v3516_v10 = vsel %vm1486_vm0, %v11219_v2, 0 }
 0x121   : > { %3092 = vmatpush.bf16.xpose.msra.mxu1 %v3078_v11  ;;  %v3564_v11 = vsel %vm1486_vm0, %v11223_v3, 0  ;;  %v3657_v3 = vsel %vm1486_vm0, %v11230_v59, 0 }
 0x122   : > { %3140 = vmatpush.bf16.xpose.msra.mxu2 %v3126_v12  ;;  %v11210_v12 = vld [vmem:[%s11669_s15 + $0x510] sm:$0xff] }
 0x123   : > { %3188 = vmatpush.bf16.xpose.msra.mxu3 %v3174_v13  ;;  %v3417_v22 = vsel %vm1486_vm0, %v11210_v12, 0  ;;  %v11233_v12 = vld [vmem:[%s11669_s15 + $0x5c8] sm:$0xff] }
 0x128   : > { %3045 = vmatpush.bf16.xpose.msra.mxu0 %v3027_v24  ;;  %v3513_v24 = vsel %vm1486_vm0, %v11218_v16, 0  ;;  %v3702_v16 = vsel %vm1486_vm0, %v11233_v12, 0 }
 0x129   : > { %3093 = vmatpush.bf16.xpose.msra.mxu1 %v3075_v25  ;;  %v3561_v25 = vsel %vm1486_vm0, %v11222_v17, 0 }
 0x12a   : > { %3141 = vmatpush.bf16.xpose.msra.mxu2 %v3123_v26 }
 0x12b   : > { %3189 = vmatpush.bf16.xpose.msra.mxu3 %v3171_v27 }
 0x12c   : > { %v2279_v13 = vpop.f32.mrf.mxu0 }
 0x12d   : > { %v2327_v14 = vpop.f32.mrf.mxu1  ;;  %8396 = vst.msk [vmem:[%s11921_s22 + $0x20] sm:$0x3] %vm8379_vm1, %v2279_v13  ;;  %v11237_v13 = vld [vmem:[%s11669_s15 + $0x5e8] sm:$0xff] }
 0x12e   : > { %8397 = vst.msk [vmem:[%s11921_s22 + $0x22] sm:$0x3] %vm8379_vm1, %v2327_v14  ;;  %v3750_v17 = vsel %vm1486_vm0, %v11237_v13, 0 }
 0x12f   : > { %9157 = vmatmul.msk.bf16.vlgmr.msra.gmra.mxu0 %vm1486_vm0, %v202_v38 }
 0x130   : > { %3234 = vmatpush.bf16.xpose.msrb.mxu0 %v3228_v28  ;;  %9174 = vmatmul.msk.bf16.vlgmr.msra.gmra.mxu1 %vm1486_vm0, %v203_v39 }
 0x131   : > { %3282 = vmatpush.bf16.xpose.msrb.mxu1 %v3276_v29  ;;  %9191 = vmatmul.msk.bf16.vlgmr.msra.gmra.mxu2 %vm1486_vm0, %v204_v40  ;;  %v11208_v40 = vld [vmem:[%s11669_s15 + $0x500] sm:$0xff] }
 0x132   : > { %3330 = vmatpush.bf16.xpose.msrb.mxu2 %v3324_v30  ;;  %9208 = vmatmul.msk.bf16.vlgmr.msra.gmra.mxu3 %vm1486_vm0, %v205_v41  ;;  %v11209_v30 = vld [vmem:[%s11669_s15 + $0x508] sm:$0xff]  ;;  %v11212_v41 = vld [vmem:[%s11669_s15 + $0x520] sm:$0xff]  ;;  %v3411_v48 = vsel %vm1486_vm0, %v11208_v40, 0  ;;  %v11250_v40 = vld [vmem:[%s11669_s15 + $0x650] sm:$0xff] }
 0x133   : > { %3378 = vmatpush.bf16.xpose.msrb.mxu3 %v3372_v31  ;;  %v11213_v31 = vld [vmem:[%s11669_s15 + $0x528] sm:$0xff]  ;;  %v3414_v34 = vsel %vm1486_vm0, %v11209_v30, 0  ;;  %v3459_v49 = vsel %vm1486_vm0, %v11212_v41, 0  ;;  %v11254_v41 = vld [vmem:[%s11669_s15 + $0x670] sm:$0xff] }
 0x134   : > { %v2375_v26 = vpop.f32.mrf.mxu2  ;;  %v2281_v28 = vpop.f32.mrf.mxu0  ;;  %v3462_v35 = vsel %vm1486_vm0, %v11213_v31, 0 }
 0x135   : > { %v2423_v27 = vpop.f32.mrf.mxu3  ;;  %8398 = vst.msk [vmem:[%s11921_s22 + $0x24] sm:$0x3] %vm8379_vm1, %v2375_v26  ;;  %v2329_v29 = vpop.f32.mrf.mxu1  ;;  %v11251_v26 = vld [vmem:[%s11669_s15 + $0x658] sm:$0xff] }
 0x136   : > { %8399 = vst.msk [vmem:[%s11921_s22 + $0x26] sm:$0x3] %vm8379_vm1, %v2423_v27  ;;  %v11255_v27 = vld [vmem:[%s11669_s15 + $0x678] sm:$0xff] }
 0x138   : > { %3235 = vmatpush.bf16.xpose.msrb.mxu0 %v3225_v42  ;;  %v11216_v42 = vld [vmem:[%s11669_s15 + $0x540] sm:$0xff] }
 0x139   : > { %3283 = vmatpush.bf16.xpose.msrb.mxu1 %v3273_v43  ;;  %v11220_v43 = vld [vmem:[%s11669_s15 + $0x560] sm:$0xff]  ;;  %v3507_v50 = vsel %vm1486_vm0, %v11216_v42, 0  ;;  %v214_v42 = vld [vmem:[%s11715_s18 + $0x2c] sm:$0x1] }
 0x13a   : > { %3331 = vmatpush.bf16.xpose.msrb.mxu2 %v3321_v44  ;;  %v11227_v44 = vld [vmem:[%s11669_s15 + $0x598] sm:$0xff]  ;;  %v3555_v51 = vsel %vm1486_vm0, %v11220_v43, 0  ;;  %v215_v43 = vld [vmem:[%s11715_s18 + $0x2d] sm:$0x1] }
 0x13b   : > { %3379 = vmatpush.bf16.xpose.msrb.mxu3 %v3369_v45  ;;  %v11231_v45 = vld [vmem:[%s11669_s15 + $0x5b8] sm:$0xff]  ;;  %v3612_v52 = vsel %vm1486_vm0, %v11227_v44, 0  ;;  %v216_v44 = vld [vmem:[%s11715_s18 + $0x2e] sm:$0x1] }
 0x13c   : > { %v2377_v38 = vpop.f32.mrf.mxu2  ;;  %v3660_v53 = vsel %vm1486_vm0, %v11231_v45, 0  ;;  %v217_v45 = vld [vmem:[%s11715_s18 + $0x2f] sm:$0x1] }
 0x13d   : > { %v2425_v39 = vpop.f32.mrf.mxu3 }
 0x13e   : > { %v11246_v39 = vld [vmem:[%s11669_s15 + $0x630] sm:$0xff] }
 0x140   : > { %3236 = vmatpush.bf16.xpose.msrb.mxu0 %v3222_v54  ;;  %v3708_v54 = vsel %vm1486_vm0, %v11235_v46, 0 }
 0x141   : > { %3284 = vmatpush.bf16.xpose.msrb.mxu1 %v3270_v55  ;;  %v3756_v55 = vsel %vm1486_vm0, %v11239_v47, 0  ;;  %v3849_v47 = vsel %vm1486_vm0, %v11246_v39, 0 }
 0x142   : > { %3332 = vmatpush.bf16.xpose.msrb.mxu2 %v3318_v56  ;;  %v11226_v56 = vld [vmem:[%s11669_s15 + $0x590] sm:$0xff] }
 0x143   : > { %3380 = vmatpush.bf16.xpose.msrb.mxu3 %v3366_v57  ;;  %v3609_v2 = vsel %vm1486_vm0, %v11226_v56, 0  ;;  %v11249_v56 = vld [vmem:[%s11669_s15 + $0x648] sm:$0xff] }
 0x148   : > { %3237 = vmatpush.bf16.xpose.msrb.mxu0 %v3219_v4  ;;  %v3705_v4 = vsel %vm1486_vm0, %v11234_v60, 0  ;;  %v3894_v60 = vsel %vm1486_vm0, %v11249_v56, 0 }
 0x149   : > { %3285 = vmatpush.bf16.xpose.msrb.mxu1 %v3267_v5  ;;  %v3753_v5 = vsel %vm1486_vm0, %v11238_v61, 0 }
 0x14a   : > { %3333 = vmatpush.bf16.xpose.msrb.mxu2 %v3315_v6 }
 0x14b   : > { %3381 = vmatpush.bf16.xpose.msrb.mxu3 %v3363_v7 }
 0x14c   : > { %v2471_v57 = vpop.f32.mrf.mxu0 }
 0x14d   : > { %v2519_v58 = vpop.f32.mrf.mxu1  ;;  %8400 = vst.msk [vmem:[%s11921_s22 + $0x28] sm:$0x3] %vm8379_vm1, %v2471_v57  ;;  %v11253_v57 = vld [vmem:[%s11669_s15 + $0x668] sm:$0xff] }
 0x14e   : > { %8401 = vst.msk [vmem:[%s11921_s22 + $0x2a] sm:$0x3] %vm8379_vm1, %v2519_v58  ;;  %v3942_v61 = vsel %vm1486_vm0, %v11253_v57, 0 }
 0x14f   : > { %9225 = vmatmul.msk.bf16.vlgmr.msrb.gmra.mxu0 %vm1486_vm0, %v206_v18 }
 0x150   : > { %3426 = vmatpush.bf16.xpose.msra.mxu0 %v3420_v8  ;;  %9242 = vmatmul.msk.bf16.vlgmr.msrb.gmra.mxu1 %vm1486_vm0, %v207_v19 }
 0x151   : > { %3474 = vmatpush.bf16.xpose.msra.mxu1 %v3468_v9  ;;  %9259 = vmatmul.msk.bf16.vlgmr.msrb.gmra.mxu2 %vm1486_vm0, %v208_v20  ;;  %v11224_v20 = vld [vmem:[%s11669_s15 + $0x580] sm:$0xff] }
 0x152   : > { %3522 = vmatpush.bf16.xpose.msra.mxu2 %v3516_v10  ;;  %9276 = vmatmul.msk.bf16.vlgmr.msrb.gmra.mxu3 %vm1486_vm0, %v209_v21  ;;  %v11225_v10 = vld [vmem:[%s11669_s15 + $0x588] sm:$0xff]  ;;  %v11228_v21 = vld [vmem:[%s11669_s15 + $0x5a0] sm:$0xff]  ;;  %v3603_v28 = vsel %vm1486_vm0, %v11224_v20, 0  ;;  %v11266_v20 = vld [vmem:[%s11669_s15 + $0x6d0] sm:$0xff] }
 0x153   : > { %3570 = vmatpush.bf16.xpose.msra.mxu3 %v3564_v11  ;;  %v11229_v11 = vld [vmem:[%s11669_s15 + $0x5a8] sm:$0xff]  ;;  %v3606_v14 = vsel %vm1486_vm0, %v11225_v10, 0  ;;  %v3651_v29 = vsel %vm1486_vm0, %v11228_v21, 0  ;;  %v11270_v21 = vld [vmem:[%s11669_s15 + $0x6f0] sm:$0xff] }
 0x154   : > { %v2567_v6 = vpop.f32.mrf.mxu2  ;;  %v2473_v8 = vpop.f32.mrf.mxu0  ;;  %v3654_v15 = vsel %vm1486_vm0, %v11229_v11, 0 }
 0x155   : > { %v2615_v7 = vpop.f32.mrf.mxu3  ;;  %8402 = vst.msk [vmem:[%s11921_s22 + $0x2c] sm:$0x3] %vm8379_vm1, %v2567_v6  ;;  %v2521_v9 = vpop.f32.mrf.mxu1  ;;  %v11267_v6 = vld [vmem:[%s11669_s15 + $0x6d8] sm:$0xff] }
 0x156   : > { %8403 = vst.msk [vmem:[%s11921_s22 + $0x2e] sm:$0x3] %vm8379_vm1, %v2615_v7  ;;  %v11271_v7 = vld [vmem:[%s11669_s15 + $0x6f8] sm:$0xff] }
 0x158   : > { %3427 = vmatpush.bf16.xpose.msra.mxu0 %v3417_v22  ;;  %v11232_v22 = vld [vmem:[%s11669_s15 + $0x5c0] sm:$0xff] }
 0x159   : > { %3475 = vmatpush.bf16.xpose.msra.mxu1 %v3465_v23  ;;  %v11236_v23 = vld [vmem:[%s11669_s15 + $0x5e0] sm:$0xff]  ;;  %v3699_v30 = vsel %vm1486_vm0, %v11232_v22, 0  ;;  %v218_v22 = vld [vmem:[%s11715_s18 + $0x30] sm:$0x1] }
 0x15a   : > { %3523 = vmatpush.bf16.xpose.msra.mxu2 %v3513_v24  ;;  %v11243_v24 = vld [vmem:[%s11669_s15 + $0x618] sm:$0xff]  ;;  %v3747_v31 = vsel %vm1486_vm0, %v11236_v23, 0  ;;  %v219_v23 = vld [vmem:[%s11715_s18 + $0x31] sm:$0x1] }
 0x15b   : > { %3571 = vmatpush.bf16.xpose.msra.mxu3 %v3561_v25  ;;  %v11247_v25 = vld [vmem:[%s11669_s15 + $0x638] sm:$0xff]  ;;  %v3804_v32 = vsel %vm1486_vm0, %v11243_v24, 0  ;;  %v220_v24 = vld [vmem:[%s11715_s18 + $0x32] sm:$0x1] }
 0x15c   : > { %v2569_v18 = vpop.f32.mrf.mxu2  ;;  %v3852_v33 = vsel %vm1486_vm0, %v11247_v25, 0  ;;  %v221_v25 = vld [vmem:[%s11715_s18 + $0x33] sm:$0x1] }
 0x15d   : > { %v2617_v19 = vpop.f32.mrf.mxu3 }
 0x15e   : > { %v11262_v19 = vld [vmem:[%s11669_s15 + $0x6b0] sm:$0xff] }
 0x160   : > { %3428 = vmatpush.bf16.xpose.msra.mxu0 %v3414_v34  ;;  %v3900_v34 = vsel %vm1486_vm0, %v11251_v26, 0 }
 0x161   : > { %3476 = vmatpush.bf16.xpose.msra.mxu1 %v3462_v35  ;;  %v3948_v35 = vsel %vm1486_vm0, %v11255_v27, 0  ;;  %v4041_v27 = vsel %vm1486_vm0, %v11262_v19, 0 }
 0x162   : > { %3524 = vmatpush.bf16.xpose.msra.mxu2 %v3510_v36  ;;  %v11242_v36 = vld [vmem:[%s11669_s15 + $0x610] sm:$0xff] }
 0x163   : > { %3572 = vmatpush.bf16.xpose.msra.mxu3 %v3558_v37  ;;  %v3801_v46 = vsel %vm1486_vm0, %v11242_v36, 0  ;;  %v11265_v36 = vld [vmem:[%s11669_s15 + $0x6c8] sm:$0xff] }
 0x168   : > { %3429 = vmatpush.bf16.xpose.msra.mxu0 %v3411_v48  ;;  %v3897_v48 = vsel %vm1486_vm0, %v11250_v40, 0  ;;  %v4086_v40 = vsel %vm1486_vm0, %v11265_v36, 0 }
 0x169   : > { %3477 = vmatpush.bf16.xpose.msra.mxu1 %v3459_v49  ;;  %v3945_v49 = vsel %vm1486_vm0, %v11254_v41, 0 }
 0x16a   : > { %3525 = vmatpush.bf16.xpose.msra.mxu2 %v3507_v50 }
 0x16b   : > { %3573 = vmatpush.bf16.xpose.msra.mxu3 %v3555_v51 }
 0x16c   : > { %v2663_v37 = vpop.f32.mrf.mxu0 }
 0x16d   : > { %v2711_v38 = vpop.f32.mrf.mxu1  ;;  %8404 = vst.msk [vmem:[%s11921_s22 + $0x30] sm:$0x3] %vm8379_vm1, %v2663_v37  ;;  %v11269_v37 = vld [vmem:[%s11669_s15 + $0x6e8] sm:$0xff] }
 0x16e   : > { %8405 = vst.msk [vmem:[%s11921_s22 + $0x32] sm:$0x3] %vm8379_vm1, %v2711_v38  ;;  %v4134_v41 = vsel %vm1486_vm0, %v11269_v37, 0 }
 0x16f   : > { %9293 = vmatmul.msk.bf16.vlgmr.msra.gmra.mxu0 %vm1486_vm0, %v210_v62 }
 0x170   : > { %3618 = vmatpush.bf16.xpose.msrb.mxu0 %v3612_v52  ;;  %9310 = vmatmul.msk.bf16.vlgmr.msra.gmra.mxu1 %vm1486_vm0, %v211_v63 }
 0x171   : > { %3666 = vmatpush.bf16.xpose.msrb.mxu1 %v3660_v53  ;;  %9327 = vmatmul.msk.bf16.vlgmr.msra.gmra.mxu2 %vm1486_vm0, %v212_v0  ;;  %v11240_v0 = vld [vmem:[%s11669_s15 + $0x600] sm:$0xff] }
 0x172   : > { %3714 = vmatpush.bf16.xpose.msrb.mxu2 %v3708_v54  ;;  %9344 = vmatmul.msk.bf16.vlgmr.msra.gmra.mxu3 %vm1486_vm0, %v213_v1  ;;  %v11241_v54 = vld [vmem:[%s11669_s15 + $0x608] sm:$0xff]  ;;  %v11244_v1 = vld [vmem:[%s11669_s15 + $0x620] sm:$0xff]  ;;  %v3795_v8 = vsel %vm1486_vm0, %v11240_v0, 0  ;;  %v11282_v0 = vld [vmem:[%s11669_s15 + $0x750] sm:$0xff] }
 0x173   : > { %3762 = vmatpush.bf16.xpose.msrb.mxu3 %v3756_v55  ;;  %v11245_v55 = vld [vmem:[%s11669_s15 + $0x628] sm:$0xff]  ;;  %v3798_v58 = vsel %vm1486_vm0, %v11241_v54, 0  ;;  %v3843_v9 = vsel %vm1486_vm0, %v11244_v1, 0  ;;  %v11286_v1 = vld [vmem:[%s11669_s15 + $0x770] sm:$0xff] }
 0x174   : > { %v2759_v50 = vpop.f32.mrf.mxu2  ;;  %v2665_v52 = vpop.f32.mrf.mxu0  ;;  %v3846_v59 = vsel %vm1486_vm0, %v11245_v55, 0 }
 0x175   : > { %v2807_v51 = vpop.f32.mrf.mxu3  ;;  %8406 = vst.msk [vmem:[%s11921_s22 + $0x34] sm:$0x3] %vm8379_vm1, %v2759_v50  ;;  %v2713_v53 = vpop.f32.mrf.mxu1  ;;  %v11283_v50 = vld [vmem:[%s11669_s15 + $0x758] sm:$0xff] }
 0x176   : > { %8407 = vst.msk [vmem:[%s11921_s22 + $0x36] sm:$0x3] %vm8379_vm1, %v2807_v51  ;;  %v11287_v51 = vld [vmem:[%s11669_s15 + $0x778] sm:$0xff] }
 0x178   : > { %3619 = vmatpush.bf16.xpose.msrb.mxu0 %v3609_v2  ;;  %v11248_v2 = vld [vmem:[%s11669_s15 + $0x640] sm:$0xff] }
 0x179   : > { %3667 = vmatpush.bf16.xpose.msrb.mxu1 %v3657_v3  ;;  %v11252_v3 = vld [vmem:[%s11669_s15 + $0x660] sm:$0xff]  ;;  %v3891_v10 = vsel %vm1486_vm0, %v11248_v2, 0  ;;  %v222_v2 = vld [vmem:[%s11715_s18 + $0x34] sm:$0x1] }
 0x17a   : > { %3715 = vmatpush.bf16.xpose.msrb.mxu2 %v3705_v4  ;;  %v11259_v4 = vld [vmem:[%s11669_s15 + $0x698] sm:$0xff]  ;;  %v3939_v11 = vsel %vm1486_vm0, %v11252_v3, 0  ;;  %v223_v3 = vld [vmem:[%s11715_s18 + $0x35] sm:$0x1] }
 0x17b   : > { %3763 = vmatpush.bf16.xpose.msrb.mxu3 %v3753_v5  ;;  %v11263_v5 = vld [vmem:[%s11669_s15 + $0x6b8] sm:$0xff]  ;;  %v3996_v12 = vsel %vm1486_vm0, %v11259_v4, 0  ;;  %v224_v4 = vld [vmem:[%s11715_s18 + $0x36] sm:$0x1] }
 0x17c   : > { %v2761_v62 = vpop.f32.mrf.mxu2  ;;  %v4044_v13 = vsel %vm1486_vm0, %v11263_v5, 0  ;;  %v225_v5 = vld [vmem:[%s11715_s18 + $0x37] sm:$0x1] }
 0x17d   : > { %v2809_v63 = vpop.f32.mrf.mxu3 }
 0x17e   : > { %v11278_v63 = vld [vmem:[%s11669_s15 + $0x730] sm:$0xff] }
 0x180   : > { %3620 = vmatpush.bf16.xpose.msrb.mxu0 %v3606_v14  ;;  %v4092_v14 = vsel %vm1486_vm0, %v11267_v6, 0 }
 0x181   : > { %3668 = vmatpush.bf16.xpose.msrb.mxu1 %v3654_v15  ;;  %v4140_v15 = vsel %vm1486_vm0, %v11271_v7, 0  ;;  %v4233_v7 = vsel %vm1486_vm0, %v11278_v63, 0 }
 0x182   : > { %3716 = vmatpush.bf16.xpose.msrb.mxu2 %v3702_v16  ;;  %v11258_v16 = vld [vmem:[%s11669_s15 + $0x690] sm:$0xff] }
 0x183   : > { %3764 = vmatpush.bf16.xpose.msrb.mxu3 %v3750_v17  ;;  %v3993_v26 = vsel %vm1486_vm0, %v11258_v16, 0  ;;  %v11281_v16 = vld [vmem:[%s11669_s15 + $0x748] sm:$0xff] }
 0x188   : > { %3621 = vmatpush.bf16.xpose.msrb.mxu0 %v3603_v28  ;;  %v4089_v28 = vsel %vm1486_vm0, %v11266_v20, 0  ;;  %v4278_v20 = vsel %vm1486_vm0, %v11281_v16, 0 }
 0x189   : > { %3669 = vmatpush.bf16.xpose.msrb.mxu1 %v3651_v29  ;;  %v4137_v29 = vsel %vm1486_vm0, %v11270_v21, 0 }
 0x18a   : > { %3717 = vmatpush.bf16.xpose.msrb.mxu2 %v3699_v30 }
 0x18b   : > { %3765 = vmatpush.bf16.xpose.msrb.mxu3 %v3747_v31 }
 0x18c   : > { %v2855_v17 = vpop.f32.mrf.mxu0 }
 0x18d   : > { %v2903_v18 = vpop.f32.mrf.mxu1  ;;  %8408 = vst.msk [vmem:[%s11921_s22 + $0x38] sm:$0x3] %vm8379_vm1, %v2855_v17  ;;  %v11285_v17 = vld [vmem:[%s11669_s15 + $0x768] sm:$0xff] }
 0x18e   : > { %8409 = vst.msk [vmem:[%s11921_s22 + $0x3a] sm:$0x3] %vm8379_vm1, %v2903_v18  ;;  %v4326_v21 = vsel %vm1486_vm0, %v11285_v17, 0 }
 0x18f   : > { %9361 = vmatmul.msk.bf16.vlgmr.msrb.gmra.mxu0 %vm1486_vm0, %v214_v42 }
 0x190   : > { %3810 = vmatpush.bf16.xpose.msra.mxu0 %v3804_v32  ;;  %9378 = vmatmul.msk.bf16.vlgmr.msrb.gmra.mxu1 %vm1486_vm0, %v215_v43 }
 0x191   : > { %3858 = vmatpush.bf16.xpose.msra.mxu1 %v3852_v33  ;;  %9395 = vmatmul.msk.bf16.vlgmr.msrb.gmra.mxu2 %vm1486_vm0, %v216_v44  ;;  %v11256_v44 = vld [vmem:[%s11669_s15 + $0x680] sm:$0xff] }
 0x192   : > { %3906 = vmatpush.bf16.xpose.msra.mxu2 %v3900_v34  ;;  %9412 = vmatmul.msk.bf16.vlgmr.msrb.gmra.mxu3 %vm1486_vm0, %v217_v45  ;;  %v11257_v34 = vld [vmem:[%s11669_s15 + $0x688] sm:$0xff]  ;;  %v11260_v45 = vld [vmem:[%s11669_s15 + $0x6a0] sm:$0xff]  ;;  %v3987_v52 = vsel %vm1486_vm0, %v11256_v44, 0  ;;  %v11298_v44 = vld [vmem:[%s11669_s15 + $0x7d0] sm:$0xff] }
 0x193   : > { %3954 = vmatpush.bf16.xpose.msra.mxu3 %v3948_v35  ;;  %v11261_v35 = vld [vmem:[%s11669_s15 + $0x6a8] sm:$0xff]  ;;  %v3990_v38 = vsel %vm1486_vm0, %v11257_v34, 0  ;;  %v4035_v53 = vsel %vm1486_vm0, %v11260_v45, 0  ;;  %v11302_v45 = vld [vmem:[%s11669_s15 + $0x7f0] sm:$0xff] }
 0x194   : > { %v2951_v30 = vpop.f32.mrf.mxu2  ;;  %v2857_v32 = vpop.f32.mrf.mxu0  ;;  %v4038_v39 = vsel %vm1486_vm0, %v11261_v35, 0 }
 0x195   : > { %v2999_v31 = vpop.f32.mrf.mxu3  ;;  %8410 = vst.msk [vmem:[%s11921_s22 + $0x3c] sm:$0x3] %vm8379_vm1, %v2951_v30  ;;  %v2905_v33 = vpop.f32.mrf.mxu1  ;;  %v11299_v30 = vld [vmem:[%s11669_s15 + $0x7d8] sm:$0xff] }
 0x196   : > { %8411 = vst.msk [vmem:[%s11921_s22 + $0x3e] sm:$0x3] %vm8379_vm1, %v2999_v31  ;;  %v11303_v31 = vld [vmem:[%s11669_s15 + $0x7f8] sm:$0xff] }
 0x198   : > { %3811 = vmatpush.bf16.xpose.msra.mxu0 %v3801_v46  ;;  %v11264_v46 = vld [vmem:[%s11669_s15 + $0x6c0] sm:$0xff] }
 0x199   : > { %3859 = vmatpush.bf16.xpose.msra.mxu1 %v3849_v47  ;;  %v11268_v47 = vld [vmem:[%s11669_s15 + $0x6e0] sm:$0xff]  ;;  %v4083_v54 = vsel %vm1486_vm0, %v11264_v46, 0  ;;  %v226_v46 = vld [vmem:[%s11715_s18 + $0x38] sm:$0x1] }
 0x19a   : > { %3907 = vmatpush.bf16.xpose.msra.mxu2 %v3897_v48  ;;  %v11275_v48 = vld [vmem:[%s11669_s15 + $0x718] sm:$0xff]  ;;  %v4131_v55 = vsel %vm1486_vm0, %v11268_v47, 0 }
 0x19b   : > { %3955 = vmatpush.bf16.xpose.msra.mxu3 %v3945_v49  ;;  %v11279_v49 = vld [vmem:[%s11669_s15 + $0x738] sm:$0xff]  ;;  %v4188_v56 = vsel %vm1486_vm0, %v11275_v48, 0 }
 0x19c   : > { %v2953_v42 = vpop.f32.mrf.mxu2  ;;  %v4236_v57 = vsel %vm1486_vm0, %v11279_v49, 0  ;;  %v227_v47 = vld [vmem:[%s11715_s18 + $0x39] sm:$0x1]  ;;  %v228_v48 = vld [vmem:[%s11715_s18 + $0x3a] sm:$0x1] }
 0x19d   : > { %v3001_v43 = vpop.f32.mrf.mxu3  ;;  %v229_v49 = vld [vmem:[%s11715_s18 + $0x3b] sm:$0x1] }
 0x19e   : > { %v11294_v43 = vld [vmem:[%s11669_s15 + $0x7b0] sm:$0xff] }
 0x1a0   : > { %3812 = vmatpush.bf16.xpose.msra.mxu0 %v3798_v58  ;;  %v4284_v58 = vsel %vm1486_vm0, %v11283_v50, 0 }
 0x1a1   : > { %3860 = vmatpush.bf16.xpose.msra.mxu1 %v3846_v59  ;;  %v4332_v59 = vsel %vm1486_vm0, %v11287_v51, 0  ;;  %v4425_v51 = vsel %vm1486_vm0, %v11294_v43, 0 }
 0x1a2   : > { %3908 = vmatpush.bf16.xpose.msra.mxu2 %v3894_v60  ;;  %v11274_v60 = vld [vmem:[%s11669_s15 + $0x710] sm:$0xff] }
 0x1a3   : > { %3956 = vmatpush.bf16.xpose.msra.mxu3 %v3942_v61  ;;  %v4185_v6 = vsel %vm1486_vm0, %v11274_v60, 0  ;;  %v11297_v60 = vld [vmem:[%s11669_s15 + $0x7c8] sm:$0xff] }
 0x1a8   : > { %3813 = vmatpush.bf16.xpose.msra.mxu0 %v3795_v8  ;;  %v4281_v8 = vsel %vm1486_vm0, %v11282_v0, 0  ;;  %v4470_v0 = vsel %vm1486_vm0, %v11297_v60, 0 }
 0x1a9   : > { %3861 = vmatpush.bf16.xpose.msra.mxu1 %v3843_v9  ;;  %v4329_v9 = vsel %vm1486_vm0, %v11286_v1, 0 }
 0x1aa   : > { %3909 = vmatpush.bf16.xpose.msra.mxu2 %v3891_v10 }
 0x1ab   : > { %3957 = vmatpush.bf16.xpose.msra.mxu3 %v3939_v11 }
 0x1ac   : > { %v3047_v61 = vpop.f32.mrf.mxu0 }
 0x1ad   : > { %v3095_v62 = vpop.f32.mrf.mxu1  ;;  %8412 = vst.msk [vmem:[%s11921_s22 + $0x40] sm:$0x3] %vm8379_vm1, %v3047_v61  ;;  %v11301_v61 = vld [vmem:[%s11669_s15 + $0x7e8] sm:$0xff] }
 0x1ae   : > { %8413 = vst.msk [vmem:[%s11921_s22 + $0x42] sm:$0x3] %vm8379_vm1, %v3095_v62  ;;  %v4518_v1 = vsel %vm1486_vm0, %v11301_v61, 0 }
 0x1af   : > { %9429 = vmatmul.msk.bf16.vlgmr.msra.gmra.mxu0 %vm1486_vm0, %v218_v22 }
 0x1b0   : > { %4002 = vmatpush.bf16.xpose.msrb.mxu0 %v3996_v12  ;;  %9446 = vmatmul.msk.bf16.vlgmr.msra.gmra.mxu1 %vm1486_vm0, %v219_v23 }
 0x1b1   : > { %4050 = vmatpush.bf16.xpose.msrb.mxu1 %v4044_v13  ;;  %9463 = vmatmul.msk.bf16.vlgmr.msra.gmra.mxu2 %vm1486_vm0, %v220_v24  ;;  %v11272_v24 = vld [vmem:[%s11669_s15 + $0x700] sm:$0xff] }
 0x1b2   : > { %4098 = vmatpush.bf16.xpose.msrb.mxu2 %v4092_v14  ;;  %9480 = vmatmul.msk.bf16.vlgmr.msra.gmra.mxu3 %vm1486_vm0, %v221_v25  ;;  %v11273_v14 = vld [vmem:[%s11669_s15 + $0x708] sm:$0xff]  ;;  %v11276_v25 = vld [vmem:[%s11669_s15 + $0x720] sm:$0xff]  ;;  %v4179_v32 = vsel %vm1486_vm0, %v11272_v24, 0  ;;  %v11314_v24 = vld [vmem:[%s11669_s15 + $0x850] sm:$0xff] }
 0x1b3   : > { %4146 = vmatpush.bf16.xpose.msrb.mxu3 %v4140_v15  ;;  %v11277_v15 = vld [vmem:[%s11669_s15 + $0x728] sm:$0xff]  ;;  %v4182_v18 = vsel %vm1486_vm0, %v11273_v14, 0  ;;  %v4227_v33 = vsel %vm1486_vm0, %v11276_v25, 0  ;;  %v11318_v25 = vld [vmem:[%s11669_s15 + $0x870] sm:$0xff] }
 0x1b4   : > { %v3143_v10 = vpop.f32.mrf.mxu2  ;;  %v3049_v12 = vpop.f32.mrf.mxu0  ;;  %v4230_v19 = vsel %vm1486_vm0, %v11277_v15, 0 }
 0x1b5   : > { %v3191_v11 = vpop.f32.mrf.mxu3  ;;  %8414 = vst.msk [vmem:[%s11921_s22 + $0x44] sm:$0x3] %vm8379_vm1, %v3143_v10  ;;  %v3097_v13 = vpop.f32.mrf.mxu1  ;;  %v11315_v10 = vld [vmem:[%s11669_s15 + $0x858] sm:$0xff] }
 0x1b6   : > { %8415 = vst.msk [vmem:[%s11921_s22 + $0x46] sm:$0x3] %vm8379_vm1, %v3191_v11  ;;  %v11319_v11 = vld [vmem:[%s11669_s15 + $0x878] sm:$0xff] }
 0x1b8   : > { %4003 = vmatpush.bf16.xpose.msrb.mxu0 %v3993_v26  ;;  %v11280_v26 = vld [vmem:[%s11669_s15 + $0x740] sm:$0xff] }
 0x1b9   : > { %4051 = vmatpush.bf16.xpose.msrb.mxu1 %v4041_v27  ;;  %v11284_v27 = vld [vmem:[%s11669_s15 + $0x760] sm:$0xff]  ;;  %v4275_v34 = vsel %vm1486_vm0, %v11280_v26, 0  ;;  %v230_v26 = vld [vmem:[%s11715_s18 + $0x3c] sm:$0x1] }
 0x1ba   : > { %4099 = vmatpush.bf16.xpose.msrb.mxu2 %v4089_v28  ;;  %v11291_v28 = vld [vmem:[%s11669_s15 + $0x798] sm:$0xff]  ;;  %v4323_v35 = vsel %vm1486_vm0, %v11284_v27, 0 }
 0x1bb   : > { %4147 = vmatpush.bf16.xpose.msrb.mxu3 %v4137_v29  ;;  %v11295_v29 = vld [vmem:[%s11669_s15 + $0x7b8] sm:$0xff]  ;;  %v4380_v36 = vsel %vm1486_vm0, %v11291_v28, 0 }
 0x1bc   : > { %v3145_v22 = vpop.f32.mrf.mxu2  ;;  %v4428_v37 = vsel %vm1486_vm0, %v11295_v29, 0  ;;  %v231_v27 = vld [vmem:[%s11715_s18 + $0x3d] sm:$0x1]  ;;  %v232_v28 = vld [vmem:[%s11715_s18 + $0x3e] sm:$0x1] }
 0x1bd   : > { %v3193_v23 = vpop.f32.mrf.mxu3  ;;  %v233_v29 = vld [vmem:[%s11715_s18 + $0x3f] sm:$0x1] }
 0x1be   : > { %v11310_v23 = vld [vmem:[%s11669_s15 + $0x830] sm:$0xff] }
 0x1c0   : > { %4004 = vmatpush.bf16.xpose.msrb.mxu0 %v3990_v38  ;;  %v4476_v38 = vsel %vm1486_vm0, %v11299_v30, 0 }
 0x1c1   : > { %4052 = vmatpush.bf16.xpose.msrb.mxu1 %v4038_v39  ;;  %v4524_v39 = vsel %vm1486_vm0, %v11303_v31, 0  ;;  %v4617_v31 = vsel %vm1486_vm0, %v11310_v23, 0 }
 0x1c2   : > { %4100 = vmatpush.bf16.xpose.msrb.mxu2 %v4086_v40  ;;  %v11290_v40 = vld [vmem:[%s11669_s15 + $0x790] sm:$0xff] }
 0x1c3   : > { %4148 = vmatpush.bf16.xpose.msrb.mxu3 %v4134_v41  ;;  %v4377_v50 = vsel %vm1486_vm0, %v11290_v40, 0  ;;  %v11313_v40 = vld [vmem:[%s11669_s15 + $0x848] sm:$0xff] }
 0x1c8   : > { %4005 = vmatpush.bf16.xpose.msrb.mxu0 %v3987_v52  ;;  %v4473_v52 = vsel %vm1486_vm0, %v11298_v44, 0  ;;  %v4662_v44 = vsel %vm1486_vm0, %v11313_v40, 0 }
 0x1c9   : > { %4053 = vmatpush.bf16.xpose.msrb.mxu1 %v4035_v53  ;;  %v4521_v53 = vsel %vm1486_vm0, %v11302_v45, 0 }
 0x1ca   : > { %4101 = vmatpush.bf16.xpose.msrb.mxu2 %v4083_v54 }
 0x1cb   : > { %4149 = vmatpush.bf16.xpose.msrb.mxu3 %v4131_v55 }
 0x1cc   : > { %v3239_v41 = vpop.f32.mrf.mxu0 }
 0x1cd   : > { %v3287_v42 = vpop.f32.mrf.mxu1  ;;  %8416 = vst.msk [vmem:[%s11921_s22 + $0x48] sm:$0x3] %vm8379_vm1, %v3239_v41  ;;  %v11317_v41 = vld [vmem:[%s11669_s15 + $0x868] sm:$0xff] }
 0x1ce   : > { %8417 = vst.msk [vmem:[%s11921_s22 + $0x4a] sm:$0x3] %vm8379_vm1, %v3287_v42  ;;  %v4710_v45 = vsel %vm1486_vm0, %v11317_v41, 0 }
 0x1cf   : > { %9497 = vmatmul.msk.bf16.vlgmr.msrb.gmra.mxu0 %vm1486_vm0, %v222_v2 }
 0x1d0   : > { %4194 = vmatpush.bf16.xpose.msra.mxu0 %v4188_v56  ;;  %9514 = vmatmul.msk.bf16.vlgmr.msrb.gmra.mxu1 %vm1486_vm0, %v223_v3 }
 0x1d1   : > { %4242 = vmatpush.bf16.xpose.msra.mxu1 %v4236_v57  ;;  %9531 = vmatmul.msk.bf16.vlgmr.msrb.gmra.mxu2 %vm1486_vm0, %v224_v4  ;;  %v11288_v4 = vld [vmem:[%s11669_s15 + $0x780] sm:$0xff] }
 0x1d2   : > { %4290 = vmatpush.bf16.xpose.msra.mxu2 %v4284_v58  ;;  %9548 = vmatmul.msk.bf16.vlgmr.msrb.gmra.mxu3 %vm1486_vm0, %v225_v5  ;;  %v11289_v58 = vld [vmem:[%s11669_s15 + $0x788] sm:$0xff]  ;;  %v11292_v5 = vld [vmem:[%s11669_s15 + $0x7a0] sm:$0xff]  ;;  %v4371_v12 = vsel %vm1486_vm0, %v11288_v4, 0  ;;  %v11330_v4 = vld [vmem:[%s11669_s15 + $0x8d0] sm:$0xff] }
 0x1d3   : > { %4338 = vmatpush.bf16.xpose.msra.mxu3 %v4332_v59  ;;  %v11293_v59 = vld [vmem:[%s11669_s15 + $0x7a8] sm:$0xff]  ;;  %v4374_v62 = vsel %vm1486_vm0, %v11289_v58, 0  ;;  %v4419_v13 = vsel %vm1486_vm0, %v11292_v5, 0  ;;  %v11334_v5 = vld [vmem:[%s11669_s15 + $0x8f0] sm:$0xff] }
 0x1d4   : > { %v3335_v54 = vpop.f32.mrf.mxu2  ;;  %v3241_v56 = vpop.f32.mrf.mxu0  ;;  %v4422_v63 = vsel %vm1486_vm0, %v11293_v59, 0 }
 0x1d5   : > { %v3383_v55 = vpop.f32.mrf.mxu3  ;;  %8418 = vst.msk [vmem:[%s11921_s22 + $0x4c] sm:$0x3] %vm8379_vm1, %v3335_v54  ;;  %v3289_v57 = vpop.f32.mrf.mxu1  ;;  %v11331_v54 = vld [vmem:[%s11669_s15 + $0x8d8] sm:$0xff] }
 0x1d6   : > { %8419 = vst.msk [vmem:[%s11921_s22 + $0x4e] sm:$0x3] %vm8379_vm1, %v3383_v55  ;;  %v11335_v55 = vld [vmem:[%s11669_s15 + $0x8f8] sm:$0xff] }
 0x1d8   : > { %4195 = vmatpush.bf16.xpose.msra.mxu0 %v4185_v6  ;;  %v11296_v6 = vld [vmem:[%s11669_s15 + $0x7c0] sm:$0xff] }
 0x1d9   : > { %4243 = vmatpush.bf16.xpose.msra.mxu1 %v4233_v7  ;;  %v11300_v7 = vld [vmem:[%s11669_s15 + $0x7e0] sm:$0xff]  ;;  %v4467_v14 = vsel %vm1486_vm0, %v11296_v6, 0 }
 0x1da   : > { %4291 = vmatpush.bf16.xpose.msra.mxu2 %v4281_v8  ;;  %v11307_v8 = vld [vmem:[%s11669_s15 + $0x818] sm:$0xff]  ;;  %v4515_v15 = vsel %vm1486_vm0, %v11300_v7, 0  ;;  %v234_v6 = vld [vmem:[%s11715_s18 + $0x40] sm:$0x1]  ;;  %v235_v7 = vld [vmem:[%s11715_s18 + $0x41] sm:$0x1] }
 0x1db   : > { %4339 = vmatpush.bf16.xpose.msra.mxu3 %v4329_v9  ;;  %v11311_v9 = vld [vmem:[%s11669_s15 + $0x838] sm:$0xff]  ;;  %v4572_v16 = vsel %vm1486_vm0, %v11307_v8, 0  ;;  %v236_v8 = vld [vmem:[%s11715_s18 + $0x42] sm:$0x1] }
 0x1dc   : > { %v3337_v2 = vpop.f32.mrf.mxu2  ;;  %v4620_v17 = vsel %vm1486_vm0, %v11311_v9, 0  ;;  %v237_v9 = vld [vmem:[%s11715_s18 + $0x43] sm:$0x1] }
 0x1dd   : > { %v3385_v3 = vpop.f32.mrf.mxu3 }
 0x1de   : > { %v11326_v3 = vld [vmem:[%s11669_s15 + $0x8b0] sm:$0xff] }
 0x1e0   : > { %4196 = vmatpush.bf16.xpose.msra.mxu0 %v4182_v18  ;;  %v4668_v18 = vsel %vm1486_vm0, %v11315_v10, 0 }
 0x1e1   : > { %4244 = vmatpush.bf16.xpose.msra.mxu1 %v4230_v19  ;;  %v4716_v19 = vsel %vm1486_vm0, %v11319_v11, 0  ;;  %v4809_v11 = vsel %vm1486_vm0, %v11326_v3, 0 }
 0x1e2   : > { %4292 = vmatpush.bf16.xpose.msra.mxu2 %v4278_v20  ;;  %v11306_v20 = vld [vmem:[%s11669_s15 + $0x810] sm:$0xff] }
 0x1e3   : > { %4340 = vmatpush.bf16.xpose.msra.mxu3 %v4326_v21  ;;  %v4569_v30 = vsel %vm1486_vm0, %v11306_v20, 0  ;;  %v11329_v20 = vld [vmem:[%s11669_s15 + $0x8c8] sm:$0xff] }
 0x1e8   : > { %4197 = vmatpush.bf16.xpose.msra.mxu0 %v4179_v32  ;;  %v4665_v32 = vsel %vm1486_vm0, %v11314_v24, 0  ;;  %v4854_v24 = vsel %vm1486_vm0, %v11329_v20, 0 }
 0x1e9   : > { %4245 = vmatpush.bf16.xpose.msra.mxu1 %v4227_v33  ;;  %v4713_v33 = vsel %vm1486_vm0, %v11318_v25, 0 }
 0x1ea   : > { %4293 = vmatpush.bf16.xpose.msra.mxu2 %v4275_v34 }
 0x1eb   : > { %4341 = vmatpush.bf16.xpose.msra.mxu3 %v4323_v35 }
 0x1ec   : > { %v3431_v21 = vpop.f32.mrf.mxu0 }
 0x1ed   : > { %v3479_v22 = vpop.f32.mrf.mxu1  ;;  %8420 = vst.msk [vmem:[%s11921_s22 + $0x50] sm:$0x3] %vm8379_vm1, %v3431_v21  ;;  %v11333_v21 = vld [vmem:[%s11669_s15 + $0x8e8] sm:$0xff] }
 0x1ee   : > { %8421 = vst.msk [vmem:[%s11921_s22 + $0x52] sm:$0x3] %vm8379_vm1, %v3479_v22  ;;  %v4902_v25 = vsel %vm1486_vm0, %v11333_v21, 0 }
 0x1ef   : > { %9565 = vmatmul.msk.bf16.vlgmr.msra.gmra.mxu0 %vm1486_vm0, %v226_v46 }
 0x1f0   : > { %4386 = vmatpush.bf16.xpose.msrb.mxu0 %v4380_v36  ;;  %9582 = vmatmul.msk.bf16.vlgmr.msra.gmra.mxu1 %vm1486_vm0, %v227_v47 }
 0x1f1   : > { %4434 = vmatpush.bf16.xpose.msrb.mxu1 %v4428_v37  ;;  %9599 = vmatmul.msk.bf16.vlgmr.msra.gmra.mxu2 %vm1486_vm0, %v228_v48  ;;  %v11304_v48 = vld [vmem:[%s11669_s15 + $0x800] sm:$0xff] }
 0x1f2   : > { %4482 = vmatpush.bf16.xpose.msrb.mxu2 %v4476_v38  ;;  %9616 = vmatmul.msk.bf16.vlgmr.msra.gmra.mxu3 %vm1486_vm0, %v229_v49  ;;  %v11305_v38 = vld [vmem:[%s11669_s15 + $0x808] sm:$0xff]  ;;  %v11308_v49 = vld [vmem:[%s11669_s15 + $0x820] sm:$0xff]  ;;  %v4563_v56 = vsel %vm1486_vm0, %v11304_v48, 0  ;;  %v11346_v48 = vld [vmem:[%s11669_s15 + $0x950] sm:$0xff] }
 0x1f3   : > { %4530 = vmatpush.bf16.xpose.msrb.mxu3 %v4524_v39  ;;  %v11309_v39 = vld [vmem:[%s11669_s15 + $0x828] sm:$0xff]  ;;  %v4566_v42 = vsel %vm1486_vm0, %v11305_v38, 0  ;;  %v4611_v57 = vsel %vm1486_vm0, %v11308_v49, 0  ;;  %v11350_v49 = vld [vmem:[%s11669_s15 + $0x970] sm:$0xff] }
 0x1f4   : > { %v3527_v34 = vpop.f32.mrf.mxu2  ;;  %v3433_v36 = vpop.f32.mrf.mxu0  ;;  %v4614_v43 = vsel %vm1486_vm0, %v11309_v39, 0 }
 0x1f5   : > { %v3575_v35 = vpop.f32.mrf.mxu3  ;;  %8422 = vst.msk [vmem:[%s11921_s22 + $0x54] sm:$0x3] %vm8379_vm1, %v3527_v34  ;;  %v3481_v37 = vpop.f32.mrf.mxu1  ;;  %v11347_v34 = vld [vmem:[%s11669_s15 + $0x958] sm:$0xff] }
 0x1f6   : > { %8423 = vst.msk [vmem:[%s11921_s22 + $0x56] sm:$0x3] %vm8379_vm1, %v3575_v35  ;;  %v11351_v35 = vld [vmem:[%s11669_s15 + $0x978] sm:$0xff] }
 0x1f8   : > { %4387 = vmatpush.bf16.xpose.msrb.mxu0 %v4377_v50  ;;  %v11312_v50 = vld [vmem:[%s11669_s15 + $0x840] sm:$0xff] }
 0x1f9   : > { %4435 = vmatpush.bf16.xpose.msrb.mxu1 %v4425_v51  ;;  %v11316_v51 = vld [vmem:[%s11669_s15 + $0x860] sm:$0xff]  ;;  %v4659_v58 = vsel %vm1486_vm0, %v11312_v50, 0 }
 0x1fa   : > { %4483 = vmatpush.bf16.xpose.msrb.mxu2 %v4473_v52  ;;  %v11323_v52 = vld [vmem:[%s11669_s15 + $0x898] sm:$0xff]  ;;  %v4707_v59 = vsel %vm1486_vm0, %v11316_v51, 0  ;;  %v238_v50 = vld [vmem:[%s11715_s18 + $0x44] sm:$0x1]  ;;  %v239_v51 = vld [vmem:[%s11715_s18 + $0x45] sm:$0x1] }
 0x1fb   : > { %4531 = vmatpush.bf16.xpose.msrb.mxu3 %v4521_v53  ;;  %v11327_v53 = vld [vmem:[%s11669_s15 + $0x8b8] sm:$0xff]  ;;  %v4764_v60 = vsel %vm1486_vm0, %v11323_v52, 0  ;;  %v240_v52 = vld [vmem:[%s11715_s18 + $0x46] sm:$0x1] }
 0x1fc   : > { %v3529_v46 = vpop.f32.mrf.mxu2  ;;  %v4812_v61 = vsel %vm1486_vm0, %v11327_v53, 0  ;;  %v241_v53 = vld [vmem:[%s11715_s18 + $0x47] sm:$0x1] }
 0x1fd   : > { %v3577_v47 = vpop.f32.mrf.mxu3 }
 0x1fe   : > { %v11342_v47 = vld [vmem:[%s11669_s15 + $0x930] sm:$0xff] }
 0x200   : > { %4388 = vmatpush.bf16.xpose.msrb.mxu0 %v4374_v62  ;;  %v4860_v62 = vsel %vm1486_vm0, %v11331_v54, 0 }
 0x201   : > { %4436 = vmatpush.bf16.xpose.msrb.mxu1 %v4422_v63  ;;  %v4908_v63 = vsel %vm1486_vm0, %v11335_v55, 0  ;;  %v5001_v55 = vsel %vm1486_vm0, %v11342_v47, 0 }
 0x202   : > { %4484 = vmatpush.bf16.xpose.msrb.mxu2 %v4470_v0  ;;  %v11322_v0 = vld [vmem:[%s11669_s15 + $0x890] sm:$0xff] }
 0x203   : > { %4532 = vmatpush.bf16.xpose.msrb.mxu3 %v4518_v1  ;;  %v4761_v10 = vsel %vm1486_vm0, %v11322_v0, 0  ;;  %v11345_v0 = vld [vmem:[%s11669_s15 + $0x948] sm:$0xff] }
 0x208   : > { %4389 = vmatpush.bf16.xpose.msrb.mxu0 %v4371_v12  ;;  %v4857_v12 = vsel %vm1486_vm0, %v11330_v4, 0  ;;  %v5046_v4 = vsel %vm1486_vm0, %v11345_v0, 0 }
 0x209   : > { %4437 = vmatpush.bf16.xpose.msrb.mxu1 %v4419_v13  ;;  %v4905_v13 = vsel %vm1486_vm0, %v11334_v5, 0 }
 0x20a   : > { %4485 = vmatpush.bf16.xpose.msrb.mxu2 %v4467_v14 }
 0x20b   : > { %4533 = vmatpush.bf16.xpose.msrb.mxu3 %v4515_v15 }
 0x20c   : > { %v3623_v1 = vpop.f32.mrf.mxu0 }
 0x20d   : > { %v3671_v2 = vpop.f32.mrf.mxu1  ;;  %8424 = vst.msk [vmem:[%s11921_s22 + $0x58] sm:$0x3] %vm8379_vm1, %v3623_v1  ;;  %v11349_v1 = vld [vmem:[%s11669_s15 + $0x968] sm:$0xff] }
 0x20e   : > { %8425 = vst.msk [vmem:[%s11921_s22 + $0x5a] sm:$0x3] %vm8379_vm1, %v3671_v2  ;;  %v5094_v5 = vsel %vm1486_vm0, %v11349_v1, 0 }
 0x20f   : > { %9633 = vmatmul.msk.bf16.vlgmr.msrb.gmra.mxu0 %vm1486_vm0, %v230_v26 }
 0x210   : > { %4578 = vmatpush.bf16.xpose.msra.mxu0 %v4572_v16  ;;  %9650 = vmatmul.msk.bf16.vlgmr.msrb.gmra.mxu1 %vm1486_vm0, %v231_v27 }
 0x211   : > { %4626 = vmatpush.bf16.xpose.msra.mxu1 %v4620_v17  ;;  %9667 = vmatmul.msk.bf16.vlgmr.msrb.gmra.mxu2 %vm1486_vm0, %v232_v28  ;;  %v11320_v28 = vld [vmem:[%s11669_s15 + $0x880] sm:$0xff] }
 0x212   : > { %4674 = vmatpush.bf16.xpose.msra.mxu2 %v4668_v18  ;;  %9684 = vmatmul.msk.bf16.vlgmr.msrb.gmra.mxu3 %vm1486_vm0, %v233_v29  ;;  %v11321_v18 = vld [vmem:[%s11669_s15 + $0x888] sm:$0xff]  ;;  %v11324_v29 = vld [vmem:[%s11669_s15 + $0x8a0] sm:$0xff]  ;;  %v4755_v36 = vsel %vm1486_vm0, %v11320_v28, 0  ;;  %v11362_v28 = vld [vmem:[%s11669_s15 + $0x9d0] sm:$0xff] }
 0x213   : > { %4722 = vmatpush.bf16.xpose.msra.mxu3 %v4716_v19  ;;  %v11325_v19 = vld [vmem:[%s11669_s15 + $0x8a8] sm:$0xff]  ;;  %v4758_v22 = vsel %vm1486_vm0, %v11321_v18, 0  ;;  %v4803_v37 = vsel %vm1486_vm0, %v11324_v29, 0  ;;  %v11366_v29 = vld [vmem:[%s11669_s15 + $0x9f0] sm:$0xff] }
 0x214   : > { %v3719_v14 = vpop.f32.mrf.mxu2  ;;  %v3625_v16 = vpop.f32.mrf.mxu0  ;;  %v4806_v23 = vsel %vm1486_vm0, %v11325_v19, 0 }
 0x215   : > { %v3767_v15 = vpop.f32.mrf.mxu3  ;;  %8426 = vst.msk [vmem:[%s11921_s22 + $0x5c] sm:$0x3] %vm8379_vm1, %v3719_v14  ;;  %v3673_v17 = vpop.f32.mrf.mxu1  ;;  %v11363_v14 = vld [vmem:[%s11669_s15 + $0x9d8] sm:$0xff] }
 0x216   : > { %8427 = vst.msk [vmem:[%s11921_s22 + $0x5e] sm:$0x3] %vm8379_vm1, %v3767_v15  ;;  %v11367_v15 = vld [vmem:[%s11669_s15 + $0x9f8] sm:$0xff] }
 0x218   : > { %4579 = vmatpush.bf16.xpose.msra.mxu0 %v4569_v30  ;;  %v11328_v30 = vld [vmem:[%s11669_s15 + $0x8c0] sm:$0xff] }
 0x219   : > { %4627 = vmatpush.bf16.xpose.msra.mxu1 %v4617_v31  ;;  %v11332_v31 = vld [vmem:[%s11669_s15 + $0x8e0] sm:$0xff]  ;;  %v4851_v38 = vsel %vm1486_vm0, %v11328_v30, 0  ;;  %v242_v30 = vld [vmem:[%s11715_s18 + $0x48] sm:$0x1] }
 0x21a   : > { %4675 = vmatpush.bf16.xpose.msra.mxu2 %v4665_v32  ;;  %v11339_v32 = vld [vmem:[%s11669_s15 + $0x918] sm:$0xff]  ;;  %v4899_v39 = vsel %vm1486_vm0, %v11332_v31, 0  ;;  %v243_v31 = vld [vmem:[%s11715_s18 + $0x49] sm:$0x1] }
 0x21b   : > { %4723 = vmatpush.bf16.xpose.msra.mxu3 %v4713_v33  ;;  %v11343_v33 = vld [vmem:[%s11669_s15 + $0x938] sm:$0xff]  ;;  %v4956_v40 = vsel %vm1486_vm0, %v11339_v32, 0  ;;  %v244_v32 = vld [vmem:[%s11715_s18 + $0x4a] sm:$0x1] }
 0x21c   : > { %v3721_v26 = vpop.f32.mrf.mxu2  ;;  %v5004_v41 = vsel %vm1486_vm0, %v11343_v33, 0  ;;  %v245_v33 = vld [vmem:[%s11715_s18 + $0x4b] sm:$0x1] }
 0x21d   : > { %v3769_v27 = vpop.f32.mrf.mxu3 }
 0x21e   : > { %v11358_v27 = vld [vmem:[%s11669_s15 + $0x9b0] sm:$0xff] }
 0x220   : > { %4580 = vmatpush.bf16.xpose.msra.mxu0 %v4566_v42  ;;  %v5052_v42 = vsel %vm1486_vm0, %v11347_v34, 0 }
 0x221   : > { %4628 = vmatpush.bf16.xpose.msra.mxu1 %v4614_v43  ;;  %v5100_v43 = vsel %vm1486_vm0, %v11351_v35, 0  ;;  %v5193_v35 = vsel %vm1486_vm0, %v11358_v27, 0 }
 0x222   : > { %4676 = vmatpush.bf16.xpose.msra.mxu2 %v4662_v44  ;;  %v11338_v44 = vld [vmem:[%s11669_s15 + $0x910] sm:$0xff] }
 0x223   : > { %4724 = vmatpush.bf16.xpose.msra.mxu3 %v4710_v45  ;;  %v4953_v54 = vsel %vm1486_vm0, %v11338_v44, 0  ;;  %v11361_v44 = vld [vmem:[%s11669_s15 + $0x9c8] sm:$0xff] }
 0x228   : > { %4581 = vmatpush.bf16.xpose.msra.mxu0 %v4563_v56  ;;  %v5049_v56 = vsel %vm1486_vm0, %v11346_v48, 0  ;;  %v5238_v48 = vsel %vm1486_vm0, %v11361_v44, 0 }
 0x229   : > { %4629 = vmatpush.bf16.xpose.msra.mxu1 %v4611_v57  ;;  %v5097_v57 = vsel %vm1486_vm0, %v11350_v49, 0 }
 0x22a   : > { %4677 = vmatpush.bf16.xpose.msra.mxu2 %v4659_v58 }
 0x22b   : > { %4725 = vmatpush.bf16.xpose.msra.mxu3 %v4707_v59 }
 0x22c   : > { %v3815_v45 = vpop.f32.mrf.mxu0 }
 0x22d   : > { %v3863_v46 = vpop.f32.mrf.mxu1  ;;  %8428 = vst.msk [vmem:[%s11921_s22 + $0x60] sm:$0x3] %vm8379_vm1, %v3815_v45  ;;  %v11365_v45 = vld [vmem:[%s11669_s15 + $0x9e8] sm:$0xff] }
 0x22e   : > { %8429 = vst.msk [vmem:[%s11921_s22 + $0x62] sm:$0x3] %vm8379_vm1, %v3863_v46  ;;  %v5286_v49 = vsel %vm1486_vm0, %v11365_v45, 0 }
 0x22f   : > { %9701 = vmatmul.msk.bf16.vlgmr.msra.gmra.mxu0 %vm1486_vm0, %v234_v6 }
 0x230   : > { %4770 = vmatpush.bf16.xpose.msrb.mxu0 %v4764_v60  ;;  %9718 = vmatmul.msk.bf16.vlgmr.msra.gmra.mxu1 %vm1486_vm0, %v235_v7 }
 0x231   : > { %4818 = vmatpush.bf16.xpose.msrb.mxu1 %v4812_v61  ;;  %9735 = vmatmul.msk.bf16.vlgmr.msra.gmra.mxu2 %vm1486_vm0, %v236_v8  ;;  %v11336_v8 = vld [vmem:[%s11669_s15 + $0x900] sm:$0xff] }
 0x232   : > { %4866 = vmatpush.bf16.xpose.msrb.mxu2 %v4860_v62  ;;  %9752 = vmatmul.msk.bf16.vlgmr.msra.gmra.mxu3 %vm1486_vm0, %v237_v9  ;;  %v11337_v62 = vld [vmem:[%s11669_s15 + $0x908] sm:$0xff]  ;;  %v11340_v9 = vld [vmem:[%s11669_s15 + $0x920] sm:$0xff]  ;;  %v4947_v16 = vsel %vm1486_vm0, %v11336_v8, 0  ;;  %v11378_v8 = vld [vmem:[%s11669_s15 + $0xa50] sm:$0xff] }
 0x233   : > { %4914 = vmatpush.bf16.xpose.msrb.mxu3 %v4908_v63  ;;  %v11341_v63 = vld [vmem:[%s11669_s15 + $0x928] sm:$0xff]  ;;  %v4950_v2 = vsel %vm1486_vm0, %v11337_v62, 0  ;;  %v4995_v17 = vsel %vm1486_vm0, %v11340_v9, 0  ;;  %v11382_v9 = vld [vmem:[%s11669_s15 + $0xa70] sm:$0xff] }
 0x234   : > { %v3911_v58 = vpop.f32.mrf.mxu2  ;;  %v3817_v60 = vpop.f32.mrf.mxu0  ;;  %v4998_v3 = vsel %vm1486_vm0, %v11341_v63, 0 }
 0x235   : > { %v3959_v59 = vpop.f32.mrf.mxu3  ;;  %8430 = vst.msk [vmem:[%s11921_s22 + $0x64] sm:$0x3] %vm8379_vm1, %v3911_v58  ;;  %v3865_v61 = vpop.f32.mrf.mxu1  ;;  %v11379_v58 = vld [vmem:[%s11669_s15 + $0xa58] sm:$0xff] }
 0x236   : > { %8431 = vst.msk [vmem:[%s11921_s22 + $0x66] sm:$0x3] %vm8379_vm1, %v3959_v59  ;;  %v11383_v59 = vld [vmem:[%s11669_s15 + $0xa78] sm:$0xff] }
 0x238   : > { %4771 = vmatpush.bf16.xpose.msrb.mxu0 %v4761_v10  ;;  %v11344_v10 = vld [vmem:[%s11669_s15 + $0x940] sm:$0xff] }
 0x239   : > { %4819 = vmatpush.bf16.xpose.msrb.mxu1 %v4809_v11  ;;  %v11348_v11 = vld [vmem:[%s11669_s15 + $0x960] sm:$0xff]  ;;  %v5043_v18 = vsel %vm1486_vm0, %v11344_v10, 0  ;;  %v246_v10 = vld [vmem:[%s11715_s18 + $0x4c] sm:$0x1] }
 0x23a   : > { %4867 = vmatpush.bf16.xpose.msrb.mxu2 %v4857_v12  ;;  %v11355_v12 = vld [vmem:[%s11669_s15 + $0x998] sm:$0xff]  ;;  %v5091_v19 = vsel %vm1486_vm0, %v11348_v11, 0  ;;  %v247_v11 = vld [vmem:[%s11715_s18 + $0x4d] sm:$0x1] }
 0x23b   : > { %4915 = vmatpush.bf16.xpose.msrb.mxu3 %v4905_v13  ;;  %v11359_v13 = vld [vmem:[%s11669_s15 + $0x9b8] sm:$0xff]  ;;  %v5148_v20 = vsel %vm1486_vm0, %v11355_v12, 0  ;;  %v248_v12 = vld [vmem:[%s11715_s18 + $0x4e] sm:$0x1] }
 0x23c   : > { %v3913_v6 = vpop.f32.mrf.mxu2  ;;  %v5196_v21 = vsel %vm1486_vm0, %v11359_v13, 0  ;;  %v249_v13 = vld [vmem:[%s11715_s18 + $0x4f] sm:$0x1] }
 0x23d   : > { %v3961_v7 = vpop.f32.mrf.mxu3 }
 0x23e   : > { %v11374_v7 = vld [vmem:[%s11669_s15 + $0xa30] sm:$0xff] }
 0x240   : > { %4772 = vmatpush.bf16.xpose.msrb.mxu0 %v4758_v22  ;;  %v5244_v22 = vsel %vm1486_vm0, %v11363_v14, 0 }
 0x241   : > { %4820 = vmatpush.bf16.xpose.msrb.mxu1 %v4806_v23  ;;  %v5292_v23 = vsel %vm1486_vm0, %v11367_v15, 0  ;;  %v5385_v15 = vsel %vm1486_vm0, %v11374_v7, 0 }
 0x242   : > { %4868 = vmatpush.bf16.xpose.msrb.mxu2 %v4854_v24  ;;  %v11354_v24 = vld [vmem:[%s11669_s15 + $0x990] sm:$0xff] }
 0x243   : > { %4916 = vmatpush.bf16.xpose.msrb.mxu3 %v4902_v25  ;;  %v5145_v34 = vsel %vm1486_vm0, %v11354_v24, 0  ;;  %v11377_v24 = vld [vmem:[%s11669_s15 + $0xa48] sm:$0xff] }
 0x248   : > { %4773 = vmatpush.bf16.xpose.msrb.mxu0 %v4755_v36  ;;  %v5241_v36 = vsel %vm1486_vm0, %v11362_v28, 0  ;;  %v5430_v28 = vsel %vm1486_vm0, %v11377_v24, 0 }
 0x249   : > { %4821 = vmatpush.bf16.xpose.msrb.mxu1 %v4803_v37  ;;  %v5289_v37 = vsel %vm1486_vm0, %v11366_v29, 0 }
 0x24a   : > { %4869 = vmatpush.bf16.xpose.msrb.mxu2 %v4851_v38 }
 0x24b   : > { %4917 = vmatpush.bf16.xpose.msrb.mxu3 %v4899_v39 }
 0x24c   : > { %v4007_v25 = vpop.f32.mrf.mxu0 }
 0x24d   : > { %v4055_v26 = vpop.f32.mrf.mxu1  ;;  %8432 = vst.msk [vmem:[%s11921_s22 + $0x68] sm:$0x3] %vm8379_vm1, %v4007_v25  ;;  %v11381_v25 = vld [vmem:[%s11669_s15 + $0xa68] sm:$0xff] }
 0x24e   : > { %8433 = vst.msk [vmem:[%s11921_s22 + $0x6a] sm:$0x3] %vm8379_vm1, %v4055_v26  ;;  %v5478_v29 = vsel %vm1486_vm0, %v11381_v25, 0 }
 0x24f   : > { %9769 = vmatmul.msk.bf16.vlgmr.msrb.gmra.mxu0 %vm1486_vm0, %v238_v50 }
 0x250   : > { %4962 = vmatpush.bf16.xpose.msra.mxu0 %v4956_v40  ;;  %9786 = vmatmul.msk.bf16.vlgmr.msrb.gmra.mxu1 %vm1486_vm0, %v239_v51 }
 0x251   : > { %5010 = vmatpush.bf16.xpose.msra.mxu1 %v5004_v41  ;;  %9803 = vmatmul.msk.bf16.vlgmr.msrb.gmra.mxu2 %vm1486_vm0, %v240_v52  ;;  %v11352_v52 = vld [vmem:[%s11669_s15 + $0x980] sm:$0xff] }
 0x252   : > { %5058 = vmatpush.bf16.xpose.msra.mxu2 %v5052_v42  ;;  %9820 = vmatmul.msk.bf16.vlgmr.msrb.gmra.mxu3 %vm1486_vm0, %v241_v53  ;;  %v11353_v42 = vld [vmem:[%s11669_s15 + $0x988] sm:$0xff]  ;;  %v11356_v53 = vld [vmem:[%s11669_s15 + $0x9a0] sm:$0xff]  ;;  %v5139_v60 = vsel %vm1486_vm0, %v11352_v52, 0  ;;  %v11394_v52 = vld [vmem:[%s11669_s15 + $0xad0] sm:$0xff] }
 0x253   : > { %5106 = vmatpush.bf16.xpose.msra.mxu3 %v5100_v43  ;;  %v11357_v43 = vld [vmem:[%s11669_s15 + $0x9a8] sm:$0xff]  ;;  %v5142_v46 = vsel %vm1486_vm0, %v11353_v42, 0  ;;  %v5187_v61 = vsel %vm1486_vm0, %v11356_v53, 0  ;;  %v11398_v53 = vld [vmem:[%s11669_s15 + $0xaf0] sm:$0xff] }
 0x254   : > { %v4103_v38 = vpop.f32.mrf.mxu2  ;;  %v4009_v40 = vpop.f32.mrf.mxu0  ;;  %v5190_v47 = vsel %vm1486_vm0, %v11357_v43, 0 }
 0x255   : > { %v4151_v39 = vpop.f32.mrf.mxu3  ;;  %8434 = vst.msk [vmem:[%s11921_s22 + $0x6c] sm:$0x3] %vm8379_vm1, %v4103_v38  ;;  %v4057_v41 = vpop.f32.mrf.mxu1  ;;  %v11395_v38 = vld [vmem:[%s11669_s15 + $0xad8] sm:$0xff] }
 0x256   : > { %8435 = vst.msk [vmem:[%s11921_s22 + $0x6e] sm:$0x3] %vm8379_vm1, %v4151_v39  ;;  %v11399_v39 = vld [vmem:[%s11669_s15 + $0xaf8] sm:$0xff] }
 0x258   : > { %4963 = vmatpush.bf16.xpose.msra.mxu0 %v4953_v54  ;;  %v11360_v54 = vld [vmem:[%s11669_s15 + $0x9c0] sm:$0xff] }
 0x259   : > { %5011 = vmatpush.bf16.xpose.msra.mxu1 %v5001_v55  ;;  %v11364_v55 = vld [vmem:[%s11669_s15 + $0x9e0] sm:$0xff]  ;;  %v5235_v62 = vsel %vm1486_vm0, %v11360_v54, 0  ;;  %v250_v54 = vld [vmem:[%s11715_s18 + $0x50] sm:$0x1] }
 0x25a   : > { %5059 = vmatpush.bf16.xpose.msra.mxu2 %v5049_v56  ;;  %v11371_v56 = vld [vmem:[%s11669_s15 + $0xa18] sm:$0xff]  ;;  %v5283_v63 = vsel %vm1486_vm0, %v11364_v55, 0  ;;  %v251_v55 = vld [vmem:[%s11715_s18 + $0x51] sm:$0x1] }
 0x25b   : > { %5107 = vmatpush.bf16.xpose.msra.mxu3 %v5097_v57  ;;  %v11375_v57 = vld [vmem:[%s11669_s15 + $0xa38] sm:$0xff]  ;;  %v5340_v0 = vsel %vm1486_vm0, %v11371_v56, 0  ;;  %v252_v56 = vld [vmem:[%s11715_s18 + $0x52] sm:$0x1] }
 0x25c   : > { %v4105_v50 = vpop.f32.mrf.mxu2  ;;  %v5388_v1 = vsel %vm1486_vm0, %v11375_v57, 0  ;;  %v253_v57 = vld [vmem:[%s11715_s18 + $0x53] sm:$0x1] }
 0x25d   : > { %v4153_v51 = vpop.f32.mrf.mxu3 }
 0x25e   : > { %v11390_v51 = vld [vmem:[%s11669_s15 + $0xab0] sm:$0xff] }
 0x260   : > { %4964 = vmatpush.bf16.xpose.msra.mxu0 %v4950_v2  ;;  %v5436_v2 = vsel %vm1486_vm0, %v11379_v58, 0 }
 0x261   : > { %5012 = vmatpush.bf16.xpose.msra.mxu1 %v4998_v3  ;;  %v5484_v3 = vsel %vm1486_vm0, %v11383_v59, 0  ;;  %v5577_v59 = vsel %vm1486_vm0, %v11390_v51, 0 }
 0x262   : > { %5060 = vmatpush.bf16.xpose.msra.mxu2 %v5046_v4  ;;  %v11370_v4 = vld [vmem:[%s11669_s15 + $0xa10] sm:$0xff] }
 0x263   : > { %5108 = vmatpush.bf16.xpose.msra.mxu3 %v5094_v5  ;;  %v5337_v14 = vsel %vm1486_vm0, %v11370_v4, 0  ;;  %v11393_v4 = vld [vmem:[%s11669_s15 + $0xac8] sm:$0xff] }
 0x268   : > { %4965 = vmatpush.bf16.xpose.msra.mxu0 %v4947_v16  ;;  %v5433_v16 = vsel %vm1486_vm0, %v11378_v8, 0  ;;  %v5622_v8 = vsel %vm1486_vm0, %v11393_v4, 0 }
 0x269   : > { %5013 = vmatpush.bf16.xpose.msra.mxu1 %v4995_v17  ;;  %v5481_v17 = vsel %vm1486_vm0, %v11382_v9, 0 }
 0x26a   : > { %5061 = vmatpush.bf16.xpose.msra.mxu2 %v5043_v18 }
 0x26b   : > { %5109 = vmatpush.bf16.xpose.msra.mxu3 %v5091_v19 }
 0x26c   : > { %v4199_v5 = vpop.f32.mrf.mxu0 }
 0x26d   : > { %v4247_v6 = vpop.f32.mrf.mxu1  ;;  %8436 = vst.msk [vmem:[%s11921_s22 + $0x70] sm:$0x3] %vm8379_vm1, %v4199_v5  ;;  %v11397_v5 = vld [vmem:[%s11669_s15 + $0xae8] sm:$0xff] }
 0x26e   : > { %8437 = vst.msk [vmem:[%s11921_s22 + $0x72] sm:$0x3] %vm8379_vm1, %v4247_v6  ;;  %v5670_v9 = vsel %vm1486_vm0, %v11397_v5, 0 }
 0x26f   : > { %9837 = vmatmul.msk.bf16.vlgmr.msra.gmra.mxu0 %vm1486_vm0, %v242_v30 }
 0x270   : > { %5154 = vmatpush.bf16.xpose.msrb.mxu0 %v5148_v20  ;;  %9854 = vmatmul.msk.bf16.vlgmr.msra.gmra.mxu1 %vm1486_vm0, %v243_v31 }
 0x271   : > { %5202 = vmatpush.bf16.xpose.msrb.mxu1 %v5196_v21  ;;  %9871 = vmatmul.msk.bf16.vlgmr.msra.gmra.mxu2 %vm1486_vm0, %v244_v32  ;;  %v11368_v32 = vld [vmem:[%s11669_s15 + $0xa00] sm:$0xff] }
 0x272   : > { %5250 = vmatpush.bf16.xpose.msrb.mxu2 %v5244_v22  ;;  %9888 = vmatmul.msk.bf16.vlgmr.msra.gmra.mxu3 %vm1486_vm0, %v245_v33  ;;  %v11369_v22 = vld [vmem:[%s11669_s15 + $0xa08] sm:$0xff]  ;;  %v11372_v33 = vld [vmem:[%s11669_s15 + $0xa20] sm:$0xff]  ;;  %v5331_v40 = vsel %vm1486_vm0, %v11368_v32, 0  ;;  %v11410_v32 = vld [vmem:[%s11669_s15 + $0xb50] sm:$0xff] }
 0x273   : > { %5298 = vmatpush.bf16.xpose.msrb.mxu3 %v5292_v23  ;;  %v11373_v23 = vld [vmem:[%s11669_s15 + $0xa28] sm:$0xff]  ;;  %v5334_v26 = vsel %vm1486_vm0, %v11369_v22, 0  ;;  %v5379_v41 = vsel %vm1486_vm0, %v11372_v33, 0  ;;  %v11414_v33 = vld [vmem:[%s11669_s15 + $0xb70] sm:$0xff] }
 0x274   : > { %v4295_v18 = vpop.f32.mrf.mxu2  ;;  %v4201_v20 = vpop.f32.mrf.mxu0  ;;  %v5382_v27 = vsel %vm1486_vm0, %v11373_v23, 0 }
 0x275   : > { %v4343_v19 = vpop.f32.mrf.mxu3  ;;  %8438 = vst.msk [vmem:[%s11921_s22 + $0x74] sm:$0x3] %vm8379_vm1, %v4295_v18  ;;  %v4249_v21 = vpop.f32.mrf.mxu1  ;;  %v11411_v18 = vld [vmem:[%s11669_s15 + $0xb58] sm:$0xff] }
 0x276   : > { %8439 = vst.msk [vmem:[%s11921_s22 + $0x76] sm:$0x3] %vm8379_vm1, %v4343_v19  ;;  %v11415_v19 = vld [vmem:[%s11669_s15 + $0xb78] sm:$0xff] }
 0x278   : > { %5155 = vmatpush.bf16.xpose.msrb.mxu0 %v5145_v34  ;;  %v11376_v34 = vld [vmem:[%s11669_s15 + $0xa40] sm:$0xff] }
 0x279   : > { %5203 = vmatpush.bf16.xpose.msrb.mxu1 %v5193_v35  ;;  %v11380_v35 = vld [vmem:[%s11669_s15 + $0xa60] sm:$0xff]  ;;  %v5427_v42 = vsel %vm1486_vm0, %v11376_v34, 0  ;;  %v254_v34 = vld [vmem:[%s11715_s18 + $0x54] sm:$0x1] }
 0x27a   : > { %5251 = vmatpush.bf16.xpose.msrb.mxu2 %v5241_v36  ;;  %v11387_v36 = vld [vmem:[%s11669_s15 + $0xa98] sm:$0xff]  ;;  %v5475_v43 = vsel %vm1486_vm0, %v11380_v35, 0  ;;  %v255_v35 = vld [vmem:[%s11715_s18 + $0x55] sm:$0x1] }
 0x27b   : > { %5299 = vmatpush.bf16.xpose.msrb.mxu3 %v5289_v37  ;;  %v11391_v37 = vld [vmem:[%s11669_s15 + $0xab8] sm:$0xff]  ;;  %v5532_v44 = vsel %vm1486_vm0, %v11387_v36, 0  ;;  %v256_v36 = vld [vmem:[%s11715_s18 + $0x56] sm:$0x1] }
 0x27c   : > { %v4297_v30 = vpop.f32.mrf.mxu2  ;;  %v5580_v45 = vsel %vm1486_vm0, %v11391_v37, 0  ;;  %v257_v37 = vld [vmem:[%s11715_s18 + $0x57] sm:$0x1] }
 0x27d   : > { %v4345_v31 = vpop.f32.mrf.mxu3 }
 0x27e   : > { %v11406_v31 = vld [vmem:[%s11669_s15 + $0xb30] sm:$0xff] }
 0x280   : > { %5156 = vmatpush.bf16.xpose.msrb.mxu0 %v5142_v46  ;;  %v5628_v46 = vsel %vm1486_vm0, %v11395_v38, 0 }
 0x281   : > { %5204 = vmatpush.bf16.xpose.msrb.mxu1 %v5190_v47  ;;  %v5676_v47 = vsel %vm1486_vm0, %v11399_v39, 0  ;;  %v5769_v39 = vsel %vm1486_vm0, %v11406_v31, 0 }
 0x282   : > { %5252 = vmatpush.bf16.xpose.msrb.mxu2 %v5238_v48  ;;  %v11386_v48 = vld [vmem:[%s11669_s15 + $0xa90] sm:$0xff] }
 0x283   : > { %5300 = vmatpush.bf16.xpose.msrb.mxu3 %v5286_v49  ;;  %v5529_v58 = vsel %vm1486_vm0, %v11386_v48, 0  ;;  %v11409_v48 = vld [vmem:[%s11669_s15 + $0xb48] sm:$0xff] }
 0x288   : > { %5157 = vmatpush.bf16.xpose.msrb.mxu0 %v5139_v60  ;;  %v5625_v60 = vsel %vm1486_vm0, %v11394_v52, 0  ;;  %v5814_v52 = vsel %vm1486_vm0, %v11409_v48, 0 }
 0x289   : > { %5205 = vmatpush.bf16.xpose.msrb.mxu1 %v5187_v61  ;;  %v5673_v61 = vsel %vm1486_vm0, %v11398_v53, 0 }
 0x28a   : > { %5253 = vmatpush.bf16.xpose.msrb.mxu2 %v5235_v62 }
 0x28b   : > { %5301 = vmatpush.bf16.xpose.msrb.mxu3 %v5283_v63 }
 0x28c   : > { %v4391_v49 = vpop.f32.mrf.mxu0 }
 0x28d   : > { %v4439_v50 = vpop.f32.mrf.mxu1  ;;  %8440 = vst.msk [vmem:[%s11921_s22 + $0x78] sm:$0x3] %vm8379_vm1, %v4391_v49  ;;  %v11413_v49 = vld [vmem:[%s11669_s15 + $0xb68] sm:$0xff] }
 0x28e   : > { %8441 = vst.msk [vmem:[%s11921_s22 + $0x7a] sm:$0x3] %vm8379_vm1, %v4439_v50  ;;  %v5862_v53 = vsel %vm1486_vm0, %v11413_v49, 0 }
 0x28f   : > { %9905 = vmatmul.msk.bf16.vlgmr.msrb.gmra.mxu0 %vm1486_vm0, %v246_v10 }
 0x290   : > { %5346 = vmatpush.bf16.xpose.msra.mxu0 %v5340_v0  ;;  %9922 = vmatmul.msk.bf16.vlgmr.msrb.gmra.mxu1 %vm1486_vm0, %v247_v11 }
 0x291   : > { %5394 = vmatpush.bf16.xpose.msra.mxu1 %v5388_v1  ;;  %9939 = vmatmul.msk.bf16.vlgmr.msrb.gmra.mxu2 %vm1486_vm0, %v248_v12  ;;  %v11384_v12 = vld [vmem:[%s11669_s15 + $0xa80] sm:$0xff] }
 0x292   : > { %5442 = vmatpush.bf16.xpose.msra.mxu2 %v5436_v2  ;;  %9956 = vmatmul.msk.bf16.vlgmr.msrb.gmra.mxu3 %vm1486_vm0, %v249_v13  ;;  %v11385_v2 = vld [vmem:[%s11669_s15 + $0xa88] sm:$0xff]  ;;  %v11388_v13 = vld [vmem:[%s11669_s15 + $0xaa0] sm:$0xff]  ;;  %v5523_v20 = vsel %vm1486_vm0, %v11384_v12, 0  ;;  %v11426_v12 = vld [vmem:[%s11669_s15 + $0xbd0] sm:$0xff] }
 0x293   : > { %5490 = vmatpush.bf16.xpose.msra.mxu3 %v5484_v3  ;;  %v11389_v3 = vld [vmem:[%s11669_s15 + $0xaa8] sm:$0xff]  ;;  %v5526_v6 = vsel %vm1486_vm0, %v11385_v2, 0  ;;  %v5571_v21 = vsel %vm1486_vm0, %v11388_v13, 0  ;;  %v11430_v13 = vld [vmem:[%s11669_s15 + $0xbf0] sm:$0xff] }
 0x294   : > { %v4487_v62 = vpop.f32.mrf.mxu2  ;;  %v4393_v0 = vpop.f32.mrf.mxu0  ;;  %v5574_v7 = vsel %vm1486_vm0, %v11389_v3, 0 }
 0x295   : > { %v4535_v63 = vpop.f32.mrf.mxu3  ;;  %8442 = vst.msk [vmem:[%s11921_s22 + $0x7c] sm:$0x3] %vm8379_vm1, %v4487_v62  ;;  %v4441_v1 = vpop.f32.mrf.mxu1  ;;  %v11427_v62 = vld [vmem:[%s11669_s15 + $0xbd8] sm:$0xff] }
 0x296   : > { %8443 = vst.msk [vmem:[%s11921_s22 + $0x7e] sm:$0x3] %vm8379_vm1, %v4535_v63  ;;  %v11431_v63 = vld [vmem:[%s11669_s15 + $0xbf8] sm:$0xff] }
 0x298   : > { %5347 = vmatpush.bf16.xpose.msra.mxu0 %v5337_v14  ;;  %v11392_v14 = vld [vmem:[%s11669_s15 + $0xac0] sm:$0xff] }
 0x299   : > { %5395 = vmatpush.bf16.xpose.msra.mxu1 %v5385_v15  ;;  %v11396_v15 = vld [vmem:[%s11669_s15 + $0xae0] sm:$0xff]  ;;  %v5619_v22 = vsel %vm1486_vm0, %v11392_v14, 0  ;;  %v258_v14 = vld [vmem:[%s11715_s18 + $0x58] sm:$0x1] }
 0x29a   : > { %5443 = vmatpush.bf16.xpose.msra.mxu2 %v5433_v16  ;;  %v11403_v16 = vld [vmem:[%s11669_s15 + $0xb18] sm:$0xff]  ;;  %v5667_v23 = vsel %vm1486_vm0, %v11396_v15, 0 }
 0x29b   : > { %5491 = vmatpush.bf16.xpose.msra.mxu3 %v5481_v17  ;;  %v11407_v17 = vld [vmem:[%s11669_s15 + $0xb38] sm:$0xff]  ;;  %v5724_v24 = vsel %vm1486_vm0, %v11403_v16, 0 }
 0x29c   : > { %v4489_v10 = vpop.f32.mrf.mxu2  ;;  %v5772_v25 = vsel %vm1486_vm0, %v11407_v17, 0  ;;  %v259_v15 = vld [vmem:[%s11715_s18 + $0x59] sm:$0x1]  ;;  %v260_v16 = vld [vmem:[%s11715_s18 + $0x5a] sm:$0x1] }
 0x29d   : > { %v4537_v11 = vpop.f32.mrf.mxu3  ;;  %v261_v17 = vld [vmem:[%s11715_s18 + $0x5b] sm:$0x1] }
 0x29e   : > { %v11422_v11 = vld [vmem:[%s11669_s15 + $0xbb0] sm:$0xff] }
 0x2a0   : > { %5348 = vmatpush.bf16.xpose.msra.mxu0 %v5334_v26  ;;  %v5820_v26 = vsel %vm1486_vm0, %v11411_v18, 0 }
 0x2a1   : > { %5396 = vmatpush.bf16.xpose.msra.mxu1 %v5382_v27  ;;  %v5868_v27 = vsel %vm1486_vm0, %v11415_v19, 0  ;;  %v5961_v19 = vsel %vm1486_vm0, %v11422_v11, 0 }
 0x2a2   : > { %5444 = vmatpush.bf16.xpose.msra.mxu2 %v5430_v28  ;;  %v11402_v28 = vld [vmem:[%s11669_s15 + $0xb10] sm:$0xff] }
 0x2a3   : > { %5492 = vmatpush.bf16.xpose.msra.mxu3 %v5478_v29  ;;  %v5721_v38 = vsel %vm1486_vm0, %v11402_v28, 0  ;;  %v11425_v28 = vld [vmem:[%s11669_s15 + $0xbc8] sm:$0xff] }
 0x2a8   : > { %5349 = vmatpush.bf16.xpose.msra.mxu0 %v5331_v40  ;;  %v5817_v40 = vsel %vm1486_vm0, %v11410_v32, 0  ;;  %v6006_v32 = vsel %vm1486_vm0, %v11425_v28, 0 }
 0x2a9   : > { %5397 = vmatpush.bf16.xpose.msra.mxu1 %v5379_v41  ;;  %v5865_v41 = vsel %vm1486_vm0, %v11414_v33, 0 }
 0x2aa   : > { %5445 = vmatpush.bf16.xpose.msra.mxu2 %v5427_v42 }
 0x2ab   : > { %5493 = vmatpush.bf16.xpose.msra.mxu3 %v5475_v43 }
 0x2ac   : > { %v4583_v29 = vpop.f32.mrf.mxu0 }
 0x2ad   : > { %v4631_v30 = vpop.f32.mrf.mxu1  ;;  %8444 = vst.msk [vmem:[%s11921_s22 + $0x80] sm:$0x3] %vm8379_vm1, %v4583_v29  ;;  %v11429_v29 = vld [vmem:[%s11669_s15 + $0xbe8] sm:$0xff] }
 0x2ae   : > { %8445 = vst.msk [vmem:[%s11921_s22 + $0x82] sm:$0x3] %vm8379_vm1, %v4631_v30  ;;  %v6054_v33 = vsel %vm1486_vm0, %v11429_v29, 0 }
 0x2af   : > { %9973 = vmatmul.msk.bf16.vlgmr.msra.gmra.mxu0 %vm1486_vm0, %v250_v54 }
 0x2b0   : > { %5538 = vmatpush.bf16.xpose.msrb.mxu0 %v5532_v44  ;;  %9990 = vmatmul.msk.bf16.vlgmr.msra.gmra.mxu1 %vm1486_vm0, %v251_v55 }
 0x2b1   : > { %5586 = vmatpush.bf16.xpose.msrb.mxu1 %v5580_v45  ;;  %10007 = vmatmul.msk.bf16.vlgmr.msra.gmra.mxu2 %vm1486_vm0, %v252_v56  ;;  %v11400_v56 = vld [vmem:[%s11669_s15 + $0xb00] sm:$0xff] }
 0x2b2   : > { %5634 = vmatpush.bf16.xpose.msrb.mxu2 %v5628_v46  ;;  %10024 = vmatmul.msk.bf16.vlgmr.msra.gmra.mxu3 %vm1486_vm0, %v253_v57  ;;  %v11401_v46 = vld [vmem:[%s11669_s15 + $0xb08] sm:$0xff]  ;;  %v11404_v57 = vld [vmem:[%s11669_s15 + $0xb20] sm:$0xff]  ;;  %v5715_v0 = vsel %vm1486_vm0, %v11400_v56, 0  ;;  %v11442_v56 = vld [vmem:[%s11669_s15 + $0xc50] sm:$0xff] }
 0x2b3   : > { %5682 = vmatpush.bf16.xpose.msrb.mxu3 %v5676_v47  ;;  %v11405_v47 = vld [vmem:[%s11669_s15 + $0xb28] sm:$0xff]  ;;  %v5718_v50 = vsel %vm1486_vm0, %v11401_v46, 0  ;;  %v5763_v1 = vsel %vm1486_vm0, %v11404_v57, 0  ;;  %v11446_v57 = vld [vmem:[%s11669_s15 + $0xc70] sm:$0xff] }
 0x2b4   : > { %v4679_v42 = vpop.f32.mrf.mxu2  ;;  %v4585_v44 = vpop.f32.mrf.mxu0  ;;  %v5766_v51 = vsel %vm1486_vm0, %v11405_v47, 0 }
 0x2b5   : > { %v4727_v43 = vpop.f32.mrf.mxu3  ;;  %8446 = vst.msk [vmem:[%s11921_s22 + $0x84] sm:$0x3] %vm8379_vm1, %v4679_v42  ;;  %v4633_v45 = vpop.f32.mrf.mxu1  ;;  %v11443_v42 = vld [vmem:[%s11669_s15 + $0xc58] sm:$0xff] }
 0x2b6   : > { %8447 = vst.msk [vmem:[%s11921_s22 + $0x86] sm:$0x3] %vm8379_vm1, %v4727_v43  ;;  %v11447_v43 = vld [vmem:[%s11669_s15 + $0xc78] sm:$0xff] }
 0x2b8   : > { %5539 = vmatpush.bf16.xpose.msrb.mxu0 %v5529_v58  ;;  %v11408_v58 = vld [vmem:[%s11669_s15 + $0xb40] sm:$0xff] }
 0x2b9   : > { %5587 = vmatpush.bf16.xpose.msrb.mxu1 %v5577_v59  ;;  %v11412_v59 = vld [vmem:[%s11669_s15 + $0xb60] sm:$0xff]  ;;  %v5811_v2 = vsel %vm1486_vm0, %v11408_v58, 0  ;;  %v262_v58 = vld [vmem:[%s11715_s18 + $0x5c] sm:$0x1] }
 0x2ba   : > { %5635 = vmatpush.bf16.xpose.msrb.mxu2 %v5625_v60  ;;  %v11419_v60 = vld [vmem:[%s11669_s15 + $0xb98] sm:$0xff]  ;;  %v5859_v3 = vsel %vm1486_vm0, %v11412_v59, 0 }
 0x2bb   : > { %5683 = vmatpush.bf16.xpose.msrb.mxu3 %v5673_v61  ;;  %v11423_v61 = vld [vmem:[%s11669_s15 + $0xbb8] sm:$0xff]  ;;  %v5916_v4 = vsel %vm1486_vm0, %v11419_v60, 0 }
 0x2bc   : > { %v4681_v54 = vpop.f32.mrf.mxu2  ;;  %v5964_v5 = vsel %vm1486_vm0, %v11423_v61, 0  ;;  %v263_v59 = vld [vmem:[%s11715_s18 + $0x5d] sm:$0x1]  ;;  %v264_v60 = vld [vmem:[%s11715_s18 + $0x5e] sm:$0x1] }
 0x2bd   : > { %v4729_v55 = vpop.f32.mrf.mxu3  ;;  %v265_v61 = vld [vmem:[%s11715_s18 + $0x5f] sm:$0x1] }
 0x2be   : > { %v11438_v55 = vld [vmem:[%s11669_s15 + $0xc30] sm:$0xff] }
 0x2c0   : > { %5540 = vmatpush.bf16.xpose.msrb.mxu0 %v5526_v6  ;;  %v6012_v6 = vsel %vm1486_vm0, %v11427_v62, 0 }
 0x2c1   : > { %5588 = vmatpush.bf16.xpose.msrb.mxu1 %v5574_v7  ;;  %v6060_v7 = vsel %vm1486_vm0, %v11431_v63, 0  ;;  %v6153_v63 = vsel %vm1486_vm0, %v11438_v55, 0 }
 0x2c2   : > { %5636 = vmatpush.bf16.xpose.msrb.mxu2 %v5622_v8  ;;  %v11418_v8 = vld [vmem:[%s11669_s15 + $0xb90] sm:$0xff] }
 0x2c3   : > { %5684 = vmatpush.bf16.xpose.msrb.mxu3 %v5670_v9  ;;  %v5913_v18 = vsel %vm1486_vm0, %v11418_v8, 0  ;;  %v11441_v8 = vld [vmem:[%s11669_s15 + $0xc48] sm:$0xff] }
 0x2c8   : > { %5541 = vmatpush.bf16.xpose.msrb.mxu0 %v5523_v20  ;;  %v6009_v20 = vsel %vm1486_vm0, %v11426_v12, 0  ;;  %v6198_v12 = vsel %vm1486_vm0, %v11441_v8, 0 }
 0x2c9   : > { %5589 = vmatpush.bf16.xpose.msrb.mxu1 %v5571_v21  ;;  %v6057_v21 = vsel %vm1486_vm0, %v11430_v13, 0 }
 0x2ca   : > { %5637 = vmatpush.bf16.xpose.msrb.mxu2 %v5619_v22 }
 0x2cb   : > { %5685 = vmatpush.bf16.xpose.msrb.mxu3 %v5667_v23 }
 0x2cc   : > { %v4775_v9 = vpop.f32.mrf.mxu0 }
 0x2cd   : > { %v4823_v10 = vpop.f32.mrf.mxu1  ;;  %8448 = vst.msk [vmem:[%s11921_s22 + $0x88] sm:$0x3] %vm8379_vm1, %v4775_v9  ;;  %v11445_v9 = vld [vmem:[%s11669_s15 + $0xc68] sm:$0xff] }
 0x2ce   : > { %8449 = vst.msk [vmem:[%s11921_s22 + $0x8a] sm:$0x3] %vm8379_vm1, %v4823_v10  ;;  %v6246_v13 = vsel %vm1486_vm0, %v11445_v9, 0 }
 0x2cf   : > { %10041 = vmatmul.msk.bf16.vlgmr.msrb.gmra.mxu0 %vm1486_vm0, %v254_v34 }
 0x2d0   : > { %5730 = vmatpush.bf16.xpose.msra.mxu0 %v5724_v24  ;;  %10058 = vmatmul.msk.bf16.vlgmr.msrb.gmra.mxu1 %vm1486_vm0, %v255_v35 }
 0x2d1   : > { %5778 = vmatpush.bf16.xpose.msra.mxu1 %v5772_v25  ;;  %10075 = vmatmul.msk.bf16.vlgmr.msrb.gmra.mxu2 %vm1486_vm0, %v256_v36  ;;  %v11416_v36 = vld [vmem:[%s11669_s15 + $0xb80] sm:$0xff] }
 0x2d2   : > { %5826 = vmatpush.bf16.xpose.msra.mxu2 %v5820_v26  ;;  %10092 = vmatmul.msk.bf16.vlgmr.msrb.gmra.mxu3 %vm1486_vm0, %v257_v37  ;;  %v11417_v26 = vld [vmem:[%s11669_s15 + $0xb88] sm:$0xff]  ;;  %v11420_v37 = vld [vmem:[%s11669_s15 + $0xba0] sm:$0xff]  ;;  %v5907_v44 = vsel %vm1486_vm0, %v11416_v36, 0  ;;  %v11458_v36 = vld [vmem:[%s11669_s15 + $0xcd0] sm:$0xff] }
 0x2d3   : > { %5874 = vmatpush.bf16.xpose.msra.mxu3 %v5868_v27  ;;  %v11421_v27 = vld [vmem:[%s11669_s15 + $0xba8] sm:$0xff]  ;;  %v5910_v30 = vsel %vm1486_vm0, %v11417_v26, 0  ;;  %v5955_v45 = vsel %vm1486_vm0, %v11420_v37, 0  ;;  %v11462_v37 = vld [vmem:[%s11669_s15 + $0xcf0] sm:$0xff] }
 0x2d4   : > { %v4871_v22 = vpop.f32.mrf.mxu2  ;;  %v4777_v24 = vpop.f32.mrf.mxu0  ;;  %v5958_v31 = vsel %vm1486_vm0, %v11421_v27, 0 }
 0x2d5   : > { %v4919_v23 = vpop.f32.mrf.mxu3  ;;  %8450 = vst.msk [vmem:[%s11921_s22 + $0x8c] sm:$0x3] %vm8379_vm1, %v4871_v22  ;;  %v4825_v25 = vpop.f32.mrf.mxu1  ;;  %v11459_v22 = vld [vmem:[%s11669_s15 + $0xcd8] sm:$0xff] }
 0x2d6   : > { %8451 = vst.msk [vmem:[%s11921_s22 + $0x8e] sm:$0x3] %vm8379_vm1, %v4919_v23  ;;  %v11463_v23 = vld [vmem:[%s11669_s15 + $0xcf8] sm:$0xff] }
 0x2d8   : > { %5731 = vmatpush.bf16.xpose.msra.mxu0 %v5721_v38  ;;  %v11424_v38 = vld [vmem:[%s11669_s15 + $0xbc0] sm:$0xff] }
 0x2d9   : > { %5779 = vmatpush.bf16.xpose.msra.mxu1 %v5769_v39  ;;  %v11428_v39 = vld [vmem:[%s11669_s15 + $0xbe0] sm:$0xff]  ;;  %v6003_v46 = vsel %vm1486_vm0, %v11424_v38, 0 }
 0x2da   : > { %5827 = vmatpush.bf16.xpose.msra.mxu2 %v5817_v40  ;;  %v11435_v40 = vld [vmem:[%s11669_s15 + $0xc18] sm:$0xff]  ;;  %v6051_v47 = vsel %vm1486_vm0, %v11428_v39, 0  ;;  %v266_v38 = vld [vmem:[%s11715_s18 + $0x60] sm:$0x1]  ;;  %v267_v39 = vld [vmem:[%s11715_s18 + $0x61] sm:$0x1] }
 0x2db   : > { %5875 = vmatpush.bf16.xpose.msra.mxu3 %v5865_v41  ;;  %v11439_v41 = vld [vmem:[%s11669_s15 + $0xc38] sm:$0xff]  ;;  %v6108_v48 = vsel %vm1486_vm0, %v11435_v40, 0  ;;  %v268_v40 = vld [vmem:[%s11715_s18 + $0x62] sm:$0x1] }
 0x2dc   : > { %v4873_v34 = vpop.f32.mrf.mxu2  ;;  %v6156_v49 = vsel %vm1486_vm0, %v11439_v41, 0  ;;  %v269_v41 = vld [vmem:[%s11715_s18 + $0x63] sm:$0x1] }
 0x2dd   : > { %v4921_v35 = vpop.f32.mrf.mxu3 }
 0x2de   : > { %v11454_v35 = vld [vmem:[%s11669_s15 + $0xcb0] sm:$0xff] }
 0x2e0   : > { %5732 = vmatpush.bf16.xpose.msra.mxu0 %v5718_v50  ;;  %v6204_v50 = vsel %vm1486_vm0, %v11443_v42, 0 }
 0x2e1   : > { %5780 = vmatpush.bf16.xpose.msra.mxu1 %v5766_v51  ;;  %v6252_v51 = vsel %vm1486_vm0, %v11447_v43, 0  ;;  %v6345_v43 = vsel %vm1486_vm0, %v11454_v35, 0 }
 0x2e2   : > { %5828 = vmatpush.bf16.xpose.msra.mxu2 %v5814_v52  ;;  %v11434_v52 = vld [vmem:[%s11669_s15 + $0xc10] sm:$0xff] }
 0x2e3   : > { %5876 = vmatpush.bf16.xpose.msra.mxu3 %v5862_v53  ;;  %v6105_v62 = vsel %vm1486_vm0, %v11434_v52, 0  ;;  %v11457_v52 = vld [vmem:[%s11669_s15 + $0xcc8] sm:$0xff] }
 0x2e8   : > { %5733 = vmatpush.bf16.xpose.msra.mxu0 %v5715_v0  ;;  %v6201_v0 = vsel %vm1486_vm0, %v11442_v56, 0  ;;  %v6390_v56 = vsel %vm1486_vm0, %v11457_v52, 0 }
 0x2e9   : > { %5781 = vmatpush.bf16.xpose.msra.mxu1 %v5763_v1  ;;  %v6249_v1 = vsel %vm1486_vm0, %v11446_v57, 0 }
 0x2ea   : > { %5829 = vmatpush.bf16.xpose.msra.mxu2 %v5811_v2 }
 0x2eb   : > { %5877 = vmatpush.bf16.xpose.msra.mxu3 %v5859_v3 }
 0x2ec   : > { %v4967_v53 = vpop.f32.mrf.mxu0 }
 0x2ed   : > { %v5015_v54 = vpop.f32.mrf.mxu1  ;;  %8452 = vst.msk [vmem:[%s11921_s22 + $0x90] sm:$0x3] %vm8379_vm1, %v4967_v53  ;;  %v11461_v53 = vld [vmem:[%s11669_s15 + $0xce8] sm:$0xff] }
 0x2ee   : > { %8453 = vst.msk [vmem:[%s11921_s22 + $0x92] sm:$0x3] %vm8379_vm1, %v5015_v54  ;;  %v6438_v57 = vsel %vm1486_vm0, %v11461_v53, 0 }
 0x2ef   : > { %10109 = vmatmul.msk.bf16.vlgmr.msra.gmra.mxu0 %vm1486_vm0, %v258_v14 }
 0x2f0   : > { %5922 = vmatpush.bf16.xpose.msrb.mxu0 %v5916_v4  ;;  %10126 = vmatmul.msk.bf16.vlgmr.msra.gmra.mxu1 %vm1486_vm0, %v259_v15 }
 0x2f1   : > { %5970 = vmatpush.bf16.xpose.msrb.mxu1 %v5964_v5  ;;  %10143 = vmatmul.msk.bf16.vlgmr.msra.gmra.mxu2 %vm1486_vm0, %v260_v16  ;;  %v11432_v16 = vld [vmem:[%s11669_s15 + $0xc00] sm:$0xff] }
 0x2f2   : > { %6018 = vmatpush.bf16.xpose.msrb.mxu2 %v6012_v6  ;;  %10160 = vmatmul.msk.bf16.vlgmr.msra.gmra.mxu3 %vm1486_vm0, %v261_v17  ;;  %v11433_v6 = vld [vmem:[%s11669_s15 + $0xc08] sm:$0xff]  ;;  %v11436_v17 = vld [vmem:[%s11669_s15 + $0xc20] sm:$0xff]  ;;  %v6099_v24 = vsel %vm1486_vm0, %v11432_v16, 0  ;;  %v11474_v16 = vld [vmem:[%s11669_s15 + $0xd50] sm:$0xff] }
 0x2f3   : > { %6066 = vmatpush.bf16.xpose.msrb.mxu3 %v6060_v7  ;;  %v11437_v7 = vld [vmem:[%s11669_s15 + $0xc28] sm:$0xff]  ;;  %v6102_v10 = vsel %vm1486_vm0, %v11433_v6, 0  ;;  %v6147_v25 = vsel %vm1486_vm0, %v11436_v17, 0  ;;  %v11478_v17 = vld [vmem:[%s11669_s15 + $0xd70] sm:$0xff] }
 0x2f4   : > { %v5063_v2 = vpop.f32.mrf.mxu2  ;;  %v4969_v4 = vpop.f32.mrf.mxu0  ;;  %v6150_v11 = vsel %vm1486_vm0, %v11437_v7, 0 }
 0x2f5   : > { %v5111_v3 = vpop.f32.mrf.mxu3  ;;  %8454 = vst.msk [vmem:[%s11921_s22 + $0x94] sm:$0x3] %vm8379_vm1, %v5063_v2  ;;  %v5017_v5 = vpop.f32.mrf.mxu1  ;;  %v11475_v2 = vld [vmem:[%s11669_s15 + $0xd58] sm:$0xff] }
 0x2f6   : > { %8455 = vst.msk [vmem:[%s11921_s22 + $0x96] sm:$0x3] %vm8379_vm1, %v5111_v3  ;;  %v11479_v3 = vld [vmem:[%s11669_s15 + $0xd78] sm:$0xff] }
 0x2f8   : > { %5923 = vmatpush.bf16.xpose.msrb.mxu0 %v5913_v18  ;;  %v11440_v18 = vld [vmem:[%s11669_s15 + $0xc40] sm:$0xff] }
 0x2f9   : > { %5971 = vmatpush.bf16.xpose.msrb.mxu1 %v5961_v19  ;;  %v11444_v19 = vld [vmem:[%s11669_s15 + $0xc60] sm:$0xff]  ;;  %v6195_v26 = vsel %vm1486_vm0, %v11440_v18, 0 }
 0x2fa   : > { %6019 = vmatpush.bf16.xpose.msrb.mxu2 %v6009_v20  ;;  %v11451_v20 = vld [vmem:[%s11669_s15 + $0xc98] sm:$0xff]  ;;  %v6243_v27 = vsel %vm1486_vm0, %v11444_v19, 0  ;;  %v270_v18 = vld [vmem:[%s11715_s18 + $0x64] sm:$0x1]  ;;  %v271_v19 = vld [vmem:[%s11715_s18 + $0x65] sm:$0x1] }
 0x2fb   : > { %6067 = vmatpush.bf16.xpose.msrb.mxu3 %v6057_v21  ;;  %v11455_v21 = vld [vmem:[%s11669_s15 + $0xcb8] sm:$0xff]  ;;  %v6300_v28 = vsel %vm1486_vm0, %v11451_v20, 0  ;;  %v272_v20 = vld [vmem:[%s11715_s18 + $0x66] sm:$0x1] }
 0x2fc   : > { %v5065_v14 = vpop.f32.mrf.mxu2  ;;  %v6348_v29 = vsel %vm1486_vm0, %v11455_v21, 0  ;;  %v273_v21 = vld [vmem:[%s11715_s18 + $0x67] sm:$0x1] }
 0x2fd   : > { %v5113_v15 = vpop.f32.mrf.mxu3 }
 0x2fe   : > { %v11470_v15 = vld [vmem:[%s11669_s15 + $0xd30] sm:$0xff] }
 0x300   : > { %5924 = vmatpush.bf16.xpose.msrb.mxu0 %v5910_v30  ;;  %v6396_v30 = vsel %vm1486_vm0, %v11459_v22, 0 }
 0x301   : > { %5972 = vmatpush.bf16.xpose.msrb.mxu1 %v5958_v31  ;;  %v6444_v31 = vsel %vm1486_vm0, %v11463_v23, 0  ;;  %v6537_v23 = vsel %vm1486_vm0, %v11470_v15, 0 }
 0x302   : > { %6020 = vmatpush.bf16.xpose.msrb.mxu2 %v6006_v32  ;;  %v11450_v32 = vld [vmem:[%s11669_s15 + $0xc90] sm:$0xff] }
 0x303   : > { %6068 = vmatpush.bf16.xpose.msrb.mxu3 %v6054_v33  ;;  %v6297_v42 = vsel %vm1486_vm0, %v11450_v32, 0  ;;  %v11473_v32 = vld [vmem:[%s11669_s15 + $0xd48] sm:$0xff] }
 0x308   : > { %5925 = vmatpush.bf16.xpose.msrb.mxu0 %v5907_v44  ;;  %v6393_v44 = vsel %vm1486_vm0, %v11458_v36, 0  ;;  %v6582_v36 = vsel %vm1486_vm0, %v11473_v32, 0 }
 0x309   : > { %5973 = vmatpush.bf16.xpose.msrb.mxu1 %v5955_v45  ;;  %v6441_v45 = vsel %vm1486_vm0, %v11462_v37, 0 }
 0x30a   : > { %6021 = vmatpush.bf16.xpose.msrb.mxu2 %v6003_v46 }
 0x30b   : > { %6069 = vmatpush.bf16.xpose.msrb.mxu3 %v6051_v47 }
 0x30c   : > { %v5159_v33 = vpop.f32.mrf.mxu0 }
 0x30d   : > { %v5207_v34 = vpop.f32.mrf.mxu1  ;;  %8456 = vst.msk [vmem:[%s11921_s22 + $0x98] sm:$0x3] %vm8379_vm1, %v5159_v33  ;;  %v11477_v33 = vld [vmem:[%s11669_s15 + $0xd68] sm:$0xff] }
 0x30e   : > { %8457 = vst.msk [vmem:[%s11921_s22 + $0x9a] sm:$0x3] %vm8379_vm1, %v5207_v34  ;;  %v6630_v37 = vsel %vm1486_vm0, %v11477_v33, 0 }
 0x30f   : > { %10177 = vmatmul.msk.bf16.vlgmr.msrb.gmra.mxu0 %vm1486_vm0, %v262_v58 }
 0x310   : > { %6114 = vmatpush.bf16.xpose.msra.mxu0 %v6108_v48  ;;  %10194 = vmatmul.msk.bf16.vlgmr.msrb.gmra.mxu1 %vm1486_vm0, %v263_v59 }
 0x311   : > { %6162 = vmatpush.bf16.xpose.msra.mxu1 %v6156_v49  ;;  %10211 = vmatmul.msk.bf16.vlgmr.msrb.gmra.mxu2 %vm1486_vm0, %v264_v60  ;;  %v11448_v60 = vld [vmem:[%s11669_s15 + $0xc80] sm:$0xff] }
 0x312   : > { %6210 = vmatpush.bf16.xpose.msra.mxu2 %v6204_v50  ;;  %10228 = vmatmul.msk.bf16.vlgmr.msrb.gmra.mxu3 %vm1486_vm0, %v265_v61  ;;  %v11449_v50 = vld [vmem:[%s11669_s15 + $0xc88] sm:$0xff]  ;;  %v11452_v61 = vld [vmem:[%s11669_s15 + $0xca0] sm:$0xff]  ;;  %v6291_v4 = vsel %vm1486_vm0, %v11448_v60, 0  ;;  %v11490_v60 = vld [vmem:[%s11669_s15 + $0xdd0] sm:$0xff] }
 0x313   : > { %6258 = vmatpush.bf16.xpose.msra.mxu3 %v6252_v51  ;;  %v11453_v51 = vld [vmem:[%s11669_s15 + $0xca8] sm:$0xff]  ;;  %v6294_v54 = vsel %vm1486_vm0, %v11449_v50, 0  ;;  %v6339_v5 = vsel %vm1486_vm0, %v11452_v61, 0  ;;  %v11494_v61 = vld [vmem:[%s11669_s15 + $0xdf0] sm:$0xff] }
 0x314   : > { %v5255_v46 = vpop.f32.mrf.mxu2  ;;  %v5161_v48 = vpop.f32.mrf.mxu0  ;;  %v6342_v55 = vsel %vm1486_vm0, %v11453_v51, 0 }
 0x315   : > { %v5303_v47 = vpop.f32.mrf.mxu3  ;;  %8458 = vst.msk [vmem:[%s11921_s22 + $0x9c] sm:$0x3] %vm8379_vm1, %v5255_v46  ;;  %v5209_v49 = vpop.f32.mrf.mxu1  ;;  %v11491_v46 = vld [vmem:[%s11669_s15 + $0xdd8] sm:$0xff] }
 0x316   : > { %8459 = vst.msk [vmem:[%s11921_s22 + $0x9e] sm:$0x3] %vm8379_vm1, %v5303_v47  ;;  %v11495_v47 = vld [vmem:[%s11669_s15 + $0xdf8] sm:$0xff] }
 0x318   : > { %6115 = vmatpush.bf16.xpose.msra.mxu0 %v6105_v62  ;;  %v11456_v62 = vld [vmem:[%s11669_s15 + $0xcc0] sm:$0xff] }
 0x319   : > { %6163 = vmatpush.bf16.xpose.msra.mxu1 %v6153_v63  ;;  %v11460_v63 = vld [vmem:[%s11669_s15 + $0xce0] sm:$0xff]  ;;  %v6387_v6 = vsel %vm1486_vm0, %v11456_v62, 0  ;;  %v274_v62 = vld [vmem:[%s11715_s18 + $0x68] sm:$0x1] }
 0x31a   : > { %6211 = vmatpush.bf16.xpose.msra.mxu2 %v6201_v0  ;;  %v11467_v0 = vld [vmem:[%s11669_s15 + $0xd18] sm:$0xff]  ;;  %v6435_v7 = vsel %vm1486_vm0, %v11460_v63, 0  ;;  %v275_v63 = vld [vmem:[%s11715_s18 + $0x69] sm:$0x1] }
 0x31b   : > { %6259 = vmatpush.bf16.xpose.msra.mxu3 %v6249_v1  ;;  %v11471_v1 = vld [vmem:[%s11669_s15 + $0xd38] sm:$0xff]  ;;  %v6492_v8 = vsel %vm1486_vm0, %v11467_v0, 0  ;;  %v276_v0 = vld [vmem:[%s11715_s18 + $0x6a] sm:$0x1] }
 0x31c   : > { %v5257_v58 = vpop.f32.mrf.mxu2  ;;  %v6540_v9 = vsel %vm1486_vm0, %v11471_v1, 0  ;;  %v277_v1 = vld [vmem:[%s11715_s18 + $0x6b] sm:$0x1] }
 0x31d   : > { %v5305_v59 = vpop.f32.mrf.mxu3 }
 0x31e   : > { %v11486_v59 = vld [vmem:[%s11669_s15 + $0xdb0] sm:$0xff] }
 0x320   : > { %6116 = vmatpush.bf16.xpose.msra.mxu0 %v6102_v10  ;;  %v6588_v10 = vsel %vm1486_vm0, %v11475_v2, 0 }
 0x321   : > { %6164 = vmatpush.bf16.xpose.msra.mxu1 %v6150_v11  ;;  %v6636_v11 = vsel %vm1486_vm0, %v11479_v3, 0  ;;  %v6729_v3 = vsel %vm1486_vm0, %v11486_v59, 0 }
 0x322   : > { %6212 = vmatpush.bf16.xpose.msra.mxu2 %v6198_v12  ;;  %v11466_v12 = vld [vmem:[%s11669_s15 + $0xd10] sm:$0xff] }
 0x323   : > { %6260 = vmatpush.bf16.xpose.msra.mxu3 %v6246_v13  ;;  %v6489_v22 = vsel %vm1486_vm0, %v11466_v12, 0  ;;  %v11489_v12 = vld [vmem:[%s11669_s15 + $0xdc8] sm:$0xff] }
 0x328   : > { %6117 = vmatpush.bf16.xpose.msra.mxu0 %v6099_v24  ;;  %v6585_v24 = vsel %vm1486_vm0, %v11474_v16, 0  ;;  %v6774_v16 = vsel %vm1486_vm0, %v11489_v12, 0 }
 0x329   : > { %6165 = vmatpush.bf16.xpose.msra.mxu1 %v6147_v25  ;;  %v6633_v25 = vsel %vm1486_vm0, %v11478_v17, 0 }
 0x32a   : > { %6213 = vmatpush.bf16.xpose.msra.mxu2 %v6195_v26 }
 0x32b   : > { %6261 = vmatpush.bf16.xpose.msra.mxu3 %v6243_v27 }
 0x32c   : > { %v5351_v13 = vpop.f32.mrf.mxu0 }
 0x32d   : > { %v5399_v14 = vpop.f32.mrf.mxu1  ;;  %8460 = vst.msk [vmem:[%s11921_s22 + $0xa0] sm:$0x3] %vm8379_vm1, %v5351_v13  ;;  %v11493_v13 = vld [vmem:[%s11669_s15 + $0xde8] sm:$0xff] }
 0x32e   : > { %8461 = vst.msk [vmem:[%s11921_s22 + $0xa2] sm:$0x3] %vm8379_vm1, %v5399_v14  ;;  %v6822_v17 = vsel %vm1486_vm0, %v11493_v13, 0 }
 0x32f   : > { %10245 = vmatmul.msk.bf16.vlgmr.msra.gmra.mxu0 %vm1486_vm0, %v266_v38 }
 0x330   : > { %6306 = vmatpush.bf16.xpose.msrb.mxu0 %v6300_v28  ;;  %10262 = vmatmul.msk.bf16.vlgmr.msra.gmra.mxu1 %vm1486_vm0, %v267_v39 }
 0x331   : > { %6354 = vmatpush.bf16.xpose.msrb.mxu1 %v6348_v29  ;;  %10279 = vmatmul.msk.bf16.vlgmr.msra.gmra.mxu2 %vm1486_vm0, %v268_v40  ;;  %v11464_v40 = vld [vmem:[%s11669_s15 + $0xd00] sm:$0xff] }
 0x332   : > { %6402 = vmatpush.bf16.xpose.msrb.mxu2 %v6396_v30  ;;  %10296 = vmatmul.msk.bf16.vlgmr.msra.gmra.mxu3 %vm1486_vm0, %v269_v41  ;;  %v11465_v30 = vld [vmem:[%s11669_s15 + $0xd08] sm:$0xff]  ;;  %v11468_v41 = vld [vmem:[%s11669_s15 + $0xd20] sm:$0xff]  ;;  %v6483_v48 = vsel %vm1486_vm0, %v11464_v40, 0  ;;  %v11506_v40 = vld [vmem:[%s11669_s15 + $0xe50] sm:$0xff] }
 0x333   : > { %6450 = vmatpush.bf16.xpose.msrb.mxu3 %v6444_v31  ;;  %v11469_v31 = vld [vmem:[%s11669_s15 + $0xd28] sm:$0xff]  ;;  %v6486_v34 = vsel %vm1486_vm0, %v11465_v30, 0  ;;  %v6531_v49 = vsel %vm1486_vm0, %v11468_v41, 0  ;;  %v11510_v41 = vld [vmem:[%s11669_s15 + $0xe70] sm:$0xff] }
 0x334   : > { %v5447_v26 = vpop.f32.mrf.mxu2  ;;  %v5353_v28 = vpop.f32.mrf.mxu0  ;;  %v6534_v35 = vsel %vm1486_vm0, %v11469_v31, 0 }
 0x335   : > { %v5495_v27 = vpop.f32.mrf.mxu3  ;;  %8462 = vst.msk [vmem:[%s11921_s22 + $0xa4] sm:$0x3] %vm8379_vm1, %v5447_v26  ;;  %v5401_v29 = vpop.f32.mrf.mxu1  ;;  %v11507_v26 = vld [vmem:[%s11669_s15 + $0xe58] sm:$0xff] }
 0x336   : > { %8463 = vst.msk [vmem:[%s11921_s22 + $0xa6] sm:$0x3] %vm8379_vm1, %v5495_v27  ;;  %v11511_v27 = vld [vmem:[%s11669_s15 + $0xe78] sm:$0xff] }
 0x338   : > { %6307 = vmatpush.bf16.xpose.msrb.mxu0 %v6297_v42  ;;  %v11472_v42 = vld [vmem:[%s11669_s15 + $0xd40] sm:$0xff] }
 0x339   : > { %6355 = vmatpush.bf16.xpose.msrb.mxu1 %v6345_v43  ;;  %v11476_v43 = vld [vmem:[%s11669_s15 + $0xd60] sm:$0xff]  ;;  %v6579_v50 = vsel %vm1486_vm0, %v11472_v42, 0  ;;  %v278_v42 = vld [vmem:[%s11715_s18 + $0x6c] sm:$0x1] }
 0x33a   : > { %6403 = vmatpush.bf16.xpose.msrb.mxu2 %v6393_v44  ;;  %v11483_v44 = vld [vmem:[%s11669_s15 + $0xd98] sm:$0xff]  ;;  %v6627_v51 = vsel %vm1486_vm0, %v11476_v43, 0  ;;  %v279_v43 = vld [vmem:[%s11715_s18 + $0x6d] sm:$0x1] }
 0x33b   : > { %6451 = vmatpush.bf16.xpose.msrb.mxu3 %v6441_v45  ;;  %v11487_v45 = vld [vmem:[%s11669_s15 + $0xdb8] sm:$0xff]  ;;  %v6684_v52 = vsel %vm1486_vm0, %v11483_v44, 0  ;;  %v280_v44 = vld [vmem:[%s11715_s18 + $0x6e] sm:$0x1] }
 0x33c   : > { %v5449_v38 = vpop.f32.mrf.mxu2  ;;  %v6732_v53 = vsel %vm1486_vm0, %v11487_v45, 0  ;;  %v281_v45 = vld [vmem:[%s11715_s18 + $0x6f] sm:$0x1] }
 0x33d   : > { %v5497_v39 = vpop.f32.mrf.mxu3 }
 0x33e   : > { %v11502_v39 = vld [vmem:[%s11669_s15 + $0xe30] sm:$0xff] }
 0x340   : > { %6308 = vmatpush.bf16.xpose.msrb.mxu0 %v6294_v54  ;;  %v6780_v54 = vsel %vm1486_vm0, %v11491_v46, 0 }
 0x341   : > { %6356 = vmatpush.bf16.xpose.msrb.mxu1 %v6342_v55  ;;  %v6828_v55 = vsel %vm1486_vm0, %v11495_v47, 0  ;;  %v6921_v47 = vsel %vm1486_vm0, %v11502_v39, 0 }
 0x342   : > { %6404 = vmatpush.bf16.xpose.msrb.mxu2 %v6390_v56  ;;  %v11482_v56 = vld [vmem:[%s11669_s15 + $0xd90] sm:$0xff] }
 0x343   : > { %6452 = vmatpush.bf16.xpose.msrb.mxu3 %v6438_v57  ;;  %v6681_v2 = vsel %vm1486_vm0, %v11482_v56, 0  ;;  %v11505_v56 = vld [vmem:[%s11669_s15 + $0xe48] sm:$0xff] }
 0x348   : > { %6309 = vmatpush.bf16.xpose.msrb.mxu0 %v6291_v4  ;;  %v6777_v4 = vsel %vm1486_vm0, %v11490_v60, 0  ;;  %v6966_v60 = vsel %vm1486_vm0, %v11505_v56, 0 }
 0x349   : > { %6357 = vmatpush.bf16.xpose.msrb.mxu1 %v6339_v5  ;;  %v6825_v5 = vsel %vm1486_vm0, %v11494_v61, 0 }
 0x34a   : > { %6405 = vmatpush.bf16.xpose.msrb.mxu2 %v6387_v6 }
 0x34b   : > { %6453 = vmatpush.bf16.xpose.msrb.mxu3 %v6435_v7 }
 0x34c   : > { %v5543_v57 = vpop.f32.mrf.mxu0 }
 0x34d   : > { %v5591_v58 = vpop.f32.mrf.mxu1  ;;  %8464 = vst.msk [vmem:[%s11921_s22 + $0xa8] sm:$0x3] %vm8379_vm1, %v5543_v57  ;;  %v11509_v57 = vld [vmem:[%s11669_s15 + $0xe68] sm:$0xff] }
 0x34e   : > { %8465 = vst.msk [vmem:[%s11921_s22 + $0xaa] sm:$0x3] %vm8379_vm1, %v5591_v58  ;;  %v7014_v61 = vsel %vm1486_vm0, %v11509_v57, 0 }
 0x34f   : > { %10313 = vmatmul.msk.bf16.vlgmr.msrb.gmra.mxu0 %vm1486_vm0, %v270_v18 }
 0x350   : > { %6498 = vmatpush.bf16.xpose.msra.mxu0 %v6492_v8  ;;  %10330 = vmatmul.msk.bf16.vlgmr.msrb.gmra.mxu1 %vm1486_vm0, %v271_v19 }
 0x351   : > { %6546 = vmatpush.bf16.xpose.msra.mxu1 %v6540_v9  ;;  %10347 = vmatmul.msk.bf16.vlgmr.msrb.gmra.mxu2 %vm1486_vm0, %v272_v20  ;;  %v11480_v20 = vld [vmem:[%s11669_s15 + $0xd80] sm:$0xff] }
 0x352   : > { %6594 = vmatpush.bf16.xpose.msra.mxu2 %v6588_v10  ;;  %10364 = vmatmul.msk.bf16.vlgmr.msrb.gmra.mxu3 %vm1486_vm0, %v273_v21  ;;  %v11481_v10 = vld [vmem:[%s11669_s15 + $0xd88] sm:$0xff]  ;;  %v11484_v21 = vld [vmem:[%s11669_s15 + $0xda0] sm:$0xff]  ;;  %v6675_v28 = vsel %vm1486_vm0, %v11480_v20, 0  ;;  %v11522_v20 = vld [vmem:[%s11669_s15 + $0xed0] sm:$0xff] }
 0x353   : > { %6642 = vmatpush.bf16.xpose.msra.mxu3 %v6636_v11  ;;  %v11485_v11 = vld [vmem:[%s11669_s15 + $0xda8] sm:$0xff]  ;;  %v6678_v14 = vsel %vm1486_vm0, %v11481_v10, 0  ;;  %v6723_v29 = vsel %vm1486_vm0, %v11484_v21, 0  ;;  %v11526_v21 = vld [vmem:[%s11669_s15 + $0xef0] sm:$0xff] }
 0x354   : > { %v5639_v6 = vpop.f32.mrf.mxu2  ;;  %v5545_v8 = vpop.f32.mrf.mxu0  ;;  %v6726_v15 = vsel %vm1486_vm0, %v11485_v11, 0 }
 0x355   : > { %v5687_v7 = vpop.f32.mrf.mxu3  ;;  %8466 = vst.msk [vmem:[%s11921_s22 + $0xac] sm:$0x3] %vm8379_vm1, %v5639_v6  ;;  %v5593_v9 = vpop.f32.mrf.mxu1  ;;  %v11523_v6 = vld [vmem:[%s11669_s15 + $0xed8] sm:$0xff] }
 0x356   : > { %8467 = vst.msk [vmem:[%s11921_s22 + $0xae] sm:$0x3] %vm8379_vm1, %v5687_v7  ;;  %v11527_v7 = vld [vmem:[%s11669_s15 + $0xef8] sm:$0xff] }
 0x358   : > { %6499 = vmatpush.bf16.xpose.msra.mxu0 %v6489_v22  ;;  %v11488_v22 = vld [vmem:[%s11669_s15 + $0xdc0] sm:$0xff] }
 0x359   : > { %6547 = vmatpush.bf16.xpose.msra.mxu1 %v6537_v23  ;;  %v11492_v23 = vld [vmem:[%s11669_s15 + $0xde0] sm:$0xff]  ;;  %v6771_v30 = vsel %vm1486_vm0, %v11488_v22, 0  ;;  %v282_v22 = vld [vmem:[%s11715_s18 + $0x70] sm:$0x1] }
 0x35a   : > { %6595 = vmatpush.bf16.xpose.msra.mxu2 %v6585_v24  ;;  %v11499_v24 = vld [vmem:[%s11669_s15 + $0xe18] sm:$0xff]  ;;  %v6819_v31 = vsel %vm1486_vm0, %v11492_v23, 0  ;;  %v283_v23 = vld [vmem:[%s11715_s18 + $0x71] sm:$0x1] }
 0x35b   : > { %6643 = vmatpush.bf16.xpose.msra.mxu3 %v6633_v25  ;;  %v11503_v25 = vld [vmem:[%s11669_s15 + $0xe38] sm:$0xff]  ;;  %v6876_v32 = vsel %vm1486_vm0, %v11499_v24, 0  ;;  %v284_v24 = vld [vmem:[%s11715_s18 + $0x72] sm:$0x1] }
 0x35c   : > { %v5641_v18 = vpop.f32.mrf.mxu2  ;;  %v6924_v33 = vsel %vm1486_vm0, %v11503_v25, 0  ;;  %v285_v25 = vld [vmem:[%s11715_s18 + $0x73] sm:$0x1] }
 0x35d   : > { %v5689_v19 = vpop.f32.mrf.mxu3 }
 0x35e   : > { %v11518_v19 = vld [vmem:[%s11669_s15 + $0xeb0] sm:$0xff] }
 0x360   : > { %6500 = vmatpush.bf16.xpose.msra.mxu0 %v6486_v34  ;;  %v6972_v34 = vsel %vm1486_vm0, %v11507_v26, 0 }
 0x361   : > { %6548 = vmatpush.bf16.xpose.msra.mxu1 %v6534_v35  ;;  %v7020_v35 = vsel %vm1486_vm0, %v11511_v27, 0  ;;  %v7113_v27 = vsel %vm1486_vm0, %v11518_v19, 0 }
 0x362   : > { %6596 = vmatpush.bf16.xpose.msra.mxu2 %v6582_v36  ;;  %v11498_v36 = vld [vmem:[%s11669_s15 + $0xe10] sm:$0xff] }
 0x363   : > { %6644 = vmatpush.bf16.xpose.msra.mxu3 %v6630_v37  ;;  %v6873_v46 = vsel %vm1486_vm0, %v11498_v36, 0  ;;  %v11521_v36 = vld [vmem:[%s11669_s15 + $0xec8] sm:$0xff] }
 0x368   : > { %6501 = vmatpush.bf16.xpose.msra.mxu0 %v6483_v48  ;;  %v6969_v48 = vsel %vm1486_vm0, %v11506_v40, 0  ;;  %v7158_v40 = vsel %vm1486_vm0, %v11521_v36, 0 }
 0x369   : > { %6549 = vmatpush.bf16.xpose.msra.mxu1 %v6531_v49  ;;  %v7017_v49 = vsel %vm1486_vm0, %v11510_v41, 0 }
 0x36a   : > { %6597 = vmatpush.bf16.xpose.msra.mxu2 %v6579_v50 }
 0x36b   : > { %6645 = vmatpush.bf16.xpose.msra.mxu3 %v6627_v51 }
 0x36c   : > { %v5735_v37 = vpop.f32.mrf.mxu0 }
 0x36d   : > { %v5783_v38 = vpop.f32.mrf.mxu1  ;;  %8468 = vst.msk [vmem:[%s11921_s22 + $0xb0] sm:$0x3] %vm8379_vm1, %v5735_v37  ;;  %v11525_v37 = vld [vmem:[%s11669_s15 + $0xee8] sm:$0xff] }
 0x36e   : > { %8469 = vst.msk [vmem:[%s11921_s22 + $0xb2] sm:$0x3] %vm8379_vm1, %v5783_v38  ;;  %v7206_v41 = vsel %vm1486_vm0, %v11525_v37, 0 }
 0x36f   : > { %10381 = vmatmul.msk.bf16.vlgmr.msra.gmra.mxu0 %vm1486_vm0, %v274_v62 }
 0x370   : > { %6690 = vmatpush.bf16.xpose.msrb.mxu0 %v6684_v52  ;;  %10398 = vmatmul.msk.bf16.vlgmr.msra.gmra.mxu1 %vm1486_vm0, %v275_v63 }
 0x371   : > { %6738 = vmatpush.bf16.xpose.msrb.mxu1 %v6732_v53  ;;  %10415 = vmatmul.msk.bf16.vlgmr.msra.gmra.mxu2 %vm1486_vm0, %v276_v0  ;;  %v11496_v0 = vld [vmem:[%s11669_s15 + $0xe00] sm:$0xff] }
 0x372   : > { %6786 = vmatpush.bf16.xpose.msrb.mxu2 %v6780_v54  ;;  %10432 = vmatmul.msk.bf16.vlgmr.msra.gmra.mxu3 %vm1486_vm0, %v277_v1  ;;  %v11497_v54 = vld [vmem:[%s11669_s15 + $0xe08] sm:$0xff]  ;;  %v11500_v1 = vld [vmem:[%s11669_s15 + $0xe20] sm:$0xff]  ;;  %v6867_v8 = vsel %vm1486_vm0, %v11496_v0, 0  ;;  %v11538_v0 = vld [vmem:[%s11669_s15 + $0xf50] sm:$0xff] }
 0x373   : > { %6834 = vmatpush.bf16.xpose.msrb.mxu3 %v6828_v55  ;;  %v11501_v55 = vld [vmem:[%s11669_s15 + $0xe28] sm:$0xff]  ;;  %v6870_v58 = vsel %vm1486_vm0, %v11497_v54, 0  ;;  %v6915_v9 = vsel %vm1486_vm0, %v11500_v1, 0  ;;  %v11542_v1 = vld [vmem:[%s11669_s15 + $0xf70] sm:$0xff] }
 0x374   : > { %v5831_v50 = vpop.f32.mrf.mxu2  ;;  %v5737_v52 = vpop.f32.mrf.mxu0  ;;  %v6918_v59 = vsel %vm1486_vm0, %v11501_v55, 0 }
 0x375   : > { %v5879_v51 = vpop.f32.mrf.mxu3  ;;  %8470 = vst.msk [vmem:[%s11921_s22 + $0xb4] sm:$0x3] %vm8379_vm1, %v5831_v50  ;;  %v5785_v53 = vpop.f32.mrf.mxu1  ;;  %v11539_v50 = vld [vmem:[%s11669_s15 + $0xf58] sm:$0xff] }
 0x376   : > { %8471 = vst.msk [vmem:[%s11921_s22 + $0xb6] sm:$0x3] %vm8379_vm1, %v5879_v51  ;;  %v11543_v51 = vld [vmem:[%s11669_s15 + $0xf78] sm:$0xff] }
 0x378   : > { %6691 = vmatpush.bf16.xpose.msrb.mxu0 %v6681_v2  ;;  %v11504_v2 = vld [vmem:[%s11669_s15 + $0xe40] sm:$0xff] }
 0x379   : > { %6739 = vmatpush.bf16.xpose.msrb.mxu1 %v6729_v3  ;;  %v11508_v3 = vld [vmem:[%s11669_s15 + $0xe60] sm:$0xff]  ;;  %v6963_v10 = vsel %vm1486_vm0, %v11504_v2, 0  ;;  %v286_v2 = vld [vmem:[%s11715_s18 + $0x74] sm:$0x1] }
 0x37a   : > { %6787 = vmatpush.bf16.xpose.msrb.mxu2 %v6777_v4  ;;  %v11515_v4 = vld [vmem:[%s11669_s15 + $0xe98] sm:$0xff]  ;;  %v7011_v11 = vsel %vm1486_vm0, %v11508_v3, 0  ;;  %v287_v3 = vld [vmem:[%s11715_s18 + $0x75] sm:$0x1] }
 0x37b   : > { %6835 = vmatpush.bf16.xpose.msrb.mxu3 %v6825_v5  ;;  %v11519_v5 = vld [vmem:[%s11669_s15 + $0xeb8] sm:$0xff]  ;;  %v7068_v12 = vsel %vm1486_vm0, %v11515_v4, 0  ;;  %v288_v4 = vld [vmem:[%s11715_s18 + $0x76] sm:$0x1] }
 0x37c   : > { %v5833_v62 = vpop.f32.mrf.mxu2  ;;  %v7116_v13 = vsel %vm1486_vm0, %v11519_v5, 0  ;;  %v289_v5 = vld [vmem:[%s11715_s18 + $0x77] sm:$0x1] }
 0x37d   : > { %v5881_v63 = vpop.f32.mrf.mxu3 }
 0x37e   : > { %v11534_v63 = vld [vmem:[%s11669_s15 + $0xf30] sm:$0xff] }
 0x380   : > { %6692 = vmatpush.bf16.xpose.msrb.mxu0 %v6678_v14  ;;  %v7164_v14 = vsel %vm1486_vm0, %v11523_v6, 0 }
 0x381   : > { %6740 = vmatpush.bf16.xpose.msrb.mxu1 %v6726_v15  ;;  %v7212_v15 = vsel %vm1486_vm0, %v11527_v7, 0  ;;  %v7305_v7 = vsel %vm1486_vm0, %v11534_v63, 0 }
 0x382   : > { %6788 = vmatpush.bf16.xpose.msrb.mxu2 %v6774_v16  ;;  %v11514_v16 = vld [vmem:[%s11669_s15 + $0xe90] sm:$0xff] }
 0x383   : > { %6836 = vmatpush.bf16.xpose.msrb.mxu3 %v6822_v17  ;;  %v7065_v26 = vsel %vm1486_vm0, %v11514_v16, 0  ;;  %v11537_v16 = vld [vmem:[%s11669_s15 + $0xf48] sm:$0xff] }
 0x388   : > { %6693 = vmatpush.bf16.xpose.msrb.mxu0 %v6675_v28  ;;  %v7161_v28 = vsel %vm1486_vm0, %v11522_v20, 0  ;;  %v7350_v20 = vsel %vm1486_vm0, %v11537_v16, 0 }
 0x389   : > { %6741 = vmatpush.bf16.xpose.msrb.mxu1 %v6723_v29  ;;  %v7209_v29 = vsel %vm1486_vm0, %v11526_v21, 0 }
 0x38a   : > { %6789 = vmatpush.bf16.xpose.msrb.mxu2 %v6771_v30 }
 0x38b   : > { %6837 = vmatpush.bf16.xpose.msrb.mxu3 %v6819_v31 }
 0x38c   : > { %v5927_v17 = vpop.f32.mrf.mxu0 }
 0x38d   : > { %v5975_v18 = vpop.f32.mrf.mxu1  ;;  %8472 = vst.msk [vmem:[%s11921_s22 + $0xb8] sm:$0x3] %vm8379_vm1, %v5927_v17  ;;  %v11541_v17 = vld [vmem:[%s11669_s15 + $0xf68] sm:$0xff] }
 0x38e   : > { %8473 = vst.msk [vmem:[%s11921_s22 + $0xba] sm:$0x3] %vm8379_vm1, %v5975_v18  ;;  %v7398_v21 = vsel %vm1486_vm0, %v11541_v17, 0 }
 0x38f   : > { %10449 = vmatmul.msk.bf16.vlgmr.msrb.gmra.mxu0 %vm1486_vm0, %v278_v42 }
 0x390   : > { %6882 = vmatpush.bf16.xpose.msra.mxu0 %v6876_v32  ;;  %10466 = vmatmul.msk.bf16.vlgmr.msrb.gmra.mxu1 %vm1486_vm0, %v279_v43 }
 0x391   : > { %6930 = vmatpush.bf16.xpose.msra.mxu1 %v6924_v33  ;;  %10483 = vmatmul.msk.bf16.vlgmr.msrb.gmra.mxu2 %vm1486_vm0, %v280_v44  ;;  %v11512_v44 = vld [vmem:[%s11669_s15 + $0xe80] sm:$0xff] }
 0x392   : > { %6978 = vmatpush.bf16.xpose.msra.mxu2 %v6972_v34  ;;  %10500 = vmatmul.msk.bf16.vlgmr.msrb.gmra.mxu3 %vm1486_vm0, %v281_v45  ;;  %v11513_v34 = vld [vmem:[%s11669_s15 + $0xe88] sm:$0xff]  ;;  %v11516_v45 = vld [vmem:[%s11669_s15 + $0xea0] sm:$0xff]  ;;  %v7059_v52 = vsel %vm1486_vm0, %v11512_v44, 0  ;;  %v11554_v44 = vld [vmem:[%s11669_s15 + $0xfd0] sm:$0xff] }
 0x393   : > { %7026 = vmatpush.bf16.xpose.msra.mxu3 %v7020_v35  ;;  %v11517_v35 = vld [vmem:[%s11669_s15 + $0xea8] sm:$0xff]  ;;  %v7062_v38 = vsel %vm1486_vm0, %v11513_v34, 0  ;;  %v7107_v53 = vsel %vm1486_vm0, %v11516_v45, 0  ;;  %v11558_v45 = vld [vmem:[%s11669_s15 + $0xff0] sm:$0xff] }
 0x394   : > { %v6023_v30 = vpop.f32.mrf.mxu2  ;;  %v5929_v32 = vpop.f32.mrf.mxu0  ;;  %v7110_v39 = vsel %vm1486_vm0, %v11517_v35, 0 }
 0x395   : > { %v6071_v31 = vpop.f32.mrf.mxu3  ;;  %8474 = vst.msk [vmem:[%s11921_s22 + $0xbc] sm:$0x3] %vm8379_vm1, %v6023_v30  ;;  %v5977_v33 = vpop.f32.mrf.mxu1  ;;  %v11555_v30 = vld [vmem:[%s11669_s15 + $0xfd8] sm:$0xff] }
 0x396   : > { %8475 = vst.msk [vmem:[%s11921_s22 + $0xbe] sm:$0x3] %vm8379_vm1, %v6071_v31  ;;  %v11559_v31 = vld [vmem:[%s11669_s15 + $0xff8] sm:$0xff] }
 0x398   : > { %6883 = vmatpush.bf16.xpose.msra.mxu0 %v6873_v46  ;;  %v11520_v46 = vld [vmem:[%s11669_s15 + $0xec0] sm:$0xff] }
 0x399   : > { %6931 = vmatpush.bf16.xpose.msra.mxu1 %v6921_v47  ;;  %v11524_v47 = vld [vmem:[%s11669_s15 + $0xee0] sm:$0xff]  ;;  %v7155_v54 = vsel %vm1486_vm0, %v11520_v46, 0  ;;  %v290_v46 = vld [vmem:[%s11715_s18 + $0x78] sm:$0x1] }
 0x39a   : > { %6979 = vmatpush.bf16.xpose.msra.mxu2 %v6969_v48  ;;  %v11531_v48 = vld [vmem:[%s11669_s15 + $0xf18] sm:$0xff]  ;;  %v7203_v55 = vsel %vm1486_vm0, %v11524_v47, 0 }
 0x39b   : > { %7027 = vmatpush.bf16.xpose.msra.mxu3 %v7017_v49  ;;  %v11535_v49 = vld [vmem:[%s11669_s15 + $0xf38] sm:$0xff]  ;;  %v7260_v56 = vsel %vm1486_vm0, %v11531_v48, 0 }
 0x39c   : > { %v6025_v42 = vpop.f32.mrf.mxu2  ;;  %v7308_v57 = vsel %vm1486_vm0, %v11535_v49, 0  ;;  %v291_v47 = vld [vmem:[%s11715_s18 + $0x79] sm:$0x1]  ;;  %v292_v48 = vld [vmem:[%s11715_s18 + $0x7a] sm:$0x1] }
 0x39d   : > { %v6073_v43 = vpop.f32.mrf.mxu3  ;;  %v293_v49 = vld [vmem:[%s11715_s18 + $0x7b] sm:$0x1] }
 0x39e   : > { %v11550_v43 = vld [vmem:[%s11669_s15 + $0xfb0] sm:$0xff] }
 0x3a0   : > { %6884 = vmatpush.bf16.xpose.msra.mxu0 %v6870_v58  ;;  %v7356_v58 = vsel %vm1486_vm0, %v11539_v50, 0 }
 0x3a1   : > { %6932 = vmatpush.bf16.xpose.msra.mxu1 %v6918_v59  ;;  %v7404_v59 = vsel %vm1486_vm0, %v11543_v51, 0  ;;  %v7497_v51 = vsel %vm1486_vm0, %v11550_v43, 0 }
 0x3a2   : > { %6980 = vmatpush.bf16.xpose.msra.mxu2 %v6966_v60  ;;  %v11530_v60 = vld [vmem:[%s11669_s15 + $0xf10] sm:$0xff] }
 0x3a3   : > { %7028 = vmatpush.bf16.xpose.msra.mxu3 %v7014_v61  ;;  %v7257_v6 = vsel %vm1486_vm0, %v11530_v60, 0  ;;  %v11553_v60 = vld [vmem:[%s11669_s15 + $0xfc8] sm:$0xff] }
 0x3a8   : > { %6885 = vmatpush.bf16.xpose.msra.mxu0 %v6867_v8  ;;  %v7353_v8 = vsel %vm1486_vm0, %v11538_v0, 0  ;;  %v7542_v0 = vsel %vm1486_vm0, %v11553_v60, 0 }
 0x3a9   : > { %6933 = vmatpush.bf16.xpose.msra.mxu1 %v6915_v9  ;;  %v7401_v9 = vsel %vm1486_vm0, %v11542_v1, 0 }
 0x3aa   : > { %6981 = vmatpush.bf16.xpose.msra.mxu2 %v6963_v10 }
 0x3ab   : > { %7029 = vmatpush.bf16.xpose.msra.mxu3 %v7011_v11 }
 0x3ac   : > { %v6119_v61 = vpop.f32.mrf.mxu0 }
 0x3ad   : > { %v6167_v62 = vpop.f32.mrf.mxu1  ;;  %8476 = vst.msk [vmem:[%s11921_s22 + $0xc0] sm:$0x3] %vm8379_vm1, %v6119_v61  ;;  %v11557_v61 = vld [vmem:[%s11669_s15 + $0xfe8] sm:$0xff] }
 0x3ae   : > { %8477 = vst.msk [vmem:[%s11921_s22 + $0xc2] sm:$0x3] %vm8379_vm1, %v6167_v62  ;;  %v7590_v1 = vsel %vm1486_vm0, %v11557_v61, 0 }
 0x3af   : > { %10517 = vmatmul.msk.bf16.vlgmr.msra.gmra.mxu0 %vm1486_vm0, %v282_v22 }
 0x3b0   : > { %7074 = vmatpush.bf16.xpose.msrb.mxu0 %v7068_v12  ;;  %10534 = vmatmul.msk.bf16.vlgmr.msra.gmra.mxu1 %vm1486_vm0, %v283_v23 }
 0x3b1   : > { %7122 = vmatpush.bf16.xpose.msrb.mxu1 %v7116_v13  ;;  %10551 = vmatmul.msk.bf16.vlgmr.msra.gmra.mxu2 %vm1486_vm0, %v284_v24  ;;  %v11528_v24 = vld [vmem:[%s11669_s15 + $0xf00] sm:$0xff] }
 0x3b2   : > { %7170 = vmatpush.bf16.xpose.msrb.mxu2 %v7164_v14  ;;  %10568 = vmatmul.msk.bf16.vlgmr.msra.gmra.mxu3 %vm1486_vm0, %v285_v25  ;;  %v11529_v14 = vld [vmem:[%s11669_s15 + $0xf08] sm:$0xff]  ;;  %v11532_v25 = vld [vmem:[%s11669_s15 + $0xf20] sm:$0xff]  ;;  %v7251_v32 = vsel %vm1486_vm0, %v11528_v24, 0  ;;  %v11570_v24 = vld [vmem:[%s11669_s15 + $0x1050] sm:$0xff] }
 0x3b3   : > { %7218 = vmatpush.bf16.xpose.msrb.mxu3 %v7212_v15  ;;  %v11533_v15 = vld [vmem:[%s11669_s15 + $0xf28] sm:$0xff]  ;;  %v7254_v18 = vsel %vm1486_vm0, %v11529_v14, 0  ;;  %v7299_v33 = vsel %vm1486_vm0, %v11532_v25, 0  ;;  %v11574_v25 = vld [vmem:[%s11669_s15 + $0x1070] sm:$0xff] }
 0x3b4   : > { %v6215_v10 = vpop.f32.mrf.mxu2  ;;  %v6121_v12 = vpop.f32.mrf.mxu0  ;;  %v7302_v19 = vsel %vm1486_vm0, %v11533_v15, 0 }
 0x3b5   : > { %v6263_v11 = vpop.f32.mrf.mxu3  ;;  %8478 = vst.msk [vmem:[%s11921_s22 + $0xc4] sm:$0x3] %vm8379_vm1, %v6215_v10  ;;  %v6169_v13 = vpop.f32.mrf.mxu1  ;;  %v11571_v10 = vld [vmem:[%s11669_s15 + $0x1058] sm:$0xff] }
 0x3b6   : > { %8479 = vst.msk [vmem:[%s11921_s22 + $0xc6] sm:$0x3] %vm8379_vm1, %v6263_v11  ;;  %v11575_v11 = vld [vmem:[%s11669_s15 + $0x1078] sm:$0xff] }
 0x3b8   : > { %7075 = vmatpush.bf16.xpose.msrb.mxu0 %v7065_v26  ;;  %v11536_v26 = vld [vmem:[%s11669_s15 + $0xf40] sm:$0xff] }
 0x3b9   : > { %7123 = vmatpush.bf16.xpose.msrb.mxu1 %v7113_v27  ;;  %v11540_v27 = vld [vmem:[%s11669_s15 + $0xf60] sm:$0xff]  ;;  %v7347_v34 = vsel %vm1486_vm0, %v11536_v26, 0  ;;  %v294_v26 = vld [vmem:[%s11715_s18 + $0x7c] sm:$0x1] }
 0x3ba   : > { %7171 = vmatpush.bf16.xpose.msrb.mxu2 %v7161_v28  ;;  %v11547_v28 = vld [vmem:[%s11669_s15 + $0xf98] sm:$0xff]  ;;  %v7395_v35 = vsel %vm1486_vm0, %v11540_v27, 0 }
 0x3bb   : > { %7219 = vmatpush.bf16.xpose.msrb.mxu3 %v7209_v29  ;;  %v11551_v29 = vld [vmem:[%s11669_s15 + $0xfb8] sm:$0xff]  ;;  %v7452_v36 = vsel %vm1486_vm0, %v11547_v28, 0 }
 0x3bc   : > { %v6217_v22 = vpop.f32.mrf.mxu2  ;;  %v7500_v37 = vsel %vm1486_vm0, %v11551_v29, 0  ;;  %v295_v27 = vld [vmem:[%s11715_s18 + $0x7d] sm:$0x1]  ;;  %v296_v28 = vld [vmem:[%s11715_s18 + $0x7e] sm:$0x1] }
 0x3bd   : > { %v6265_v23 = vpop.f32.mrf.mxu3  ;;  %v297_v29 = vld [vmem:[%s11715_s18 + $0x7f] sm:$0x1] }
 0x3be   : > { %v11566_v23 = vld [vmem:[%s11669_s15 + $0x1030] sm:$0xff] }
 0x3c0   : > { %7076 = vmatpush.bf16.xpose.msrb.mxu0 %v7062_v38  ;;  %v7548_v38 = vsel %vm1486_vm0, %v11555_v30, 0 }
 0x3c1   : > { %7124 = vmatpush.bf16.xpose.msrb.mxu1 %v7110_v39  ;;  %v7596_v39 = vsel %vm1486_vm0, %v11559_v31, 0  ;;  %v7689_v31 = vsel %vm1486_vm0, %v11566_v23, 0 }
 0x3c2   : > { %7172 = vmatpush.bf16.xpose.msrb.mxu2 %v7158_v40  ;;  %v11546_v40 = vld [vmem:[%s11669_s15 + $0xf90] sm:$0xff] }
 0x3c3   : > { %7220 = vmatpush.bf16.xpose.msrb.mxu3 %v7206_v41  ;;  %v7449_v50 = vsel %vm1486_vm0, %v11546_v40, 0  ;;  %v11569_v40 = vld [vmem:[%s11669_s15 + $0x1048] sm:$0xff] }
 0x3c8   : > { %7077 = vmatpush.bf16.xpose.msrb.mxu0 %v7059_v52  ;;  %v7545_v52 = vsel %vm1486_vm0, %v11554_v44, 0  ;;  %v7734_v44 = vsel %vm1486_vm0, %v11569_v40, 0 }
 0x3c9   : > { %7125 = vmatpush.bf16.xpose.msrb.mxu1 %v7107_v53  ;;  %v7593_v53 = vsel %vm1486_vm0, %v11558_v45, 0 }
 0x3ca   : > { %7173 = vmatpush.bf16.xpose.msrb.mxu2 %v7155_v54 }
 0x3cb   : > { %7221 = vmatpush.bf16.xpose.msrb.mxu3 %v7203_v55 }
 0x3cc   : > { %v6311_v41 = vpop.f32.mrf.mxu0 }
 0x3cd   : > { %v6359_v42 = vpop.f32.mrf.mxu1  ;;  %8480 = vst.msk [vmem:[%s11921_s22 + $0xc8] sm:$0x3] %vm8379_vm1, %v6311_v41  ;;  %v11573_v41 = vld [vmem:[%s11669_s15 + $0x1068] sm:$0xff] }
 0x3ce   : > { %8481 = vst.msk [vmem:[%s11921_s22 + $0xca] sm:$0x3] %vm8379_vm1, %v6359_v42  ;;  %v7782_v45 = vsel %vm1486_vm0, %v11573_v41, 0 }
 0x3cf   : > { %10585 = vmatmul.msk.bf16.vlgmr.msrb.gmra.mxu0 %vm1486_vm0, %v286_v2 }
 0x3d0   : > { %7266 = vmatpush.bf16.xpose.msra.mxu0 %v7260_v56  ;;  %10602 = vmatmul.msk.bf16.vlgmr.msrb.gmra.mxu1 %vm1486_vm0, %v287_v3 }
 0x3d1   : > { %7314 = vmatpush.bf16.xpose.msra.mxu1 %v7308_v57  ;;  %10619 = vmatmul.msk.bf16.vlgmr.msrb.gmra.mxu2 %vm1486_vm0, %v288_v4  ;;  %v11544_v4 = vld [vmem:[%s11669_s15 + $0xf80] sm:$0xff] }
 0x3d2   : > { %7362 = vmatpush.bf16.xpose.msra.mxu2 %v7356_v58  ;;  %10636 = vmatmul.msk.bf16.vlgmr.msrb.gmra.mxu3 %vm1486_vm0, %v289_v5  ;;  %v11545_v58 = vld [vmem:[%s11669_s15 + $0xf88] sm:$0xff]  ;;  %v11548_v5 = vld [vmem:[%s11669_s15 + $0xfa0] sm:$0xff]  ;;  %v7443_v12 = vsel %vm1486_vm0, %v11544_v4, 0  ;;  %v11586_v4 = vld [vmem:[%s11669_s15 + $0x10d0] sm:$0xff] }
 0x3d3   : > { %7410 = vmatpush.bf16.xpose.msra.mxu3 %v7404_v59  ;;  %v11549_v59 = vld [vmem:[%s11669_s15 + $0xfa8] sm:$0xff]  ;;  %v7446_v62 = vsel %vm1486_vm0, %v11545_v58, 0  ;;  %v7491_v13 = vsel %vm1486_vm0, %v11548_v5, 0  ;;  %v11590_v5 = vld [vmem:[%s11669_s15 + $0x10f0] sm:$0xff] }
 0x3d4   : > { %v6407_v54 = vpop.f32.mrf.mxu2  ;;  %v6313_v56 = vpop.f32.mrf.mxu0  ;;  %v7494_v63 = vsel %vm1486_vm0, %v11549_v59, 0 }
 0x3d5   : > { %v6455_v55 = vpop.f32.mrf.mxu3  ;;  %8482 = vst.msk [vmem:[%s11921_s22 + $0xcc] sm:$0x3] %vm8379_vm1, %v6407_v54  ;;  %v6361_v57 = vpop.f32.mrf.mxu1  ;;  %v11587_v54 = vld [vmem:[%s11669_s15 + $0x10d8] sm:$0xff] }
 0x3d6   : > { %8483 = vst.msk [vmem:[%s11921_s22 + $0xce] sm:$0x3] %vm8379_vm1, %v6455_v55  ;;  %v11591_v55 = vld [vmem:[%s11669_s15 + $0x10f8] sm:$0xff] }
 0x3d8   : > { %7267 = vmatpush.bf16.xpose.msra.mxu0 %v7257_v6  ;;  %v11552_v6 = vld [vmem:[%s11669_s15 + $0xfc0] sm:$0xff] }
 0x3d9   : > { %7315 = vmatpush.bf16.xpose.msra.mxu1 %v7305_v7  ;;  %v11556_v7 = vld [vmem:[%s11669_s15 + $0xfe0] sm:$0xff]  ;;  %v7539_v14 = vsel %vm1486_vm0, %v11552_v6, 0 }
 0x3da   : > { %7363 = vmatpush.bf16.xpose.msra.mxu2 %v7353_v8  ;;  %v11563_v8 = vld [vmem:[%s11669_s15 + $0x1018] sm:$0xff]  ;;  %v7587_v15 = vsel %vm1486_vm0, %v11556_v7, 0  ;;  %v298_v6 = vld [vmem:[%s11715_s18 + $0x80] sm:$0x1]  ;;  %v299_v7 = vld [vmem:[%s11715_s18 + $0x81] sm:$0x1] }
 0x3db   : > { %7411 = vmatpush.bf16.xpose.msra.mxu3 %v7401_v9  ;;  %v11567_v9 = vld [vmem:[%s11669_s15 + $0x1038] sm:$0xff]  ;;  %v7644_v16 = vsel %vm1486_vm0, %v11563_v8, 0  ;;  %v300_v8 = vld [vmem:[%s11715_s18 + $0x82] sm:$0x1] }
 0x3dc   : > { %v6409_v2 = vpop.f32.mrf.mxu2  ;;  %v7692_v17 = vsel %vm1486_vm0, %v11567_v9, 0  ;;  %v301_v9 = vld [vmem:[%s11715_s18 + $0x83] sm:$0x1] }
 0x3dd   : > { %v6457_v3 = vpop.f32.mrf.mxu3 }
 0x3de   : > { %v11582_v3 = vld [vmem:[%s11669_s15 + $0x10b0] sm:$0xff] }
 0x3e0   : > { %7268 = vmatpush.bf16.xpose.msra.mxu0 %v7254_v18  ;;  %v7740_v18 = vsel %vm1486_vm0, %v11571_v10, 0 }
 0x3e1   : > { %7316 = vmatpush.bf16.xpose.msra.mxu1 %v7302_v19  ;;  %v7788_v19 = vsel %vm1486_vm0, %v11575_v11, 0  ;;  %v7881_v11 = vsel %vm1486_vm0, %v11582_v3, 0 }
 0x3e2   : > { %7364 = vmatpush.bf16.xpose.msra.mxu2 %v7350_v20  ;;  %v11562_v20 = vld [vmem:[%s11669_s15 + $0x1010] sm:$0xff] }
 0x3e3   : > { %7412 = vmatpush.bf16.xpose.msra.mxu3 %v7398_v21  ;;  %v7641_v30 = vsel %vm1486_vm0, %v11562_v20, 0  ;;  %v11585_v20 = vld [vmem:[%s11669_s15 + $0x10c8] sm:$0xff] }
 0x3e8   : > { %7269 = vmatpush.bf16.xpose.msra.mxu0 %v7251_v32  ;;  %v7737_v32 = vsel %vm1486_vm0, %v11570_v24, 0  ;;  %v7926_v24 = vsel %vm1486_vm0, %v11585_v20, 0 }
 0x3e9   : > { %7317 = vmatpush.bf16.xpose.msra.mxu1 %v7299_v33  ;;  %v7785_v33 = vsel %vm1486_vm0, %v11574_v25, 0 }
 0x3ea   : > { %7365 = vmatpush.bf16.xpose.msra.mxu2 %v7347_v34 }
 0x3eb   : > { %7413 = vmatpush.bf16.xpose.msra.mxu3 %v7395_v35 }
 0x3ec   : > { %v6503_v21 = vpop.f32.mrf.mxu0 }
 0x3ed   : > { %v6551_v22 = vpop.f32.mrf.mxu1  ;;  %8484 = vst.msk [vmem:[%s11921_s22 + $0xd0] sm:$0x3] %vm8379_vm1, %v6503_v21  ;;  %v11589_v21 = vld [vmem:[%s11669_s15 + $0x10e8] sm:$0xff] }
 0x3ee   : > { %8485 = vst.msk [vmem:[%s11921_s22 + $0xd2] sm:$0x3] %vm8379_vm1, %v6551_v22  ;;  %v7974_v25 = vsel %vm1486_vm0, %v11589_v21, 0 }
 0x3ef   : > { %10653 = vmatmul.msk.bf16.vlgmr.msra.gmra.mxu0 %vm1486_vm0, %v290_v46 }
 0x3f0   : > { %7458 = vmatpush.bf16.xpose.msrb.mxu0 %v7452_v36  ;;  %10670 = vmatmul.msk.bf16.vlgmr.msra.gmra.mxu1 %vm1486_vm0, %v291_v47 }
 0x3f1   : > { %7506 = vmatpush.bf16.xpose.msrb.mxu1 %v7500_v37  ;;  %10687 = vmatmul.msk.bf16.vlgmr.msra.gmra.mxu2 %vm1486_vm0, %v292_v48  ;;  %v11560_v48 = vld [vmem:[%s11669_s15 + $0x1000] sm:$0xff] }
 0x3f2   : > { %7554 = vmatpush.bf16.xpose.msrb.mxu2 %v7548_v38  ;;  %10704 = vmatmul.msk.bf16.vlgmr.msra.gmra.mxu3 %vm1486_vm0, %v293_v49  ;;  %v11561_v38 = vld [vmem:[%s11669_s15 + $0x1008] sm:$0xff]  ;;  %v11564_v49 = vld [vmem:[%s11669_s15 + $0x1020] sm:$0xff]  ;;  %v7635_v56 = vsel %vm1486_vm0, %v11560_v48, 0  ;;  %v11602_v48 = vld [vmem:[%s11669_s15 + $0x1150] sm:$0xff] }
 0x3f3   : > { %7602 = vmatpush.bf16.xpose.msrb.mxu3 %v7596_v39  ;;  %v11565_v39 = vld [vmem:[%s11669_s15 + $0x1028] sm:$0xff]  ;;  %v7638_v42 = vsel %vm1486_vm0, %v11561_v38, 0  ;;  %v7683_v57 = vsel %vm1486_vm0, %v11564_v49, 0  ;;  %v11606_v49 = vld [vmem:[%s11669_s15 + $0x1170] sm:$0xff] }
 0x3f4   : > { %v6599_v34 = vpop.f32.mrf.mxu2  ;;  %v6505_v36 = vpop.f32.mrf.mxu0  ;;  %v7686_v43 = vsel %vm1486_vm0, %v11565_v39, 0 }
 0x3f5   : > { %v6647_v35 = vpop.f32.mrf.mxu3  ;;  %8486 = vst.msk [vmem:[%s11921_s22 + $0xd4] sm:$0x3] %vm8379_vm1, %v6599_v34  ;;  %v6553_v37 = vpop.f32.mrf.mxu1  ;;  %v11603_v34 = vld [vmem:[%s11669_s15 + $0x1158] sm:$0xff] }
 0x3f6   : > { %8487 = vst.msk [vmem:[%s11921_s22 + $0xd6] sm:$0x3] %vm8379_vm1, %v6647_v35  ;;  %v11607_v35 = vld [vmem:[%s11669_s15 + $0x1178] sm:$0xff] }
 0x3f8   : > { %7459 = vmatpush.bf16.xpose.msrb.mxu0 %v7449_v50  ;;  %v11568_v50 = vld [vmem:[%s11669_s15 + $0x1040] sm:$0xff] }
 0x3f9   : > { %7507 = vmatpush.bf16.xpose.msrb.mxu1 %v7497_v51  ;;  %v11572_v51 = vld [vmem:[%s11669_s15 + $0x1060] sm:$0xff]  ;;  %v7731_v58 = vsel %vm1486_vm0, %v11568_v50, 0 }
 0x3fa   : > { %7555 = vmatpush.bf16.xpose.msrb.mxu2 %v7545_v52  ;;  %v11579_v52 = vld [vmem:[%s11669_s15 + $0x1098] sm:$0xff]  ;;  %v7779_v59 = vsel %vm1486_vm0, %v11572_v51, 0  ;;  %v302_v50 = vld [vmem:[%s11715_s18 + $0x84] sm:$0x1]  ;;  %v303_v51 = vld [vmem:[%s11715_s18 + $0x85] sm:$0x1] }
 0x3fb   : > { %7603 = vmatpush.bf16.xpose.msrb.mxu3 %v7593_v53  ;;  %v11583_v53 = vld [vmem:[%s11669_s15 + $0x10b8] sm:$0xff]  ;;  %v7836_v60 = vsel %vm1486_vm0, %v11579_v52, 0  ;;  %v304_v52 = vld [vmem:[%s11715_s18 + $0x86] sm:$0x1] }
 0x3fc   : > { %v6601_v46 = vpop.f32.mrf.mxu2  ;;  %v7884_v61 = vsel %vm1486_vm0, %v11583_v53, 0  ;;  %v305_v53 = vld [vmem:[%s11715_s18 + $0x87] sm:$0x1] }
 0x3fd   : > { %v6649_v47 = vpop.f32.mrf.mxu3 }
 0x3fe   : > { %v11598_v47 = vld [vmem:[%s11669_s15 + $0x1130] sm:$0xff] }
 0x400   : > { %7460 = vmatpush.bf16.xpose.msrb.mxu0 %v7446_v62  ;;  %v7932_v62 = vsel %vm1486_vm0, %v11587_v54, 0 }
 0x401   : > { %7508 = vmatpush.bf16.xpose.msrb.mxu1 %v7494_v63  ;;  %v7980_v63 = vsel %vm1486_vm0, %v11591_v55, 0  ;;  %v8073_v55 = vsel %vm1486_vm0, %v11598_v47, 0 }
 0x402   : > { %7556 = vmatpush.bf16.xpose.msrb.mxu2 %v7542_v0  ;;  %v11578_v0 = vld [vmem:[%s11669_s15 + $0x1090] sm:$0xff] }
 0x403   : > { %7604 = vmatpush.bf16.xpose.msrb.mxu3 %v7590_v1  ;;  %v7833_v10 = vsel %vm1486_vm0, %v11578_v0, 0  ;;  %v11601_v0 = vld [vmem:[%s11669_s15 + $0x1148] sm:$0xff] }
 0x408   : > { %7461 = vmatpush.bf16.xpose.msrb.mxu0 %v7443_v12  ;;  %v7929_v12 = vsel %vm1486_vm0, %v11586_v4, 0  ;;  %v8118_v4 = vsel %vm1486_vm0, %v11601_v0, 0  ;;  %v312_v0 = vld [vmem:[%s11715_s18 + $0x8e] sm:$0x1] }
 0x409   : > { %7509 = vmatpush.bf16.xpose.msrb.mxu1 %v7491_v13  ;;  %v7977_v13 = vsel %vm1486_vm0, %v11590_v5, 0 }
 0x40a   : > { %7557 = vmatpush.bf16.xpose.msrb.mxu2 %v7539_v14 }
 0x40b   : > { %7605 = vmatpush.bf16.xpose.msrb.mxu3 %v7587_v15 }
 0x40c   : > { %v6695_v1 = vpop.f32.mrf.mxu0 }
 0x40d   : > { %v6743_v2 = vpop.f32.mrf.mxu1  ;;  %8488 = vst.msk [vmem:[%s11921_s22 + $0xd8] sm:$0x3] %vm8379_vm1, %v6695_v1  ;;  %v11605_v1 = vld [vmem:[%s11669_s15 + $0x1168] sm:$0xff] }
 0x40e   : > { %8489 = vst.msk [vmem:[%s11921_s22 + $0xda] sm:$0x3] %vm8379_vm1, %v6743_v2  ;;  %v8166_v5 = vsel %vm1486_vm0, %v11605_v1, 0  ;;  %v313_v1 = vld [vmem:[%s11715_s18 + $0x8f] sm:$0x1] }
 0x40f   : > { %10721 = vmatmul.msk.bf16.vlgmr.msrb.gmra.mxu0 %vm1486_vm0, %v294_v26 }
 0x410   : > { %7650 = vmatpush.bf16.xpose.msra.mxu0 %v7644_v16  ;;  %10738 = vmatmul.msk.bf16.vlgmr.msrb.gmra.mxu1 %vm1486_vm0, %v295_v27 }
 0x411   : > { %7698 = vmatpush.bf16.xpose.msra.mxu1 %v7692_v17  ;;  %10755 = vmatmul.msk.bf16.vlgmr.msrb.gmra.mxu2 %vm1486_vm0, %v296_v28  ;;  %v11576_v28 = vld [vmem:[%s11669_s15 + $0x1080] sm:$0xff] }
 0x412   : > { %7746 = vmatpush.bf16.xpose.msra.mxu2 %v7740_v18  ;;  %10772 = vmatmul.msk.bf16.vlgmr.msrb.gmra.mxu3 %vm1486_vm0, %v297_v29  ;;  %v11577_v18 = vld [vmem:[%s11669_s15 + $0x1088] sm:$0xff]  ;;  %v11580_v29 = vld [vmem:[%s11669_s15 + $0x10a0] sm:$0xff]  ;;  %v7827_v36 = vsel %vm1486_vm0, %v11576_v28, 0  ;;  %v11618_v28 = vld [vmem:[%s11669_s15 + $0x11d0] sm:$0xff] }
 0x413   : > { %7794 = vmatpush.bf16.xpose.msra.mxu3 %v7788_v19  ;;  %v11581_v19 = vld [vmem:[%s11669_s15 + $0x10a8] sm:$0xff]  ;;  %v7830_v22 = vsel %vm1486_vm0, %v11577_v18, 0  ;;  %v7875_v37 = vsel %vm1486_vm0, %v11580_v29, 0  ;;  %v11622_v29 = vld [vmem:[%s11669_s15 + $0x11f0] sm:$0xff] }
 0x414   : > { %v6791_v14 = vpop.f32.mrf.mxu2  ;;  %v6697_v16 = vpop.f32.mrf.mxu0  ;;  %v7878_v23 = vsel %vm1486_vm0, %v11581_v19, 0 }
 0x415   : > { %v6839_v15 = vpop.f32.mrf.mxu3  ;;  %8490 = vst.msk [vmem:[%s11921_s22 + $0xdc] sm:$0x3] %vm8379_vm1, %v6791_v14  ;;  %v6745_v17 = vpop.f32.mrf.mxu1  ;;  %v11619_v14 = vld [vmem:[%s11669_s15 + $0x11d8] sm:$0xff] }
 0x416   : > { %8491 = vst.msk [vmem:[%s11921_s22 + $0xde] sm:$0x3] %vm8379_vm1, %v6839_v15  ;;  %v11623_v15 = vld [vmem:[%s11669_s15 + $0x11f8] sm:$0xff] }
 0x418   : > { %7651 = vmatpush.bf16.xpose.msra.mxu0 %v7641_v30  ;;  %v11584_v30 = vld [vmem:[%s11669_s15 + $0x10c0] sm:$0xff] }
 0x419   : > { %7699 = vmatpush.bf16.xpose.msra.mxu1 %v7689_v31  ;;  %v11588_v31 = vld [vmem:[%s11669_s15 + $0x10e0] sm:$0xff]  ;;  %v7923_v38 = vsel %vm1486_vm0, %v11584_v30, 0  ;;  %v306_v30 = vld [vmem:[%s11715_s18 + $0x88] sm:$0x1] }
 0x41a   : > { %7747 = vmatpush.bf16.xpose.msra.mxu2 %v7737_v32  ;;  %v11595_v32 = vld [vmem:[%s11669_s15 + $0x1118] sm:$0xff]  ;;  %v7971_v39 = vsel %vm1486_vm0, %v11588_v31, 0  ;;  %v307_v31 = vld [vmem:[%s11715_s18 + $0x89] sm:$0x1] }
 0x41b   : > { %7795 = vmatpush.bf16.xpose.msra.mxu3 %v7785_v33  ;;  %v11599_v33 = vld [vmem:[%s11669_s15 + $0x1138] sm:$0xff]  ;;  %v8028_v40 = vsel %vm1486_vm0, %v11595_v32, 0  ;;  %v308_v32 = vld [vmem:[%s11715_s18 + $0x8a] sm:$0x1] }
 0x41c   : > { %v6793_v26 = vpop.f32.mrf.mxu2  ;;  %v8076_v41 = vsel %vm1486_vm0, %v11599_v33, 0  ;;  %v309_v33 = vld [vmem:[%s11715_s18 + $0x8b] sm:$0x1] }
 0x41d   : > { %v6841_v27 = vpop.f32.mrf.mxu3 }
 0x41e   : > { %v11614_v27 = vld [vmem:[%s11669_s15 + $0x11b0] sm:$0xff] }
 0x420   : > { %7652 = vmatpush.bf16.xpose.msra.mxu0 %v7638_v42  ;;  %v8124_v42 = vsel %vm1486_vm0, %v11603_v34, 0 }
 0x421   : > { %7700 = vmatpush.bf16.xpose.msra.mxu1 %v7686_v43  ;;  %v8172_v43 = vsel %vm1486_vm0, %v11607_v35, 0  ;;  %v8265_v35 = vsel %vm1486_vm0, %v11614_v27, 0 }
 0x422   : > { %7748 = vmatpush.bf16.xpose.msra.mxu2 %v7734_v44  ;;  %v11594_v44 = vld [vmem:[%s11669_s15 + $0x1110] sm:$0xff] }
 0x423   : > { %7796 = vmatpush.bf16.xpose.msra.mxu3 %v7782_v45  ;;  %v8025_v54 = vsel %vm1486_vm0, %v11594_v44, 0  ;;  %v11617_v44 = vld [vmem:[%s11669_s15 + $0x11c8] sm:$0xff] }
 0x428   : > { %7653 = vmatpush.bf16.xpose.msra.mxu0 %v7635_v56  ;;  %v8121_v56 = vsel %vm1486_vm0, %v11602_v48, 0  ;;  %v8310_v48 = vsel %vm1486_vm0, %v11617_v44, 0 }
 0x429   : > { %7701 = vmatpush.bf16.xpose.msra.mxu1 %v7683_v57  ;;  %v8169_v57 = vsel %vm1486_vm0, %v11606_v49, 0 }
 0x42a   : > { %7749 = vmatpush.bf16.xpose.msra.mxu2 %v7731_v58 }
 0x42b   : > { %7797 = vmatpush.bf16.xpose.msra.mxu3 %v7779_v59 }
 0x42c   : > { %v6887_v45 = vpop.f32.mrf.mxu0 }
 0x42d   : > { %v6935_v46 = vpop.f32.mrf.mxu1  ;;  %8492 = vst.msk [vmem:[%s11921_s22 + $0xe0] sm:$0x3] %vm8379_vm1, %v6887_v45  ;;  %v11621_v45 = vld [vmem:[%s11669_s15 + $0x11e8] sm:$0xff] }
 0x42e   : > { %8493 = vst.msk [vmem:[%s11921_s22 + $0xe2] sm:$0x3] %vm8379_vm1, %v6935_v46  ;;  %v8358_v49 = vsel %vm1486_vm0, %v11621_v45, 0 }
 0x42f   : > { %10789 = vmatmul.msk.bf16.vlgmr.msra.gmra.mxu0 %vm1486_vm0, %v298_v6 }
 0x430   : > { %7842 = vmatpush.bf16.xpose.msrb.mxu0 %v7836_v60  ;;  %10806 = vmatmul.msk.bf16.vlgmr.msra.gmra.mxu1 %vm1486_vm0, %v299_v7 }
 0x431   : > { %7890 = vmatpush.bf16.xpose.msrb.mxu1 %v7884_v61  ;;  %10823 = vmatmul.msk.bf16.vlgmr.msra.gmra.mxu2 %vm1486_vm0, %v300_v8  ;;  %v11592_v8 = vld [vmem:[%s11669_s15 + $0x1100] sm:$0xff] }
 0x432   : > { %7938 = vmatpush.bf16.xpose.msrb.mxu2 %v7932_v62  ;;  %10840 = vmatmul.msk.bf16.vlgmr.msra.gmra.mxu3 %vm1486_vm0, %v301_v9  ;;  %v11593_v62 = vld [vmem:[%s11669_s15 + $0x1108] sm:$0xff]  ;;  %v11596_v9 = vld [vmem:[%s11669_s15 + $0x1120] sm:$0xff]  ;;  %v8019_v16 = vsel %vm1486_vm0, %v11592_v8, 0 }
 0x433   : > { %7986 = vmatpush.bf16.xpose.msrb.mxu3 %v7980_v63  ;;  %v11597_v63 = vld [vmem:[%s11669_s15 + $0x1128] sm:$0xff]  ;;  %v8022_v2 = vsel %vm1486_vm0, %v11593_v62, 0  ;;  %v8067_v17 = vsel %vm1486_vm0, %v11596_v9, 0 }
 0x434   : > { %v6983_v58 = vpop.f32.mrf.mxu2  ;;  %v6889_v60 = vpop.f32.mrf.mxu0  ;;  %v8070_v3 = vsel %vm1486_vm0, %v11597_v63, 0  ;;  %v310_v62 = vld [vmem:[%s11715_s18 + $0x8c] sm:$0x1]  ;;  %v311_v63 = vld [vmem:[%s11715_s18 + $0x8d] sm:$0x1] }
 0x435   : > { %v7031_v59 = vpop.f32.mrf.mxu3  ;;  %8494 = vst.msk [vmem:[%s11921_s22 + $0xe4] sm:$0x3] %vm8379_vm1, %v6983_v58  ;;  %v6937_v61 = vpop.f32.mrf.mxu1 }
 0x436   : > { %8495 = vst.msk [vmem:[%s11921_s22 + $0xe6] sm:$0x3] %vm8379_vm1, %v7031_v59 }
 0x438   : > { %7843 = vmatpush.bf16.xpose.msrb.mxu0 %v7833_v10  ;;  %v11600_v10 = vld [vmem:[%s11669_s15 + $0x1140] sm:$0xff] }
 0x439   : > { %7891 = vmatpush.bf16.xpose.msrb.mxu1 %v7881_v11  ;;  %v11604_v11 = vld [vmem:[%s11669_s15 + $0x1160] sm:$0xff]  ;;  %v8115_v18 = vsel %vm1486_vm0, %v11600_v10, 0 }
 0x43a   : > { %7939 = vmatpush.bf16.xpose.msrb.mxu2 %v7929_v12  ;;  %v11611_v12 = vld [vmem:[%s11669_s15 + $0x1198] sm:$0xff]  ;;  %v8163_v19 = vsel %vm1486_vm0, %v11604_v11, 0 }
 0x43b   : > { %7987 = vmatpush.bf16.xpose.msrb.mxu3 %v7977_v13  ;;  %v11615_v13 = vld [vmem:[%s11669_s15 + $0x11b8] sm:$0xff]  ;;  %v8220_v20 = vsel %vm1486_vm0, %v11611_v12, 0 }
 0x43c   : > { %v6985_v6 = vpop.f32.mrf.mxu2  ;;  %v8268_v21 = vsel %vm1486_vm0, %v11615_v13, 0 }
 0x43d   : > { %v7033_v7 = vpop.f32.mrf.mxu3 }
 0x440   : > { %7844 = vmatpush.bf16.xpose.msrb.mxu0 %v7830_v22  ;;  %v8316_v22 = vsel %vm1486_vm0, %v11619_v14, 0 }
 0x441   : > { %7892 = vmatpush.bf16.xpose.msrb.mxu1 %v7878_v23  ;;  %v8364_v23 = vsel %vm1486_vm0, %v11623_v15, 0 }
 0x442   : > { %7940 = vmatpush.bf16.xpose.msrb.mxu2 %v7926_v24  ;;  %v11610_v24 = vld [vmem:[%s11669_s15 + $0x1190] sm:$0xff] }
 0x443   : > { %7988 = vmatpush.bf16.xpose.msrb.mxu3 %v7974_v25  ;;  %v8217_v34 = vsel %vm1486_vm0, %v11610_v24, 0 }
 0x448   : > { %7845 = vmatpush.bf16.xpose.msrb.mxu0 %v7827_v36  ;;  %v8313_v36 = vsel %vm1486_vm0, %v11618_v28, 0 }
 0x449   : > { %7893 = vmatpush.bf16.xpose.msrb.mxu1 %v7875_v37  ;;  %v8361_v37 = vsel %vm1486_vm0, %v11622_v29, 0 }
 0x44a   : > { %7941 = vmatpush.bf16.xpose.msrb.mxu2 %v7923_v38 }
 0x44b   : > { %7989 = vmatpush.bf16.xpose.msrb.mxu3 %v7971_v39 }
 0x44c   : > { %v7079_v25 = vpop.f32.mrf.mxu0 }
 0x44d   : > { %v7127_v26 = vpop.f32.mrf.mxu1  ;;  %8496 = vst.msk [vmem:[%s11921_s22 + $0xe8] sm:$0x3] %vm8379_vm1, %v7079_v25 }
 0x44e   : > { %8497 = vst.msk [vmem:[%s11921_s22 + $0xea] sm:$0x3] %vm8379_vm1, %v7127_v26 }
 0x44f   : > { %10857 = vmatmul.msk.bf16.vlgmr.msrb.gmra.mxu0 %vm1486_vm0, %v302_v50 }
 0x450   : > { %8034 = vmatpush.bf16.xpose.msra.mxu0 %v8028_v40  ;;  %10874 = vmatmul.msk.bf16.vlgmr.msrb.gmra.mxu1 %vm1486_vm0, %v303_v51 }
 0x451   : > { %8082 = vmatpush.bf16.xpose.msra.mxu1 %v8076_v41  ;;  %10891 = vmatmul.msk.bf16.vlgmr.msrb.gmra.mxu2 %vm1486_vm0, %v304_v52  ;;  %v11608_v52 = vld [vmem:[%s11669_s15 + $0x1180] sm:$0xff] }
 0x452   : > { %8130 = vmatpush.bf16.xpose.msra.mxu2 %v8124_v42  ;;  %10908 = vmatmul.msk.bf16.vlgmr.msrb.gmra.mxu3 %vm1486_vm0, %v305_v53  ;;  %v11609_v42 = vld [vmem:[%s11669_s15 + $0x1188] sm:$0xff]  ;;  %v11612_v53 = vld [vmem:[%s11669_s15 + $0x11a0] sm:$0xff] }
 0x453   : > { %8178 = vmatpush.bf16.xpose.msra.mxu3 %v8172_v43  ;;  %v11613_v43 = vld [vmem:[%s11669_s15 + $0x11a8] sm:$0xff]  ;;  %v8214_v46 = vsel %vm1486_vm0, %v11609_v42, 0 }
 0x454   : > { %v7175_v38 = vpop.f32.mrf.mxu2  ;;  %v7081_v40 = vpop.f32.mrf.mxu0  ;;  %v8262_v47 = vsel %vm1486_vm0, %v11613_v43, 0 }
 0x455   : > { %v7223_v39 = vpop.f32.mrf.mxu3  ;;  %8498 = vst.msk [vmem:[%s11921_s22 + $0xec] sm:$0x3] %vm8379_vm1, %v7175_v38  ;;  %v7129_v41 = vpop.f32.mrf.mxu1 }
 0x456   : > { %8499 = vst.msk [vmem:[%s11921_s22 + $0xee] sm:$0x3] %vm8379_vm1, %v7223_v39 }
 0x458   : > { %8035 = vmatpush.bf16.xpose.msra.mxu0 %v8025_v54  ;;  %v11616_v54 = vld [vmem:[%s11669_s15 + $0x11c0] sm:$0xff] }
 0x459   : > { %8083 = vmatpush.bf16.xpose.msra.mxu1 %v8073_v55  ;;  %v11620_v55 = vld [vmem:[%s11669_s15 + $0x11e0] sm:$0xff]  ;;  %v8307_v58 = vsel %vm1486_vm0, %v11616_v54, 0 }
 0x45a   : > { %8131 = vmatpush.bf16.xpose.msra.mxu2 %v8121_v56  ;;  %v8211_v56 = vsel %vm1486_vm0, %v11608_v52, 0  ;;  %v8355_v59 = vsel %vm1486_vm0, %v11620_v55, 0 }
 0x45b   : > { %8179 = vmatpush.bf16.xpose.msra.mxu3 %v8169_v57  ;;  %v8259_v57 = vsel %vm1486_vm0, %v11612_v53, 0 }
 0x45c   : > { %v7177_v50 = vpop.f32.mrf.mxu2 }
 0x45d   : > { %v7225_v51 = vpop.f32.mrf.mxu3 }
 0x460   : > { %8036 = vmatpush.bf16.xpose.msra.mxu0 %v8022_v2 }
 0x461   : > { %8084 = vmatpush.bf16.xpose.msra.mxu1 %v8070_v3 }
 0x462   : > { %8132 = vmatpush.bf16.xpose.msra.mxu2 %v8118_v4 }
 0x463   : > { %8180 = vmatpush.bf16.xpose.msra.mxu3 %v8166_v5 }
 0x468   : > { %8037 = vmatpush.bf16.xpose.msra.mxu0 %v8019_v16 }
 0x469   : > { %8085 = vmatpush.bf16.xpose.msra.mxu1 %v8067_v17 }
 0x46a   : > { %8133 = vmatpush.bf16.xpose.msra.mxu2 %v8115_v18 }
 0x46b   : > { %8181 = vmatpush.bf16.xpose.msra.mxu3 %v8163_v19 }
 0x46c   : > { %v7271_v60 = vpop.f32.mrf.mxu0 }
 0x46d   : > { %v7319_v61 = vpop.f32.mrf.mxu1  ;;  %8500 = vst.msk [vmem:[%s11921_s22 + $0xf0] sm:$0x3] %vm8379_vm1, %v7271_v60 }
 0x46e   : > { %8501 = vst.msk [vmem:[%s11921_s22 + $0xf2] sm:$0x3] %vm8379_vm1, %v7319_v61 }
 0x46f   : > { %10925 = vmatmul.msk.bf16.vlgmr.msra.gmra.mxu0 %vm1486_vm0, %v306_v30 }
 0x470   : > { %8226 = vmatpush.bf16.xpose.msrb.mxu0 %v8220_v20  ;;  %10942 = vmatmul.msk.bf16.vlgmr.msra.gmra.mxu1 %vm1486_vm0, %v307_v31 }
 0x471   : > { %8274 = vmatpush.bf16.xpose.msrb.mxu1 %v8268_v21  ;;  %10959 = vmatmul.msk.bf16.vlgmr.msra.gmra.mxu2 %vm1486_vm0, %v308_v32 }
 0x472   : > { %8322 = vmatpush.bf16.xpose.msrb.mxu2 %v8316_v22  ;;  %10976 = vmatmul.msk.bf16.vlgmr.msra.gmra.mxu3 %vm1486_vm0, %v309_v33 }
 0x473   : > { %8370 = vmatpush.bf16.xpose.msrb.mxu3 %v8364_v23 }
 0x474   : > { %v7367_v2 = vpop.f32.mrf.mxu2  ;;  %v7273_v4 = vpop.f32.mrf.mxu0 }
 0x475   : > { %v7415_v3 = vpop.f32.mrf.mxu3  ;;  %8502 = vst.msk [vmem:[%s11921_s22 + $0xf4] sm:$0x3] %vm8379_vm1, %v7367_v2  ;;  %v7321_v5 = vpop.f32.mrf.mxu1 }
 0x476   : > { %8503 = vst.msk [vmem:[%s11921_s22 + $0xf6] sm:$0x3] %vm8379_vm1, %v7415_v3 }
 0x478   : > { %8227 = vmatpush.bf16.xpose.msrb.mxu0 %v8217_v34 }
 0x479   : > { %8275 = vmatpush.bf16.xpose.msrb.mxu1 %v8265_v35 }
 0x47a   : > { %8323 = vmatpush.bf16.xpose.msrb.mxu2 %v8313_v36 }
 0x47b   : > { %8371 = vmatpush.bf16.xpose.msrb.mxu3 %v8361_v37 }
 0x47c   : > { %v7369_v6 = vpop.f32.mrf.mxu2 }
 0x47d   : > { %v7417_v7 = vpop.f32.mrf.mxu3 }
 0x480   : > { %8228 = vmatpush.bf16.xpose.msrb.mxu0 %v8214_v46 }
 0x481   : > { %8276 = vmatpush.bf16.xpose.msrb.mxu1 %v8262_v47 }
 0x482   : > { %8324 = vmatpush.bf16.xpose.msrb.mxu2 %v8310_v48 }
 0x483   : > { %8372 = vmatpush.bf16.xpose.msrb.mxu3 %v8358_v49 }
 0x488   : > { %8229 = vmatpush.bf16.xpose.msrb.mxu0 %v8211_v56 }
 0x489   : > { %8277 = vmatpush.bf16.xpose.msrb.mxu1 %v8259_v57 }
 0x48a   : > { %8325 = vmatpush.bf16.xpose.msrb.mxu2 %v8307_v58 }
 0x48b   : > { %8373 = vmatpush.bf16.xpose.msrb.mxu3 %v8355_v59 }
 0x48c   : > { %v7463_v8 = vpop.f32.mrf.mxu0 }
 0x48d   : > { %v7511_v9 = vpop.f32.mrf.mxu1  ;;  %8504 = vst.msk [vmem:[%s11921_s22 + $0xf8] sm:$0x3] %vm8379_vm1, %v7463_v8 }
 0x48e   : > { %8505 = vst.msk [vmem:[%s11921_s22 + $0xfa] sm:$0x3] %vm8379_vm1, %v7511_v9 }
 0x48f   : > { %10993 = vmatmul.msk.bf16.vlgmr.msrb.gmra.mxu0 %vm1486_vm0, %v310_v62 }
 0x490   : > { %11010 = vmatmul.msk.bf16.vlgmr.msrb.gmra.mxu1 %vm1486_vm0, %v311_v63 }
 0x491   : > { %11027 = vmatmul.msk.bf16.vlgmr.msrb.gmra.mxu2 %vm1486_vm0, %v312_v0 }
 0x492   : > { %11044 = vmatmul.msk.bf16.vlgmr.msrb.gmra.mxu3 %vm1486_vm0, %v313_v1 }
 0x494   : > { %v7559_v10 = vpop.f32.mrf.mxu2  ;;  %v7465_v12 = vpop.f32.mrf.mxu0 }
 0x495   : > { %v7607_v11 = vpop.f32.mrf.mxu3  ;;  %8506 = vst.msk [vmem:[%s11921_s22 + $0xfc] sm:$0x3] %vm8379_vm1, %v7559_v10  ;;  %v7513_v13 = vpop.f32.mrf.mxu1 }
 0x496   : > { %8507 = vst.msk [vmem:[%s11921_s22 + $0xfe] sm:$0x3] %vm8379_vm1, %v7607_v11 }
 0x49c   : > { %v7561_v14 = vpop.f32.mrf.mxu2 }
 0x49d   : > { %v7609_v15 = vpop.f32.mrf.mxu3 }
 0x4ac   : > { %v7655_v16 = vpop.f32.mrf.mxu0 }
 0x4ad   : > { %v7703_v17 = vpop.f32.mrf.mxu1  ;;  %8508 = vst.msk [vmem:[%s11921_s22 + $0x100] sm:$0x3] %vm8379_vm1, %v7655_v16 }
 0x4ae   : > { %8509 = vst.msk [vmem:[%s11921_s22 + $0x102] sm:$0x3] %vm8379_vm1, %v7703_v17 }
 0x4b4   : > { %v7751_v18 = vpop.f32.mrf.mxu2  ;;  %v7657_v20 = vpop.f32.mrf.mxu0 }
 0x4b5   : > { %v7799_v19 = vpop.f32.mrf.mxu3  ;;  %8510 = vst.msk [vmem:[%s11921_s22 + $0x104] sm:$0x3] %vm8379_vm1, %v7751_v18  ;;  %v7705_v21 = vpop.f32.mrf.mxu1 }
 0x4b6   : > { %8511 = vst.msk [vmem:[%s11921_s22 + $0x106] sm:$0x3] %vm8379_vm1, %v7799_v19 }
 0x4bc   : > { %v7753_v22 = vpop.f32.mrf.mxu2 }
 0x4bd   : > { %v7801_v23 = vpop.f32.mrf.mxu3 }
 0x4cc   : > { %v7847_v24 = vpop.f32.mrf.mxu0 }
 0x4cd   : > { %v7895_v25 = vpop.f32.mrf.mxu1  ;;  %8512 = vst.msk [vmem:[%s11921_s22 + $0x108] sm:$0x3] %vm8379_vm1, %v7847_v24 }
 0x4ce   : > { %8513 = vst.msk [vmem:[%s11921_s22 + $0x10a] sm:$0x3] %vm8379_vm1, %v7895_v25 }
 0x4d4   : > { %v7943_v26 = vpop.f32.mrf.mxu2  ;;  %v7849_v28 = vpop.f32.mrf.mxu0 }
 0x4d5   : > { %v7991_v27 = vpop.f32.mrf.mxu3  ;;  %8514 = vst.msk [vmem:[%s11921_s22 + $0x10c] sm:$0x3] %vm8379_vm1, %v7943_v26  ;;  %v7897_v29 = vpop.f32.mrf.mxu1 }
 0x4d6   : > { %8515 = vst.msk [vmem:[%s11921_s22 + $0x10e] sm:$0x3] %vm8379_vm1, %v7991_v27 }
 0x4dc   : > { %v7945_v30 = vpop.f32.mrf.mxu2 }
 0x4dd   : > { %v7993_v31 = vpop.f32.mrf.mxu3 }
 0x4ec   : > { %v8039_v32 = vpop.f32.mrf.mxu0 }
 0x4ed   : > { %v8087_v33 = vpop.f32.mrf.mxu1  ;;  %8516 = vst.msk [vmem:[%s11921_s22 + $0x110] sm:$0x3] %vm8379_vm1, %v8039_v32 }
 0x4ee   : > { %8517 = vst.msk [vmem:[%s11921_s22 + $0x112] sm:$0x3] %vm8379_vm1, %v8087_v33 }
 0x4f4   : > { %v8135_v34 = vpop.f32.mrf.mxu2  ;;  %v8041_v36 = vpop.f32.mrf.mxu0 }
 0x4f5   : > { %v8183_v35 = vpop.f32.mrf.mxu3  ;;  %8518 = vst.msk [vmem:[%s11921_s22 + $0x114] sm:$0x3] %vm8379_vm1, %v8135_v34  ;;  %v8089_v37 = vpop.f32.mrf.mxu1 }
 0x4f6   : > { %8519 = vst.msk [vmem:[%s11921_s22 + $0x116] sm:$0x3] %vm8379_vm1, %v8183_v35 }
 0x4fc   : > { %v8137_v38 = vpop.f32.mrf.mxu2 }
 0x4fd   : > { %v8185_v39 = vpop.f32.mrf.mxu3 }
 0x50c   : > { %v8231_v40 = vpop.f32.mrf.mxu0 }
 0x50d   : > { %v8279_v41 = vpop.f32.mrf.mxu1  ;;  %8520 = vst.msk [vmem:[%s11921_s22 + $0x118] sm:$0x3] %vm8379_vm1, %v8231_v40 }
 0x50e   : > { %8521 = vst.msk [vmem:[%s11921_s22 + $0x11a] sm:$0x3] %vm8379_vm1, %v8279_v41 }
 0x514   : > { %v8327_v42 = vpop.f32.mrf.mxu2  ;;  %v8233_v44 = vpop.f32.mrf.mxu0 }
 0x515   : > { %v8375_v43 = vpop.f32.mrf.mxu3  ;;  %8522 = vst.msk [vmem:[%s11921_s22 + $0x11c] sm:$0x3] %vm8379_vm1, %v8327_v42  ;;  %v8281_v45 = vpop.f32.mrf.mxu1 }
 0x516   : > { %8523 = vst.msk [vmem:[%s11921_s22 + $0x11e] sm:$0x3] %vm8379_vm1, %v8375_v43 }
 0x51c   : > { %v8329_v46 = vpop.f32.mrf.mxu2 }
 0x51d   : > { %v8377_v47 = vpop.f32.mrf.mxu3 }
 0x51e PF: > { %s12_s9 = sadd.s32 1, %s11638_s9  }
 0x51f   : > { %p9_p4 = scmp.ge.s32.totalorder %s12_s9, 4  }
 0x521   :  { %11 = sbr.rel (!%p9_p4) target bundleno = 1 (0x1), region = 61 }

// kernel: reverse.8
= control target key start
LH: loop header
LB: loop body
LE: loop exit
PB: predicated region body
PF: predicated region fallthrough
CT: control target
= control target key end

     0   :  { %s1160_s0 = inlined_call_operand.vmem [shape: f32[2,32,25,12], index: 0, kind: input, shape index: {}]   ;;  %s1161_s1 = inlined_call_operand.vmem [shape: f32[2,32,25,12], index: 1, kind: output, shape index: {}]  }
   0x1   :  { %v384_v0 = vld [vmem:[%s1160_s0 + $0x160] sm:$0xff]  ;;  %v430_v24 = vld [vmem:[%s1160_s0 + $0x168] sm:$0xff]  ;;  %v478_v48 = vld [vmem:[%s1160_s0 + $0x170] sm:$0xff] }
   0x2   :  { %v385_v1 = vld [vmem:[%s1160_s0 + $0x2e0] sm:$0xff]  ;;  %4 = vst [vmem:[%s1161_s1] sm:$0xff] %v384_v0  ;;  %v432_v25 = vld [vmem:[%s1160_s0 + $0x2e8] sm:$0xff]  ;;  %v480_v49 = vld [vmem:[%s1160_s0 + $0x2f0] sm:$0xff] }
   0x3   :  { %v387_v2 = vld [vmem:[%s1160_s0 + $0x140] sm:$0xff]  ;;  %386 = vst [vmem:[%s1161_s1 + $0x180] sm:$0xff] %v385_v1  ;;  %v434_v26 = vld [vmem:[%s1160_s0 + $0x148] sm:$0xff]  ;;  %v482_v50 = vld [vmem:[%s1160_s0 + $0x150] sm:$0xff] }
   0x4   :  { %v389_v3 = vld [vmem:[%s1160_s0 + $0x2c0] sm:$0xff]  ;;  %388 = vst [vmem:[%s1161_s1 + $0x20] sm:$0xff] %v387_v2  ;;  %v436_v27 = vld [vmem:[%s1160_s0 + $0x2c8] sm:$0xff]  ;;  %v484_v51 = vld [vmem:[%s1160_s0 + $0x2d0] sm:$0xff] }
   0x5   :  { %v391_v4 = vld [vmem:[%s1160_s0 + $0x120] sm:$0xff]  ;;  %390 = vst [vmem:[%s1161_s1 + $0x1a0] sm:$0xff] %v389_v3  ;;  %v438_v28 = vld [vmem:[%s1160_s0 + $0x128] sm:$0xff]  ;;  %v486_v52 = vld [vmem:[%s1160_s0 + $0x130] sm:$0xff] }
   0x6   :  { %v393_v5 = vld [vmem:[%s1160_s0 + $0x2a0] sm:$0xff]  ;;  %392 = vst [vmem:[%s1161_s1 + $0x40] sm:$0xff] %v391_v4  ;;  %v440_v29 = vld [vmem:[%s1160_s0 + $0x2a8] sm:$0xff]  ;;  %v488_v53 = vld [vmem:[%s1160_s0 + $0x2b0] sm:$0xff] }
   0x7   :  { %v395_v6 = vld [vmem:[%s1160_s0 + $0x100] sm:$0xff]  ;;  %394 = vst [vmem:[%s1161_s1 + $0x1c0] sm:$0xff] %v393_v5  ;;  %v442_v30 = vld [vmem:[%s1160_s0 + $0x108] sm:$0xff]  ;;  %v490_v54 = vld [vmem:[%s1160_s0 + $0x110] sm:$0xff] }
   0x8   :  { %v397_v7 = vld [vmem:[%s1160_s0 + $0x280] sm:$0xff]  ;;  %396 = vst [vmem:[%s1161_s1 + $0x60] sm:$0xff] %v395_v6  ;;  %v444_v31 = vld [vmem:[%s1160_s0 + $0x288] sm:$0xff]  ;;  %v492_v55 = vld [vmem:[%s1160_s0 + $0x290] sm:$0xff] }
   0x9   :  { %v399_v8 = vld [vmem:[%s1160_s0 + $0xe0] sm:$0xff]  ;;  %398 = vst [vmem:[%s1161_s1 + $0x1e0] sm:$0xff] %v397_v7  ;;  %v446_v32 = vld [vmem:[%s1160_s0 + $0xe8] sm:$0xff]  ;;  %v494_v56 = vld [vmem:[%s1160_s0 + $0xf0] sm:$0xff] }
   0xa   :  { %v401_v9 = vld [vmem:[%s1160_s0 + $0x260] sm:$0xff]  ;;  %400 = vst [vmem:[%s1161_s1 + $0x80] sm:$0xff] %v399_v8  ;;  %v448_v33 = vld [vmem:[%s1160_s0 + $0x268] sm:$0xff]  ;;  %v496_v57 = vld [vmem:[%s1160_s0 + $0x270] sm:$0xff] }
   0xb   :  { %v403_v10 = vld [vmem:[%s1160_s0 + $0xc0] sm:$0xff]  ;;  %402 = vst [vmem:[%s1161_s1 + $0x200] sm:$0xff] %v401_v9  ;;  %v450_v34 = vld [vmem:[%s1160_s0 + $0xc8] sm:$0xff]  ;;  %v498_v58 = vld [vmem:[%s1160_s0 + $0xd0] sm:$0xff] }
   0xc   :  { %v405_v11 = vld [vmem:[%s1160_s0 + $0x240] sm:$0xff]  ;;  %404 = vst [vmem:[%s1161_s1 + $0xa0] sm:$0xff] %v403_v10  ;;  %v452_v35 = vld [vmem:[%s1160_s0 + $0x248] sm:$0xff]  ;;  %v500_v59 = vld [vmem:[%s1160_s0 + $0x250] sm:$0xff] }
   0xd   :  { %v407_v12 = vld [vmem:[%s1160_s0 + $0xa0] sm:$0xff]  ;;  %406 = vst [vmem:[%s1161_s1 + $0x220] sm:$0xff] %v405_v11  ;;  %v454_v36 = vld [vmem:[%s1160_s0 + $0xa8] sm:$0xff]  ;;  %v502_v60 = vld [vmem:[%s1160_s0 + $0xb0] sm:$0xff] }
   0xe   :  { %v409_v13 = vld [vmem:[%s1160_s0 + $0x220] sm:$0xff]  ;;  %408 = vst [vmem:[%s1161_s1 + $0xc0] sm:$0xff] %v407_v12  ;;  %v456_v37 = vld [vmem:[%s1160_s0 + $0x228] sm:$0xff]  ;;  %v504_v61 = vld [vmem:[%s1160_s0 + $0x230] sm:$0xff] }
   0xf   :  { %v411_v14 = vld [vmem:[%s1160_s0 + $0x80] sm:$0xff]  ;;  %410 = vst [vmem:[%s1161_s1 + $0x240] sm:$0xff] %v409_v13  ;;  %v458_v38 = vld [vmem:[%s1160_s0 + $0x88] sm:$0xff]  ;;  %v506_v62 = vld [vmem:[%s1160_s0 + $0x90] sm:$0xff] }
  0x10   :  { %v413_v15 = vld [vmem:[%s1160_s0 + $0x200] sm:$0xff]  ;;  %412 = vst [vmem:[%s1161_s1 + $0xe0] sm:$0xff] %v411_v14  ;;  %v460_v39 = vld [vmem:[%s1160_s0 + $0x208] sm:$0xff]  ;;  %v508_v63 = vld [vmem:[%s1160_s0 + $0x210] sm:$0xff] }
  0x11   :  { %v415_v16 = vld [vmem:[%s1160_s0 + $0x60] sm:$0xff]  ;;  %414 = vst [vmem:[%s1161_s1 + $0x260] sm:$0xff] %v413_v15  ;;  %v462_v40 = vld [vmem:[%s1160_s0 + $0x68] sm:$0xff]  ;;  %v510_v0 = vld [vmem:[%s1160_s0 + $0x70] sm:$0xff] }
  0x12   :  { %v417_v17 = vld [vmem:[%s1160_s0 + $0x1e0] sm:$0xff]  ;;  %416 = vst [vmem:[%s1161_s1 + $0x100] sm:$0xff] %v415_v16  ;;  %v464_v41 = vld [vmem:[%s1160_s0 + $0x1e8] sm:$0xff]  ;;  %v512_v1 = vld [vmem:[%s1160_s0 + $0x1f0] sm:$0xff] }
  0x13   :  { %v419_v18 = vld [vmem:[%s1160_s0 + $0x40] sm:$0xff]  ;;  %418 = vst [vmem:[%s1161_s1 + $0x280] sm:$0xff] %v417_v17  ;;  %v466_v42 = vld [vmem:[%s1160_s0 + $0x48] sm:$0xff]  ;;  %v514_v2 = vld [vmem:[%s1160_s0 + $0x50] sm:$0xff] }
  0x14   :  { %v421_v19 = vld [vmem:[%s1160_s0 + $0x1c0] sm:$0xff]  ;;  %420 = vst [vmem:[%s1161_s1 + $0x120] sm:$0xff] %v419_v18  ;;  %v468_v43 = vld [vmem:[%s1160_s0 + $0x1c8] sm:$0xff]  ;;  %v516_v3 = vld [vmem:[%s1160_s0 + $0x1d0] sm:$0xff] }
  0x15   :  { %v423_v20 = vld [vmem:[%s1160_s0 + $0x20] sm:$0xff]  ;;  %422 = vst [vmem:[%s1161_s1 + $0x2a0] sm:$0xff] %v421_v19  ;;  %v470_v44 = vld [vmem:[%s1160_s0 + $0x28] sm:$0xff]  ;;  %v518_v4 = vld [vmem:[%s1160_s0 + $0x30] sm:$0xff] }
  0x16   :  { %v425_v21 = vld [vmem:[%s1160_s0 + $0x1a0] sm:$0xff]  ;;  %424 = vst [vmem:[%s1161_s1 + $0x140] sm:$0xff] %v423_v20  ;;  %v472_v45 = vld [vmem:[%s1160_s0 + $0x1a8] sm:$0xff]  ;;  %v520_v5 = vld [vmem:[%s1160_s0 + $0x1b0] sm:$0xff] }
  0x17   :  { %v89_v22 = vld [vmem:[%s1160_s0] sm:$0xff]  ;;  %426 = vst [vmem:[%s1161_s1 + $0x2c0] sm:$0xff] %v425_v21  ;;  %v474_v46 = vld [vmem:[%s1160_s0 + $0x8] sm:$0xff]  ;;  %v522_v6 = vld [vmem:[%s1160_s0 + $0x10] sm:$0xff] }
  0x18   :  { %v428_v23 = vld [vmem:[%s1160_s0 + $0x180] sm:$0xff]  ;;  %427 = vst [vmem:[%s1161_s1 + $0x160] sm:$0xff] %v89_v22  ;;  %v476_v47 = vld [vmem:[%s1160_s0 + $0x188] sm:$0xff]  ;;  %v524_v7 = vld [vmem:[%s1160_s0 + $0x190] sm:$0xff] }
  0x19   :  { %429 = vst [vmem:[%s1161_s1 + $0x2e0] sm:$0xff] %v428_v23  ;;  %v526_v8 = vld [vmem:[%s1160_s0 + $0x178] sm:$0xff] }
  0x1a   :  { %431 = vst [vmem:[%s1161_s1 + $0x8] sm:$0xff] %v430_v24  ;;  %v528_v9 = vld [vmem:[%s1160_s0 + $0x2f8] sm:$0xff] }
  0x1b   :  { %433 = vst [vmem:[%s1161_s1 + $0x188] sm:$0xff] %v432_v25  ;;  %v530_v10 = vld [vmem:[%s1160_s0 + $0x158] sm:$0xff] }
  0x1c   :  { %435 = vst [vmem:[%s1161_s1 + $0x28] sm:$0xff] %v434_v26  ;;  %v532_v11 = vld [vmem:[%s1160_s0 + $0x2d8] sm:$0xff] }
  0x1d   :  { %437 = vst [vmem:[%s1161_s1 + $0x1a8] sm:$0xff] %v436_v27  ;;  %v534_v12 = vld [vmem:[%s1160_s0 + $0x138] sm:$0xff] }
  0x1e   :  { %439 = vst [vmem:[%s1161_s1 + $0x48] sm:$0xff] %v438_v28  ;;  %v536_v13 = vld [vmem:[%s1160_s0 + $0x2b8] sm:$0xff] }
  0x1f   :  { %441 = vst [vmem:[%s1161_s1 + $0x1c8] sm:$0xff] %v440_v29  ;;  %v538_v14 = vld [vmem:[%s1160_s0 + $0x118] sm:$0xff] }
  0x20   :  { %443 = vst [vmem:[%s1161_s1 + $0x68] sm:$0xff] %v442_v30  ;;  %v540_v15 = vld [vmem:[%s1160_s0 + $0x298] sm:$0xff] }
  0x21   :  { %445 = vst [vmem:[%s1161_s1 + $0x1e8] sm:$0xff] %v444_v31  ;;  %v542_v16 = vld [vmem:[%s1160_s0 + $0xf8] sm:$0xff] }
  0x22   :  { %447 = vst [vmem:[%s1161_s1 + $0x88] sm:$0xff] %v446_v32  ;;  %v544_v17 = vld [vmem:[%s1160_s0 + $0x278] sm:$0xff] }
  0x23   :  { %449 = vst [vmem:[%s1161_s1 + $0x208] sm:$0xff] %v448_v33  ;;  %v546_v18 = vld [vmem:[%s1160_s0 + $0xd8] sm:$0xff] }
  0x24   :  { %451 = vst [vmem:[%s1161_s1 + $0xa8] sm:$0xff] %v450_v34  ;;  %v548_v19 = vld [vmem:[%s1160_s0 + $0x258] sm:$0xff] }
  0x25   :  { %453 = vst [vmem:[%s1161_s1 + $0x228] sm:$0xff] %v452_v35  ;;  %v550_v20 = vld [vmem:[%s1160_s0 + $0xb8] sm:$0xff] }
  0x26   :  { %455 = vst [vmem:[%s1161_s1 + $0xc8] sm:$0xff] %v454_v36  ;;  %v552_v21 = vld [vmem:[%s1160_s0 + $0x238] sm:$0xff] }
  0x27   :  { %457 = vst [vmem:[%s1161_s1 + $0x248] sm:$0xff] %v456_v37  ;;  %v554_v22 = vld [vmem:[%s1160_s0 + $0x98] sm:$0xff] }
  0x28   :  { %459 = vst [vmem:[%s1161_s1 + $0xe8] sm:$0xff] %v458_v38  ;;  %v556_v23 = vld [vmem:[%s1160_s0 + $0x218] sm:$0xff] }
  0x29   :  { %461 = vst [vmem:[%s1161_s1 + $0x268] sm:$0xff] %v460_v39  ;;  %v558_v24 = vld [vmem:[%s1160_s0 + $0x78] sm:$0xff] }
  0x2a   :  { %463 = vst [vmem:[%s1161_s1 + $0x108] sm:$0xff] %v462_v40  ;;  %v560_v25 = vld [vmem:[%s1160_s0 + $0x1f8] sm:$0xff] }
  0x2b   :  { %465 = vst [vmem:[%s1161_s1 + $0x288] sm:$0xff] %v464_v41  ;;  %v562_v26 = vld [vmem:[%s1160_s0 + $0x58] sm:$0xff] }
  0x2c   :  { %467 = vst [vmem:[%s1161_s1 + $0x128] sm:$0xff] %v466_v42  ;;  %v564_v27 = vld [vmem:[%s1160_s0 + $0x1d8] sm:$0xff] }
  0x2d   :  { %469 = vst [vmem:[%s1161_s1 + $0x2a8] sm:$0xff] %v468_v43  ;;  %v566_v28 = vld [vmem:[%s1160_s0 + $0x38] sm:$0xff] }
  0x2e   :  { %471 = vst [vmem:[%s1161_s1 + $0x148] sm:$0xff] %v470_v44  ;;  %v568_v29 = vld [vmem:[%s1160_s0 + $0x1b8] sm:$0xff] }
  0x2f   :  { %473 = vst [vmem:[%s1161_s1 + $0x2c8] sm:$0xff] %v472_v45  ;;  %v570_v30 = vld [vmem:[%s1160_s0 + $0x18] sm:$0xff] }
  0x30   :  { %475 = vst [vmem:[%s1161_s1 + $0x168] sm:$0xff] %v474_v46  ;;  %v572_v31 = vld [vmem:[%s1160_s0 + $0x198] sm:$0xff] }
  0x31   :  { %477 = vst [vmem:[%s1161_s1 + $0x2e8] sm:$0xff] %v476_v47 }
  0x32   :  { %479 = vst [vmem:[%s1161_s1 + $0x10] sm:$0xff] %v478_v48 }
  0x33   :  { %481 = vst [vmem:[%s1161_s1 + $0x190] sm:$0xff] %v480_v49 }
  0x34   :  { %483 = vst [vmem:[%s1161_s1 + $0x30] sm:$0xff] %v482_v50 }
  0x35   :  { %485 = vst [vmem:[%s1161_s1 + $0x1b0] sm:$0xff] %v484_v51 }
  0x36   :  { %487 = vst [vmem:[%s1161_s1 + $0x50] sm:$0xff] %v486_v52 }
  0x37   :  { %489 = vst [vmem:[%s1161_s1 + $0x1d0] sm:$0xff] %v488_v53 }
  0x38   :  { %491 = vst [vmem:[%s1161_s1 + $0x70] sm:$0xff] %v490_v54 }
  0x39   :  { %493 = vst [vmem:[%s1161_s1 + $0x1f0] sm:$0xff] %v492_v55 }
  0x3a   :  { %495 = vst [vmem:[%s1161_s1 + $0x90] sm:$0xff] %v494_v56 }
  0x3b   :  { %497 = vst [vmem:[%s1161_s1 + $0x210] sm:$0xff] %v496_v57 }
  0x3c   :  { %499 = vst [vmem:[%s1161_s1 + $0xb0] sm:$0xff] %v498_v58 }
  0x3d   :  { %501 = vst [vmem:[%s1161_s1 + $0x230] sm:$0xff] %v500_v59 }
  0x3e   :  { %503 = vst [vmem:[%s1161_s1 + $0xd0] sm:$0xff] %v502_v60 }
  0x3f   :  { %505 = vst [vmem:[%s1161_s1 + $0x250] sm:$0xff] %v504_v61 }
  0x40   :  { %507 = vst [vmem:[%s1161_s1 + $0xf0] sm:$0xff] %v506_v62 }
  0x41   :  { %509 = vst [vmem:[%s1161_s1 + $0x270] sm:$0xff] %v508_v63 }
  0x42   :  { %511 = vst [vmem:[%s1161_s1 + $0x110] sm:$0xff] %v510_v0 }
  0x43   :  { %513 = vst [vmem:[%s1161_s1 + $0x290] sm:$0xff] %v512_v1 }
  0x44   :  { %515 = vst [vmem:[%s1161_s1 + $0x130] sm:$0xff] %v514_v2 }
  0x45   :  { %517 = vst [vmem:[%s1161_s1 + $0x2b0] sm:$0xff] %v516_v3 }
  0x46   :  { %519 = vst [vmem:[%s1161_s1 + $0x150] sm:$0xff] %v518_v4 }
  0x47   :  { %521 = vst [vmem:[%s1161_s1 + $0x2d0] sm:$0xff] %v520_v5 }
  0x48   :  { %523 = vst [vmem:[%s1161_s1 + $0x170] sm:$0xff] %v522_v6 }
  0x49   :  { %525 = vst [vmem:[%s1161_s1 + $0x2f0] sm:$0xff] %v524_v7 }
  0x4a   :  { %527 = vst [vmem:[%s1161_s1 + $0x18] sm:$0xff] %v526_v8 }
  0x4b   :  { %529 = vst [vmem:[%s1161_s1 + $0x198] sm:$0xff] %v528_v9 }
  0x4c   :  { %531 = vst [vmem:[%s1161_s1 + $0x38] sm:$0xff] %v530_v10 }
  0x4d   :  { %533 = vst [vmem:[%s1161_s1 + $0x1b8] sm:$0xff] %v532_v11 }
  0x4e   :  { %535 = vst [vmem:[%s1161_s1 + $0x58] sm:$0xff] %v534_v12 }
  0x4f   :  { %537 = vst [vmem:[%s1161_s1 + $0x1d8] sm:$0xff] %v536_v13 }
  0x50   :  { %539 = vst [vmem:[%s1161_s1 + $0x78] sm:$0xff] %v538_v14 }
  0x51   :  { %541 = vst [vmem:[%s1161_s1 + $0x1f8] sm:$0xff] %v540_v15 }
  0x52   :  { %543 = vst [vmem:[%s1161_s1 + $0x98] sm:$0xff] %v542_v16 }
  0x53   :  { %545 = vst [vmem:[%s1161_s1 + $0x218] sm:$0xff] %v544_v17 }
  0x54   :  { %547 = vst [vmem:[%s1161_s1 + $0xb8] sm:$0xff] %v546_v18 }
  0x55   :  { %549 = vst [vmem:[%s1161_s1 + $0x238] sm:$0xff] %v548_v19 }
  0x56   :  { %551 = vst [vmem:[%s1161_s1 + $0xd8] sm:$0xff] %v550_v20 }
  0x57   :  { %553 = vst [vmem:[%s1161_s1 + $0x258] sm:$0xff] %v552_v21 }
  0x58   :  { %555 = vst [vmem:[%s1161_s1 + $0xf8] sm:$0xff] %v554_v22 }
  0x59   :  { %557 = vst [vmem:[%s1161_s1 + $0x278] sm:$0xff] %v556_v23 }
  0x5a   :  { %559 = vst [vmem:[%s1161_s1 + $0x118] sm:$0xff] %v558_v24 }
  0x5b   :  { %561 = vst [vmem:[%s1161_s1 + $0x298] sm:$0xff] %v560_v25 }
  0x5c   :  { %563 = vst [vmem:[%s1161_s1 + $0x138] sm:$0xff] %v562_v26 }
  0x5d   :  { %565 = vst [vmem:[%s1161_s1 + $0x2b8] sm:$0xff] %v564_v27 }
  0x5e   :  { %567 = vst [vmem:[%s1161_s1 + $0x158] sm:$0xff] %v566_v28 }
  0x5f   :  { %569 = vst [vmem:[%s1161_s1 + $0x2d8] sm:$0xff] %v568_v29 }
  0x60   :  { %571 = vst [vmem:[%s1161_s1 + $0x178] sm:$0xff] %v570_v30 }
  0x61   :  { %573 = vst [vmem:[%s1161_s1 + $0x2f8] sm:$0xff] %v572_v31 }

// kernel: fno2d_forward.12
= control target key start
LH: loop header
LB: loop body
LE: loop exit
PB: predicated region body
PF: predicated region fallthrough
CT: control target
= control target key end

     0   :  { %s1972_s15 = smov 0   ;;  %s3028_s0 = inlined_call_operand.vmem [shape: f32[2,625,32], index: 0, kind: input, shape index: {}]   ;;  %s3029_s1 = inlined_call_operand.vmem [shape: bf16[32,32], index: 1, kind: input, shape index: {}]   ;;  %s3030_s2 = inlined_call_operand.vmem [shape: f32[1,32], index: 2, kind: input, shape index: {}]   ;;  %s3031_s3 = inlined_call_operand.vmem [shape: f32[2,625,32], index: 3, kind: input, shape index: {}]   ;;  %s3032_s4 = inlined_call_operand.vmem [shape: f32[2,625,32], index: 4, kind: output, shape index: {}]  }
   0x1 LB: > { %s1703_s16 = sadd.s32 4294967295, %s1945_s15   ;;  %p1707_p0 = scmp.ge.s32.totalorder %s1945_s15, 1  ;;  %s1945_s15 = sphi %s1972_s15, %s14_s15  }
   0x2   : > { %p172_p1 = scmp.lt.s32.totalorder %s1945_s15, 3 }
   0x4   : > { %p173_p2 = pnand %p1707_p0, %p172_p1 }
   0x5   : > { %p203_p3 = scmp.lt.s32.totalorder (!%p173_p2), %s1703_s16, 1 }
   0x6   : > { %176 = sbr.rel (%p173_p2) target bundleno = 380 (0x17c), region = 36 }
   0xb   : > { %v1762_v0 = vld [vmem:[%s3029_s1 + $0x8] sm:$0xff]  ;;  %v1761_v1 = vld [vmem:[%s3029_s1] sm:$0xff]  ;;  %s3034_s16 = smov (!%p203_p3, %s1703_s16), 1  ;;  %vm358_vm0 = vcmask 261120   ;;  %vm1634_vm1 = vcmask 253952  }
   0xc   : > { %485 = vmatpush.bf16.msra.mxu0 %v1762_v0  ;;  %1763 = vmatpush.bf16.msra.mxu1 %v1762_v0  ;;  %s1986_s21 = smul.u32 632, %s3034_s16 }
   0xd   : > { %1764 = vmatpush.bf16.msra.mxu2 %v1762_v0  ;;  %1765 = vmatpush.bf16.msra.mxu3 %v1762_v0 }
   0xe   : > { %s1992_s24 = scalar_lea.vmem %s3028_s0, %s1986_s21  ;;  %s2102_s29 = scalar_lea.vmem %s3031_s3, %s1986_s21 }
   0xf   : > { %v219_v2 = vld [vmem:[%s1992_s24] sm:$0xff]  ;;  %v220_v3 = vld [vmem:[%s1992_s24 + $0x8] sm:$0xff]  ;;  %v221_v14 = vld [vmem:[%s1992_s24 + $0x10] sm:$0xff]  ;;  %s2176_s6 = scalar_lea.vmem %s3032_s4, %s1986_s21 }
  0x10   : > { %486 = vmatpush.bf16.msra.mxu0 %v1761_v1  ;;  %1766 = vmatpush.bf16.msra.mxu1 %v1761_v1  ;;  %v239_v4 = vld [vmem:[%s1992_s24 + $0xa0] sm:$0xff]  ;;  %v298_v5 = vpack.c.bf16 %v220_v3, %v219_v2  ;;  %v240_v6 = vld [vmem:[%s1992_s24 + $0xa8] sm:$0xff]  ;;  %v222_v15 = vld [vmem:[%s1992_s24 + $0x18] sm:$0xff] }
  0x11   : > { %1767 = vmatpush.bf16.msra.mxu2 %v1761_v1  ;;  %1768 = vmatpush.bf16.msra.mxu3 %v1761_v1  ;;  %v259_v7 = vld [vmem:[%s1992_s24 + $0x140] sm:$0xff]  ;;  %v260_v8 = vld [vmem:[%s1992_s24 + $0x148] sm:$0xff]  ;;  %v308_v9 = vpack.c.bf16 %v240_v6, %v239_v4  ;;  %v241_v16 = vld [vmem:[%s1992_s24 + $0xb0] sm:$0xff]  ;;  %v299_v22 = vpack.c.bf16 %v222_v15, %v221_v14 }
  0x12   : > { %v318_v10 = vpack.c.bf16 %v260_v8, %v259_v7  ;;  %v279_v11 = vld [vmem:[%s1992_s24 + $0x1e0] sm:$0xff]  ;;  %v280_v12 = vld [vmem:[%s1992_s24 + $0x1e8] sm:$0xff]  ;;  %v242_v17 = vld [vmem:[%s1992_s24 + $0xb8] sm:$0xff] }
  0x13   : > { %1719 = vmatmul.msk.bf16.vlgmr.msra.gmra.mxu0 %vm358_vm0, %v298_v5  ;;  %v328_v13 = vpack.c.bf16 %v280_v12, %v279_v11  ;;  %1729 = vmatmul.msk.bf16.vlgmr.msra.gmra.mxu1 %vm358_vm0, %v308_v9  ;;  %v261_v18 = vld [vmem:[%s1992_s24 + $0x150] sm:$0xff]  ;;  %v262_v19 = vld [vmem:[%s1992_s24 + $0x158] sm:$0xff]  ;;  %v309_v23 = vpack.c.bf16 %v242_v17, %v241_v16  ;;  %v223_v26 = vld [vmem:[%s1992_s24 + $0x20] sm:$0xff] }
  0x14   : > { %1739 = vmatmul.msk.bf16.vlgmr.msra.gmra.mxu2 %vm358_vm0, %v318_v10  ;;  %v281_v20 = vld [vmem:[%s1992_s24 + $0x1f0] sm:$0xff]  ;;  %v282_v21 = vld [vmem:[%s1992_s24 + $0x1f8] sm:$0xff]  ;;  %v319_v24 = vpack.c.bf16 %v262_v19, %v261_v18  ;;  %v224_v27 = vld [vmem:[%s1992_s24 + $0x28] sm:$0xff] }
  0x15   : > { %1749 = vmatmul.msk.bf16.vlgmr.msra.gmra.mxu3 %vm358_vm0, %v328_v13  ;;  %v329_v25 = vpack.c.bf16 %v282_v21, %v281_v20  ;;  %v243_v28 = vld [vmem:[%s1992_s24 + $0xc0] sm:$0xff]  ;;  %v244_v29 = vld [vmem:[%s1992_s24 + $0xc8] sm:$0xff]  ;;  %v300_v34 = vpack.c.bf16 %v224_v27, %v223_v26  ;;  %v225_v38 = vld [vmem:[%s1992_s24 + $0x30] sm:$0xff] }
  0x16   : > { %v263_v30 = vld [vmem:[%s1992_s24 + $0x160] sm:$0xff]  ;;  %v264_v31 = vld [vmem:[%s1992_s24 + $0x168] sm:$0xff]  ;;  %v310_v35 = vpack.c.bf16 %v244_v29, %v243_v28  ;;  %v226_v39 = vld [vmem:[%s1992_s24 + $0x38] sm:$0xff] }
  0x17   : > { %v283_v32 = vld [vmem:[%s1992_s24 + $0x200] sm:$0xff]  ;;  %v284_v33 = vld [vmem:[%s1992_s24 + $0x208] sm:$0xff]  ;;  %v320_v36 = vpack.c.bf16 %v264_v31, %v263_v30  ;;  %v245_v40 = vld [vmem:[%s1992_s24 + $0xd0] sm:$0xff]  ;;  %v301_v46 = vpack.c.bf16 %v226_v39, %v225_v38 }
  0x18   : > { %v330_v37 = vpack.c.bf16 %v284_v33, %v283_v32  ;;  %v246_v41 = vld [vmem:[%s1992_s24 + $0xd8] sm:$0xff]  ;;  %v265_v42 = vld [vmem:[%s1992_s24 + $0x170] sm:$0xff]  ;;  %v227_v50 = vld [vmem:[%s1992_s24 + $0x40] sm:$0xff] }
  0x19   : > { %v266_v43 = vld [vmem:[%s1992_s24 + $0x178] sm:$0xff]  ;;  %v285_v44 = vld [vmem:[%s1992_s24 + $0x210] sm:$0xff]  ;;  %v311_v47 = vpack.c.bf16 %v246_v41, %v245_v40  ;;  %v228_v51 = vld [vmem:[%s1992_s24 + $0x48] sm:$0xff] }
  0x1a   : > { %v286_v45 = vld [vmem:[%s1992_s24 + $0x218] sm:$0xff]  ;;  %v321_v48 = vpack.c.bf16 %v266_v43, %v265_v42  ;;  %v247_v52 = vld [vmem:[%s1992_s24 + $0xe0] sm:$0xff]  ;;  %v248_v53 = vld [vmem:[%s1992_s24 + $0xe8] sm:$0xff]  ;;  %v302_v58 = vpack.c.bf16 %v228_v51, %v227_v50 }
  0x1b   : > { %v331_v49 = vpack.c.bf16 %v286_v45, %v285_v44  ;;  %v267_v54 = vld [vmem:[%s1992_s24 + $0x180] sm:$0xff]  ;;  %v268_v55 = vld [vmem:[%s1992_s24 + $0x188] sm:$0xff]  ;;  %v312_v59 = vpack.c.bf16 %v248_v53, %v247_v52  ;;  %v229_v62 = vld [vmem:[%s1992_s24 + $0x50] sm:$0xff] }
  0x1c   : > { %v287_v56 = vld [vmem:[%s1992_s24 + $0x220] sm:$0xff]  ;;  %v288_v57 = vld [vmem:[%s1992_s24 + $0x228] sm:$0xff]  ;;  %v322_v60 = vpack.c.bf16 %v268_v55, %v267_v54  ;;  %v230_v63 = vld [vmem:[%s1992_s24 + $0x58] sm:$0xff] }
  0x1d   : > { %v332_v61 = vpack.c.bf16 %v288_v57, %v287_v56  ;;  %v249_v0 = vld [vmem:[%s1992_s24 + $0xf0] sm:$0xff]  ;;  %v250_v1 = vld [vmem:[%s1992_s24 + $0xf8] sm:$0xff]  ;;  %v303_v6 = vpack.c.bf16 %v230_v63, %v229_v62  ;;  %v231_v10 = vld [vmem:[%s1992_s24 + $0x60] sm:$0xff] }
  0x1e   : > { %v269_v2 = vld [vmem:[%s1992_s24 + $0x190] sm:$0xff]  ;;  %v270_v3 = vld [vmem:[%s1992_s24 + $0x198] sm:$0xff]  ;;  %v313_v7 = vpack.c.bf16 %v250_v1, %v249_v0  ;;  %v232_v11 = vld [vmem:[%s1992_s24 + $0x68] sm:$0xff] }
  0x1f   : > { %v289_v4 = vld [vmem:[%s1992_s24 + $0x230] sm:$0xff]  ;;  %v290_v5 = vld [vmem:[%s1992_s24 + $0x238] sm:$0xff]  ;;  %v323_v8 = vpack.c.bf16 %v270_v3, %v269_v2  ;;  %v251_v12 = vld [vmem:[%s1992_s24 + $0x100] sm:$0xff]  ;;  %v304_v18 = vpack.c.bf16 %v232_v11, %v231_v10 }
  0x20   : > { %v333_v9 = vpack.c.bf16 %v290_v5, %v289_v4  ;;  %v252_v13 = vld [vmem:[%s1992_s24 + $0x108] sm:$0xff]  ;;  %v271_v14 = vld [vmem:[%s1992_s24 + $0x1a0] sm:$0xff]  ;;  %v273_v26 = vld [vmem:[%s1992_s24 + $0x1b0] sm:$0xff] }
  0x21   : > { %v272_v15 = vld [vmem:[%s1992_s24 + $0x1a8] sm:$0xff]  ;;  %v291_v16 = vld [vmem:[%s1992_s24 + $0x240] sm:$0xff]  ;;  %v314_v19 = vpack.c.bf16 %v252_v13, %v251_v12  ;;  %v274_v27 = vld [vmem:[%s1992_s24 + $0x1b8] sm:$0xff] }
  0x22   : > { %v292_v17 = vld [vmem:[%s1992_s24 + $0x248] sm:$0xff]  ;;  %v324_v20 = vpack.c.bf16 %v272_v15, %v271_v14  ;;  %v293_v28 = vld [vmem:[%s1992_s24 + $0x250] sm:$0xff]  ;;  %v294_v29 = vld [vmem:[%s1992_s24 + $0x258] sm:$0xff]  ;;  %v325_v32 = vpack.c.bf16 %v274_v27, %v273_v26 }
  0x23   : > { %1720 = vmatmul.msk.bf16.gmra.mxu0 %vm358_vm0, %v299_v22  ;;  %1730 = vmatmul.msk.bf16.gmra.mxu1 %vm358_vm0, %v309_v23  ;;  %v334_v21 = vpack.c.bf16 %v292_v17, %v291_v16  ;;  %v233_v22 = vld [vmem:[%s1992_s24 + $0x70] sm:$0xff]  ;;  %v234_v23 = vld [vmem:[%s1992_s24 + $0x78] sm:$0xff]  ;;  %v335_v33 = vpack.c.bf16 %v294_v29, %v293_v28  ;;  %v256_v38 = vld [vmem:[%s1992_s24 + $0x128] sm:$0xff] }
  0x24   : > { %1740 = vmatmul.msk.bf16.gmra.mxu2 %vm358_vm0, %v319_v24  ;;  %v253_v24 = vld [vmem:[%s1992_s24 + $0x110] sm:$0xff]  ;;  %v305_v30 = vpack.c.bf16 %v234_v23, %v233_v22  ;;  %v275_v39 = vld [vmem:[%s1992_s24 + $0x1c0] sm:$0xff]  ;;  %v276_v40 = vld [vmem:[%s1992_s24 + $0x1c8] sm:$0xff] }
  0x25   : > { %1750 = vmatmul.msk.bf16.gmra.mxu3 %vm358_vm0, %v329_v25  ;;  %v254_v25 = vld [vmem:[%s1992_s24 + $0x118] sm:$0xff]  ;;  %v295_v41 = vld [vmem:[%s1992_s24 + $0x260] sm:$0xff]  ;;  %v296_v42 = vld [vmem:[%s1992_s24 + $0x268] sm:$0xff] }
  0x26   : > { %v315_v31 = vpack.c.bf16 %v254_v25, %v253_v24  ;;  %v687_v45 = vld [vmem:[%s2102_s29] sm:$0xff]  ;;  %v336_v51 = vpack.c.bf16 %v296_v42, %v295_v41  ;;  %v688_v1 = vld [vmem:[%s2102_s29 + $0x8] sm:$0xff]  ;;  %v258_v13 = vld [vmem:[%s1992_s24 + $0x138] sm:$0xff] }
  0x27   : > { %v707_v50 = vld [vmem:[%s2102_s29 + $0xa0] sm:$0xff]  ;;  %v708_v2 = vld [vmem:[%s2102_s29 + $0xa8] sm:$0xff]  ;;  %v277_v14 = vld [vmem:[%s1992_s24 + $0x1d0] sm:$0xff] }
  0x28   : > { %v747_v63 = vld [vmem:[%s2102_s29 + $0x1e0] sm:$0xff]  ;;  %v278_v15 = vld [vmem:[%s1992_s24 + $0x1d8] sm:$0xff]  ;;  %v748_v42 = vld [vmem:[%s2102_s29 + $0x1e8] sm:$0xff] }
  0x29   : > { %v327_v27 = vpack.c.bf16 %v278_v15, %v277_v14 }
  0x33   : > { %1721 = vmatmul.msk.bf16.gmra.mxu0 %vm358_vm0, %v300_v34  ;;  %1731 = vmatmul.msk.bf16.gmra.mxu1 %vm358_vm0, %v310_v35  ;;  %v2093_v34 = vld [vmem:[%s3030_s2] ss:$0 sm:$0xff] }
  0x34   : > { %1741 = vmatmul.msk.bf16.gmra.mxu2 %vm358_vm0, %v320_v36  ;;  %v235_v35 = vld [vmem:[%s1992_s24 + $0x80] sm:$0xff]  ;;  %v236_v36 = vld [vmem:[%s1992_s24 + $0x88] sm:$0xff] }
  0x35   : > { %1751 = vmatmul.msk.bf16.gmra.mxu3 %vm358_vm0, %v330_v37  ;;  %v255_v37 = vld [vmem:[%s1992_s24 + $0x120] sm:$0xff]  ;;  %v306_v43 = vpack.c.bf16 %v236_v36, %v235_v35 }
  0x43   : > { %1722 = vmatmul.msk.bf16.gmra.mxu0 %vm358_vm0, %v301_v46  ;;  %1732 = vmatmul.msk.bf16.gmra.mxu1 %vm358_vm0, %v311_v47  ;;  %v316_v46 = vpack.c.bf16 %v256_v38, %v255_v37  ;;  %v326_v47 = vpack.c.bf16 %v276_v40, %v275_v39  ;;  %v728_v37 = vld [vmem:[%s2102_s29 + $0x148] sm:$0xff] }
  0x44   : > { %1742 = vmatmul.msk.bf16.gmra.mxu2 %vm358_vm0, %v321_v48 }
  0x45   : > { %1752 = vmatmul.msk.bf16.gmra.mxu3 %vm358_vm0, %v331_v49 }
  0x53   : > { %1723 = vmatmul.msk.bf16.gmra.mxu0 %vm358_vm0, %v302_v58  ;;  %1733 = vmatmul.msk.bf16.gmra.mxu1 %vm358_vm0, %v312_v59  ;;  %v727_v59 = vld [vmem:[%s2102_s29 + $0x140] sm:$0xff] }
  0x54   : > { %1743 = vmatmul.msk.bf16.gmra.mxu2 %vm358_vm0, %v322_v60 }
  0x55   : > { %1753 = vmatmul.msk.bf16.gmra.mxu3 %vm358_vm0, %v332_v61 }
  0x63   : > { %1724 = vmatmul.msk.bf16.gmra.mxu0 %vm358_vm0, %v303_v6  ;;  %1734 = vmatmul.msk.bf16.gmra.mxu1 %vm358_vm0, %v313_v7  ;;  %v237_v7 = vld [vmem:[%s1992_s24 + $0x90] sm:$0xff] }
  0x64   : > { %1744 = vmatmul.msk.bf16.gmra.mxu2 %vm358_vm0, %v323_v8  ;;  %v238_v8 = vld [vmem:[%s1992_s24 + $0x98] sm:$0xff] }
  0x65   : > { %1754 = vmatmul.msk.bf16.gmra.mxu3 %vm358_vm0, %v333_v9  ;;  %v257_v9 = vld [vmem:[%s1992_s24 + $0x130] sm:$0xff]  ;;  %v307_v23 = vpack.c.bf16 %v238_v8, %v237_v7 }
  0x66   : > { %v317_v26 = vpack.c.bf16 %v258_v13, %v257_v9 }
  0x73   : > { %1725 = vmatmul.msk.bf16.gmra.mxu0 %vm358_vm0, %v304_v18  ;;  %1735 = vmatmul.msk.bf16.gmra.mxu1 %vm358_vm0, %v314_v19  ;;  %v297_v19 = vld [vmem:[%s1992_s24 + $0x270] sm:$0x1] }
  0x74   : > { %1745 = vmatmul.msk.bf16.gmra.mxu2 %vm358_vm0, %v324_v20 }
  0x75   : > { %1755 = vmatmul.msk.bf16.gmra.mxu3 %vm358_vm0, %v334_v21 }
  0x83   : > { %1726 = vmatmul.msk.bf16.gmra.mxu0 %vm358_vm0, %v305_v30  ;;  %1736 = vmatmul.msk.bf16.gmra.mxu1 %vm358_vm0, %v315_v31  ;;  %v337_v31 = vpack.c.bf16 %v297_v19, %v297_v19 }
  0x84   : > { %1746 = vmatmul.msk.bf16.gmra.mxu2 %vm358_vm0, %v325_v32 }
  0x85   : > { %1756 = vmatmul.msk.bf16.gmra.mxu3 %vm358_vm0, %v335_v33 }
  0x90   : > { %v488_v44 = vpop.f32.mrf.mxu0  ;;  %v538_v49 = vpop.f32.mrf.mxu1 }
  0x91   : > { %v489_v48 = vadd.f32 %v2093_v34, %v488_v44  ;;  %v539_v52 = vadd.f32 %v2093_v34, %v538_v49 }
  0x93   : > { %v766_v53 = vadd.f32 %v687_v45, %v489_v48  ;;  %1727 = vmatmul.msk.bf16.gmra.mxu0 %vm358_vm0, %v306_v43  ;;  %v786_v54 = vadd.f32 %v707_v50, %v539_v52  ;;  %1737 = vmatmul.msk.bf16.gmra.mxu1 %vm358_vm0, %v316_v46 }
  0x94   : > { %1747 = vmatmul.msk.bf16.gmra.mxu2 %vm358_vm0, %v326_v47 }
  0x95   : > { %v924_v55 = vmul.f32 0.044715, %v766_v53  ;;  %1757 = vmatmul.msk.bf16.gmra.mxu3 %vm358_vm0, %v336_v51  ;;  %v944_v56 = vmul.f32 0.044715, %v786_v54  ;;  %v845_v32 = vmul.f32 0.5, %v766_v53  ;;  %v865_v49 = vmul.f32 0.5, %v786_v54 }
  0x97   : > { %v1003_v57 = vmul.f32 %v924_v55, %v766_v53  ;;  %v588_v58 = vpop.f32.mrf.mxu2  ;;  %v1023_v60 = vmul.f32 %v944_v56, %v786_v54 }
  0x98   : > { %v589_v61 = vadd.f32 %v2093_v34, %v588_v58  ;;  %v638_v62 = vpop.f32.mrf.mxu3  ;;  %v490_v0 = vpop.f32.mrf.mxu0 }
  0x99   : > { %v1082_v3 = vmul.f32 %v1003_v57, %v766_v53  ;;  %v639_v4 = vadd.f32 %v2093_v34, %v638_v62  ;;  %v491_v5 = vadd.f32 %v2093_v34, %v490_v0  ;;  %v540_v6 = vpop.f32.mrf.mxu1  ;;  %v1102_v10 = vmul.f32 %v1023_v60, %v786_v54 }
  0x9a   : > { %v806_v11 = vadd.f32 %v727_v59, %v589_v61  ;;  %v541_v12 = vadd.f32 %v2093_v34, %v540_v6 }
  0x9b   : > { %v1161_v16 = vadd.f32 %v1082_v3, %v766_v53  ;;  %v2131_v17 = vadd.f32 %v747_v63, %v639_v4  ;;  %v2133_v18 = vadd.f32 %v688_v1, %v491_v5  ;;  %v1181_v20 = vadd.f32 %v1102_v10, %v786_v54  ;;  %v689_v53 = vld [vmem:[%s2102_s29 + $0x10] sm:$0xff] }
  0x9c   : > { %v964_v21 = vmul.f32 0.044715, %v806_v11  ;;  %v2136_v22 = vadd.f32 %v708_v2, %v541_v12  ;;  %v2154_v55 = vmul.f32 0.5, %v806_v11  ;;  %v709_v10 = vld [vmem:[%s2102_s29 + $0xb0] sm:$0xff] }
  0x9d   : > { %v1240_v24 = vmul.f32 0.7978846, %v1161_v16  ;;  %v984_v25 = vmul.f32 0.044715, %v2131_v17  ;;  %v1260_v28 = vmul.f32 0.7978846, %v1181_v20 }
  0x9e   : > { %v1043_v29 = vmul.f32 %v964_v21, %v806_v11  ;;  %v925_v30 = vmul.f32 0.044715, %v2133_v18  ;;  %v945_v35 = vmul.f32 0.044715, %v2136_v22  ;;  %v905_v13 = vmul.f32 0.5, %v2131_v17  ;;  %v729_v21 = vld [vmem:[%s2102_s29 + $0x150] sm:$0xff] }
  0x9f   : > { %1779 = vtanh.f32 %v1240_v24  ;;  %v1063_v33 = vmul.f32 %v984_v25, %v2131_v17  ;;  %v590_v36 = vpop.f32.mrf.mxu2 }
  0xa0   : > { %1781 = vtanh.f32 %v1260_v28  ;;  %v1122_v38 = vmul.f32 %v1043_v29, %v806_v11  ;;  %v1004_v39 = vmul.f32 %v925_v30, %v2133_v18  ;;  %v591_v40 = vadd.f32 %v2093_v34, %v590_v36  ;;  %v640_v41 = vpop.f32.mrf.mxu3  ;;  %v493_v43 = vpop.f32.mrf.mxu0 }
  0xa1   : > { %v1142_v44 = vmul.f32 %v1063_v33, %v2131_v17  ;;  %v1024_v45 = vmul.f32 %v945_v35, %v2136_v22  ;;  %v641_v46 = vadd.f32 %v2093_v34, %v640_v41  ;;  %v494_v47 = vadd.f32 %v2093_v34, %v493_v43  ;;  %v543_v48 = vpop.f32.mrf.mxu1 }
  0xa2   : > { %v1201_v50 = vadd.f32 %v1122_v38, %v806_v11  ;;  %v1083_v51 = vmul.f32 %v1004_v39, %v2133_v18  ;;  %v2151_v52 = vadd.f32 %v728_v37, %v591_v40  ;;  %v544_v61 = vadd.f32 %v2093_v34, %v543_v48 }
  0xa3   : > { %v1221_v56 = vadd.f32 %v1142_v44, %v2131_v17  ;;  %v1103_v57 = vmul.f32 %v1024_v45, %v2136_v22  ;;  %v2158_v58 = vadd.f32 %v748_v42, %v641_v46  ;;  %1728 = vmatmul.msk.bf16.gmra.mxu0 %vm358_vm0, %v307_v23  ;;  %1738 = vmatmul.msk.bf16.gmra.mxu1 %vm358_vm0, %v317_v26  ;;  %v846_v28 = vmul.f32 0.5, %v2133_v18 }
  0xa4   : > { %v1280_v59 = vmul.f32 0.7978846, %v1201_v50  ;;  %v1162_v60 = vadd.f32 %v1083_v51, %v2133_v18  ;;  %v965_v54 = vmul.f32 0.044715, %v2151_v52  ;;  %1748 = vmatmul.msk.bf16.gmra.mxu2 %vm358_vm0, %v327_v27  ;;  %v2168_v2 = vadd.f32 %v689_v53, %v494_v47  ;;  %v749_v27 = vld [vmem:[%s2102_s29 + $0x1f0] sm:$0xff]  ;;  %v690_v50 = vld [vmem:[%s2102_s29 + $0x18] sm:$0xff] }
  0xa5   : > { %v1780_v62 = vpop.eup %1779  ;;  %v1300_v63 = vmul.f32 0.7978846, %v1221_v56  ;;  %v1182_v0 = vadd.f32 %v1103_v57, %v2136_v22  ;;  %v985_v1 = vmul.f32 0.044715, %v2158_v58  ;;  %1758 = vmatmul.msk.bf16.gmra.mxu3 %vm358_vm0, %v337_v31  ;;  %v2188_v25 = vadd.f32 %v709_v10, %v544_v61 }
  0xa6   : > { %v1782_v3 = vpop.eup %1781  ;;  %v1398_v4 = vadd.f32 1.0, %v1780_v62  ;;  %1783 = vtanh.f32 %v1280_v59  ;;  %v1241_v5 = vmul.f32 0.7978846, %v1162_v60  ;;  %v1044_v6 = vmul.f32 %v965_v54, %v2151_v52  ;;  %v710_v59 = vld [vmem:[%s2102_s29 + $0xb8] sm:$0xff] }
  0xa7   : > { %v1418_v7 = vadd.f32 1.0, %v1782_v3  ;;  %1785 = vtanh.f32 %v1300_v63  ;;  %v1261_v8 = vmul.f32 0.7978846, %v1182_v0  ;;  %v1064_v9 = vmul.f32 %v985_v1, %v2158_v58  ;;  %v593_v11 = vpop.f32.mrf.mxu2 }
  0xa8   : > { %v1477_v12 = vmul.f32 %v1398_v4, %v845_v32  ;;  %1787 = vtanh.f32 %v1241_v5  ;;  %v1123_v14 = vmul.f32 %v1044_v6, %v2151_v52  ;;  %v643_v15 = vpop.f32.mrf.mxu3  ;;  %v926_v20 = vmul.f32 0.044715, %v2168_v2  ;;  %v495_v23 = vpop.f32.mrf.mxu0 }
  0xa9   : > { %v1497_v16 = vmul.f32 %v1418_v7, %v865_v49  ;;  %1789 = vtanh.f32 %v1261_v8  ;;  %v1143_v19 = vmul.f32 %v1064_v9, %v2158_v58  ;;  %v594_v17 = vadd.f32 %v2093_v34, %v593_v11  ;;  %v545_v32 = vpop.f32.mrf.mxu1  ;;  %v730_v7 = vld [vmem:[%s2102_s29 + $0x158] sm:$0xff] }
  0xaa   : > { %1556 = vst.msk [vmem:[%s2176_s6] sm:$0xff] %vm358_vm0, %v1477_v12  ;;  %v1202_v24 = vadd.f32 %v1123_v14, %v2151_v52  ;;  %v644_v26 = vadd.f32 %v2093_v34, %v643_v15  ;;  %v866_v29 = vmul.f32 0.5, %v2136_v22  ;;  %v1005_v31 = vmul.f32 %v926_v20, %v2168_v2 }
  0xab   : > { %1576 = vst.msk [vmem:[%s2176_s6 + $0xa0] sm:$0xff] %vm358_vm0, %v1497_v16  ;;  %v1222_v30 = vadd.f32 %v1143_v19, %v2158_v58  ;;  %v946_v36 = vmul.f32 0.044715, %v2188_v25  ;;  %v2200_v37 = vadd.f32 %v729_v21, %v594_v17  ;;  %v496_v38 = vadd.f32 %v2093_v34, %v495_v23 }
  0xac   : > { %v1784_v33 = vpop.eup %1783  ;;  %v1281_v35 = vmul.f32 0.7978846, %v1202_v24  ;;  %v1084_v18 = vmul.f32 %v1005_v31, %v2168_v2  ;;  %v2204_v22 = vadd.f32 %v749_v27, %v644_v26  ;;  %v546_v45 = vadd.f32 %v2093_v34, %v545_v32 }
  0xad   : > { %v1786_v39 = vpop.eup %1785  ;;  %v1438_v40 = vadd.f32 1.0, %v1784_v33  ;;  %v1301_v41 = vmul.f32 0.7978846, %v1222_v30  ;;  %v1025_v44 = vmul.f32 %v946_v36, %v2188_v25  ;;  %v966_v57 = vmul.f32 0.044715, %v2200_v37 }
  0xae   : > { %v1788_v42 = vpop.eup %1787  ;;  %v1458_v43 = vadd.f32 1.0, %v1786_v39  ;;  %1791 = vtanh.f32 %v1281_v35  ;;  %v1163_v49 = vadd.f32 %v1084_v18, %v2168_v2  ;;  %v886_v61 = vmul.f32 0.5, %v2151_v52 }
  0xaf   : > { %v1790_v46 = vpop.eup %1789  ;;  %v1517_v47 = vmul.f32 %v1438_v40, %v2154_v55  ;;  %v1399_v48 = vadd.f32 1.0, %v1788_v42  ;;  %1793 = vtanh.f32 %v1301_v41  ;;  %v1104_v56 = vmul.f32 %v1025_v44, %v2188_v25  ;;  %v595_v60 = vpop.f32.mrf.mxu2 }
  0xb0   : > { %v1537_v51 = vmul.f32 %v1458_v43, %v905_v13  ;;  %v1419_v53 = vadd.f32 1.0, %v1790_v46  ;;  %v645_v54 = vpop.f32.mrf.mxu3  ;;  %v1242_v62 = vmul.f32 0.7978846, %v1163_v49  ;;  %v986_v63 = vmul.f32 0.044715, %v2204_v22  ;;  %v498_v13 = vpop.f32.mrf.mxu0  ;;  %v691_v43 = vld [vmem:[%s2102_s29 + $0x20] sm:$0xff] }
  0xb1   : > { %1596 = vst.msk [vmem:[%s2176_s6 + $0x140] sm:$0xff] %vm358_vm0, %v1517_v47  ;;  %v1478_v55 = vmul.f32 %v1399_v48, %v846_v28  ;;  %v1183_v1 = vadd.f32 %v1104_v56, %v2188_v25  ;;  %v1045_v3 = vmul.f32 %v966_v57, %v2200_v37  ;;  %v2222_v4 = vadd.f32 %v690_v50, %v496_v38  ;;  %v548_v40 = vpop.f32.mrf.mxu1 }
  0xb2   : > { %1616 = vst.msk [vmem:[%s2176_s6 + $0x1e0] sm:$0xff] %vm358_vm0, %v1537_v51  ;;  %v1498_v0 = vmul.f32 %v1419_v53, %v866_v29  ;;  %1795 = vtanh.f32 %v1242_v62  ;;  %v1065_v5 = vmul.f32 %v986_v63, %v2204_v22  ;;  %v2227_v6 = vadd.f32 %v710_v59, %v546_v45 }
  0xb3   : > { %1557 = vst.msk [vmem:[%s2176_s6 + $0x8] sm:$0xff] %vm358_vm0, %v1478_v55  ;;  %v596_v52 = vadd.f32 %v2093_v34, %v595_v60  ;;  %v906_v9 = vmul.f32 0.5, %v2158_v58  ;;  %v1262_v10 = vmul.f32 0.7978846, %v1183_v1  ;;  %v1124_v11 = vmul.f32 %v1045_v3, %v2200_v37  ;;  %v711_v60 = vld [vmem:[%s2102_s29 + $0xc0] sm:$0xff] }
  0xb4   : > { %v1792_v8 = vpop.eup %1791  ;;  %1577 = vst.msk [vmem:[%s2176_s6 + $0xa8] sm:$0xff] %vm358_vm0, %v1498_v0  ;;  %v927_v12 = vmul.f32 0.044715, %v2222_v4  ;;  %v847_v16 = vmul.f32 0.5, %v2168_v2  ;;  %v1144_v19 = vmul.f32 %v1065_v5, %v2204_v22  ;;  %v947_v20 = vmul.f32 0.044715, %v2227_v6 }
  0xb5   : > { %v1794_v14 = vpop.eup %1793  ;;  %v1439_v15 = vadd.f32 1.0, %v1792_v8  ;;  %1797 = vtanh.f32 %v1262_v10  ;;  %v1203_v58 = vadd.f32 %v1124_v11, %v2200_v37  ;;  %v2243_v27 = vadd.f32 %v730_v7, %v596_v52  ;;  %v750_v2 = vld [vmem:[%s2102_s29 + $0x1f8] sm:$0xff] }
  0xb6   : > { %v1459_v21 = vadd.f32 1.0, %v1794_v14  ;;  %v1006_v23 = vmul.f32 %v927_v12, %v2222_v4  ;;  %v1223_v17 = vadd.f32 %v1144_v19, %v2204_v22  ;;  %v1026_v26 = vmul.f32 %v947_v20, %v2227_v6  ;;  %v751_v20 = vld [vmem:[%s2102_s29 + $0x200] sm:$0xff] }
  0xb7   : > { %v1518_v24 = vmul.f32 %v1439_v15, %v886_v61  ;;  %v1282_v29 = vmul.f32 0.7978846, %v1203_v58  ;;  %v646_v31 = vadd.f32 %v2093_v34, %v645_v54  ;;  %v867_v35 = vmul.f32 0.5, %v2188_v25  ;;  %v598_v46 = vpop.f32.mrf.mxu2  ;;  %v731_v54 = vld [vmem:[%s2102_s29 + $0x160] sm:$0xff] }
  0xb8   : > { %v1538_v28 = vmul.f32 %v1459_v21, %v906_v9  ;;  %v1085_v30 = vmul.f32 %v1006_v23, %v2222_v4  ;;  %v648_v32 = vpop.f32.mrf.mxu3  ;;  %v1796_v33 = vpop.eup %1795  ;;  %v1302_v36 = vmul.f32 0.7978846, %v1223_v17  ;;  %v1105_v38 = vmul.f32 %v1026_v26, %v2227_v6  ;;  %v692_v21 = vld [vmem:[%s2102_s29 + $0x28] sm:$0xff] }
  0xb9   : > { %1597 = vst.msk [vmem:[%s2176_s6 + $0x148] sm:$0xff] %vm358_vm0, %v1518_v24  ;;  %v967_v39 = vmul.f32 0.044715, %v2243_v27  ;;  %v1400_v41 = vadd.f32 1.0, %v1796_v33  ;;  %1799 = vtanh.f32 %v1282_v29  ;;  %v2256_v42 = vadd.f32 %v750_v2, %v646_v31  ;;  %v500_v62 = vpop.f32.mrf.mxu0  ;;  %v550_v17 = vpop.f32.mrf.mxu1 }
  0xba   : > { %1617 = vst.msk [vmem:[%s2176_s6 + $0x1e8] sm:$0xff] %vm358_vm0, %v1538_v28  ;;  %v1164_v18 = vadd.f32 %v1085_v30, %v2222_v4  ;;  %1801 = vtanh.f32 %v1302_v36  ;;  %v1184_v25 = vadd.f32 %v1105_v38, %v2227_v6  ;;  %v499_v45 = vadd.f32 %v2093_v34, %v498_v13 }
  0xbb   : > { %v1046_v44 = vmul.f32 %v967_v39, %v2243_v27  ;;  %v1798_v47 = vpop.eup %1797  ;;  %v1479_v48 = vmul.f32 %v1400_v41, %v847_v16  ;;  %v887_v49 = vmul.f32 0.5, %v2200_v37  ;;  %v987_v51 = vmul.f32 0.044715, %v2256_v42 }
  0xbc   : > { %v1243_v50 = vmul.f32 0.7978846, %v1164_v18  ;;  %v1420_v53 = vadd.f32 1.0, %v1798_v47  ;;  %v1263_v56 = vmul.f32 0.7978846, %v1184_v25  ;;  %v2265_v59 = vadd.f32 %v691_v43, %v499_v45  ;;  %v712_v47 = vld [vmem:[%s2102_s29 + $0xc8] sm:$0xff] }
  0xbd   : > { %v1125_v57 = vmul.f32 %v1046_v44, %v2243_v27  ;;  %1558 = vst.msk [vmem:[%s2176_s6 + $0x10] sm:$0xff] %vm358_vm0, %v1479_v48  ;;  %v1066_v55 = vmul.f32 %v987_v51, %v2256_v42  ;;  %v549_v61 = vadd.f32 %v2093_v34, %v548_v40  ;;  %v599_v37 = vadd.f32 %v2093_v34, %v598_v46 }
  0xbe   : > { %1803 = vtanh.f32 %v1243_v50  ;;  %v1499_v63 = vmul.f32 %v1420_v53, %v867_v35  ;;  %v907_v0 = vmul.f32 0.5, %v2204_v22  ;;  %v928_v52 = vmul.f32 0.044715, %v2265_v59 }
  0xbf   : > { %1805 = vtanh.f32 %v1263_v56  ;;  %v1204_v1 = vadd.f32 %v1125_v57, %v2243_v27  ;;  %v1800_v3 = vpop.eup %1799  ;;  %v1145_v5 = vmul.f32 %v1066_v55, %v2256_v42  ;;  %v2278_v7 = vadd.f32 %v711_v60, %v549_v61  ;;  %v600_v43 = vpop.f32.mrf.mxu2  ;;  %v732_v56 = vld [vmem:[%s2102_s29 + $0x168] sm:$0xff] }
  0xc0   : > { %v2280_v8 = vadd.f32 %v731_v54, %v599_v37  ;;  %v2282_v9 = vpop.f32.mrf.mxu3  ;;  %v1802_v10 = vpop.eup %1801  ;;  %1578 = vst.msk [vmem:[%s2176_s6 + $0xb0] sm:$0xff] %vm358_vm0, %v1499_v63  ;;  %v1440_v22 = vadd.f32 1.0, %v1800_v3  ;;  %v649_v12 = vadd.f32 %v2093_v34, %v648_v32  ;;  %v501_v13 = vadd.f32 %v2093_v34, %v500_v62 }
  0xc1   : > { %v1283_v11 = vmul.f32 0.7978846, %v1204_v1  ;;  %v1460_v14 = vadd.f32 1.0, %v1802_v10  ;;  %v848_v15 = vmul.f32 0.5, %v2222_v4  ;;  %v1224_v16 = vadd.f32 %v1145_v5, %v2256_v42 }
  0xc2   : > { %v1007_v19 = vmul.f32 %v928_v52, %v2265_v59  ;;  %v1519_v58 = vmul.f32 %v1440_v22, %v887_v49  ;;  %v868_v23 = vmul.f32 0.5, %v2227_v6  ;;  %v948_v24 = vmul.f32 0.044715, %v2278_v7  ;;  %v752_v22 = vld [vmem:[%s2102_s29 + $0x208] sm:$0xff] }
  0xc3   : > { %1807 = vtanh.f32 %v1283_v11  ;;  %v1539_v2 = vmul.f32 %v1460_v14, %v907_v0  ;;  %v1303_v28 = vmul.f32 0.7978846, %v1224_v16  ;;  %v968_v29 = vmul.f32 0.044715, %v2280_v8  ;;  %v503_v11 = vpop.f32.mrf.mxu0 }
  0xc4   : > { %v1804_v26 = vpop.eup %1803  ;;  %v1086_v4 = vmul.f32 %v1007_v19, %v2265_v59  ;;  %1598 = vst.msk [vmem:[%s2176_s6 + $0x150] sm:$0xff] %vm358_vm0, %v1519_v58  ;;  %v1027_v32 = vmul.f32 %v948_v24, %v2278_v7  ;;  %v2300_v33 = vadd.f32 %v751_v20, %v649_v12  ;;  %v2302_v6 = vadd.f32 %v692_v21, %v501_v13  ;;  %v553_v12 = vpop.f32.mrf.mxu1  ;;  %v693_v21 = vld [vmem:[%s2102_s29 + $0x30] sm:$0xff] }
  0xc5   : > { %v1806_v30 = vpop.eup %1805  ;;  %v1401_v31 = vadd.f32 1.0, %v1804_v26  ;;  %1618 = vst.msk [vmem:[%s2176_s6 + $0x1f0] sm:$0xff] %vm358_vm0, %v1539_v2  ;;  %1809 = vtanh.f32 %v1303_v28  ;;  %v1047_v38 = vmul.f32 %v968_v29, %v2280_v8  ;;  %v888_v40 = vmul.f32 0.5, %v2243_v27 }
  0xc6   : > { %v1421_v35 = vadd.f32 1.0, %v1806_v30  ;;  %v1165_v36 = vadd.f32 %v1086_v4, %v2265_v59  ;;  %v1106_v41 = vmul.f32 %v1027_v32, %v2278_v7  ;;  %v988_v18 = vmul.f32 0.044715, %v2300_v33 }
  0xc7   : > { %v1480_v39 = vmul.f32 %v1401_v31, %v848_v15  ;;  %v908_v44 = vmul.f32 0.5, %v2256_v42  ;;  %v1126_v46 = vmul.f32 %v1047_v38, %v2280_v8  ;;  %v929_v51 = vmul.f32 0.044715, %v2302_v6  ;;  %v603_v29 = vpop.f32.mrf.mxu2 }
  0xc8   : > { %v1500_v25 = vmul.f32 %v1421_v35, %v868_v23  ;;  %v1244_v45 = vmul.f32 0.7978846, %v1165_v36  ;;  %v2314_v48 = vpop.f32.mrf.mxu3  ;;  %v1185_v27 = vadd.f32 %v1106_v41, %v2278_v7  ;;  %v1067_v50 = vmul.f32 %v988_v18, %v2300_v33 }
  0xc9   : > { %v1808_v49 = vpop.eup %1807  ;;  %1559 = vst.msk [vmem:[%s2176_s6 + $0x18] sm:$0xff] %vm358_vm0, %v1480_v39  ;;  %v551_v53 = vadd.f32 %v2093_v34, %v550_v17  ;;  %v1205_v57 = vadd.f32 %v1126_v46, %v2280_v8  ;;  %v601_v60 = vadd.f32 %v2093_v34, %v600_v43  ;;  %v1008_v61 = vmul.f32 %v929_v51, %v2302_v6  ;;  %v733_v51 = vld [vmem:[%s2102_s29 + $0x170] sm:$0xff] }
  0xca   : > { %1579 = vst.msk [vmem:[%s2176_s6 + $0xb8] sm:$0xff] %vm358_vm0, %v1500_v25  ;;  %v1441_v42 = vadd.f32 1.0, %v1808_v49  ;;  %1811 = vtanh.f32 %v1244_v45  ;;  %v1264_v54 = vmul.f32 0.7978846, %v1185_v27  ;;  %v1146_v55 = vmul.f32 %v1067_v50, %v2300_v33 }
  0xcb   : > { %v2329_v37 = vadd.f32 %v712_v47, %v551_v53  ;;  %v1810_v62 = vpop.eup %1809  ;;  %v1284_v0 = vmul.f32 0.7978846, %v1205_v57  ;;  %v2331_v1 = vadd.f32 %v732_v56, %v601_v60  ;;  %v651_v3 = vadd.f32 %v2093_v34, %v2282_v9 }
  0xcc   : > { %v1520_v63 = vmul.f32 %v1441_v42, %v888_v40  ;;  %v1461_v5 = vadd.f32 1.0, %v1810_v62  ;;  %1813 = vtanh.f32 %v1264_v54  ;;  %v1225_v52 = vadd.f32 %v1146_v55, %v2300_v33 }
  0xcd   : > { %v1087_v10 = vmul.f32 %v1008_v61, %v2302_v6  ;;  %v849_v13 = vmul.f32 0.5, %v2265_v59  ;;  %v869_v14 = vmul.f32 0.5, %v2278_v7  ;;  %1815 = vtanh.f32 %v1284_v0  ;;  %v713_v7 = vld [vmem:[%s2102_s29 + $0xd0] sm:$0xff] }
  0xce   : > { %1599 = vst.msk [vmem:[%s2176_s6 + $0x158] sm:$0xff] %vm358_vm0, %v1520_v63  ;;  %v949_v9 = vmul.f32 0.044715, %v2329_v37  ;;  %v1540_v15 = vmul.f32 %v1461_v5, %v908_v44  ;;  %v1304_v16 = vmul.f32 0.7978846, %v1225_v52  ;;  %v2347_v24 = vadd.f32 %v752_v22, %v651_v3  ;;  %v753_v61 = vld [vmem:[%s2102_s29 + $0x210] sm:$0xff]  ;;  %v505_v5 = vpop.f32.mrf.mxu0 }
  0xcf   : > { %v1166_v19 = vadd.f32 %v1087_v10, %v2302_v6  ;;  %v969_v20 = vmul.f32 0.044715, %v2331_v1  ;;  %v504_v59 = vadd.f32 %v2093_v34, %v503_v11  ;;  %v554_v17 = vadd.f32 %v2093_v34, %v553_v12 }
  0xd0   : > { %v1812_v58 = vpop.eup %1811  ;;  %v1028_v23 = vmul.f32 %v949_v9, %v2329_v37  ;;  %v2352_v26 = vpop.f32.mrf.mxu3  ;;  %1619 = vst.msk [vmem:[%s2176_s6 + $0x1f8] sm:$0xff] %vm358_vm0, %v1540_v15  ;;  %1817 = vtanh.f32 %v1304_v16  ;;  %v889_v30 = vmul.f32 0.5, %v2280_v8  ;;  %v989_v32 = vmul.f32 0.044715, %v2347_v24  ;;  %v694_v16 = vld [vmem:[%s2102_s29 + $0x38] sm:$0xff] }
  0xd1   : > { %v1402_v2 = vadd.f32 1.0, %v1812_v58  ;;  %v1245_v28 = vmul.f32 0.7978846, %v1166_v19  ;;  %v1048_v4 = vmul.f32 %v969_v20, %v2331_v1  ;;  %v2360_v35 = vadd.f32 %v693_v21, %v504_v59  ;;  %v555_v19 = vpop.f32.mrf.mxu1 }
  0xd2   : > { %v1107_v31 = vmul.f32 %v1028_v23, %v2329_v37  ;;  %v1814_v36 = vpop.eup %1813  ;;  %v2363_v40 = vadd.f32 %v713_v7, %v554_v17  ;;  %v909_v43 = vmul.f32 0.5, %v2300_v33  ;;  %v1068_v25 = vmul.f32 %v989_v32, %v2347_v24 }
  0xd3   : > { %v1481_v38 = vmul.f32 %v1402_v2, %v849_v13  ;;  %1819 = vtanh.f32 %v1245_v28  ;;  %v1127_v39 = vmul.f32 %v1048_v4, %v2331_v1  ;;  %v1816_v41 = vpop.eup %1815  ;;  %v1422_v18 = vadd.f32 1.0, %v1814_v36 }
  0xd4   : > { %v1186_v8 = vadd.f32 %v1107_v31, %v2329_v37  ;;  %v1442_v44 = vadd.f32 1.0, %v1816_v41  ;;  %v850_v45 = vmul.f32 0.5, %v2302_v6  ;;  %v930_v47 = vmul.f32 0.044715, %v2360_v35 }
  0xd5   : > { %1560 = vst.msk [vmem:[%s2176_s6 + $0x20] sm:$0xff] %vm358_vm0, %v1481_v38  ;;  %v1206_v46 = vadd.f32 %v1127_v39, %v2331_v1  ;;  %v1501_v49 = vmul.f32 %v1422_v18, %v869_v14  ;;  %v1147_v33 = vmul.f32 %v1068_v25, %v2347_v24  ;;  %v950_v50 = vmul.f32 0.044715, %v2363_v40  ;;  %v734_v38 = vld [vmem:[%s2102_s29 + $0x178] sm:$0xff] }
  0xd6   : > { %v1265_v27 = vmul.f32 0.7978846, %v1186_v8  ;;  %v1818_v53 = vpop.eup %1817  ;;  %v1521_v56 = vmul.f32 %v1442_v44, %v889_v30  ;;  %v1009_v57 = vmul.f32 %v930_v47, %v2360_v35  ;;  %v604_v6 = vadd.f32 %v2093_v34, %v603_v29  ;;  %v714_v29 = vld [vmem:[%s2102_s29 + $0xd8] sm:$0xff] }
  0xd7   : > { %v1285_v42 = vmul.f32 0.7978846, %v1206_v46  ;;  %1580 = vst.msk [vmem:[%s2176_s6 + $0xc0] sm:$0xff] %vm358_vm0, %v1501_v49  ;;  %v1462_v60 = vadd.f32 1.0, %v1818_v53  ;;  %v1226_v54 = vadd.f32 %v1147_v33, %v2347_v24  ;;  %v1029_v55 = vmul.f32 %v950_v50, %v2363_v40 }
  0xd8   : > { %1821 = vtanh.f32 %v1265_v27  ;;  %1600 = vst.msk [vmem:[%s2176_s6 + $0x160] sm:$0xff] %vm358_vm0, %v1521_v56  ;;  %v1088_v63 = vmul.f32 %v1009_v57, %v2360_v35  ;;  %v2386_v0 = vadd.f32 %v733_v51, %v604_v6  ;;  %v654_v3 = vadd.f32 %v2093_v34, %v2314_v48  ;;  %v2390_v52 = vpop.f32.mrf.mxu3  ;;  %v605_v48 = vpop.f32.mrf.mxu2  ;;  %v754_v27 = vld [vmem:[%s2102_s29 + $0x218] sm:$0xff] }
  0xd9   : > { %v1820_v62 = vpop.eup %1819  ;;  %1823 = vtanh.f32 %v1285_v42  ;;  %v1541_v10 = vmul.f32 %v1462_v60, %v909_v43  ;;  %v1305_v11 = vmul.f32 0.7978846, %v1226_v54  ;;  %v1108_v12 = vmul.f32 %v1029_v55, %v2363_v40  ;;  %v508_v56 = vpop.f32.mrf.mxu0 }
  0xda   : > { %v1403_v22 = vadd.f32 1.0, %v1820_v62  ;;  %v870_v13 = vmul.f32 0.5, %v2329_v37  ;;  %v1167_v14 = vadd.f32 %v1088_v63, %v2360_v35  ;;  %v970_v9 = vmul.f32 0.044715, %v2386_v0 }
  0xdb   : > { %v2396_v15 = vadd.f32 %v753_v61, %v654_v3  ;;  %1620 = vst.msk [vmem:[%s2176_s6 + $0x200] sm:$0xff] %vm358_vm0, %v1541_v10  ;;  %1825 = vtanh.f32 %v1305_v11  ;;  %v1187_v21 = vadd.f32 %v1108_v12, %v2363_v40  ;;  %v506_v58 = vadd.f32 %v2093_v34, %v505_v5  ;;  %v558_v10 = vpop.f32.mrf.mxu1 }
  0xdc   : > { %v1482_v20 = vmul.f32 %v1403_v22, %v850_v45  ;;  %v890_v37 = vmul.f32 0.5, %v2331_v1  ;;  %v1246_v23 = vmul.f32 0.7978846, %v1167_v14  ;;  %v1049_v59 = vmul.f32 %v970_v9, %v2386_v0 }
  0xdd   : > { %v990_v17 = vmul.f32 0.044715, %v2396_v15  ;;  %v1266_v2 = vmul.f32 0.7978846, %v1187_v21  ;;  %v2408_v28 = vadd.f32 %v694_v16, %v506_v58  ;;  %v556_v4 = vadd.f32 %v2093_v34, %v555_v19 }
  0xde   : > { %v1822_v7 = vpop.eup %1821  ;;  %1561 = vst.msk [vmem:[%s2176_s6 + $0x28] sm:$0xff] %vm358_vm0, %v1482_v20  ;;  %v606_v30 = vadd.f32 %v2093_v34, %v605_v48  ;;  %1827 = vtanh.f32 %v1246_v23  ;;  %v1128_v1 = vmul.f32 %v1049_v59, %v2386_v0  ;;  %v910_v41 = vmul.f32 0.5, %v2347_v24  ;;  %v695_v48 = vld [vmem:[%s2102_s29 + $0x40] sm:$0xff] }
  0xdf   : > { %v1824_v31 = vpop.eup %1823  ;;  %v1423_v32 = vadd.f32 1.0, %v1822_v7  ;;  %v1069_v36 = vmul.f32 %v990_v17, %v2396_v15  ;;  %1829 = vtanh.f32 %v1266_v2  ;;  %v931_v18 = vmul.f32 0.044715, %v2408_v28  ;;  %v715_v20 = vld [vmem:[%s2102_s29 + $0xe0] sm:$0xff] }
  0xe0   : > { %v1443_v39 = vadd.f32 1.0, %v1824_v31  ;;  %v1207_v8 = vadd.f32 %v1128_v1, %v2386_v0  ;;  %v2420_v44 = vadd.f32 %v714_v29, %v556_v4  ;;  %v2423_v49 = vadd.f32 %v734_v38, %v606_v30  ;;  %v2432_v42 = vpop.f32.mrf.mxu3  ;;  %v735_v23 = vld [vmem:[%s2102_s29 + $0x180] sm:$0xff] }
  0xe1   : > { %v1502_v43 = vmul.f32 %v1423_v32, %v870_v13  ;;  %v1148_v25 = vmul.f32 %v1069_v36, %v2396_v15  ;;  %v1826_v45 = vpop.eup %1825  ;;  %v1010_v47 = vmul.f32 %v931_v18, %v2408_v28  ;;  %v656_v24 = vadd.f32 %v2093_v34, %v2352_v26  ;;  %v608_v13 = vpop.f32.mrf.mxu2 }
  0xe2   : > { %v1522_v46 = vmul.f32 %v1443_v39, %v890_v37  ;;  %v1463_v33 = vadd.f32 1.0, %v1826_v45  ;;  %v851_v50 = vmul.f32 0.5, %v2360_v35  ;;  %v1286_v51 = vmul.f32 0.7978846, %v1207_v8  ;;  %v510_v45 = vpop.f32.mrf.mxu0 }
  0xe3   : > { %1581 = vst.msk [vmem:[%s2176_s6 + $0xc8] sm:$0xff] %vm358_vm0, %v1502_v43  ;;  %v1227_v53 = vadd.f32 %v1148_v25, %v2396_v15  ;;  %v871_v57 = vmul.f32 0.5, %v2363_v40  ;;  %v1089_v6 = vmul.f32 %v1010_v47, %v2408_v28  ;;  %v951_v26 = vmul.f32 0.044715, %v2420_v44  ;;  %v755_v25 = vld [vmem:[%s2102_s29 + $0x220] sm:$0xff] }
  0xe4   : > { %1601 = vst.msk [vmem:[%s2176_s6 + $0x168] sm:$0xff] %vm358_vm0, %v1522_v46  ;;  %v971_v60 = vmul.f32 0.044715, %v2423_v49  ;;  %v1828_v54 = vpop.eup %1827  ;;  %v1542_v55 = vmul.f32 %v1463_v33, %v910_v41  ;;  %1831 = vtanh.f32 %v1286_v51  ;;  %v2440_v61 = vadd.f32 %v754_v27, %v656_v24 }
  0xe5   : > { %v1306_v35 = vmul.f32 0.7978846, %v1227_v53  ;;  %v1830_v62 = vpop.eup %1829  ;;  %v1404_v63 = vadd.f32 1.0, %v1828_v54  ;;  %v1168_v3 = vadd.f32 %v1089_v6, %v2408_v28  ;;  %v1030_v40 = vmul.f32 %v951_v26, %v2420_v44  ;;  %v2494_v26 = vld [vmem:[%s3030_s2] ss:$0 sm:$0xff] }
  0xe6   : > { %v1050_v5 = vmul.f32 %v971_v60, %v2423_v49  ;;  %1621 = vst.msk [vmem:[%s2176_s6 + $0x208] sm:$0xff] %vm358_vm0, %v1542_v55  ;;  %v1424_v22 = vadd.f32 1.0, %v1830_v62  ;;  %v891_v11 = vmul.f32 0.5, %v2386_v0  ;;  %v991_v12 = vmul.f32 0.044715, %v2440_v61 }
  0xe7   : > { %1833 = vtanh.f32 %v1306_v35  ;;  %v1483_v14 = vmul.f32 %v1404_v63, %v851_v50  ;;  %v1247_v9 = vmul.f32 0.7978846, %v1168_v3  ;;  %v1109_v16 = vmul.f32 %v1030_v40, %v2420_v44  ;;  %v716_v63 = vld [vmem:[%s2102_s29 + $0xe8] sm:$0xff] }
  0xe8   : > { %v1129_v19 = vmul.f32 %v1050_v5, %v2423_v49  ;;  %v1503_v21 = vmul.f32 %v1424_v22, %v871_v57  ;;  %v1070_v58 = vmul.f32 %v991_v12, %v2440_v61  ;;  %v509_v37 = vadd.f32 %v2093_v34, %v508_v56  ;;  %v2478_v46 = vpop.f32.mrf.mxu3  ;;  %v696_v56 = vld [vmem:[%s2102_s29 + $0x48] sm:$0xff]  ;;  %v560_v57 = vpop.f32.mrf.mxu1 }
  0xe9   : > { %v559_v0 = vadd.f32 %v2093_v34, %v558_v10  ;;  %1562 = vst.msk [vmem:[%s2176_s6 + $0x30] sm:$0xff] %vm358_vm0, %v1483_v14  ;;  %1835 = vtanh.f32 %v1247_v9  ;;  %v1188_v59 = vadd.f32 %v1109_v16, %v2420_v44  ;;  %v609_v7 = vadd.f32 %v2093_v34, %v608_v13  ;;  %v610_v3 = vpop.f32.mrf.mxu2 }
  0xea   : > { %v1208_v17 = vadd.f32 %v1129_v19, %v2423_v49  ;;  %v1832_v2 = vpop.eup %1831  ;;  %1582 = vst.msk [vmem:[%s2176_s6 + $0xd0] sm:$0xff] %vm358_vm0, %v1503_v21  ;;  %v1149_v4 = vmul.f32 %v1070_v58, %v2440_v61  ;;  %v2465_v29 = vadd.f32 %v695_v48, %v509_v37  ;;  %v659_v31 = vadd.f32 %v2093_v34, %v2390_v52 }
  0xeb   : > { %v2467_v30 = vadd.f32 %v715_v20, %v559_v0  ;;  %v1444_v32 = vadd.f32 1.0, %v1832_v2  ;;  %v1267_v1 = vmul.f32 0.7978846, %v1188_v59  ;;  %v2471_v38 = vadd.f32 %v735_v23, %v609_v7  ;;  %v736_v0 = vld [vmem:[%s2102_s29 + $0x188] sm:$0xff]  ;;  %v513_v2 = vpop.f32.mrf.mxu0 }
  0xec   : > { %v1287_v36 = vmul.f32 0.7978846, %v1208_v17  ;;  %v911_v41 = vmul.f32 0.5, %v2396_v15  ;;  %v852_v18 = vmul.f32 0.5, %v2408_v28  ;;  %v1228_v43 = vadd.f32 %v1149_v4, %v2440_v61 }
  0xed   : > { %v1834_v39 = vpop.eup %1833  ;;  %v932_v8 = vmul.f32 0.044715, %v2465_v29  ;;  %v1523_v34 = vmul.f32 %v1444_v32, %v891_v11  ;;  %1837 = vtanh.f32 %v1267_v1  ;;  %v952_v47 = vmul.f32 0.044715, %v2467_v30 }
  0xee   : > { %v1464_v52 = vadd.f32 1.0, %v1834_v39  ;;  %v872_v24 = vmul.f32 0.5, %v2420_v44  ;;  %1839 = vtanh.f32 %v1287_v36  ;;  %v1307_v15 = vmul.f32 0.7978846, %v1228_v43  ;;  %v697_v43 = vld [vmem:[%s2102_s29 + $0x50] sm:$0xff] }
  0xef   : > { %v1011_v28 = vmul.f32 %v932_v8, %v2465_v29  ;;  %v1836_v27 = vpop.eup %1835  ;;  %1602 = vst.msk [vmem:[%s2176_s6 + $0x170] sm:$0xff] %vm358_vm0, %v1523_v34  ;;  %v1031_v50 = vmul.f32 %v952_v47, %v2467_v30  ;;  %v972_v51 = vmul.f32 0.044715, %v2471_v38  ;;  %v2487_v53 = vadd.f32 %v755_v25, %v659_v31 }
  0xf0   : > { %v1543_v33 = vmul.f32 %v1464_v52, %v911_v41  ;;  %v1405_v6 = vadd.f32 1.0, %v1836_v27  ;;  %1841 = vtanh.f32 %v1307_v15  ;;  %v511_v60 = vadd.f32 %v2494_v26, %v510_v45  ;;  %v2522_v4 = vpop.f32.mrf.mxu3  ;;  %v563_v15 = vpop.f32.mrf.mxu1 }
  0xf1   : > { %v1090_v44 = vmul.f32 %v1011_v28, %v2465_v29  ;;  %v892_v54 = vmul.f32 0.5, %v2423_v49  ;;  %v1110_v55 = vmul.f32 %v1031_v50, %v2467_v30  ;;  %v1051_v35 = vmul.f32 %v972_v51, %v2471_v38  ;;  %v613_v50 = vpop.f32.mrf.mxu2 }
  0xf2   : > { %1622 = vst.msk [vmem:[%s2176_s6 + $0x210] sm:$0xff] %vm358_vm0, %v1543_v33  ;;  %v992_v62 = vmul.f32 0.044715, %v2487_v53  ;;  %v1484_v40 = vmul.f32 %v1405_v6, %v852_v18  ;;  %v2505_v10 = vadd.f32 %v696_v56, %v511_v60  ;;  %v561_v22 = vadd.f32 %v2494_v26, %v560_v57  ;;  %v756_v18 = vld [vmem:[%s2102_s29 + $0x228] sm:$0xff] }
  0xf3   : > { %v1169_v5 = vadd.f32 %v1090_v44, %v2465_v29  ;;  %v1838_v11 = vpop.eup %1837  ;;  %v912_v49 = vmul.f32 0.5, %v2440_v61  ;;  %v1189_v12 = vadd.f32 %v1110_v55, %v2467_v30  ;;  %v1130_v13 = vmul.f32 %v1051_v35, %v2471_v38 }
  0xf4   : > { %v1071_v14 = vmul.f32 %v992_v62, %v2487_v53  ;;  %v1840_v9 = vpop.eup %1839  ;;  %1563 = vst.msk [vmem:[%s2176_s6 + $0x38] sm:$0xff] %vm358_vm0, %v1484_v40  ;;  %v1425_v16 = vadd.f32 1.0, %v1838_v11  ;;  %v2514_v48 = vadd.f32 %v716_v63, %v561_v22  ;;  %v611_v20 = vadd.f32 %v2494_v26, %v610_v3 }
  0xf5   : > { %v1248_v19 = vmul.f32 0.7978846, %v1169_v5  ;;  %v1445_v21 = vadd.f32 1.0, %v1840_v9  ;;  %v1268_v58 = vmul.f32 0.7978846, %v1189_v12  ;;  %v1209_v61 = vadd.f32 %v1130_v13, %v2471_v38 }
  0xf6   : > { %v1150_v37 = vmul.f32 %v1071_v14, %v2487_v53  ;;  %v1842_v23 = vpop.eup %1841  ;;  %v1504_v59 = vmul.f32 %v1425_v16, %v872_v24  ;;  %v853_v17 = vmul.f32 0.5, %v2465_v29  ;;  %v933_v7 = vmul.f32 0.044715, %v2505_v10 }
  0xf7   : > { %1843 = vtanh.f32 %v1248_v19  ;;  %v1524_v31 = vmul.f32 %v1445_v21, %v892_v54  ;;  %v1465_v32 = vadd.f32 1.0, %v1842_v23  ;;  %v1288_v1 = vmul.f32 0.7978846, %v1209_v61 }
  0xf8   : > { %1845 = vtanh.f32 %v1268_v58  ;;  %1583 = vst.msk [vmem:[%s2176_s6 + $0xd8] sm:$0xff] %vm358_vm0, %v1504_v59  ;;  %v1229_v36 = vadd.f32 %v1150_v37, %v2487_v53  ;;  %v1012_v39 = vmul.f32 %v933_v7, %v2505_v10  ;;  %v953_v29 = vmul.f32 0.044715, %v2514_v48  ;;  %v2562_v9 = vpop.f32.mrf.mxu3  ;;  %v757_v58 = vld [vmem:[%s2102_s29 + $0x230] sm:$0xff] }
  0xf9   : > { %v2529_v41 = vadd.f32 %v736_v0, %v611_v20  ;;  %1603 = vst.msk [vmem:[%s2176_s6 + $0x178] sm:$0xff] %vm358_vm0, %v1524_v31  ;;  %v1544_v8 = vmul.f32 %v1465_v32, %v912_v49  ;;  %1847 = vtanh.f32 %v1288_v1  ;;  %v661_v25 = vadd.f32 %v2494_v26, %v2432_v42  ;;  %v737_v49 = vld [vmem:[%s2102_s29 + $0x190] sm:$0xff] }
  0xfa   : > { %v514_v45 = vadd.f32 %v2494_v26, %v513_v2  ;;  %v873_v34 = vmul.f32 0.5, %v2467_v30  ;;  %v1308_v52 = vmul.f32 0.7978846, %v1229_v36  ;;  %v1091_v47 = vmul.f32 %v1012_v39, %v2505_v10  ;;  %v515_v39 = vpop.f32.mrf.mxu0 }
  0xfb   : > { %v1032_v24 = vmul.f32 %v953_v29, %v2514_v48  ;;  %1623 = vst.msk [vmem:[%s2176_s6 + $0x218] sm:$0xff] %vm358_vm0, %v1544_v8  ;;  %v893_v28 = vmul.f32 0.5, %v2471_v38  ;;  %v973_v27 = vmul.f32 0.044715, %v2529_v41  ;;  %v2545_v33 = vadd.f32 %v756_v18, %v661_v25 }
  0xfc   : > { %v2547_v42 = vadd.f32 %v697_v43, %v514_v45  ;;  %v913_v30 = vmul.f32 0.5, %v2487_v53  ;;  %1849 = vtanh.f32 %v1308_v52  ;;  %v1170_v56 = vadd.f32 %v1091_v47, %v2505_v10  ;;  %v717_v53 = vld [vmem:[%s2102_s29 + $0xf0] sm:$0xff]  ;;  %v565_v43 = vpop.f32.mrf.mxu1 }
  0xfd   : > { %v1844_v51 = vpop.eup %1843  ;;  %v1111_v57 = vmul.f32 %v1032_v24, %v2514_v48  ;;  %v1052_v38 = vmul.f32 %v973_v27, %v2529_v41  ;;  %v993_v60 = vmul.f32 0.044715, %v2545_v33  ;;  %v564_v54 = vadd.f32 %v2494_v26, %v563_v15  ;;  %v718_v15 = vld [vmem:[%s2102_s29 + $0xf8] sm:$0xff] }
  0xfe   : > { %v1846_v6 = vpop.eup %1845  ;;  %v1406_v44 = vadd.f32 1.0, %v1844_v51  ;;  %v1249_v35 = vmul.f32 0.7978846, %v1170_v56  ;;  %v614_v63 = vadd.f32 %v2494_v26, %v613_v50  ;;  %v934_v11 = vmul.f32 0.044715, %v2547_v42 }
  0xff   : > { %v1426_v55 = vadd.f32 1.0, %v1846_v6  ;;  %v1190_v62 = vadd.f32 %v1111_v57, %v2514_v48  ;;  %v1848_v3 = vpop.eup %1847  ;;  %v1131_v5 = vmul.f32 %v1052_v38, %v2529_v41  ;;  %v1072_v22 = vmul.f32 %v993_v60, %v2545_v33 }
 0x100   : > { %v1485_v40 = vmul.f32 %v1406_v44, %v853_v17  ;;  %v1446_v13 = vadd.f32 1.0, %v1848_v3  ;;  %1851 = vtanh.f32 %v1249_v35  ;;  %v1013_v20 = vmul.f32 %v934_v11, %v2547_v42  ;;  %v2609_v35 = vpop.f32.mrf.mxu3 }
 0x101   : > { %v1505_v12 = vmul.f32 %v1426_v55, %v873_v34  ;;  %v1269_v14 = vmul.f32 0.7978846, %v1190_v62  ;;  %v1210_v16 = vadd.f32 %v1131_v5, %v2529_v41  ;;  %v1151_v19 = vmul.f32 %v1072_v22, %v2545_v33  ;;  %v698_v34 = vld [vmem:[%s2102_s29 + $0x58] sm:$0xff] }
 0x102   : > { %1564 = vst.msk [vmem:[%s2176_s6 + $0x40] sm:$0xff] %vm358_vm0, %v1485_v40  ;;  %v2569_v21 = vadd.f32 %v717_v53, %v564_v54  ;;  %v1850_v61 = vpop.eup %1849  ;;  %v1525_v37 = vmul.f32 %v1446_v13, %v893_v28  ;;  %v2574_v0 = vadd.f32 %v737_v49, %v614_v63  ;;  %v664_v23 = vadd.f32 %v2494_v26, %v2478_v46  ;;  %v615_v28 = vpop.f32.mrf.mxu2  ;;  %v738_v55 = vld [vmem:[%s2102_s29 + $0x198] sm:$0xff] }
 0x103   : > { %1584 = vst.msk [vmem:[%s2176_s6 + $0xe0] sm:$0xff] %vm358_vm0, %v1505_v12  ;;  %1853 = vtanh.f32 %v1269_v14  ;;  %v1466_v59 = vadd.f32 1.0, %v1850_v61  ;;  %v1289_v17 = vmul.f32 0.7978846, %v1210_v16  ;;  %v1230_v7 = vadd.f32 %v1151_v19, %v2545_v33  ;;  %v518_v61 = vpop.f32.mrf.mxu0 }
 0x104   : > { %v1092_v2 = vmul.f32 %v1013_v20, %v2547_v42  ;;  %1604 = vst.msk [vmem:[%s2176_s6 + $0x180] sm:$0xff] %vm358_vm0, %v1525_v37  ;;  %v854_v31 = vmul.f32 0.5, %v2505_v10  ;;  %v874_v32 = vmul.f32 0.5, %v2514_v48  ;;  %v954_v1 = vmul.f32 0.044715, %v2569_v21 }
 0x105   : > { %v2585_v36 = vadd.f32 %v757_v58, %v664_v23  ;;  %v1545_v46 = vmul.f32 %v1466_v59, %v913_v30  ;;  %1855 = vtanh.f32 %v1289_v17  ;;  %v1309_v29 = vmul.f32 0.7978846, %v1230_v7  ;;  %v568_v7 = vpop.f32.mrf.mxu1 }
 0x106   : > { %v1171_v18 = vadd.f32 %v1092_v2, %v2547_v42  ;;  %v1852_v8 = vpop.eup %1851  ;;  %v894_v25 = vmul.f32 0.5, %v2529_v41  ;;  %v1033_v10 = vmul.f32 %v954_v1, %v2569_v21  ;;  %v974_v45 = vmul.f32 0.044715, %v2574_v0  ;;  %v758_v1 = vld [vmem:[%s2102_s29 + $0x238] sm:$0xff] }
 0x107   : > { %v994_v48 = vmul.f32 0.044715, %v2585_v36  ;;  %1624 = vst.msk [vmem:[%s2176_s6 + $0x220] sm:$0xff] %vm358_vm0, %v1545_v46  ;;  %v1407_v52 = vadd.f32 1.0, %v1852_v8  ;;  %1857 = vtanh.f32 %v1309_v29  ;;  %v516_v24 = vadd.f32 %v2494_v26, %v515_v39  ;;  %v699_v29 = vld [vmem:[%s2102_s29 + $0x60] sm:$0xff] }
 0x108   : > { %v1250_v47 = vmul.f32 0.7978846, %v1171_v18  ;;  %v1112_v41 = vmul.f32 %v1033_v10, %v2569_v21  ;;  %v1053_v50 = vmul.f32 %v974_v45, %v2574_v0  ;;  %v566_v30 = vadd.f32 %v2494_v26, %v565_v43  ;;  %v719_v18 = vld [vmem:[%s2102_s29 + $0x100] sm:$0xff] }
 0x109   : > { %v1854_v27 = vpop.eup %1853  ;;  %v1073_v51 = vmul.f32 %v994_v48, %v2585_v36  ;;  %v1486_v56 = vmul.f32 %v1407_v52, %v854_v31  ;;  %v2601_v6 = vadd.f32 %v698_v34, %v516_v24  ;;  %v914_v63 = vmul.f32 0.5, %v2545_v33 }
 0x10a   : > { %v1427_v57 = vadd.f32 1.0, %v1854_v27  ;;  %1859 = vtanh.f32 %v1250_v47  ;;  %v1191_v44 = vadd.f32 %v1112_v41, %v2569_v21  ;;  %v1132_v38 = vmul.f32 %v1053_v50, %v2574_v0  ;;  %v618_v43 = vpop.f32.mrf.mxu2  ;;  %v2655_v41 = vpop.f32.mrf.mxu3 }
 0x10b   : > { %v1152_v60 = vmul.f32 %v1073_v51, %v2585_v36  ;;  %v2606_v54 = vadd.f32 %v718_v15, %v566_v30  ;;  %v1856_v62 = vpop.eup %1855  ;;  %1565 = vst.msk [vmem:[%s2176_s6 + $0x48] sm:$0xff] %vm358_vm0, %v1486_v56  ;;  %v935_v3 = vmul.f32 0.044715, %v2601_v6  ;;  %v616_v40 = vadd.f32 %v2494_v26, %v615_v28  ;;  %v739_v51 = vld [vmem:[%s2102_s29 + $0x1a0] sm:$0xff] }
 0x10c   : > { %v1506_v53 = vmul.f32 %v1427_v57, %v874_v32  ;;  %v1447_v5 = vadd.f32 1.0, %v1856_v62  ;;  %v1270_v22 = vmul.f32 0.7978846, %v1191_v44  ;;  %v1211_v11 = vadd.f32 %v1132_v38, %v2574_v0 }
 0x10d   : > { %v1231_v49 = vadd.f32 %v1152_v60, %v2585_v36  ;;  %v1858_v12 = vpop.eup %1857  ;;  %v855_v13 = vmul.f32 0.5, %v2547_v42  ;;  %v1014_v14 = vmul.f32 %v935_v3, %v2601_v6  ;;  %v955_v33 = vmul.f32 0.044715, %v2606_v54 }
 0x10e   : > { %1585 = vst.msk [vmem:[%s2176_s6 + $0xe8] sm:$0xff] %vm358_vm0, %v1506_v53  ;;  %v2623_v16 = vadd.f32 %v738_v55, %v616_v40  ;;  %v1526_v19 = vmul.f32 %v1447_v5, %v894_v25  ;;  %v1467_v20 = vadd.f32 1.0, %v1858_v12  ;;  %1861 = vtanh.f32 %v1270_v22  ;;  %v759_v55 = vld [vmem:[%s2102_s29 + $0x240] sm:$0xff]  ;;  %v520_v22 = vpop.f32.mrf.mxu0 }
 0x10f   : > { %v1290_v58 = vmul.f32 0.7978846, %v1211_v11  ;;  %v875_v23 = vmul.f32 0.5, %v2569_v21  ;;  %v1310_v59 = vmul.f32 0.7978846, %v1231_v49  ;;  %v1093_v42 = vmul.f32 %v1014_v14, %v2601_v6 }
 0x110   : > { %v1860_v37 = vpop.eup %1859  ;;  %v1034_v17 = vmul.f32 %v955_v33, %v2606_v54  ;;  %1605 = vst.msk [vmem:[%s2176_s6 + $0x188] sm:$0xff] %vm358_vm0, %v1526_v19  ;;  %v1546_v2 = vmul.f32 %v1467_v20, %v914_v63  ;;  %v975_v32 = vmul.f32 0.044715, %v2623_v16  ;;  %v666_v46 = vadd.f32 %v2494_v26, %v2522_v4  ;;  %v570_v19 = vpop.f32.mrf.mxu1 }
 0x111   : > { %v1408_v31 = vadd.f32 1.0, %v1860_v37  ;;  %1863 = vtanh.f32 %v1290_v58  ;;  %v1172_v39 = vadd.f32 %v1093_v42, %v2601_v6  ;;  %v519_v10 = vadd.f32 %v2494_v26, %v518_v61 }
 0x112   : > { %1865 = vtanh.f32 %v1310_v59  ;;  %v1113_v21 = vmul.f32 %v1034_v17, %v2606_v54  ;;  %1625 = vst.msk [vmem:[%s2176_s6 + $0x228] sm:$0xff] %vm358_vm0, %v1546_v2  ;;  %v1054_v25 = vmul.f32 %v975_v32, %v2623_v16  ;;  %v569_v45 = vadd.f32 %v2494_v26, %v568_v7  ;;  %v700_v2 = vld [vmem:[%s2102_s29 + $0x68] sm:$0xff] }
 0x113   : > { %v1487_v8 = vmul.f32 %v1408_v31, %v855_v13  ;;  %v895_v48 = vmul.f32 0.5, %v2574_v0  ;;  %v1251_v34 = vmul.f32 0.7978846, %v1172_v39  ;;  %v2645_v47 = vadd.f32 %v758_v1, %v666_v46  ;;  %v720_v39 = vld [vmem:[%s2102_s29 + $0x108] sm:$0xff] }
 0x114   : > { %v1192_v52 = vadd.f32 %v1113_v21, %v2606_v54  ;;  %v1862_v4 = vpop.eup %1861  ;;  %v1133_v24 = vmul.f32 %v1054_v25, %v2623_v16  ;;  %v2650_v15 = vadd.f32 %v699_v29, %v519_v10  ;;  %v2652_v28 = vadd.f32 %v719_v18, %v569_v45  ;;  %v620_v21 = vpop.f32.mrf.mxu2 }
 0x115   : > { %1566 = vst.msk [vmem:[%s2176_s6 + $0x50] sm:$0xff] %vm358_vm0, %v1487_v8  ;;  %v619_v27 = vadd.f32 %v2494_v26, %v618_v43  ;;  %v1428_v0 = vadd.f32 1.0, %v1862_v4  ;;  %1867 = vtanh.f32 %v1251_v34  ;;  %v669_v30 = vadd.f32 %v2494_v26, %v2562_v9  ;;  %v2694_v8 = vpop.f32.mrf.mxu3 }
 0x116   : > { %v1271_v50 = vmul.f32 0.7978846, %v1192_v52  ;;  %v915_v57 = vmul.f32 0.5, %v2585_v36  ;;  %v1212_v44 = vadd.f32 %v1133_v24, %v2623_v16  ;;  %v995_v38 = vmul.f32 0.044715, %v2645_v47 }
 0x117   : > { %v1864_v56 = vpop.eup %1863  ;;  %v936_v60 = vmul.f32 0.044715, %v2650_v15  ;;  %v1507_v53 = vmul.f32 %v1428_v0, %v875_v23  ;;  %v856_v3 = vmul.f32 0.5, %v2601_v6  ;;  %v956_v49 = vmul.f32 0.044715, %v2652_v28 }
 0x118   : > { %v1866_v62 = vpop.eup %1865  ;;  %v1448_v63 = vadd.f32 1.0, %v1864_v56  ;;  %1869 = vtanh.f32 %v1271_v50  ;;  %v1291_v9 = vmul.f32 0.7978846, %v1212_v44  ;;  %v1074_v5 = vmul.f32 %v995_v38, %v2645_v47  ;;  %v523_v38 = vpop.f32.mrf.mxu0 }
 0x119   : > { %v1468_v40 = vadd.f32 1.0, %v1866_v62  ;;  %v1015_v36 = vmul.f32 %v936_v60, %v2650_v15  ;;  %1586 = vst.msk [vmem:[%s2176_s6 + $0xf0] sm:$0xff] %vm358_vm0, %v1507_v53  ;;  %v2671_v12 = vadd.f32 %v739_v51, %v619_v27  ;;  %v2673_v13 = vadd.f32 %v759_v55, %v669_v30  ;;  %v740_v51 = vld [vmem:[%s2102_s29 + $0x1a8] sm:$0xff] }
 0x11a   : > { %v1527_v11 = vmul.f32 %v1448_v63, %v895_v48  ;;  %1871 = vtanh.f32 %v1291_v9  ;;  %v1153_v14 = vmul.f32 %v1074_v5, %v2645_v47  ;;  %v876_v58 = vmul.f32 0.5, %v2606_v54 }
 0x11b   : > { %v1547_v6 = vmul.f32 %v1468_v40, %v915_v57  ;;  %v1094_v33 = vmul.f32 %v1015_v36, %v2650_v15  ;;  %v1868_v20 = vpop.eup %1867  ;;  %v896_v61 = vmul.f32 0.5, %v2623_v16  ;;  %v1035_v37 = vmul.f32 %v956_v49, %v2652_v28  ;;  %v701_v40 = vld [vmem:[%s2102_s29 + $0x70] sm:$0xff] }
 0x11c   : > { %1606 = vst.msk [vmem:[%s2176_s6 + $0x190] sm:$0xff] %vm358_vm0, %v1527_v11  ;;  %v976_v23 = vmul.f32 0.044715, %v2671_v12  ;;  %v1409_v59 = vadd.f32 1.0, %v1868_v20  ;;  %v1232_v42 = vadd.f32 %v1153_v14, %v2645_v47  ;;  %v996_v7 = vmul.f32 0.044715, %v2673_v13 }
 0x11d   : > { %1626 = vst.msk [vmem:[%s2176_s6 + $0x230] sm:$0xff] %vm358_vm0, %v1547_v6  ;;  %v1173_v17 = vadd.f32 %v1094_v33, %v2650_v15  ;;  %v1114_v32 = vmul.f32 %v1035_v37, %v2652_v28  ;;  %v521_v16 = vadd.f32 %v2494_v26, %v520_v22  ;;  %v571_v1 = vadd.f32 %v2494_v26, %v570_v19 }
 0x11e   : > { %v1870_v31 = vpop.eup %1869  ;;  %v1055_v54 = vmul.f32 %v976_v23, %v2671_v12  ;;  %v1488_v46 = vmul.f32 %v1409_v59, %v856_v3  ;;  %v1311_v18 = vmul.f32 0.7978846, %v1232_v42  ;;  %v1075_v45 = vmul.f32 %v996_v7, %v2673_v13  ;;  %v2738_v23 = vpop.f32.mrf.mxu3 }
 0x11f   : > { %v1429_v29 = vadd.f32 1.0, %v1870_v31  ;;  %v1252_v43 = vmul.f32 0.7978846, %v1173_v17  ;;  %v1193_v25 = vadd.f32 %v1114_v32, %v2652_v28  ;;  %v2699_v48 = vadd.f32 %v700_v2, %v521_v16  ;;  %v623_v31 = vpop.f32.mrf.mxu2 }
 0x120   : > { %v1134_v10 = vmul.f32 %v1055_v54, %v2671_v12  ;;  %v1872_v34 = vpop.eup %1871  ;;  %1567 = vst.msk [vmem:[%s2176_s6 + $0x58] sm:$0xff] %vm358_vm0, %v1488_v46  ;;  %1873 = vtanh.f32 %v1311_v18  ;;  %v2703_v4 = vadd.f32 %v720_v39, %v571_v1  ;;  %v621_v24 = vadd.f32 %v2494_v26, %v620_v21  ;;  %v721_v39 = vld [vmem:[%s2102_s29 + $0x110] sm:$0xff] }
 0x121   : > { %v1508_v52 = vmul.f32 %v1429_v29, %v876_v58  ;;  %v1449_v27 = vadd.f32 1.0, %v1872_v34  ;;  %1875 = vtanh.f32 %v1252_v43  ;;  %v1272_v0 = vmul.f32 0.7978846, %v1193_v25 }
 0x122   : > { %v1213_v50 = vadd.f32 %v1134_v10, %v2671_v12  ;;  %v916_v30 = vmul.f32 0.5, %v2645_v47  ;;  %v857_v56 = vmul.f32 0.5, %v2650_v15  ;;  %v1154_v57 = vmul.f32 %v1075_v45, %v2673_v13  ;;  %v760_v15 = vld [vmem:[%s2102_s29 + $0x248] sm:$0xff] }
 0x123   : > { %1587 = vst.msk [vmem:[%s2176_s6 + $0xf8] sm:$0xff] %vm358_vm0, %v1508_v52  ;;  %v937_v44 = vmul.f32 0.044715, %v2699_v48  ;;  %v1528_v60 = vmul.f32 %v1449_v27, %v896_v61  ;;  %1877 = vtanh.f32 %v1272_v0  ;;  %v957_v62 = vmul.f32 0.044715, %v2703_v4  ;;  %v761_v27 = vld [vmem:[%s2102_s29 + $0x250] sm:$0xff] }
 0x124   : > { %v1292_v55 = vmul.f32 0.7978846, %v1213_v50  ;;  %v1233_v53 = vadd.f32 %v1154_v57, %v2673_v13  ;;  %v2717_v3 = vadd.f32 %v740_v51, %v621_v24  ;;  %v671_v47 = vadd.f32 %v2494_v26, %v2609_v35  ;;  %v573_v35 = vpop.f32.mrf.mxu1  ;;  %v741_v24 = vld [vmem:[%s2102_s29 + $0x1b0] sm:$0xff]  ;;  %v525_v57 = vpop.f32.mrf.mxu0 }
 0x125   : > { %v1016_v63 = vmul.f32 %v937_v44, %v2699_v48  ;;  %1607 = vst.msk [vmem:[%s2176_s6 + $0x198] sm:$0xff] %vm358_vm0, %v1528_v60  ;;  %v877_v9 = vmul.f32 0.5, %v2652_v28  ;;  %v1036_v5 = vmul.f32 %v957_v62, %v2703_v4  ;;  %v524_v36 = vadd.f32 %v2494_v26, %v523_v38 }
 0x126   : > { %1879 = vtanh.f32 %v1292_v55  ;;  %v1874_v22 = vpop.eup %1873  ;;  %v897_v11 = vmul.f32 0.5, %v2671_v12  ;;  %v1312_v49 = vmul.f32 0.7978846, %v1233_v53  ;;  %v977_v14 = vmul.f32 0.044715, %v2717_v3 }
 0x127   : > { %v1095_v6 = vmul.f32 %v1016_v63, %v2699_v48  ;;  %v1876_v33 = vpop.eup %1875  ;;  %v1469_v19 = vadd.f32 1.0, %v1874_v22  ;;  %v1115_v20 = vmul.f32 %v1036_v5, %v2703_v4  ;;  %v2732_v58 = vadd.f32 %v760_v15, %v671_v47 }
 0x128   : > { %v2734_v28 = vadd.f32 %v701_v40, %v524_v36  ;;  %v1410_v61 = vadd.f32 1.0, %v1876_v33  ;;  %1881 = vtanh.f32 %v1312_v49  ;;  %v1056_v37 = vmul.f32 %v977_v14, %v2717_v3  ;;  %v702_v40 = vld [vmem:[%s2102_s29 + $0x78] sm:$0xff] }
 0x129   : > { %v1174_v12 = vadd.f32 %v1095_v6, %v2699_v48  ;;  %v1878_v59 = vpop.eup %1877  ;;  %v1548_v42 = vmul.f32 %v1469_v19, %v916_v30  ;;  %v1194_v17 = vadd.f32 %v1115_v20, %v2703_v4  ;;  %v997_v7 = vmul.f32 0.044715, %v2732_v58  ;;  %v2781_v6 = vpop.f32.mrf.mxu3 }
 0x12a   : > { %v574_v2 = vadd.f32 %v2494_v26, %v573_v35  ;;  %v1489_v32 = vmul.f32 %v1410_v61, %v857_v56  ;;  %v1430_v54 = vadd.f32 1.0, %v1878_v59  ;;  %v1135_v1 = vmul.f32 %v1056_v37, %v2717_v3  ;;  %v722_v37 = vld [vmem:[%s2102_s29 + $0x118] sm:$0xff] }
 0x12b   : > { %v1253_v16 = vmul.f32 0.7978846, %v1174_v12  ;;  %1627 = vst.msk [vmem:[%s2176_s6 + $0x238] sm:$0xff] %vm358_vm0, %v1548_v42  ;;  %v917_v46 = vmul.f32 0.5, %v2673_v13  ;;  %v1273_v29 = vmul.f32 0.7978846, %v1194_v17  ;;  %v1076_v18 = vmul.f32 %v997_v7, %v2732_v58 }
 0x12c   : > { %v1880_v21 = vpop.eup %1879  ;;  %v938_v43 = vmul.f32 0.044715, %v2734_v28  ;;  %1568 = vst.msk [vmem:[%s2176_s6 + $0x60] sm:$0xff] %vm358_vm0, %v1489_v32  ;;  %v1509_v25 = vmul.f32 %v1430_v54, %v877_v9  ;;  %v1214_v45 = vadd.f32 %v1135_v1, %v2717_v3  ;;  %v2755_v13 = vadd.f32 %v721_v39, %v574_v2  ;;  %v575_v49 = vpop.f32.mrf.mxu1 }
 0x12d   : > { %v1450_v10 = vadd.f32 1.0, %v1880_v21  ;;  %1883 = vtanh.f32 %v1253_v16  ;;  %v1155_v34 = vmul.f32 %v1076_v18, %v2732_v58  ;;  %v624_v30 = vadd.f32 %v2494_v26, %v623_v31  ;;  %v742_v18 = vld [vmem:[%s2102_s29 + $0x1b8] sm:$0xff] }
 0x12e   : > { %1885 = vtanh.f32 %v1273_v29  ;;  %v1017_v52 = vmul.f32 %v938_v43, %v2734_v28  ;;  %v1882_v0 = vpop.eup %1881  ;;  %1588 = vst.msk [vmem:[%s2176_s6 + $0x100] sm:$0xff] %vm358_vm0, %v1509_v25  ;;  %v1293_v51 = vmul.f32 0.7978846, %v1214_v45  ;;  %v674_v56 = vadd.f32 %v2494_v26, %v2655_v41  ;;  %v762_v25 = vld [vmem:[%s2102_s29 + $0x258] sm:$0xff] }
 0x12f   : > { %v1529_v50 = vmul.f32 %v1450_v10, %v897_v11  ;;  %v1470_v44 = vadd.f32 1.0, %v1882_v0  ;;  %v858_v38 = vmul.f32 0.5, %v2699_v48  ;;  %v1234_v60 = vadd.f32 %v1155_v34, %v2732_v58 }
 0x130   : > { %v1096_v55 = vmul.f32 %v1017_v52, %v2734_v28  ;;  %1887 = vtanh.f32 %v1293_v51  ;;  %v958_v62 = vmul.f32 0.044715, %v2755_v13  ;;  %v2770_v53 = vadd.f32 %v741_v24, %v624_v30 }
 0x131   : > { %1608 = vst.msk [vmem:[%s2176_s6 + $0x1a0] sm:$0xff] %vm358_vm0, %v1529_v50  ;;  %v2772_v63 = vadd.f32 %v761_v27, %v674_v56  ;;  %v1549_v47 = vmul.f32 %v1470_v44, %v917_v46  ;;  %v1313_v41 = vmul.f32 0.7978846, %v1234_v60  ;;  %v526_v48 = vadd.f32 %v2494_v26, %v525_v57 }
 0x132   : > { %v1175_v15 = vadd.f32 %v1096_v55, %v2734_v28  ;;  %v878_v5 = vmul.f32 0.5, %v2703_v4  ;;  %v898_v36 = vmul.f32 0.5, %v2717_v3  ;;  %v1037_v22 = vmul.f32 %v958_v62, %v2755_v13  ;;  %v625_v4 = vpop.f32.mrf.mxu2  ;;  %v2822_v62 = vpop.f32.mrf.mxu3 }
 0x133   : > { %v1884_v9 = vpop.eup %1883  ;;  %v978_v11 = vmul.f32 0.044715, %v2770_v53  ;;  %1628 = vst.msk [vmem:[%s2176_s6 + $0x240] sm:$0xff] %vm358_vm0, %v1549_v47  ;;  %1889 = vtanh.f32 %v1313_v41  ;;  %v998_v19 = vmul.f32 0.044715, %v2772_v63  ;;  %v2788_v12 = vadd.f32 %v702_v40, %v526_v48 }
 0x134   : > { %v1886_v14 = vpop.eup %1885  ;;  %v1411_v35 = vadd.f32 1.0, %v1884_v9  ;;  %v1254_v33 = vmul.f32 0.7978846, %v1175_v15  ;;  %v1116_v3 = vmul.f32 %v1037_v22, %v2755_v13  ;;  %v576_v17 = vadd.f32 %v2494_v26, %v575_v49  ;;  %v578_v55 = vpop.f32.mrf.mxu1  ;;  %v703_v22 = vld [vmem:[%s2102_s29 + $0x80] sm:$0xff] }
 0x135   : > { %v1431_v20 = vadd.f32 1.0, %v1886_v14  ;;  %v1057_v61 = vmul.f32 %v978_v11, %v2770_v53  ;;  %v1077_v42 = vmul.f32 %v998_v19, %v2772_v63  ;;  %v918_v31 = vmul.f32 0.5, %v2732_v58 }
 0x136   : > { %v1490_v59 = vmul.f32 %v1411_v35, %v858_v38  ;;  %1891 = vtanh.f32 %v1254_v33  ;;  %v1888_v7 = vpop.eup %1887  ;;  %v1195_v32 = vadd.f32 %v1116_v3, %v2755_v13  ;;  %v939_v39 = vmul.f32 0.044715, %v2788_v12  ;;  %v723_v35 = vld [vmem:[%s2102_s29 + $0x120] sm:$0xff] }
 0x137   : > { %v1510_v2 = vmul.f32 %v1431_v20, %v878_v5  ;;  %v1136_v54 = vmul.f32 %v1057_v61, %v2770_v53  ;;  %v1451_v16 = vadd.f32 1.0, %v1888_v7  ;;  %v1156_v1 = vmul.f32 %v1077_v42, %v2772_v63  ;;  %v743_v3 = vld [vmem:[%s2102_s29 + $0x1c0] sm:$0xff] }
 0x138   : > { %1569 = vst.msk [vmem:[%s2176_s6 + $0x68] sm:$0xff] %vm358_vm0, %v1490_v59  ;;  %v2800_v21 = vadd.f32 %v722_v37, %v576_v17  ;;  %v1274_v46 = vmul.f32 0.7978846, %v1195_v32  ;;  %v626_v58 = vadd.f32 %v2494_v26, %v625_v4  ;;  %v676_v43 = vadd.f32 %v2494_v26, %v2694_v8 }
 0x139   : > { %1589 = vst.msk [vmem:[%s2176_s6 + $0x108] sm:$0xff] %vm358_vm0, %v1510_v2  ;;  %v1215_v29 = vadd.f32 %v1136_v54, %v2770_v53  ;;  %v1890_v10 = vpop.eup %1889  ;;  %v1530_v45 = vmul.f32 %v1451_v16, %v898_v36  ;;  %v859_v34 = vmul.f32 0.5, %v2734_v28  ;;  %v1235_v52 = vadd.f32 %v1156_v1, %v2772_v63  ;;  %v528_v28 = vpop.f32.mrf.mxu0 }
 0x13a   : > { %v1018_v24 = vmul.f32 %v939_v39, %v2788_v12  ;;  %v1471_v27 = vadd.f32 1.0, %v1890_v10  ;;  %1893 = vtanh.f32 %v1274_v46  ;;  %v959_v50 = vmul.f32 0.044715, %v2800_v21  ;;  %v628_v48 = vpop.f32.mrf.mxu2 }
 0x13b   : > { %v1294_v0 = vmul.f32 0.7978846, %v1215_v29  ;;  %1609 = vst.msk [vmem:[%s2176_s6 + $0x1a8] sm:$0xff] %vm358_vm0, %v1530_v45  ;;  %v1314_v30 = vmul.f32 0.7978846, %v1235_v52  ;;  %v2817_v56 = vadd.f32 %v742_v18, %v626_v58  ;;  %v2819_v57 = vadd.f32 %v762_v25, %v676_v43  ;;  %v763_v58 = vld [vmem:[%s2102_s29 + $0x260] sm:$0xff]  ;;  %v685_v18 = vpop.f32.mrf.mxu3 }
 0x13c   : > { %v1892_v51 = vpop.eup %1891  ;;  %v1097_v8 = vmul.f32 %v1018_v24, %v2788_v12  ;;  %v1550_v44 = vmul.f32 %v1471_v27, %v918_v31  ;;  %v1038_v60 = vmul.f32 %v959_v50, %v2800_v21  ;;  %v879_v47 = vmul.f32 0.5, %v2755_v13 }
 0x13d   : > { %v1412_v38 = vadd.f32 1.0, %v1892_v51  ;;  %1895 = vtanh.f32 %v1294_v0  ;;  %v979_v15 = vmul.f32 0.044715, %v2817_v56  ;;  %v899_v9 = vmul.f32 0.5, %v2770_v53 }
 0x13e   : > { %1897 = vtanh.f32 %v1314_v30  ;;  %v1176_v41 = vadd.f32 %v1097_v8, %v2788_v12  ;;  %1629 = vst.msk [vmem:[%s2176_s6 + $0x248] sm:$0xff] %vm358_vm0, %v1550_v44  ;;  %v1117_v5 = vmul.f32 %v1038_v60, %v2800_v21  ;;  %v999_v36 = vmul.f32 0.044715, %v2819_v57  ;;  %v704_v30 = vld [vmem:[%s2102_s29 + $0x88] sm:$0xff]  ;;  %v580_v8 = vpop.f32.mrf.mxu1 }
 0x13f   : > { %v1491_v40 = vmul.f32 %v1412_v38, %v859_v34  ;;  %v1058_v13 = vmul.f32 %v979_v15, %v2817_v56  ;;  %v529_v49 = vadd.f32 %v2494_v26, %v528_v28  ;;  %v579_v14 = vadd.f32 %v2494_v26, %v578_v55  ;;  %v724_v15 = vld [vmem:[%s2102_s29 + $0x128] sm:$0xff] }
 0x140   : > { %v1255_v11 = vmul.f32 0.7978846, %v1176_v41  ;;  %v1894_v33 = vpop.eup %1893  ;;  %v919_v19 = vmul.f32 0.5, %v2772_v63  ;;  %v1196_v53 = vadd.f32 %v1117_v5, %v2800_v21  ;;  %v1078_v4 = vmul.f32 %v999_v36, %v2819_v57 }
 0x141   : > { %1570 = vst.msk [vmem:[%s2176_s6 + $0x70] sm:$0xff] %vm358_vm0, %v1491_v40  ;;  %v629_v20 = vadd.f32 %v2494_v26, %v628_v48  ;;  %v1432_v61 = vadd.f32 1.0, %v1894_v33  ;;  %v1137_v37 = vmul.f32 %v1058_v13, %v2817_v56  ;;  %v2845_v59 = vadd.f32 %v703_v22, %v529_v49  ;;  %v530_v45 = vpop.f32.mrf.mxu0 }
 0x142   : > { %1899 = vtanh.f32 %v1255_v11  ;;  %v1275_v17 = vmul.f32 0.7978846, %v1196_v53  ;;  %v1157_v7 = vmul.f32 %v1078_v4, %v2819_v57  ;;  %v2848_v63 = vadd.f32 %v723_v35, %v579_v14  ;;  %v630_v38 = vpop.f32.mrf.mxu2 }
 0x143   : > { %v1896_v42 = vpop.eup %1895  ;;  %v679_v2 = vadd.f32 %v2494_v26, %v2738_v23  ;;  %v1511_v32 = vmul.f32 %v1432_v61, %v879_v47  ;;  %v1216_v16 = vadd.f32 %v1137_v37, %v2817_v56  ;;  %v2853_v1 = vadd.f32 %v743_v3, %v629_v20 }
 0x144   : > { %v1898_v31 = vpop.eup %1897  ;;  %v1452_v54 = vadd.f32 1.0, %v1896_v42  ;;  %1901 = vtanh.f32 %v1275_v17  ;;  %v1236_v46 = vadd.f32 %v1157_v7, %v2819_v57  ;;  %v940_v29 = vmul.f32 0.044715, %v2845_v59 }
 0x145   : > { %v1472_v39 = vadd.f32 1.0, %v1898_v31  ;;  %1590 = vst.msk [vmem:[%s2176_s6 + $0x110] sm:$0xff] %vm358_vm0, %v1511_v32  ;;  %v860_v43 = vmul.f32 0.5, %v2788_v12  ;;  %v1295_v25 = vmul.f32 0.7978846, %v1216_v16  ;;  %v880_v52 = vmul.f32 0.5, %v2800_v21 }
 0x146   : > { %v1531_v23 = vmul.f32 %v1452_v54, %v899_v9  ;;  %v960_v10 = vmul.f32 0.044715, %v2848_v63  ;;  %v1315_v24 = vmul.f32 0.7978846, %v1236_v46  ;;  %v1019_v27 = vmul.f32 %v940_v29, %v2845_v59  ;;  %v764_v46 = vld [vmem:[%s2102_s29 + $0x268] sm:$0xff] }
 0x147   : > { %v1551_v34 = vmul.f32 %v1472_v39, %v919_v19  ;;  %1903 = vtanh.f32 %v1295_v25  ;;  %v980_v12 = vmul.f32 0.044715, %v2853_v1  ;;  %v2868_v51 = vadd.f32 %v763_v58, %v679_v2  ;;  %v744_v2 = vld [vmem:[%s2102_s29 + $0x1c8] sm:$0xff] }
 0x148   : > { %v1900_v0 = vpop.eup %1899  ;;  %1610 = vst.msk [vmem:[%s2176_s6 + $0x1b0] sm:$0xff] %vm358_vm0, %v1531_v23  ;;  %v1039_v50 = vmul.f32 %v960_v10, %v2848_v63  ;;  %1905 = vtanh.f32 %v1315_v24  ;;  %v1098_v21 = vmul.f32 %v1019_v27, %v2845_v59  ;;  %v531_v44 = vadd.f32 %v2494_v26, %v530_v45  ;;  %v583_v23 = vpop.f32.mrf.mxu1 }
 0x149   : > { %1630 = vst.msk [vmem:[%s2176_s6 + $0x250] sm:$0xff] %vm358_vm0, %v1551_v34  ;;  %v1413_v28 = vadd.f32 1.0, %v1900_v0  ;;  %v900_v60 = vmul.f32 0.5, %v2817_v56  ;;  %v1059_v47 = vmul.f32 %v980_v12, %v2853_v1  ;;  %v1000_v41 = vmul.f32 0.044715, %v2868_v51  ;;  %v533_v31 = vpop.f32.mrf.mxu0  ;;  %v705_v34 = vld [vmem:[%s2102_s29 + $0x90] sm:$0xff] }
 0x14a   : > { %v1118_v55 = vmul.f32 %v1039_v50, %v2848_v63  ;;  %v1902_v48 = vpop.eup %1901  ;;  %v1177_v9 = vadd.f32 %v1098_v21, %v2845_v59  ;;  %v2881_v5 = vadd.f32 %v704_v30, %v531_v44  ;;  %v581_v36 = vadd.f32 %v2494_v26, %v580_v8 }
 0x14b   : > { %v1492_v40 = vmul.f32 %v1413_v28, %v860_v43  ;;  %v1433_v22 = vadd.f32 1.0, %v1902_v48  ;;  %v1138_v56 = vmul.f32 %v1059_v47, %v2853_v1  ;;  %v1079_v13 = vmul.f32 %v1000_v41, %v2868_v51  ;;  %v725_v47 = vld [vmem:[%s2102_s29 + $0x130] sm:$0xff] }
 0x14c   : > { %v1197_v11 = vadd.f32 %v1118_v55, %v2848_v63  ;;  %v920_v49 = vmul.f32 0.5, %v2819_v57  ;;  %v1256_v14 = vmul.f32 0.7978846, %v1177_v9  ;;  %v941_v35 = vmul.f32 0.044715, %v2881_v5  ;;  %v745_v41 = vld [vmem:[%s2102_s29 + $0x1d0] sm:$0xff] }
 0x14d   : > { %1571 = vst.msk [vmem:[%s2176_s6 + $0x78] sm:$0xff] %vm358_vm0, %v1492_v40  ;;  %v2891_v33 = vadd.f32 %v724_v15, %v581_v36  ;;  %v1904_v19 = vpop.eup %1903  ;;  %v1512_v26 = vmul.f32 %v1433_v22, %v880_v52  ;;  %v1217_v4 = vadd.f32 %v1138_v56, %v2853_v1  ;;  %v1158_v20 = vmul.f32 %v1079_v13, %v2868_v51  ;;  %v633_v52 = vpop.f32.mrf.mxu2 }
 0x14e   : > { %v1276_v53 = vmul.f32 0.7978846, %v1197_v11  ;;  %v1906_v3 = vpop.eup %1905  ;;  %v1453_v61 = vadd.f32 1.0, %v1904_v19  ;;  %v861_v37 = vmul.f32 0.5, %v2845_v59  ;;  %1907 = vtanh.f32 %v1256_v14  ;;  %v2906_v59 = vld [vmem:[%s3030_s2] ss:$0 sm:$0xff] }
 0x14f   : > { %v1020_v57 = vmul.f32 %v941_v35, %v2881_v5  ;;  %1591 = vst.msk [vmem:[%s2176_s6 + $0x118] sm:$0xff] %vm358_vm0, %v1512_v26  ;;  %v1473_v42 = vadd.f32 1.0, %v1906_v3  ;;  %v1296_v17 = vmul.f32 0.7978846, %v1217_v4  ;;  %v1237_v7 = vadd.f32 %v1158_v20, %v2868_v51 }
 0x150   : > { %1909 = vtanh.f32 %v1276_v53  ;;  %v1532_v32 = vmul.f32 %v1453_v61, %v900_v60  ;;  %v961_v16 = vmul.f32 0.044715, %v2891_v33  ;;  %v631_v39 = vadd.f32 %v2906_v59, %v630_v38 }
 0x151   : > { %v1099_v54 = vmul.f32 %v1020_v57, %v2881_v5  ;;  %v1552_v29 = vmul.f32 %v1473_v42, %v920_v49  ;;  %1911 = vtanh.f32 %v1296_v17  ;;  %v1316_v58 = vmul.f32 0.7978846, %v1237_v7 }
 0x152   : > { %v681_v18 = vadd.f32 %v2906_v59, %v2781_v6  ;;  %1611 = vst.msk [vmem:[%s2176_s6 + $0x1b8] sm:$0xff] %vm358_vm0, %v1532_v32  ;;  %v1040_v25 = vmul.f32 %v961_v16, %v2891_v33  ;;  %v2916_v10 = vadd.f32 %v744_v2, %v631_v39  ;;  %v534_v45 = vadd.f32 %v2906_v59, %v533_v31  ;;  %v765_v16 = vld [vmem:[%s2102_s29 + $0x270] sm:$0x1]  ;;  %v535_v39 = vpop.f32.mrf.mxu0 }
 0x153   : > { %v1178_v43 = vadd.f32 %v1099_v54, %v2881_v5  ;;  %1631 = vst.msk [vmem:[%s2176_s6 + $0x258] sm:$0xff] %vm358_vm0, %v1552_v29  ;;  %v881_v24 = vmul.f32 0.5, %v2848_v63  ;;  %v901_v27 = vmul.f32 0.5, %v2853_v1  ;;  %1913 = vtanh.f32 %v1316_v58 }
 0x154   : > { %v2924_v6 = vadd.f32 %v764_v46, %v681_v18  ;;  %v1908_v0 = vpop.eup %1907  ;;  %v1119_v12 = vmul.f32 %v1040_v25, %v2891_v33  ;;  %v981_v30 = vmul.f32 0.044715, %v2916_v10  ;;  %v584_v8 = vadd.f32 %v2906_v59, %v583_v23  ;;  %v585_v46 = vpop.f32.mrf.mxu1 }
 0x155   : > { %v1257_v50 = vmul.f32 0.7978846, %v1178_v43  ;;  %v1414_v21 = vadd.f32 1.0, %v1908_v0  ;;  %v2930_v63 = vadd.f32 %v705_v34, %v534_v45  ;;  %v634_v1 = vadd.f32 %v2906_v59, %v633_v52  ;;  %v635_v18 = vpop.f32.mrf.mxu2  ;;  %v706_v45 = vld [vmem:[%s2102_s29 + $0x98] sm:$0xff] }
 0x156   : > { %v1910_v28 = vpop.eup %1909  ;;  %v1001_v44 = vmul.f32 0.044715, %v2924_v6  ;;  %v1198_v60 = vadd.f32 %v1119_v12, %v2891_v33  ;;  %v1060_v55 = vmul.f32 %v981_v30, %v2916_v10  ;;  %v921_v40 = vmul.f32 0.5, %v2868_v51  ;;  %v726_v0 = vld [vmem:[%s2102_s29 + $0x138] sm:$0xff] }
 0x157   : > { %v1434_v38 = vadd.f32 1.0, %v1910_v28  ;;  %1915 = vtanh.f32 %v1257_v50  ;;  %v1912_v15 = vpop.eup %1911  ;;  %v1493_v48 = vmul.f32 %v1414_v21, %v861_v37  ;;  %v942_v36 = vmul.f32 0.044715, %v2930_v63  ;;  %v746_v50 = vld [vmem:[%s2102_s29 + $0x1d8] sm:$0xff] }
 0x158   : > { %v1080_v9 = vmul.f32 %v1001_v44, %v2924_v6  ;;  %v1454_v11 = vadd.f32 1.0, %v1912_v15  ;;  %v1277_v56 = vmul.f32 0.7978846, %v1198_v60  ;;  %v1139_v13 = vmul.f32 %v1060_v55, %v2916_v10 }
 0x159   : > { %v1513_v22 = vmul.f32 %v1434_v38, %v881_v24  ;;  %v1914_v49 = vpop.eup %1913  ;;  %1572 = vst.msk [vmem:[%s2176_s6 + $0x80] sm:$0xff] %vm358_vm0, %v1493_v48  ;;  %v1021_v35 = vmul.f32 %v942_v36, %v2930_v63  ;;  %v2945_v19 = vadd.f32 %v725_v47, %v584_v8  ;;  %v2947_v51 = vadd.f32 %v745_v41, %v634_v1 }
 0x15a   : > { %v1159_v14 = vmul.f32 %v1080_v9, %v2924_v6  ;;  %v1533_v26 = vmul.f32 %v1454_v11, %v901_v27  ;;  %v1474_v53 = vadd.f32 1.0, %v1914_v49  ;;  %1917 = vtanh.f32 %v1277_v56 }
 0x15b   : > { %1592 = vst.msk [vmem:[%s2176_s6 + $0x120] sm:$0xff] %vm358_vm0, %v1513_v22  ;;  %v1218_v4 = vadd.f32 %v1139_v13, %v2916_v10  ;;  %v1100_v3 = vmul.f32 %v1021_v35, %v2930_v63  ;;  %v962_v61 = vmul.f32 0.044715, %v2945_v19  ;;  %v862_v42 = vmul.f32 0.5, %v2881_v5 }
 0x15c   : > { %v1238_v20 = vadd.f32 %v1159_v14, %v2924_v6  ;;  %1612 = vst.msk [vmem:[%s2176_s6 + $0x1c0] sm:$0xff] %vm358_vm0, %v1533_v26  ;;  %v1553_v57 = vmul.f32 %v1474_v53, %v921_v40  ;;  %v982_v7 = vmul.f32 0.044715, %v2947_v51  ;;  %v882_v29 = vmul.f32 0.5, %v2891_v33 }
 0x15d   : > { %v1916_v37 = vpop.eup %1915  ;;  %v1297_v17 = vmul.f32 0.7978846, %v1218_v4  ;;  %v1179_v32 = vadd.f32 %v1100_v3, %v2930_v63  ;;  %v1041_v54 = vmul.f32 %v962_v61, %v2945_v19  ;;  %v684_v58 = vadd.f32 %v2906_v59, %v2822_v62 }
 0x15e   : > { %v1415_v2 = vadd.f32 1.0, %v1916_v37  ;;  %v1317_v31 = vmul.f32 0.7978846, %v1238_v20  ;;  %1632 = vst.msk [vmem:[%s2176_s6 + $0x260] sm:$0xff] %vm358_vm0, %v1553_v57  ;;  %v1061_v5 = vmul.f32 %v982_v7, %v2947_v51  ;;  %v536_v33 = vadd.f32 %v2906_v59, %v535_v39 }
 0x15f   : > { %1919 = vtanh.f32 %v1297_v17  ;;  %v1258_v43 = vmul.f32 0.7978846, %v1179_v32  ;;  %v1120_v25 = vmul.f32 %v1041_v54, %v2945_v19  ;;  %v2971_v24 = vadd.f32 %v765_v16, %v684_v58 }
 0x160   : > { %v1494_v23 = vmul.f32 %v1415_v2, %v862_v42  ;;  %1921 = vtanh.f32 %v1317_v31  ;;  %v1918_v34 = vpop.eup %1917  ;;  %v1140_v52 = vmul.f32 %v1061_v5, %v2947_v51  ;;  %v586_v27 = vadd.f32 %v2906_v59, %v585_v46 }
 0x161   : > { %v1435_v62 = vadd.f32 1.0, %v1918_v34  ;;  %1923 = vtanh.f32 %v1258_v43  ;;  %v1199_v12 = vadd.f32 %v1120_v25, %v2945_v19  ;;  %v636_v30 = vadd.f32 %v2906_v59, %v635_v18 }
 0x162   : > { %1573 = vst.msk [vmem:[%s2176_s6 + $0x88] sm:$0xff] %vm358_vm0, %v1494_v23  ;;  %v1219_v8 = vadd.f32 %v1140_v52, %v2947_v51  ;;  %v1002_v28 = vmul.f32 0.044715, %v2971_v24  ;;  %v2983_v21 = vadd.f32 %v706_v45, %v536_v33  ;;  %v805_v38 = vadd.f32 %v726_v0, %v586_v27 }
 0x163   : > { %v1514_v44 = vmul.f32 %v1435_v62, %v882_v29  ;;  %v1278_v1 = vmul.f32 0.7978846, %v1199_v12  ;;  %v2985_v60 = vadd.f32 %v746_v50, %v636_v30  ;;  %v902_v47 = vmul.f32 0.5, %v2916_v10 }
 0x164   : > { %v1298_v41 = vmul.f32 0.7978846, %v1219_v8  ;;  %v1081_v15 = vmul.f32 %v1002_v28, %v2971_v24  ;;  %v943_v48 = vmul.f32 0.044715, %v2983_v21  ;;  %v922_v9 = vmul.f32 0.5, %v2924_v6 }
 0x165   : > { %v1920_v55 = vpop.eup %1919  ;;  %1593 = vst.msk [vmem:[%s2176_s6 + $0x128] sm:$0xff] %vm358_vm0, %v1514_v44  ;;  %1925 = vtanh.f32 %v1278_v1  ;;  %v963_v36 = vmul.f32 0.044715, %v805_v38  ;;  %v863_v49 = vmul.f32 0.5, %v2930_v63  ;;  %v983_v35 = vmul.f32 0.044715, %v2985_v60 }
 0x166   : > { %v1922_v59 = vpop.eup %1921  ;;  %v1455_v40 = vadd.f32 1.0, %v1920_v55  ;;  %1927 = vtanh.f32 %v1298_v41  ;;  %v1160_v11 = vmul.f32 %v1081_v15, %v2971_v24  ;;  %v1022_v10 = vmul.f32 %v943_v48, %v2983_v21 }
 0x167   : > { %v1475_v22 = vadd.f32 1.0, %v1922_v59  ;;  %v1924_v56 = vpop.eup %1923  ;;  %v1042_v14 = vmul.f32 %v963_v36, %v805_v38  ;;  %v1062_v3 = vmul.f32 %v983_v35, %v2985_v60  ;;  %v883_v2 = vmul.f32 0.5, %v2945_v19 }
 0x168   : > { %v1534_v13 = vmul.f32 %v1455_v40, %v902_v47  ;;  %v1416_v6 = vadd.f32 1.0, %v1924_v56  ;;  %v1239_v53 = vadd.f32 %v1160_v11, %v2971_v24  ;;  %v1101_v4 = vmul.f32 %v1022_v10, %v2983_v21 }
 0x169   : > { %v1554_v26 = vmul.f32 %v1475_v22, %v922_v9  ;;  %v1121_v20 = vmul.f32 %v1042_v14, %v805_v38  ;;  %v1141_v17 = vmul.f32 %v1062_v3, %v2985_v60  ;;  %v903_v54 = vmul.f32 0.5, %v2947_v51 }
 0x16a   : > { %1613 = vst.msk [vmem:[%s2176_s6 + $0x1c8] sm:$0xff] %vm358_vm0, %v1534_v13  ;;  %v1495_v61 = vmul.f32 %v1416_v6, %v863_v49  ;;  %v1318_v37 = vmul.f32 0.7978846, %v1239_v53  ;;  %v1180_v63 = vadd.f32 %v1101_v4, %v2983_v21  ;;  %v923_v18 = vmul.f32 0.5, %v2971_v24 }
 0x16b   : > { %1633 = vst.msk [vmem:[%s2176_s6 + $0x268] sm:$0xff] %vm358_vm0, %v1554_v26  ;;  %v1926_v57 = vpop.eup %1925  ;;  %v1200_v42 = vadd.f32 %v1121_v20, %v805_v38  ;;  %v1220_v46 = vadd.f32 %v1141_v17, %v2985_v60  ;;  %v864_v45 = vmul.f32 0.5, %v2983_v21  ;;  %v884_v52 = vmul.f32 0.5, %v805_v38 }
 0x16c   : > { %v1928_v7 = vpop.eup %1927  ;;  %1574 = vst.msk [vmem:[%s2176_s6 + $0x90] sm:$0xff] %vm358_vm0, %v1495_v61  ;;  %v1436_v31 = vadd.f32 1.0, %v1926_v57  ;;  %1929 = vtanh.f32 %v1318_v37  ;;  %v1259_v32 = vmul.f32 0.7978846, %v1180_v63  ;;  %v904_v62 = vmul.f32 0.5, %v2985_v60 }
 0x16d   : > { %v1456_v16 = vadd.f32 1.0, %v1928_v7  ;;  %v1279_v39 = vmul.f32 0.7978846, %v1200_v42  ;;  %v1299_v58 = vmul.f32 0.7978846, %v1220_v46 }
 0x16e   : > { %v1515_v29 = vmul.f32 %v1436_v31, %v883_v2  ;;  %1931 = vtanh.f32 %v1259_v32 }
 0x16f   : > { %v1535_v5 = vmul.f32 %v1456_v16, %v903_v54  ;;  %1933 = vtanh.f32 %v1279_v39 }
 0x170   : > { %1594 = vst.msk [vmem:[%s2176_s6 + $0x130] sm:$0xff] %vm358_vm0, %v1515_v29  ;;  %1935 = vtanh.f32 %v1299_v58 }
 0x171   : > { %1614 = vst.msk [vmem:[%s2176_s6 + $0x1d0] sm:$0xff] %vm358_vm0, %v1535_v5 }
 0x172   : > { %v1930_v19 = vpop.eup %1929 }
 0x173   : > { %v1476_v51 = vadd.f32 1.0, %v1930_v19 }
 0x174   : > { %v1932_v23 = vpop.eup %1931 }
 0x175   : > { %v1934_v43 = vpop.eup %1933  ;;  %v1555_v25 = vmul.f32 %v1476_v51, %v923_v18  ;;  %v1417_v34 = vadd.f32 1.0, %v1932_v23 }
 0x176   : > { %v1437_v33 = vadd.f32 1.0, %v1934_v43  ;;  %v1936_v27 = vpop.eup %1935 }
 0x177   : > { %1635 = vst.msk [vmem:[%s2176_s6 + $0x270] sm:$0x1] %vm1634_vm1, %v1555_v25  ;;  %v1496_v0 = vmul.f32 %v1417_v34, %v864_v45  ;;  %v1457_v24 = vadd.f32 1.0, %v1936_v27 }
 0x178   : > { %v1516_v50 = vmul.f32 %v1437_v33, %v884_v52 }
 0x179   : > { %1575 = vst.msk [vmem:[%s2176_s6 + $0x98] sm:$0xff] %vm358_vm0, %v1496_v0  ;;  %v1536_v12 = vmul.f32 %v1457_v24, %v904_v62 }
 0x17a   : > { %1595 = vst.msk [vmem:[%s2176_s6 + $0x138] sm:$0xff] %vm358_vm0, %v1516_v50 }
 0x17b   : > { %1615 = vst.msk [vmem:[%s2176_s6 + $0x1d8] sm:$0xff] %vm358_vm0, %v1536_v12 }
 0x17c PF: > { %s14_s15 = sadd.s32 1, %s1945_s15  }
 0x17d   : > { %p11_p4 = scmp.ge.s32.totalorder %s14_s15, 4  }
 0x17f   :  { %13 = sbr.rel (!%p11_p4) target bundleno = 1 (0x1), region = 69 }

// kernel: fno2d_forward.18
= control target key start
LH: loop header
LB: loop body
LE: loop exit
PB: predicated region body
PF: predicated region fallthrough
CT: control target
= control target key end

     0   :  { %s1101_s15 = smov 0   ;;  %s1577_s0 = inlined_call_operand.vmem [shape: f32[2,625,32], index: 0, kind: input, shape index: {}]   ;;  %s1578_s1 = inlined_call_operand.vmem [shape: bf16[32,32], index: 1, kind: input, shape index: {}]   ;;  %s1579_s2 = inlined_call_operand.vmem [shape: f32[1,32], index: 2, kind: input, shape index: {}]   ;;  %s1580_s3 = inlined_call_operand.vmem [shape: f32[2,625,32], index: 3, kind: input, shape index: {}]   ;;  %s1581_s4 = inlined_call_operand.vmem [shape: f32[2,625,32], index: 4, kind: output, shape index: {}]  }
   0x1 LB: > { %s992_s16 = sadd.s32 4294967295, %s1074_s15   ;;  %p996_p0 = scmp.ge.s32.totalorder %s1074_s15, 1  ;;  %s1074_s15 = sphi %s1101_s15, %s14_s15  }
   0x2   : > { %p172_p1 = scmp.lt.s32.totalorder %s1074_s15, 3 }
   0x4   : > { %p173_p2 = pnand %p996_p0, %p172_p1 }
   0x5   : > { %p203_p3 = scmp.lt.s32.totalorder (!%p173_p2), %s992_s16, 1 }
   0x6   : > { %176 = sbr.rel (%p173_p2) target bundleno = 309 (0x135), region = 36 }
   0xb   : > { %v1051_v0 = vld [vmem:[%s1578_s1 + $0x8] sm:$0xff]  ;;  %v1050_v1 = vld [vmem:[%s1578_s1] sm:$0xff]  ;;  %s1583_s16 = smov (!%p203_p3, %s992_s16), 1  ;;  %vm358_vm0 = vcmask 261120   ;;  %vm923_vm1 = vcmask 253952  }
   0xc   : > { %485 = vmatpush.bf16.msra.mxu0 %v1051_v0  ;;  %1052 = vmatpush.bf16.msra.mxu1 %v1051_v0  ;;  %s1115_s21 = smul.u32 632, %s1583_s16 }
   0xd   : > { %1053 = vmatpush.bf16.msra.mxu2 %v1051_v0  ;;  %1054 = vmatpush.bf16.msra.mxu3 %v1051_v0 }
   0xe   : > { %s1121_s24 = scalar_lea.vmem %s1577_s0, %s1115_s21  ;;  %s1231_s29 = scalar_lea.vmem %s1580_s3, %s1115_s21 }
   0xf   : > { %v219_v2 = vld [vmem:[%s1121_s24] sm:$0xff]  ;;  %v220_v3 = vld [vmem:[%s1121_s24 + $0x8] sm:$0xff]  ;;  %v221_v14 = vld [vmem:[%s1121_s24 + $0x10] sm:$0xff]  ;;  %s1245_s6 = scalar_lea.vmem %s1581_s4, %s1115_s21 }
  0x10   : > { %486 = vmatpush.bf16.msra.mxu0 %v1050_v1  ;;  %1055 = vmatpush.bf16.msra.mxu1 %v1050_v1  ;;  %v239_v4 = vld [vmem:[%s1121_s24 + $0xa0] sm:$0xff]  ;;  %v298_v5 = vpack.c.bf16 %v220_v3, %v219_v2  ;;  %v240_v6 = vld [vmem:[%s1121_s24 + $0xa8] sm:$0xff]  ;;  %v222_v15 = vld [vmem:[%s1121_s24 + $0x18] sm:$0xff] }
  0x11   : > { %1056 = vmatpush.bf16.msra.mxu2 %v1050_v1  ;;  %1057 = vmatpush.bf16.msra.mxu3 %v1050_v1  ;;  %v259_v7 = vld [vmem:[%s1121_s24 + $0x140] sm:$0xff]  ;;  %v260_v8 = vld [vmem:[%s1121_s24 + $0x148] sm:$0xff]  ;;  %v308_v9 = vpack.c.bf16 %v240_v6, %v239_v4  ;;  %v241_v16 = vld [vmem:[%s1121_s24 + $0xb0] sm:$0xff]  ;;  %v299_v22 = vpack.c.bf16 %v222_v15, %v221_v14 }
  0x12   : > { %v318_v10 = vpack.c.bf16 %v260_v8, %v259_v7  ;;  %v279_v11 = vld [vmem:[%s1121_s24 + $0x1e0] sm:$0xff]  ;;  %v280_v12 = vld [vmem:[%s1121_s24 + $0x1e8] sm:$0xff]  ;;  %v242_v17 = vld [vmem:[%s1121_s24 + $0xb8] sm:$0xff] }
  0x13   : > { %1008 = vmatmul.msk.bf16.vlgmr.msra.gmra.mxu0 %vm358_vm0, %v298_v5  ;;  %v328_v13 = vpack.c.bf16 %v280_v12, %v279_v11  ;;  %1018 = vmatmul.msk.bf16.vlgmr.msra.gmra.mxu1 %vm358_vm0, %v308_v9  ;;  %v261_v18 = vld [vmem:[%s1121_s24 + $0x150] sm:$0xff]  ;;  %v262_v19 = vld [vmem:[%s1121_s24 + $0x158] sm:$0xff]  ;;  %v309_v23 = vpack.c.bf16 %v242_v17, %v241_v16  ;;  %v223_v26 = vld [vmem:[%s1121_s24 + $0x20] sm:$0xff] }
  0x14   : > { %1028 = vmatmul.msk.bf16.vlgmr.msra.gmra.mxu2 %vm358_vm0, %v318_v10  ;;  %v281_v20 = vld [vmem:[%s1121_s24 + $0x1f0] sm:$0xff]  ;;  %v282_v21 = vld [vmem:[%s1121_s24 + $0x1f8] sm:$0xff]  ;;  %v319_v24 = vpack.c.bf16 %v262_v19, %v261_v18  ;;  %v224_v27 = vld [vmem:[%s1121_s24 + $0x28] sm:$0xff] }
  0x15   : > { %1038 = vmatmul.msk.bf16.vlgmr.msra.gmra.mxu3 %vm358_vm0, %v328_v13  ;;  %v329_v25 = vpack.c.bf16 %v282_v21, %v281_v20  ;;  %v243_v28 = vld [vmem:[%s1121_s24 + $0xc0] sm:$0xff]  ;;  %v244_v29 = vld [vmem:[%s1121_s24 + $0xc8] sm:$0xff]  ;;  %v300_v34 = vpack.c.bf16 %v224_v27, %v223_v26  ;;  %v225_v38 = vld [vmem:[%s1121_s24 + $0x30] sm:$0xff] }
  0x16   : > { %v263_v30 = vld [vmem:[%s1121_s24 + $0x160] sm:$0xff]  ;;  %v264_v31 = vld [vmem:[%s1121_s24 + $0x168] sm:$0xff]  ;;  %v310_v35 = vpack.c.bf16 %v244_v29, %v243_v28  ;;  %v226_v39 = vld [vmem:[%s1121_s24 + $0x38] sm:$0xff] }
  0x17   : > { %v283_v32 = vld [vmem:[%s1121_s24 + $0x200] sm:$0xff]  ;;  %v284_v33 = vld [vmem:[%s1121_s24 + $0x208] sm:$0xff]  ;;  %v320_v36 = vpack.c.bf16 %v264_v31, %v263_v30  ;;  %v245_v40 = vld [vmem:[%s1121_s24 + $0xd0] sm:$0xff]  ;;  %v301_v46 = vpack.c.bf16 %v226_v39, %v225_v38 }
  0x18   : > { %v330_v37 = vpack.c.bf16 %v284_v33, %v283_v32  ;;  %v246_v41 = vld [vmem:[%s1121_s24 + $0xd8] sm:$0xff]  ;;  %v265_v42 = vld [vmem:[%s1121_s24 + $0x170] sm:$0xff]  ;;  %v227_v50 = vld [vmem:[%s1121_s24 + $0x40] sm:$0xff] }
  0x19   : > { %v266_v43 = vld [vmem:[%s1121_s24 + $0x178] sm:$0xff]  ;;  %v285_v44 = vld [vmem:[%s1121_s24 + $0x210] sm:$0xff]  ;;  %v311_v47 = vpack.c.bf16 %v246_v41, %v245_v40  ;;  %v228_v51 = vld [vmem:[%s1121_s24 + $0x48] sm:$0xff] }
  0x1a   : > { %v286_v45 = vld [vmem:[%s1121_s24 + $0x218] sm:$0xff]  ;;  %v321_v48 = vpack.c.bf16 %v266_v43, %v265_v42  ;;  %v247_v52 = vld [vmem:[%s1121_s24 + $0xe0] sm:$0xff]  ;;  %v248_v53 = vld [vmem:[%s1121_s24 + $0xe8] sm:$0xff]  ;;  %v302_v58 = vpack.c.bf16 %v228_v51, %v227_v50 }
  0x1b   : > { %v331_v49 = vpack.c.bf16 %v286_v45, %v285_v44  ;;  %v267_v54 = vld [vmem:[%s1121_s24 + $0x180] sm:$0xff]  ;;  %v268_v55 = vld [vmem:[%s1121_s24 + $0x188] sm:$0xff]  ;;  %v312_v59 = vpack.c.bf16 %v248_v53, %v247_v52  ;;  %v229_v62 = vld [vmem:[%s1121_s24 + $0x50] sm:$0xff] }
  0x1c   : > { %v287_v56 = vld [vmem:[%s1121_s24 + $0x220] sm:$0xff]  ;;  %v288_v57 = vld [vmem:[%s1121_s24 + $0x228] sm:$0xff]  ;;  %v322_v60 = vpack.c.bf16 %v268_v55, %v267_v54  ;;  %v230_v63 = vld [vmem:[%s1121_s24 + $0x58] sm:$0xff] }
  0x1d   : > { %v332_v61 = vpack.c.bf16 %v288_v57, %v287_v56  ;;  %v249_v0 = vld [vmem:[%s1121_s24 + $0xf0] sm:$0xff]  ;;  %v250_v1 = vld [vmem:[%s1121_s24 + $0xf8] sm:$0xff]  ;;  %v303_v6 = vpack.c.bf16 %v230_v63, %v229_v62  ;;  %v231_v10 = vld [vmem:[%s1121_s24 + $0x60] sm:$0xff] }
  0x1e   : > { %v269_v2 = vld [vmem:[%s1121_s24 + $0x190] sm:$0xff]  ;;  %v270_v3 = vld [vmem:[%s1121_s24 + $0x198] sm:$0xff]  ;;  %v313_v7 = vpack.c.bf16 %v250_v1, %v249_v0  ;;  %v232_v11 = vld [vmem:[%s1121_s24 + $0x68] sm:$0xff] }
  0x1f   : > { %v289_v4 = vld [vmem:[%s1121_s24 + $0x230] sm:$0xff]  ;;  %v290_v5 = vld [vmem:[%s1121_s24 + $0x238] sm:$0xff]  ;;  %v323_v8 = vpack.c.bf16 %v270_v3, %v269_v2  ;;  %v251_v12 = vld [vmem:[%s1121_s24 + $0x100] sm:$0xff]  ;;  %v304_v18 = vpack.c.bf16 %v232_v11, %v231_v10 }
  0x20   : > { %v333_v9 = vpack.c.bf16 %v290_v5, %v289_v4  ;;  %v252_v13 = vld [vmem:[%s1121_s24 + $0x108] sm:$0xff]  ;;  %v271_v14 = vld [vmem:[%s1121_s24 + $0x1a0] sm:$0xff]  ;;  %v273_v26 = vld [vmem:[%s1121_s24 + $0x1b0] sm:$0xff] }
  0x21   : > { %v272_v15 = vld [vmem:[%s1121_s24 + $0x1a8] sm:$0xff]  ;;  %v291_v16 = vld [vmem:[%s1121_s24 + $0x240] sm:$0xff]  ;;  %v314_v19 = vpack.c.bf16 %v252_v13, %v251_v12  ;;  %v274_v27 = vld [vmem:[%s1121_s24 + $0x1b8] sm:$0xff] }
  0x22   : > { %v292_v17 = vld [vmem:[%s1121_s24 + $0x248] sm:$0xff]  ;;  %v324_v20 = vpack.c.bf16 %v272_v15, %v271_v14  ;;  %v293_v28 = vld [vmem:[%s1121_s24 + $0x250] sm:$0xff]  ;;  %v294_v29 = vld [vmem:[%s1121_s24 + $0x258] sm:$0xff]  ;;  %v325_v32 = vpack.c.bf16 %v274_v27, %v273_v26 }
  0x23   : > { %1009 = vmatmul.msk.bf16.gmra.mxu0 %vm358_vm0, %v299_v22  ;;  %1019 = vmatmul.msk.bf16.gmra.mxu1 %vm358_vm0, %v309_v23  ;;  %v334_v21 = vpack.c.bf16 %v292_v17, %v291_v16  ;;  %v233_v22 = vld [vmem:[%s1121_s24 + $0x70] sm:$0xff]  ;;  %v234_v23 = vld [vmem:[%s1121_s24 + $0x78] sm:$0xff]  ;;  %v335_v33 = vpack.c.bf16 %v294_v29, %v293_v28  ;;  %v256_v38 = vld [vmem:[%s1121_s24 + $0x128] sm:$0xff] }
  0x24   : > { %1029 = vmatmul.msk.bf16.gmra.mxu2 %vm358_vm0, %v319_v24  ;;  %v253_v24 = vld [vmem:[%s1121_s24 + $0x110] sm:$0xff]  ;;  %v305_v30 = vpack.c.bf16 %v234_v23, %v233_v22  ;;  %v275_v39 = vld [vmem:[%s1121_s24 + $0x1c0] sm:$0xff]  ;;  %v276_v40 = vld [vmem:[%s1121_s24 + $0x1c8] sm:$0xff] }
  0x25   : > { %1039 = vmatmul.msk.bf16.gmra.mxu3 %vm358_vm0, %v329_v25  ;;  %v254_v25 = vld [vmem:[%s1121_s24 + $0x118] sm:$0xff]  ;;  %v295_v41 = vld [vmem:[%s1121_s24 + $0x260] sm:$0xff]  ;;  %v296_v42 = vld [vmem:[%s1121_s24 + $0x268] sm:$0xff] }
  0x26   : > { %v315_v31 = vpack.c.bf16 %v254_v25, %v253_v24  ;;  %v687_v45 = vld [vmem:[%s1231_s29] sm:$0xff]  ;;  %v336_v51 = vpack.c.bf16 %v296_v42, %v295_v41  ;;  %v708_v1 = vld [vmem:[%s1231_s29 + $0xa8] sm:$0xff]  ;;  %v258_v10 = vld [vmem:[%s1121_s24 + $0x138] sm:$0xff] }
  0x27   : > { %v707_v50 = vld [vmem:[%s1231_s29 + $0xa0] sm:$0xff]  ;;  %v277_v11 = vld [vmem:[%s1121_s24 + $0x1d0] sm:$0xff]  ;;  %v278_v12 = vld [vmem:[%s1121_s24 + $0x1d8] sm:$0xff] }
  0x28   : > { %v727_v56 = vld [vmem:[%s1231_s29 + $0x140] sm:$0xff]  ;;  %v297_v13 = vld [vmem:[%s1121_s24 + $0x270] sm:$0x1]  ;;  %v728_v15 = vld [vmem:[%s1231_s29 + $0x148] sm:$0xff]  ;;  %v327_v23 = vpack.c.bf16 %v278_v12, %v277_v11 }
  0x29   : > { %v709_v27 = vld [vmem:[%s1231_s29 + $0xb0] sm:$0xff]  ;;  %v337_v28 = vpack.c.bf16 %v297_v13, %v297_v13  ;;  %v690_v41 = vld [vmem:[%s1231_s29 + $0x18] sm:$0xff]  ;;  %v712_v13 = vld [vmem:[%s1231_s29 + $0xc8] sm:$0xff] }
  0x33   : > { %1010 = vmatmul.msk.bf16.gmra.mxu0 %vm358_vm0, %v300_v34  ;;  %1020 = vmatmul.msk.bf16.gmra.mxu1 %vm358_vm0, %v310_v35  ;;  %v1222_v34 = vld [vmem:[%s1579_s2] ss:$0 sm:$0xff] }
  0x34   : > { %1030 = vmatmul.msk.bf16.gmra.mxu2 %vm358_vm0, %v320_v36  ;;  %v235_v35 = vld [vmem:[%s1121_s24 + $0x80] sm:$0xff]  ;;  %v236_v36 = vld [vmem:[%s1121_s24 + $0x88] sm:$0xff] }
  0x35   : > { %1040 = vmatmul.msk.bf16.gmra.mxu3 %vm358_vm0, %v330_v37  ;;  %v255_v37 = vld [vmem:[%s1121_s24 + $0x120] sm:$0xff]  ;;  %v306_v43 = vpack.c.bf16 %v236_v36, %v235_v35  ;;  %v729_v36 = vld [vmem:[%s1231_s29 + $0x150] sm:$0xff] }
  0x43   : > { %1011 = vmatmul.msk.bf16.gmra.mxu0 %vm358_vm0, %v301_v46  ;;  %1021 = vmatmul.msk.bf16.gmra.mxu1 %vm358_vm0, %v311_v47  ;;  %v316_v46 = vpack.c.bf16 %v256_v38, %v255_v37  ;;  %v326_v47 = vpack.c.bf16 %v276_v40, %v275_v39  ;;  %v749_v39 = vld [vmem:[%s1231_s29 + $0x1f0] sm:$0xff] }
  0x44   : > { %1031 = vmatmul.msk.bf16.gmra.mxu2 %vm358_vm0, %v321_v48 }
  0x45   : > { %1041 = vmatmul.msk.bf16.gmra.mxu3 %vm358_vm0, %v331_v49 }
  0x53   : > { %1012 = vmatmul.msk.bf16.gmra.mxu0 %vm358_vm0, %v302_v58  ;;  %1022 = vmatmul.msk.bf16.gmra.mxu1 %vm358_vm0, %v312_v59  ;;  %v747_v59 = vld [vmem:[%s1231_s29 + $0x1e0] sm:$0xff] }
  0x54   : > { %1032 = vmatmul.msk.bf16.gmra.mxu2 %vm358_vm0, %v322_v60 }
  0x55   : > { %1042 = vmatmul.msk.bf16.gmra.mxu3 %vm358_vm0, %v332_v61  ;;  %v688_v61 = vld [vmem:[%s1231_s29 + $0x8] sm:$0xff] }
  0x63   : > { %1013 = vmatmul.msk.bf16.gmra.mxu0 %vm358_vm0, %v303_v6  ;;  %1023 = vmatmul.msk.bf16.gmra.mxu1 %vm358_vm0, %v313_v7  ;;  %v237_v7 = vld [vmem:[%s1121_s24 + $0x90] sm:$0xff] }
  0x64   : > { %1033 = vmatmul.msk.bf16.gmra.mxu2 %vm358_vm0, %v323_v8  ;;  %v238_v8 = vld [vmem:[%s1121_s24 + $0x98] sm:$0xff] }
  0x65   : > { %1043 = vmatmul.msk.bf16.gmra.mxu3 %vm358_vm0, %v333_v9  ;;  %v257_v9 = vld [vmem:[%s1121_s24 + $0x130] sm:$0xff]  ;;  %v307_v16 = vpack.c.bf16 %v238_v8, %v237_v7  ;;  %v751_v7 = vld [vmem:[%s1231_s29 + $0x200] sm:$0xff] }
  0x66   : > { %v317_v22 = vpack.c.bf16 %v258_v10, %v257_v9  ;;  %v692_v9 = vld [vmem:[%s1231_s29 + $0x28] sm:$0xff] }
  0x73   : > { %1014 = vmatmul.msk.bf16.gmra.mxu0 %vm358_vm0, %v304_v18  ;;  %1024 = vmatmul.msk.bf16.gmra.mxu1 %vm358_vm0, %v314_v19  ;;  %v748_v19 = vld [vmem:[%s1231_s29 + $0x1e8] sm:$0xff] }
  0x74   : > { %1034 = vmatmul.msk.bf16.gmra.mxu2 %vm358_vm0, %v324_v20 }
  0x75   : > { %1044 = vmatmul.msk.bf16.gmra.mxu3 %vm358_vm0, %v334_v21  ;;  %v689_v21 = vld [vmem:[%s1231_s29 + $0x10] sm:$0xff] }
  0x83   : > { %1015 = vmatmul.msk.bf16.gmra.mxu0 %vm358_vm0, %v305_v30  ;;  %1025 = vmatmul.msk.bf16.gmra.mxu1 %vm358_vm0, %v315_v31 }
  0x84   : > { %1035 = vmatmul.msk.bf16.gmra.mxu2 %vm358_vm0, %v325_v32 }
  0x85   : > { %1045 = vmatmul.msk.bf16.gmra.mxu3 %vm358_vm0, %v335_v33 }
  0x90   : > { %v488_v44 = vpop.f32.mrf.mxu0  ;;  %v538_v49 = vpop.f32.mrf.mxu1 }
  0x91   : > { %v489_v48 = vadd.f32 %v1222_v34, %v488_v44  ;;  %v539_v52 = vadd.f32 %v1222_v34, %v538_v49 }
  0x93   : > { %v766_v53 = vadd.f32 %v687_v45, %v489_v48  ;;  %1016 = vmatmul.msk.bf16.gmra.mxu0 %vm358_vm0, %v306_v43  ;;  %v786_v54 = vadd.f32 %v707_v50, %v539_v52  ;;  %1026 = vmatmul.msk.bf16.gmra.mxu1 %vm358_vm0, %v316_v46  ;;  %v710_v45 = vld [vmem:[%s1231_s29 + $0xb8] sm:$0xff] }
  0x94   : > { %1036 = vmatmul.msk.bf16.gmra.mxu2 %vm358_vm0, %v326_v47  ;;  %v730_v52 = vld [vmem:[%s1231_s29 + $0x158] sm:$0xff] }
  0x95   : > { %845 = vst.msk [vmem:[%s1245_s6] sm:$0xff] %vm358_vm0, %v766_v53  ;;  %1046 = vmatmul.msk.bf16.gmra.mxu3 %vm358_vm0, %v336_v51 }
  0x96   : > { %865 = vst.msk [vmem:[%s1245_s6 + $0xa0] sm:$0xff] %vm358_vm0, %v786_v54 }
  0x97   : > { %v588_v55 = vpop.f32.mrf.mxu2 }
  0x98   : > { %v589_v57 = vadd.f32 %v1222_v34, %v588_v55  ;;  %v638_v58 = vpop.f32.mrf.mxu3  ;;  %v490_v60 = vpop.f32.mrf.mxu0  ;;  %v750_v55 = vld [vmem:[%s1231_s29 + $0x1f8] sm:$0xff] }
  0x99   : > { %v639_v62 = vadd.f32 %v1222_v34, %v638_v58  ;;  %v491_v63 = vadd.f32 %v1222_v34, %v490_v60  ;;  %v540_v0 = vpop.f32.mrf.mxu1 }
  0x9a   : > { %v806_v2 = vadd.f32 %v727_v56, %v589_v57  ;;  %v541_v3 = vadd.f32 %v1222_v34, %v540_v0  ;;  %v691_v57 = vld [vmem:[%s1231_s29 + $0x20] sm:$0xff] }
  0x9b   : > { %v826_v4 = vadd.f32 %v747_v59, %v639_v62  ;;  %v767_v5 = vadd.f32 %v688_v61, %v491_v63  ;;  %v711_v61 = vld [vmem:[%s1231_s29 + $0xc0] sm:$0xff] }
  0x9c   : > { %885 = vst.msk [vmem:[%s1245_s6 + $0x140] sm:$0xff] %vm358_vm0, %v806_v2  ;;  %v787_v6 = vadd.f32 %v708_v1, %v541_v3 }
  0x9d   : > { %905 = vst.msk [vmem:[%s1245_s6 + $0x1e0] sm:$0xff] %vm358_vm0, %v826_v4  ;;  %v731_v4 = vld [vmem:[%s1231_s29 + $0x160] sm:$0xff] }
  0x9e   : > { %846 = vst.msk [vmem:[%s1245_s6 + $0x8] sm:$0xff] %vm358_vm0, %v767_v5 }
  0x9f   : > { %866 = vst.msk [vmem:[%s1245_s6 + $0xa8] sm:$0xff] %vm358_vm0, %v787_v6  ;;  %v590_v14 = vpop.f32.mrf.mxu2 }
  0xa0   : > { %v591_v17 = vadd.f32 %v1222_v34, %v590_v14  ;;  %v640_v18 = vpop.f32.mrf.mxu3  ;;  %v493_v20 = vpop.f32.mrf.mxu0 }
  0xa1   : > { %v641_v24 = vadd.f32 %v1222_v34, %v640_v18  ;;  %v494_v25 = vadd.f32 %v1222_v34, %v493_v20  ;;  %v543_v26 = vpop.f32.mrf.mxu1  ;;  %v732_v20 = vld [vmem:[%s1231_s29 + $0x168] sm:$0xff] }
  0xa2   : > { %v807_v29 = vadd.f32 %v728_v15, %v591_v17  ;;  %v544_v30 = vadd.f32 %v1222_v34, %v543_v26 }
  0xa3   : > { %v827_v31 = vadd.f32 %v748_v19, %v641_v24  ;;  %v768_v32 = vadd.f32 %v689_v21, %v494_v25  ;;  %1017 = vmatmul.msk.bf16.gmra.mxu0 %vm358_vm0, %v307_v16  ;;  %1027 = vmatmul.msk.bf16.gmra.mxu1 %vm358_vm0, %v317_v22  ;;  %v693_v25 = vld [vmem:[%s1231_s29 + $0x30] sm:$0xff] }
  0xa4   : > { %886 = vst.msk [vmem:[%s1245_s6 + $0x148] sm:$0xff] %vm358_vm0, %v807_v29  ;;  %v788_v33 = vadd.f32 %v709_v27, %v544_v30  ;;  %1037 = vmatmul.msk.bf16.gmra.mxu2 %vm358_vm0, %v327_v23  ;;  %v752_v23 = vld [vmem:[%s1231_s29 + $0x208] sm:$0xff]  ;;  %v713_v29 = vld [vmem:[%s1231_s29 + $0xd0] sm:$0xff] }
  0xa5   : > { %906 = vst.msk [vmem:[%s1245_s6 + $0x1e8] sm:$0xff] %vm358_vm0, %v827_v31  ;;  %1047 = vmatmul.msk.bf16.gmra.mxu3 %vm358_vm0, %v337_v28 }
  0xa6   : > { %847 = vst.msk [vmem:[%s1245_s6 + $0x10] sm:$0xff] %vm358_vm0, %v768_v32 }
  0xa7   : > { %867 = vst.msk [vmem:[%s1245_s6 + $0xb0] sm:$0xff] %vm358_vm0, %v788_v33  ;;  %v593_v35 = vpop.f32.mrf.mxu2 }
  0xa8   : > { %v594_v37 = vadd.f32 %v1222_v34, %v593_v35  ;;  %v643_v38 = vpop.f32.mrf.mxu3  ;;  %v495_v40 = vpop.f32.mrf.mxu0 }
  0xa9   : > { %v644_v42 = vadd.f32 %v1222_v34, %v643_v38  ;;  %v496_v43 = vadd.f32 %v1222_v34, %v495_v40  ;;  %v545_v44 = vpop.f32.mrf.mxu1  ;;  %v753_v40 = vld [vmem:[%s1231_s29 + $0x210] sm:$0xff] }
  0xaa   : > { %v808_v46 = vadd.f32 %v729_v36, %v594_v37  ;;  %v546_v47 = vadd.f32 %v1222_v34, %v545_v44  ;;  %v733_v37 = vld [vmem:[%s1231_s29 + $0x170] sm:$0xff] }
  0xab   : > { %v828_v48 = vadd.f32 %v749_v39, %v644_v42  ;;  %v769_v49 = vadd.f32 %v690_v41, %v496_v43  ;;  %v694_v42 = vld [vmem:[%s1231_s29 + $0x38] sm:$0xff] }
  0xac   : > { %887 = vst.msk [vmem:[%s1245_s6 + $0x150] sm:$0xff] %vm358_vm0, %v808_v46  ;;  %v789_v50 = vadd.f32 %v710_v45, %v546_v47  ;;  %v714_v46 = vld [vmem:[%s1231_s29 + $0xd8] sm:$0xff] }
  0xad   : > { %907 = vst.msk [vmem:[%s1245_s6 + $0x1f0] sm:$0xff] %vm358_vm0, %v828_v48 }
  0xae   : > { %848 = vst.msk [vmem:[%s1245_s6 + $0x18] sm:$0xff] %vm358_vm0, %v769_v49 }
  0xaf   : > { %868 = vst.msk [vmem:[%s1245_s6 + $0xb8] sm:$0xff] %vm358_vm0, %v789_v50  ;;  %v595_v51 = vpop.f32.mrf.mxu2 }
  0xb0   : > { %v596_v53 = vadd.f32 %v1222_v34, %v595_v51  ;;  %v645_v54 = vpop.f32.mrf.mxu3  ;;  %v498_v56 = vpop.f32.mrf.mxu0 }
  0xb1   : > { %v646_v58 = vadd.f32 %v1222_v34, %v645_v54  ;;  %v499_v59 = vadd.f32 %v1222_v34, %v498_v56  ;;  %v548_v60 = vpop.f32.mrf.mxu1  ;;  %v754_v56 = vld [vmem:[%s1231_s29 + $0x218] sm:$0xff] }
  0xb2   : > { %v809_v62 = vadd.f32 %v730_v52, %v596_v53  ;;  %v549_v63 = vadd.f32 %v1222_v34, %v548_v60  ;;  %v734_v53 = vld [vmem:[%s1231_s29 + $0x178] sm:$0xff] }
  0xb3   : > { %v829_v0 = vadd.f32 %v750_v55, %v646_v58  ;;  %v770_v1 = vadd.f32 %v691_v57, %v499_v59  ;;  %v695_v58 = vld [vmem:[%s1231_s29 + $0x40] sm:$0xff] }
  0xb4   : > { %888 = vst.msk [vmem:[%s1245_s6 + $0x158] sm:$0xff] %vm358_vm0, %v809_v62  ;;  %v790_v2 = vadd.f32 %v711_v61, %v549_v63  ;;  %v715_v62 = vld [vmem:[%s1231_s29 + $0xe0] sm:$0xff] }
  0xb5   : > { %908 = vst.msk [vmem:[%s1245_s6 + $0x1f8] sm:$0xff] %vm358_vm0, %v829_v0 }
  0xb6   : > { %849 = vst.msk [vmem:[%s1245_s6 + $0x20] sm:$0xff] %vm358_vm0, %v770_v1 }
  0xb7   : > { %869 = vst.msk [vmem:[%s1245_s6 + $0xc0] sm:$0xff] %vm358_vm0, %v790_v2  ;;  %v598_v3 = vpop.f32.mrf.mxu2 }
  0xb8   : > { %v599_v5 = vadd.f32 %v1222_v34, %v598_v3  ;;  %v648_v6 = vpop.f32.mrf.mxu3  ;;  %v500_v8 = vpop.f32.mrf.mxu0 }
  0xb9   : > { %v649_v10 = vadd.f32 %v1222_v34, %v648_v6  ;;  %v501_v11 = vadd.f32 %v1222_v34, %v500_v8  ;;  %v550_v12 = vpop.f32.mrf.mxu1  ;;  %v755_v8 = vld [vmem:[%s1231_s29 + $0x220] sm:$0xff] }
  0xba   : > { %v810_v14 = vadd.f32 %v731_v4, %v599_v5  ;;  %v551_v15 = vadd.f32 %v1222_v34, %v550_v12  ;;  %v735_v5 = vld [vmem:[%s1231_s29 + $0x180] sm:$0xff] }
  0xbb   : > { %v830_v16 = vadd.f32 %v751_v7, %v649_v10  ;;  %v771_v17 = vadd.f32 %v692_v9, %v501_v11  ;;  %v696_v10 = vld [vmem:[%s1231_s29 + $0x48] sm:$0xff] }
  0xbc   : > { %889 = vst.msk [vmem:[%s1245_s6 + $0x160] sm:$0xff] %vm358_vm0, %v810_v14  ;;  %v791_v18 = vadd.f32 %v712_v13, %v551_v15  ;;  %v716_v14 = vld [vmem:[%s1231_s29 + $0xe8] sm:$0xff] }
  0xbd   : > { %909 = vst.msk [vmem:[%s1245_s6 + $0x200] sm:$0xff] %vm358_vm0, %v830_v16 }
  0xbe   : > { %850 = vst.msk [vmem:[%s1245_s6 + $0x28] sm:$0xff] %vm358_vm0, %v771_v17 }
  0xbf   : > { %870 = vst.msk [vmem:[%s1245_s6 + $0xc8] sm:$0xff] %vm358_vm0, %v791_v18  ;;  %v600_v19 = vpop.f32.mrf.mxu2 }
  0xc0   : > { %v601_v21 = vadd.f32 %v1222_v34, %v600_v19  ;;  %v650_v22 = vpop.f32.mrf.mxu3  ;;  %v503_v24 = vpop.f32.mrf.mxu0 }
  0xc1   : > { %v651_v26 = vadd.f32 %v1222_v34, %v650_v22  ;;  %v504_v27 = vadd.f32 %v1222_v34, %v503_v24  ;;  %v553_v28 = vpop.f32.mrf.mxu1  ;;  %v756_v24 = vld [vmem:[%s1231_s29 + $0x228] sm:$0xff] }
  0xc2   : > { %v811_v30 = vadd.f32 %v732_v20, %v601_v21  ;;  %v554_v31 = vadd.f32 %v1222_v34, %v553_v28  ;;  %v736_v21 = vld [vmem:[%s1231_s29 + $0x188] sm:$0xff] }
  0xc3   : > { %v831_v32 = vadd.f32 %v752_v23, %v651_v26  ;;  %v772_v33 = vadd.f32 %v693_v25, %v504_v27  ;;  %v697_v26 = vld [vmem:[%s1231_s29 + $0x50] sm:$0xff] }
  0xc4   : > { %890 = vst.msk [vmem:[%s1245_s6 + $0x168] sm:$0xff] %vm358_vm0, %v811_v30  ;;  %v792_v35 = vadd.f32 %v713_v29, %v554_v31  ;;  %v717_v30 = vld [vmem:[%s1231_s29 + $0xf0] sm:$0xff] }
  0xc5   : > { %910 = vst.msk [vmem:[%s1245_s6 + $0x208] sm:$0xff] %vm358_vm0, %v831_v32 }
  0xc6   : > { %851 = vst.msk [vmem:[%s1245_s6 + $0x30] sm:$0xff] %vm358_vm0, %v772_v33 }
  0xc7   : > { %871 = vst.msk [vmem:[%s1245_s6 + $0xd0] sm:$0xff] %vm358_vm0, %v792_v35  ;;  %v603_v36 = vpop.f32.mrf.mxu2 }
  0xc8   : > { %v604_v38 = vadd.f32 %v1222_v34, %v603_v36  ;;  %v653_v39 = vpop.f32.mrf.mxu3  ;;  %v505_v41 = vpop.f32.mrf.mxu0 }
  0xc9   : > { %v654_v43 = vadd.f32 %v1222_v34, %v653_v39  ;;  %v506_v44 = vadd.f32 %v1222_v34, %v505_v41  ;;  %v555_v45 = vpop.f32.mrf.mxu1  ;;  %v757_v41 = vld [vmem:[%s1231_s29 + $0x230] sm:$0xff] }
  0xca   : > { %v812_v47 = vadd.f32 %v733_v37, %v604_v38  ;;  %v556_v48 = vadd.f32 %v1222_v34, %v555_v45  ;;  %v737_v38 = vld [vmem:[%s1231_s29 + $0x190] sm:$0xff] }
  0xcb   : > { %v832_v49 = vadd.f32 %v753_v40, %v654_v43  ;;  %v773_v50 = vadd.f32 %v694_v42, %v506_v44  ;;  %v698_v43 = vld [vmem:[%s1231_s29 + $0x58] sm:$0xff] }
  0xcc   : > { %891 = vst.msk [vmem:[%s1245_s6 + $0x170] sm:$0xff] %vm358_vm0, %v812_v47  ;;  %v793_v51 = vadd.f32 %v714_v46, %v556_v48  ;;  %v718_v47 = vld [vmem:[%s1231_s29 + $0xf8] sm:$0xff] }
  0xcd   : > { %911 = vst.msk [vmem:[%s1245_s6 + $0x210] sm:$0xff] %vm358_vm0, %v832_v49 }
  0xce   : > { %852 = vst.msk [vmem:[%s1245_s6 + $0x38] sm:$0xff] %vm358_vm0, %v773_v50 }
  0xcf   : > { %872 = vst.msk [vmem:[%s1245_s6 + $0xd8] sm:$0xff] %vm358_vm0, %v793_v51  ;;  %v605_v52 = vpop.f32.mrf.mxu2 }
  0xd0   : > { %v606_v54 = vadd.f32 %v1222_v34, %v605_v52  ;;  %v655_v55 = vpop.f32.mrf.mxu3  ;;  %v508_v57 = vpop.f32.mrf.mxu0 }
  0xd1   : > { %v656_v59 = vadd.f32 %v1222_v34, %v655_v55  ;;  %v509_v60 = vadd.f32 %v1222_v34, %v508_v57  ;;  %v558_v61 = vpop.f32.mrf.mxu1  ;;  %v758_v57 = vld [vmem:[%s1231_s29 + $0x238] sm:$0xff] }
  0xd2   : > { %v813_v63 = vadd.f32 %v734_v53, %v606_v54  ;;  %v559_v0 = vadd.f32 %v1222_v34, %v558_v61  ;;  %v738_v54 = vld [vmem:[%s1231_s29 + $0x198] sm:$0xff] }
  0xd3   : > { %v833_v1 = vadd.f32 %v754_v56, %v656_v59  ;;  %v774_v2 = vadd.f32 %v695_v58, %v509_v60  ;;  %v699_v59 = vld [vmem:[%s1231_s29 + $0x60] sm:$0xff] }
  0xd4   : > { %892 = vst.msk [vmem:[%s1245_s6 + $0x178] sm:$0xff] %vm358_vm0, %v813_v63  ;;  %v794_v3 = vadd.f32 %v715_v62, %v559_v0  ;;  %v719_v63 = vld [vmem:[%s1231_s29 + $0x100] sm:$0xff] }
  0xd5   : > { %912 = vst.msk [vmem:[%s1245_s6 + $0x218] sm:$0xff] %vm358_vm0, %v833_v1 }
  0xd6   : > { %853 = vst.msk [vmem:[%s1245_s6 + $0x40] sm:$0xff] %vm358_vm0, %v774_v2 }
  0xd7   : > { %873 = vst.msk [vmem:[%s1245_s6 + $0xe0] sm:$0xff] %vm358_vm0, %v794_v3  ;;  %v608_v4 = vpop.f32.mrf.mxu2 }
  0xd8   : > { %v609_v6 = vadd.f32 %v1222_v34, %v608_v4  ;;  %v658_v7 = vpop.f32.mrf.mxu3  ;;  %v510_v9 = vpop.f32.mrf.mxu0 }
  0xd9   : > { %v659_v11 = vadd.f32 %v1222_v34, %v658_v7  ;;  %v511_v12 = vadd.f32 %v1222_v34, %v510_v9  ;;  %v560_v13 = vpop.f32.mrf.mxu1  ;;  %v759_v9 = vld [vmem:[%s1231_s29 + $0x240] sm:$0xff] }
  0xda   : > { %v814_v15 = vadd.f32 %v735_v5, %v609_v6  ;;  %v561_v16 = vadd.f32 %v1222_v34, %v560_v13  ;;  %v739_v6 = vld [vmem:[%s1231_s29 + $0x1a0] sm:$0xff] }
  0xdb   : > { %v834_v17 = vadd.f32 %v755_v8, %v659_v11  ;;  %v775_v18 = vadd.f32 %v696_v10, %v511_v12  ;;  %v700_v11 = vld [vmem:[%s1231_s29 + $0x68] sm:$0xff] }
  0xdc   : > { %893 = vst.msk [vmem:[%s1245_s6 + $0x180] sm:$0xff] %vm358_vm0, %v814_v15  ;;  %v795_v19 = vadd.f32 %v716_v14, %v561_v16  ;;  %v720_v15 = vld [vmem:[%s1231_s29 + $0x108] sm:$0xff] }
  0xdd   : > { %913 = vst.msk [vmem:[%s1245_s6 + $0x220] sm:$0xff] %vm358_vm0, %v834_v17 }
  0xde   : > { %854 = vst.msk [vmem:[%s1245_s6 + $0x48] sm:$0xff] %vm358_vm0, %v775_v18 }
  0xdf   : > { %874 = vst.msk [vmem:[%s1245_s6 + $0xe8] sm:$0xff] %vm358_vm0, %v795_v19  ;;  %v610_v20 = vpop.f32.mrf.mxu2 }
  0xe0   : > { %v611_v22 = vadd.f32 %v1222_v34, %v610_v20  ;;  %v660_v23 = vpop.f32.mrf.mxu3  ;;  %v513_v25 = vpop.f32.mrf.mxu0 }
  0xe1   : > { %v661_v27 = vadd.f32 %v1222_v34, %v660_v23  ;;  %v514_v28 = vadd.f32 %v1222_v34, %v513_v25  ;;  %v563_v29 = vpop.f32.mrf.mxu1  ;;  %v760_v25 = vld [vmem:[%s1231_s29 + $0x248] sm:$0xff] }
  0xe2   : > { %v815_v31 = vadd.f32 %v736_v21, %v611_v22  ;;  %v564_v32 = vadd.f32 %v1222_v34, %v563_v29  ;;  %v740_v22 = vld [vmem:[%s1231_s29 + $0x1a8] sm:$0xff] }
  0xe3   : > { %v835_v33 = vadd.f32 %v756_v24, %v661_v27  ;;  %v776_v35 = vadd.f32 %v697_v26, %v514_v28  ;;  %v701_v27 = vld [vmem:[%s1231_s29 + $0x70] sm:$0xff] }
  0xe4   : > { %894 = vst.msk [vmem:[%s1245_s6 + $0x188] sm:$0xff] %vm358_vm0, %v815_v31  ;;  %v796_v36 = vadd.f32 %v717_v30, %v564_v32  ;;  %v721_v31 = vld [vmem:[%s1231_s29 + $0x110] sm:$0xff] }
  0xe5   : > { %914 = vst.msk [vmem:[%s1245_s6 + $0x228] sm:$0xff] %vm358_vm0, %v835_v33 }
  0xe6   : > { %855 = vst.msk [vmem:[%s1245_s6 + $0x50] sm:$0xff] %vm358_vm0, %v776_v35 }
  0xe7   : > { %875 = vst.msk [vmem:[%s1245_s6 + $0xf0] sm:$0xff] %vm358_vm0, %v796_v36  ;;  %v613_v37 = vpop.f32.mrf.mxu2 }
  0xe8   : > { %v614_v39 = vadd.f32 %v1222_v34, %v613_v37  ;;  %v663_v40 = vpop.f32.mrf.mxu3  ;;  %v515_v42 = vpop.f32.mrf.mxu0 }
  0xe9   : > { %v664_v44 = vadd.f32 %v1222_v34, %v663_v40  ;;  %v516_v45 = vadd.f32 %v1222_v34, %v515_v42  ;;  %v565_v46 = vpop.f32.mrf.mxu1  ;;  %v761_v42 = vld [vmem:[%s1231_s29 + $0x250] sm:$0xff] }
  0xea   : > { %v816_v48 = vadd.f32 %v737_v38, %v614_v39  ;;  %v566_v49 = vadd.f32 %v1222_v34, %v565_v46  ;;  %v741_v39 = vld [vmem:[%s1231_s29 + $0x1b0] sm:$0xff] }
  0xeb   : > { %v836_v50 = vadd.f32 %v757_v41, %v664_v44  ;;  %v777_v51 = vadd.f32 %v698_v43, %v516_v45  ;;  %v702_v44 = vld [vmem:[%s1231_s29 + $0x78] sm:$0xff] }
  0xec   : > { %895 = vst.msk [vmem:[%s1245_s6 + $0x190] sm:$0xff] %vm358_vm0, %v816_v48  ;;  %v797_v52 = vadd.f32 %v718_v47, %v566_v49  ;;  %v722_v48 = vld [vmem:[%s1231_s29 + $0x118] sm:$0xff] }
  0xed   : > { %915 = vst.msk [vmem:[%s1245_s6 + $0x230] sm:$0xff] %vm358_vm0, %v836_v50 }
  0xee   : > { %856 = vst.msk [vmem:[%s1245_s6 + $0x58] sm:$0xff] %vm358_vm0, %v777_v51 }
  0xef   : > { %876 = vst.msk [vmem:[%s1245_s6 + $0xf8] sm:$0xff] %vm358_vm0, %v797_v52  ;;  %v615_v53 = vpop.f32.mrf.mxu2 }
  0xf0   : > { %v616_v55 = vadd.f32 %v1222_v34, %v615_v53  ;;  %v665_v56 = vpop.f32.mrf.mxu3  ;;  %v518_v58 = vpop.f32.mrf.mxu0 }
  0xf1   : > { %v666_v60 = vadd.f32 %v1222_v34, %v665_v56  ;;  %v519_v61 = vadd.f32 %v1222_v34, %v518_v58  ;;  %v568_v62 = vpop.f32.mrf.mxu1  ;;  %v762_v58 = vld [vmem:[%s1231_s29 + $0x258] sm:$0xff] }
  0xf2   : > { %v817_v0 = vadd.f32 %v738_v54, %v616_v55  ;;  %v569_v1 = vadd.f32 %v1222_v34, %v568_v62  ;;  %v742_v55 = vld [vmem:[%s1231_s29 + $0x1b8] sm:$0xff] }
  0xf3   : > { %v837_v2 = vadd.f32 %v758_v57, %v666_v60  ;;  %v778_v3 = vadd.f32 %v699_v59, %v519_v61  ;;  %v703_v60 = vld [vmem:[%s1231_s29 + $0x80] sm:$0xff] }
  0xf4   : > { %896 = vst.msk [vmem:[%s1245_s6 + $0x198] sm:$0xff] %vm358_vm0, %v817_v0  ;;  %v798_v4 = vadd.f32 %v719_v63, %v569_v1  ;;  %v723_v0 = vld [vmem:[%s1231_s29 + $0x120] sm:$0xff] }
  0xf5   : > { %916 = vst.msk [vmem:[%s1245_s6 + $0x238] sm:$0xff] %vm358_vm0, %v837_v2 }
  0xf6   : > { %857 = vst.msk [vmem:[%s1245_s6 + $0x60] sm:$0xff] %vm358_vm0, %v778_v3 }
  0xf7   : > { %877 = vst.msk [vmem:[%s1245_s6 + $0x100] sm:$0xff] %vm358_vm0, %v798_v4  ;;  %v618_v5 = vpop.f32.mrf.mxu2 }
  0xf8   : > { %v619_v7 = vadd.f32 %v1222_v34, %v618_v5  ;;  %v668_v8 = vpop.f32.mrf.mxu3  ;;  %v520_v10 = vpop.f32.mrf.mxu0 }
  0xf9   : > { %v669_v12 = vadd.f32 %v1222_v34, %v668_v8  ;;  %v521_v13 = vadd.f32 %v1222_v34, %v520_v10  ;;  %v570_v14 = vpop.f32.mrf.mxu1  ;;  %v763_v10 = vld [vmem:[%s1231_s29 + $0x260] sm:$0xff] }
  0xfa   : > { %v818_v16 = vadd.f32 %v739_v6, %v619_v7  ;;  %v571_v17 = vadd.f32 %v1222_v34, %v570_v14  ;;  %v743_v7 = vld [vmem:[%s1231_s29 + $0x1c0] sm:$0xff] }
  0xfb   : > { %v838_v18 = vadd.f32 %v759_v9, %v669_v12  ;;  %v779_v19 = vadd.f32 %v700_v11, %v521_v13  ;;  %v704_v12 = vld [vmem:[%s1231_s29 + $0x88] sm:$0xff] }
  0xfc   : > { %897 = vst.msk [vmem:[%s1245_s6 + $0x1a0] sm:$0xff] %vm358_vm0, %v818_v16  ;;  %v799_v20 = vadd.f32 %v720_v15, %v571_v17  ;;  %v724_v16 = vld [vmem:[%s1231_s29 + $0x128] sm:$0xff] }
  0xfd   : > { %917 = vst.msk [vmem:[%s1245_s6 + $0x240] sm:$0xff] %vm358_vm0, %v838_v18 }
  0xfe   : > { %858 = vst.msk [vmem:[%s1245_s6 + $0x68] sm:$0xff] %vm358_vm0, %v779_v19 }
  0xff   : > { %878 = vst.msk [vmem:[%s1245_s6 + $0x108] sm:$0xff] %vm358_vm0, %v799_v20  ;;  %v620_v21 = vpop.f32.mrf.mxu2 }
 0x100   : > { %v621_v23 = vadd.f32 %v1222_v34, %v620_v21  ;;  %v670_v24 = vpop.f32.mrf.mxu3  ;;  %v523_v26 = vpop.f32.mrf.mxu0 }
 0x101   : > { %v671_v28 = vadd.f32 %v1222_v34, %v670_v24  ;;  %v524_v29 = vadd.f32 %v1222_v34, %v523_v26  ;;  %v573_v30 = vpop.f32.mrf.mxu1  ;;  %v764_v26 = vld [vmem:[%s1231_s29 + $0x268] sm:$0xff] }
 0x102   : > { %v819_v32 = vadd.f32 %v740_v22, %v621_v23  ;;  %v574_v33 = vadd.f32 %v1222_v34, %v573_v30  ;;  %v744_v23 = vld [vmem:[%s1231_s29 + $0x1c8] sm:$0xff] }
 0x103   : > { %v839_v35 = vadd.f32 %v760_v25, %v671_v28  ;;  %v780_v36 = vadd.f32 %v701_v27, %v524_v29  ;;  %v705_v28 = vld [vmem:[%s1231_s29 + $0x90] sm:$0xff] }
 0x104   : > { %898 = vst.msk [vmem:[%s1245_s6 + $0x1a8] sm:$0xff] %vm358_vm0, %v819_v32  ;;  %v800_v37 = vadd.f32 %v721_v31, %v574_v33  ;;  %v725_v32 = vld [vmem:[%s1231_s29 + $0x130] sm:$0xff] }
 0x105   : > { %918 = vst.msk [vmem:[%s1245_s6 + $0x248] sm:$0xff] %vm358_vm0, %v839_v35 }
 0x106   : > { %859 = vst.msk [vmem:[%s1245_s6 + $0x70] sm:$0xff] %vm358_vm0, %v780_v36 }
 0x107   : > { %879 = vst.msk [vmem:[%s1245_s6 + $0x110] sm:$0xff] %vm358_vm0, %v800_v37  ;;  %v623_v38 = vpop.f32.mrf.mxu2 }
 0x108   : > { %v624_v40 = vadd.f32 %v1222_v34, %v623_v38  ;;  %v673_v41 = vpop.f32.mrf.mxu3  ;;  %v525_v43 = vpop.f32.mrf.mxu0 }
 0x109   : > { %v674_v45 = vadd.f32 %v1222_v34, %v673_v41  ;;  %v526_v46 = vadd.f32 %v1222_v34, %v525_v43  ;;  %v575_v47 = vpop.f32.mrf.mxu1  ;;  %v765_v43 = vld [vmem:[%s1231_s29 + $0x270] sm:$0x1] }
 0x10a   : > { %v820_v49 = vadd.f32 %v741_v39, %v624_v40  ;;  %v576_v50 = vadd.f32 %v1222_v34, %v575_v47  ;;  %v745_v40 = vld [vmem:[%s1231_s29 + $0x1d0] sm:$0xff] }
 0x10b   : > { %v840_v51 = vadd.f32 %v761_v42, %v674_v45  ;;  %v781_v52 = vadd.f32 %v702_v44, %v526_v46  ;;  %v706_v45 = vld [vmem:[%s1231_s29 + $0x98] sm:$0xff] }
 0x10c   : > { %899 = vst.msk [vmem:[%s1245_s6 + $0x1b0] sm:$0xff] %vm358_vm0, %v820_v49  ;;  %v801_v53 = vadd.f32 %v722_v48, %v576_v50  ;;  %v726_v49 = vld [vmem:[%s1231_s29 + $0x138] sm:$0xff] }
 0x10d   : > { %919 = vst.msk [vmem:[%s1245_s6 + $0x250] sm:$0xff] %vm358_vm0, %v840_v51 }
 0x10e   : > { %860 = vst.msk [vmem:[%s1245_s6 + $0x78] sm:$0xff] %vm358_vm0, %v781_v52 }
 0x10f   : > { %880 = vst.msk [vmem:[%s1245_s6 + $0x118] sm:$0xff] %vm358_vm0, %v801_v53  ;;  %v625_v54 = vpop.f32.mrf.mxu2 }
 0x110   : > { %v626_v56 = vadd.f32 %v1222_v34, %v625_v54  ;;  %v675_v57 = vpop.f32.mrf.mxu3  ;;  %v528_v59 = vpop.f32.mrf.mxu0 }
 0x111   : > { %v676_v61 = vadd.f32 %v1222_v34, %v675_v57  ;;  %v529_v62 = vadd.f32 %v1222_v34, %v528_v59  ;;  %v578_v63 = vpop.f32.mrf.mxu1 }
 0x112   : > { %v821_v1 = vadd.f32 %v742_v55, %v626_v56  ;;  %v579_v2 = vadd.f32 %v1222_v34, %v578_v63  ;;  %v746_v56 = vld [vmem:[%s1231_s29 + $0x1d8] sm:$0xff] }
 0x113   : > { %v841_v3 = vadd.f32 %v762_v58, %v676_v61  ;;  %v782_v4 = vadd.f32 %v703_v60, %v529_v62 }
 0x114   : > { %900 = vst.msk [vmem:[%s1245_s6 + $0x1b8] sm:$0xff] %vm358_vm0, %v821_v1  ;;  %v802_v5 = vadd.f32 %v723_v0, %v579_v2 }
 0x115   : > { %920 = vst.msk [vmem:[%s1245_s6 + $0x258] sm:$0xff] %vm358_vm0, %v841_v3 }
 0x116   : > { %861 = vst.msk [vmem:[%s1245_s6 + $0x80] sm:$0xff] %vm358_vm0, %v782_v4 }
 0x117   : > { %881 = vst.msk [vmem:[%s1245_s6 + $0x120] sm:$0xff] %vm358_vm0, %v802_v5  ;;  %v628_v6 = vpop.f32.mrf.mxu2 }
 0x118   : > { %v629_v8 = vadd.f32 %v1222_v34, %v628_v6  ;;  %v678_v9 = vpop.f32.mrf.mxu3  ;;  %v530_v11 = vpop.f32.mrf.mxu0 }
 0x119   : > { %v679_v13 = vadd.f32 %v1222_v34, %v678_v9  ;;  %v531_v14 = vadd.f32 %v1222_v34, %v530_v11  ;;  %v580_v15 = vpop.f32.mrf.mxu1 }
 0x11a   : > { %v822_v17 = vadd.f32 %v743_v7, %v629_v8  ;;  %v581_v18 = vadd.f32 %v1222_v34, %v580_v15 }
 0x11b   : > { %v842_v19 = vadd.f32 %v763_v10, %v679_v13  ;;  %v783_v20 = vadd.f32 %v704_v12, %v531_v14 }
 0x11c   : > { %901 = vst.msk [vmem:[%s1245_s6 + $0x1c0] sm:$0xff] %vm358_vm0, %v822_v17  ;;  %v803_v21 = vadd.f32 %v724_v16, %v581_v18 }
 0x11d   : > { %921 = vst.msk [vmem:[%s1245_s6 + $0x260] sm:$0xff] %vm358_vm0, %v842_v19 }
 0x11e   : > { %862 = vst.msk [vmem:[%s1245_s6 + $0x88] sm:$0xff] %vm358_vm0, %v783_v20 }
 0x11f   : > { %882 = vst.msk [vmem:[%s1245_s6 + $0x128] sm:$0xff] %vm358_vm0, %v803_v21  ;;  %v630_v22 = vpop.f32.mrf.mxu2 }
 0x120   : > { %v631_v24 = vadd.f32 %v1222_v34, %v630_v22  ;;  %v680_v25 = vpop.f32.mrf.mxu3  ;;  %v533_v27 = vpop.f32.mrf.mxu0 }
 0x121   : > { %v681_v29 = vadd.f32 %v1222_v34, %v680_v25  ;;  %v534_v30 = vadd.f32 %v1222_v34, %v533_v27  ;;  %v583_v31 = vpop.f32.mrf.mxu1 }
 0x122   : > { %v823_v33 = vadd.f32 %v744_v23, %v631_v24  ;;  %v584_v35 = vadd.f32 %v1222_v34, %v583_v31 }
 0x123   : > { %v843_v36 = vadd.f32 %v764_v26, %v681_v29  ;;  %v784_v37 = vadd.f32 %v705_v28, %v534_v30 }
 0x124   : > { %902 = vst.msk [vmem:[%s1245_s6 + $0x1c8] sm:$0xff] %vm358_vm0, %v823_v33  ;;  %v804_v38 = vadd.f32 %v725_v32, %v584_v35 }
 0x125   : > { %922 = vst.msk [vmem:[%s1245_s6 + $0x268] sm:$0xff] %vm358_vm0, %v843_v36 }
 0x126   : > { %863 = vst.msk [vmem:[%s1245_s6 + $0x90] sm:$0xff] %vm358_vm0, %v784_v37 }
 0x127   : > { %883 = vst.msk [vmem:[%s1245_s6 + $0x130] sm:$0xff] %vm358_vm0, %v804_v38  ;;  %v633_v39 = vpop.f32.mrf.mxu2 }
 0x128   : > { %v634_v41 = vadd.f32 %v1222_v34, %v633_v39  ;;  %v683_v42 = vpop.f32.mrf.mxu3  ;;  %v535_v44 = vpop.f32.mrf.mxu0 }
 0x129   : > { %v684_v46 = vadd.f32 %v1222_v34, %v683_v42  ;;  %v536_v47 = vadd.f32 %v1222_v34, %v535_v44  ;;  %v585_v48 = vpop.f32.mrf.mxu1 }
 0x12a   : > { %v824_v50 = vadd.f32 %v745_v40, %v634_v41  ;;  %v586_v51 = vadd.f32 %v1222_v34, %v585_v48 }
 0x12b   : > { %v844_v52 = vadd.f32 %v765_v43, %v684_v46  ;;  %v785_v53 = vadd.f32 %v706_v45, %v536_v47 }
 0x12c   : > { %903 = vst.msk [vmem:[%s1245_s6 + $0x1d0] sm:$0xff] %vm358_vm0, %v824_v50  ;;  %v805_v54 = vadd.f32 %v726_v49, %v586_v51 }
 0x12d   : > { %924 = vst.msk [vmem:[%s1245_s6 + $0x270] sm:$0x1] %vm923_vm1, %v844_v52 }
 0x12e   : > { %864 = vst.msk [vmem:[%s1245_s6 + $0x98] sm:$0xff] %vm358_vm0, %v785_v53 }
 0x12f   : > { %884 = vst.msk [vmem:[%s1245_s6 + $0x138] sm:$0xff] %vm358_vm0, %v805_v54  ;;  %v635_v55 = vpop.f32.mrf.mxu2 }
 0x130   : > { %v636_v57 = vadd.f32 %v1222_v34, %v635_v55  ;;  %v685_v58 = vpop.f32.mrf.mxu3 }
 0x132   : > { %v825_v59 = vadd.f32 %v746_v56, %v636_v57 }
 0x134   : > { %904 = vst.msk [vmem:[%s1245_s6 + $0x1d8] sm:$0xff] %vm358_vm0, %v825_v59 }
 0x135 PF: > { %s14_s15 = sadd.s32 1, %s1074_s15  }
 0x136   : > { %p11_p4 = scmp.ge.s32.totalorder %s14_s15, 4  }
 0x138   :  { %13 = sbr.rel (!%p11_p4) target bundleno = 1 (0x1), region = 69 }

// kernel: fno2d_forward.19
= control target key start
LH: loop header
LB: loop body
LE: loop exit
PB: predicated region body
PF: predicated region fallthrough
CT: control target
= control target key end

     0   :  { %s1182_s18 = smov 0   ;;  %s1510_s0 = inlined_call_operand.vmem [shape: f32[2,256,32], index: 0, kind: input, shape index: {}]   ;;  %s1511_s1 = inlined_call_operand.vmem [shape: bf16[32,128], index: 1, kind: input, shape index: {}]   ;;  %s1512_s2 = inlined_call_operand.vmem [shape: f32[1,128], index: 2, kind: input, shape index: {}]   ;;  %s1513_s3 = inlined_call_operand.vmem [shape: bf16[128,2], index: 3, kind: input, shape index: {}]   ;;  %s1514_s4 = inlined_call_operand.vmem [shape: f32[1,2], index: 4, kind: input, shape index: {}]   ;;  %s1515_s5 = inlined_call_operand.vmem [shape: f32[2,256,2], index: 5, kind: output, shape index: {}]  }
   0x1 LB: > { %s981_s19 = sadd.s32 4294967295, %s1150_s18   ;;  %p985_p0 = scmp.ge.s32.totalorder %s1150_s18, 1  ;;  %s1150_s18 = sphi %s1182_s18, %s15_s18  }
   0x2   : > { %p187_p1 = scmp.lt.s32.totalorder %s1150_s18, 3 }
   0x4   : > { %p188_p2 = pnand %p985_p0, %p187_p1 }
   0x5   : > { %p215_p3 = scmp.lt.s32.totalorder (!%p188_p2), %s981_s19, 1 }
   0x6   : > { %191 = sbr.rel (%p188_p2) target bundleno = 561 (0x231), region = 40 }
   0xb   : > { %v1051_v0 = vld [vmem:[%s1511_s1 + $0x8] sm:$0xff]  ;;  %v1050_v1 = vld [vmem:[%s1511_s1] sm:$0xff]  ;;  %s1517_s19 = smov (!%p215_p3, %s981_s19), 1  ;;  %vm294_vm0 = vcmask 261120   ;;  %v1059_v26 = vld [vmem:[%s1513_s3 + $0x38] sm:$0xff]  ;;  %vm893_vm1 = vcmask 15360  }
   0xc   : > { %349 = vmatpush.bf16.msra.mxu0 %v1051_v0  ;;  %1060 = vmatpush.bf16.msra.mxu3 %v1051_v0  ;;  %s1048_s24 = sshll.u32 %s1517_s19, 8  ;;  %v1058_v30 = vld [vmem:[%s1513_s3 + $0x30] sm:$0xff]  ;;  %v1057_v31 = vld [vmem:[%s1513_s3 + $0x28] sm:$0xff]  ;;  %v1056_v32 = vld [vmem:[%s1513_s3 + $0x20] sm:$0xff] }
   0xd   : > { %s1204_s27 = scalar_lea.vmem %s1510_s0, %s1048_s24  ;;  %804 = vmatpush.bf16.msra.mxu1 %v1059_v26  ;;  %1062 = vmatpush.bf16.msra.mxu2 %v1059_v26  ;;  %v1055_v36 = vld [vmem:[%s1513_s3 + $0x18] sm:$0xff]  ;;  %v1054_v40 = vld [vmem:[%s1513_s3 + $0x10] sm:$0xff]  ;;  %v1053_v41 = vld [vmem:[%s1513_s3 + $0x8] sm:$0xff]  ;;  %s1334_s28 = scalar_lea.vmem %s1515_s5, %s1048_s24 }
   0xe   : > { %v226_v2 = vld [vmem:[%s1204_s27] sm:$0xff]  ;;  %v227_v3 = vld [vmem:[%s1204_s27 + $0x8] sm:$0xff]  ;;  %v228_v5 = vld [vmem:[%s1204_s27 + $0x10] sm:$0xff] }
   0xf   : > { %v258_v4 = vpack.c.bf16 %v227_v3, %v226_v2  ;;  %v229_v6 = vld [vmem:[%s1204_s27 + $0x18] sm:$0xff]  ;;  %v230_v8 = vld [vmem:[%s1204_s27 + $0x20] sm:$0xff]  ;;  %v231_v9 = vld [vmem:[%s1204_s27 + $0x28] sm:$0xff] }
  0x10   : > { %350 = vmatpush.bf16.msra.mxu0 %v1050_v1  ;;  %1061 = vmatpush.bf16.msra.mxu3 %v1050_v1  ;;  %v259_v7 = vpack.c.bf16 %v229_v6, %v228_v5  ;;  %v260_v10 = vpack.c.bf16 %v231_v9, %v230_v8  ;;  %v232_v11 = vld [vmem:[%s1204_s27 + $0x30] sm:$0xff]  ;;  %v233_v12 = vld [vmem:[%s1204_s27 + $0x38] sm:$0xff]  ;;  %v234_v14 = vld [vmem:[%s1204_s27 + $0x40] sm:$0xff] }
  0x11   : > { %v261_v13 = vpack.c.bf16 %v233_v12, %v232_v11  ;;  %v235_v15 = vld [vmem:[%s1204_s27 + $0x48] sm:$0xff]  ;;  %v236_v17 = vld [vmem:[%s1204_s27 + $0x50] sm:$0xff]  ;;  %v237_v18 = vld [vmem:[%s1204_s27 + $0x58] sm:$0xff]  ;;  %805 = vmatpush.bf16.msra.mxu1 %v1058_v30  ;;  %1063 = vmatpush.bf16.msra.mxu2 %v1058_v30 }
  0x12   : > { %v262_v16 = vpack.c.bf16 %v235_v15, %v234_v14  ;;  %v263_v19 = vpack.c.bf16 %v237_v18, %v236_v17  ;;  %v244_v20 = vld [vmem:[%s1204_s27 + $0x90] sm:$0xff]  ;;  %v245_v21 = vld [vmem:[%s1204_s27 + $0x98] sm:$0xff]  ;;  %v238_v23 = vld [vmem:[%s1204_s27 + $0x60] sm:$0xff] }
  0x13   : > { %998 = vmatmul.msk.bf16.vlgmr.msra.gmra.mxu0 %vm294_vm0, %v258_v4  ;;  %v267_v22 = vpack.c.bf16 %v245_v21, %v244_v20  ;;  %v239_v24 = vld [vmem:[%s1204_s27 + $0x68] sm:$0xff]  ;;  %v246_v27 = vld [vmem:[%s1204_s27 + $0xa0] sm:$0xff]  ;;  %v240_v33 = vld [vmem:[%s1204_s27 + $0x70] sm:$0xff] }
  0x14   : > { %v264_v25 = vpack.c.bf16 %v239_v24, %v238_v23  ;;  %v247_v28 = vld [vmem:[%s1204_s27 + $0xa8] sm:$0xff]  ;;  %v241_v34 = vld [vmem:[%s1204_s27 + $0x78] sm:$0xff]  ;;  %v248_v37 = vld [vmem:[%s1204_s27 + $0xb0] sm:$0xff] }
  0x15   : > { %1007 = vmatmul.msk.bf16.vlgmr.msra.gmra.mxu3 %vm294_vm0, %v267_v22  ;;  %v268_v29 = vpack.c.bf16 %v247_v28, %v246_v27  ;;  %806 = vmatpush.bf16.msra.mxu1 %v1057_v31  ;;  %v265_v35 = vpack.c.bf16 %v241_v34, %v240_v33  ;;  %v249_v38 = vld [vmem:[%s1204_s27 + $0xb8] sm:$0xff]  ;;  %v1052_v42 = vld [vmem:[%s1513_s3] sm:$0xff]  ;;  %v243_v44 = vld [vmem:[%s1204_s27 + $0x88] sm:$0xff] }
  0x16   : > { %1064 = vmatpush.bf16.msra.mxu2 %v1057_v31  ;;  %v269_v39 = vpack.c.bf16 %v249_v38, %v248_v37  ;;  %v242_v43 = vld [vmem:[%s1204_s27 + $0x80] sm:$0xff]  ;;  %v251_v50 = vld [vmem:[%s1204_s27 + $0xc8] sm:$0xff]  ;;  %v252_v1 = vld [vmem:[%s1204_s27 + $0xd0] sm:$0xff] }
  0x17   : > { %v1268_v45 = vld [vmem:[%s1512_s2] ss:$0 sm:$0xff]  ;;  %v266_v46 = vpack.c.bf16 %v243_v44, %v242_v43  ;;  %v253_v2 = vld [vmem:[%s1204_s27 + $0xd8] sm:$0xff]  ;;  %v255_v28 = vld [vmem:[%s1204_s27 + $0xe8] sm:$0xff] }
  0x18   : > { %v250_v49 = vld [vmem:[%s1204_s27 + $0xc0] sm:$0xff]  ;;  %v271_v3 = vpack.c.bf16 %v253_v2, %v252_v1 }
  0x19   : > { %807 = vmatpush.bf16.msra.mxu1 %v1056_v32  ;;  %v270_v51 = vpack.c.bf16 %v251_v50, %v250_v49  ;;  %v254_v27 = vld [vmem:[%s1204_s27 + $0xe0] sm:$0xff] }
  0x1a   : > { %1065 = vmatpush.bf16.msra.mxu2 %v1056_v32 }
  0x1d   : > { %808 = vmatpush.bf16.msra.mxu1 %v1055_v36 }
  0x1e   : > { %1066 = vmatpush.bf16.msra.mxu2 %v1055_v36 }
  0x21   : > { %809 = vmatpush.bf16.msra.mxu1 %v1054_v40 }
  0x22   : > { %1067 = vmatpush.bf16.msra.mxu2 %v1054_v40 }
  0x23   : > { %999 = vmatmul.msk.bf16.gmra.mxu0 %vm294_vm0, %v259_v7 }
  0x25   : > { %1008 = vmatmul.msk.bf16.gmra.mxu3 %vm294_vm0, %v268_v29  ;;  %810 = vmatpush.bf16.msra.mxu1 %v1053_v41  ;;  %v272_v29 = vpack.c.bf16 %v255_v28, %v254_v27 }
  0x26   : > { %1068 = vmatpush.bf16.msra.mxu2 %v1053_v41 }
  0x29   : > { %811 = vmatpush.bf16.msra.mxu1 %v1052_v42 }
  0x2a   : > { %1069 = vmatpush.bf16.msra.mxu2 %v1052_v42 }
  0x33   : > { %1000 = vmatmul.msk.bf16.gmra.mxu0 %vm294_vm0, %v260_v10 }
  0x35   : > { %1009 = vmatmul.msk.bf16.gmra.mxu3 %vm294_vm0, %v269_v39 }
  0x43   : > { %1001 = vmatmul.msk.bf16.gmra.mxu0 %vm294_vm0, %v261_v13 }
  0x45   : > { %1010 = vmatmul.msk.bf16.gmra.mxu3 %vm294_vm0, %v270_v51 }
  0x53   : > { %1002 = vmatmul.msk.bf16.gmra.mxu0 %vm294_vm0, %v262_v16 }
  0x55   : > { %1011 = vmatmul.msk.bf16.gmra.mxu3 %vm294_vm0, %v271_v3 }
  0x63   : > { %1003 = vmatmul.msk.bf16.gmra.mxu0 %vm294_vm0, %v263_v19 }
  0x65   : > { %1012 = vmatmul.msk.bf16.gmra.mxu3 %vm294_vm0, %v272_v29 }
  0x73   : > { %1004 = vmatmul.msk.bf16.gmra.mxu0 %vm294_vm0, %v264_v25 }
  0x83   : > { %1005 = vmatmul.msk.bf16.gmra.mxu0 %vm294_vm0, %v265_v35 }
  0x90   : > { %v352_v47 = vpop.f32.mrf.mxu0 }
  0x91   : > { %v353_v48 = vadd.f32 %v1268_v45, %v352_v47 }
  0x93   : > { %v464_v52 = vmul.f32 0.044715, %v353_v48  ;;  %1006 = vmatmul.msk.bf16.gmra.mxu0 %vm294_vm0, %v266_v46  ;;  %v432_v15 = vmul.f32 0.5, %v353_v48 }
  0x95   : > { %v496_v53 = vmul.f32 %v464_v52, %v353_v48 }
  0x97   : > { %v528_v54 = vmul.f32 %v496_v53, %v353_v48 }
  0x98   : > { %v354_v55 = vpop.f32.mrf.mxu0 }
  0x99   : > { %v355_v56 = vadd.f32 %v1268_v45, %v354_v55  ;;  %v560_v57 = vadd.f32 %v528_v54, %v353_v48  ;;  %v256_v54 = vld [vmem:[%s1204_s27 + $0xf0] sm:$0xff]  ;;  %v257_v55 = vld [vmem:[%s1204_s27 + $0xf8] sm:$0xff] }
  0x9b   : > { %v465_v58 = vmul.f32 0.044715, %v355_v56  ;;  %v592_v60 = vmul.f32 0.7978846, %v560_v57  ;;  %v433_v16 = vmul.f32 0.5, %v355_v56 }
  0x9d   : > { %v497_v59 = vmul.f32 %v465_v58, %v355_v56  ;;  %1080 = vtanh.f32 %v592_v60 }
  0x9f   : > { %v529_v61 = vmul.f32 %v497_v59, %v355_v56 }
  0xa0   : > { %v357_v62 = vpop.f32.mrf.mxu0 }
  0xa1   : > { %v358_v63 = vadd.f32 %v1268_v45, %v357_v62  ;;  %v561_v0 = vadd.f32 %v529_v61, %v355_v56  ;;  %v273_v56 = vpack.c.bf16 %v257_v55, %v256_v54 }
  0xa3   : > { %v466_v4 = vmul.f32 0.044715, %v358_v63  ;;  %v593_v5 = vmul.f32 0.7978846, %v561_v0  ;;  %v1081_v7 = vpop.eup %1080  ;;  %v434_v41 = vmul.f32 0.5, %v358_v63  ;;  %1013 = vmatmul.msk.bf16.gmra.mxu3 %vm294_vm0, %v273_v56 }
  0xa4   : > { %v656_v12 = vadd.f32 1.0, %v1081_v7 }
  0xa5   : > { %1082 = vtanh.f32 %v593_v5  ;;  %v498_v6 = vmul.f32 %v466_v4, %v358_v63 }
  0xa6   : > { %v688_v20 = vmul.f32 %v656_v12, %v432_v15 }
  0xa7   : > { %v530_v8 = vmul.f32 %v498_v6, %v358_v63 }
  0xa8   : > { %v359_v9 = vpop.f32.mrf.mxu0 }
  0xa9   : > { %v360_v10 = vadd.f32 %v1268_v45, %v359_v9  ;;  %v562_v11 = vadd.f32 %v530_v8, %v358_v63 }
  0xab   : > { %v1083_v13 = vpop.eup %1082  ;;  %v467_v14 = vmul.f32 0.044715, %v360_v10  ;;  %v594_v19 = vmul.f32 0.7978846, %v562_v11  ;;  %v435_v42 = vmul.f32 0.5, %v360_v10 }
  0xac   : > { %v657_v17 = vadd.f32 1.0, %v1083_v13 }
  0xad   : > { %v499_v18 = vmul.f32 %v467_v14, %v360_v10  ;;  %1084 = vtanh.f32 %v594_v19 }
  0xae   : > { %v689_v21 = vmul.f32 %v657_v17, %v433_v16 }
  0xaf   : > { %v531_v22 = vmul.f32 %v499_v18, %v360_v10 }
  0xb0   : > { %v362_v23 = vpop.f32.mrf.mxu0  ;;  %v720_v24 = vpack.c.bf16 %v689_v21, %v688_v20 }
  0xb1   : > { %v363_v25 = vadd.f32 %v1268_v45, %v362_v23  ;;  %v563_v26 = vadd.f32 %v531_v22, %v360_v10 }
  0xb2   : > { %812 = vmatmul.bf16.vlgmr.msra.gmra.mxu1 %v720_v24 }
  0xb3   : > { %v468_v30 = vmul.f32 0.044715, %v363_v25  ;;  %v595_v31 = vmul.f32 0.7978846, %v563_v26  ;;  %v1085_v33 = vpop.eup %1084  ;;  %v436_v4 = vmul.f32 0.5, %v363_v25 }
  0xb4   : > { %v658_v38 = vadd.f32 1.0, %v1085_v33 }
  0xb5   : > { %1086 = vtanh.f32 %v595_v31  ;;  %v500_v32 = vmul.f32 %v468_v30, %v363_v25 }
  0xb6   : > { %v690_v47 = vmul.f32 %v658_v38, %v434_v41 }
  0xb7   : > { %v532_v34 = vmul.f32 %v500_v32, %v363_v25 }
  0xb8   : > { %v364_v35 = vpop.f32.mrf.mxu0 }
  0xb9   : > { %v365_v36 = vadd.f32 %v1268_v45, %v364_v35  ;;  %v564_v37 = vadd.f32 %v532_v34, %v363_v25 }
  0xbb   : > { %v1087_v39 = vpop.eup %1086  ;;  %v469_v40 = vmul.f32 0.044715, %v365_v36  ;;  %v596_v46 = vmul.f32 0.7978846, %v564_v37  ;;  %v437_v5 = vmul.f32 0.5, %v365_v36 }
  0xbc   : > { %v659_v43 = vadd.f32 1.0, %v1087_v39 }
  0xbd   : > { %v501_v44 = vmul.f32 %v469_v40, %v365_v36  ;;  %1088 = vtanh.f32 %v596_v46 }
  0xbe   : > { %v691_v48 = vmul.f32 %v659_v43, %v435_v42 }
  0xbf   : > { %v533_v49 = vmul.f32 %v501_v44, %v365_v36 }
  0xc0   : > { %v367_v50 = vpop.f32.mrf.mxu0  ;;  %v721_v51 = vpack.c.bf16 %v691_v48, %v690_v47 }
  0xc1   : > { %v368_v52 = vadd.f32 %v1268_v45, %v367_v50  ;;  %v565_v53 = vadd.f32 %v533_v49, %v365_v36 }
  0xc2   : > { %817 = vmatmul.bf16.gmra.mxu1 %v721_v51 }
  0xc3   : > { %v470_v57 = vmul.f32 0.044715, %v368_v52  ;;  %v597_v58 = vmul.f32 0.7978846, %v565_v53  ;;  %v1089_v60 = vpop.eup %1088  ;;  %v438_v27 = vmul.f32 0.5, %v368_v52 }
  0xc4   : > { %v660_v1 = vadd.f32 1.0, %v1089_v60 }
  0xc5   : > { %1090 = vtanh.f32 %v597_v58  ;;  %v502_v59 = vmul.f32 %v470_v57, %v368_v52 }
  0xc6   : > { %v692_v9 = vmul.f32 %v660_v1, %v436_v4 }
  0xc7   : > { %v534_v61 = vmul.f32 %v502_v59, %v368_v52 }
  0xc8   : > { %v369_v62 = vpop.f32.mrf.mxu0 }
  0xc9   : > { %v370_v63 = vadd.f32 %v1268_v45, %v369_v62  ;;  %v566_v0 = vadd.f32 %v534_v61, %v368_v52 }
  0xcb   : > { %v1091_v2 = vpop.eup %1090  ;;  %v471_v3 = vmul.f32 0.044715, %v370_v63  ;;  %v598_v8 = vmul.f32 0.7978846, %v566_v0  ;;  %v439_v28 = vmul.f32 0.5, %v370_v63 }
  0xcc   : > { %v661_v6 = vadd.f32 1.0, %v1091_v2 }
  0xcd   : > { %v503_v7 = vmul.f32 %v471_v3, %v370_v63  ;;  %1092 = vtanh.f32 %v598_v8 }
  0xce   : > { %v693_v10 = vmul.f32 %v661_v6, %v437_v5 }
  0xcf   : > { %v535_v11 = vmul.f32 %v503_v7, %v370_v63 }
  0xd0   : > { %v372_v12 = vpop.f32.mrf.mxu0  ;;  %v722_v13 = vpack.c.bf16 %v693_v10, %v692_v9 }
  0xd1   : > { %v373_v14 = vadd.f32 %v1268_v45, %v372_v12  ;;  %v567_v15 = vadd.f32 %v535_v11, %v370_v63  ;;  %v397_v63 = vpop.f32.mrf.mxu3 }
  0xd2   : > { %822 = vmatmul.bf16.gmra.mxu1 %v722_v13 }
  0xd3   : > { %v472_v16 = vmul.f32 0.044715, %v373_v14  ;;  %v599_v17 = vmul.f32 0.7978846, %v567_v15  ;;  %v1093_v19 = vpop.eup %1092  ;;  %v440_v51 = vmul.f32 0.5, %v373_v14 }
  0xd4   : > { %v662_v24 = vadd.f32 1.0, %v1093_v19 }
  0xd5   : > { %1094 = vtanh.f32 %v599_v17  ;;  %v504_v18 = vmul.f32 %v472_v16, %v373_v14 }
  0xd6   : > { %v694_v32 = vmul.f32 %v662_v24, %v438_v27 }
  0xd7   : > { %v536_v20 = vmul.f32 %v504_v18, %v373_v14 }
  0xd8   : > { %v374_v21 = vpop.f32.mrf.mxu0 }
  0xd9   : > { %v375_v22 = vadd.f32 %v1268_v45, %v374_v21  ;;  %v568_v23 = vadd.f32 %v536_v20, %v373_v14  ;;  %v399_v14 = vpop.f32.mrf.mxu3 }
  0xdb   : > { %v1095_v25 = vpop.eup %1094  ;;  %v473_v26 = vmul.f32 0.044715, %v375_v22  ;;  %v600_v31 = vmul.f32 0.7978846, %v568_v23  ;;  %v441_v52 = vmul.f32 0.5, %v375_v22 }
  0xdc   : > { %v663_v29 = vadd.f32 1.0, %v1095_v25 }
  0xdd   : > { %v505_v30 = vmul.f32 %v473_v26, %v375_v22  ;;  %1096 = vtanh.f32 %v600_v31 }
  0xde   : > { %v695_v33 = vmul.f32 %v663_v29, %v439_v28 }
  0xdf   : > { %v537_v34 = vmul.f32 %v505_v30, %v375_v22 }
  0xe0   : > { %v377_v35 = vpop.f32.mrf.mxu0  ;;  %v723_v36 = vpack.c.bf16 %v695_v33, %v694_v32 }
  0xe1   : > { %v378_v37 = vadd.f32 %v1268_v45, %v377_v35  ;;  %v569_v38 = vadd.f32 %v537_v34, %v375_v22  ;;  %v402_v27 = vpop.f32.mrf.mxu3 }
  0xe2   : > { %827 = vmatmul.bf16.gmra.mxu1 %v723_v36 }
  0xe3   : > { %v474_v39 = vmul.f32 0.044715, %v378_v37  ;;  %v601_v40 = vmul.f32 0.7978846, %v569_v38  ;;  %v1097_v42 = vpop.eup %1096  ;;  %v442_v11 = vmul.f32 0.5, %v378_v37 }
  0xe4   : > { %v664_v48 = vadd.f32 1.0, %v1097_v42 }
  0xe5   : > { %1098 = vtanh.f32 %v601_v40  ;;  %v506_v41 = vmul.f32 %v474_v39, %v378_v37 }
  0xe6   : > { %v696_v56 = vmul.f32 %v664_v48, %v440_v51 }
  0xe7   : > { %v538_v43 = vmul.f32 %v506_v41, %v378_v37 }
  0xe8   : > { %v379_v44 = vpop.f32.mrf.mxu0 }
  0xe9   : > { %v380_v46 = vadd.f32 %v1268_v45, %v379_v44  ;;  %v570_v47 = vadd.f32 %v538_v43, %v378_v37 }
  0xeb   : > { %v1099_v49 = vpop.eup %1098  ;;  %v475_v50 = vmul.f32 0.044715, %v380_v46  ;;  %v602_v55 = vmul.f32 0.7978846, %v570_v47  ;;  %v443_v12 = vmul.f32 0.5, %v380_v46  ;;  %v404_v47 = vpop.f32.mrf.mxu3 }
  0xec   : > { %v665_v53 = vadd.f32 1.0, %v1099_v49 }
  0xed   : > { %v507_v54 = vmul.f32 %v475_v50, %v380_v46  ;;  %1100 = vtanh.f32 %v602_v55  ;;  %v1304_v55 = vadd.f32 %v1268_v45, %v399_v14 }
  0xee   : > { %v697_v57 = vmul.f32 %v665_v53, %v441_v52  ;;  %v1301_v53 = vadd.f32 %v1268_v45, %v397_v63 }
  0xef   : > { %v539_v58 = vmul.f32 %v507_v54, %v380_v46 }
  0xf0   : > { %v382_v59 = vpop.f32.mrf.mxu0  ;;  %v724_v60 = vpack.c.bf16 %v697_v57, %v696_v56 }
  0xf1   : > { %v383_v61 = vadd.f32 %v1268_v45, %v382_v59  ;;  %v571_v62 = vadd.f32 %v539_v58, %v380_v46 }
  0xf2   : > { %832 = vmatmul.bf16.gmra.mxu1 %v724_v60  ;;  %v482_v60 = vmul.f32 0.044715, %v1301_v53 }
  0xf3   : > { %v476_v0 = vmul.f32 0.044715, %v383_v61  ;;  %v603_v1 = vmul.f32 0.7978846, %v571_v62  ;;  %v1101_v3 = vpop.eup %1100  ;;  %v444_v36 = vmul.f32 0.5, %v383_v61  ;;  %v407_v62 = vpop.f32.mrf.mxu3 }
  0xf4   : > { %v666_v8 = vadd.f32 1.0, %v1101_v3 }
  0xf5   : > { %1102 = vtanh.f32 %v603_v1  ;;  %v508_v2 = vmul.f32 %v476_v0, %v383_v61  ;;  %v483_v1 = vmul.f32 0.044715, %v1304_v55 }
  0xf6   : > { %v698_v17 = vmul.f32 %v666_v8, %v442_v11 }
  0xf7   : > { %v540_v4 = vmul.f32 %v508_v2, %v383_v61  ;;  %v515_v11 = vmul.f32 %v483_v1, %v1304_v55 }
  0xf8   : > { %v384_v5 = vpop.f32.mrf.mxu0 }
  0xf9   : > { %v385_v6 = vadd.f32 %v1268_v45, %v384_v5  ;;  %v572_v7 = vadd.f32 %v540_v4, %v383_v61 }
  0xfb   : > { %v1103_v9 = vpop.eup %1102  ;;  %v477_v10 = vmul.f32 0.044715, %v385_v6  ;;  %v604_v16 = vmul.f32 0.7978846, %v572_v7  ;;  %v445_v37 = vmul.f32 0.5, %v385_v6 }
  0xfc   : > { %v667_v13 = vadd.f32 1.0, %v1103_v9  ;;  %v514_v9 = vmul.f32 %v482_v60, %v1301_v53 }
  0xfd   : > { %v509_v15 = vmul.f32 %v477_v10, %v385_v6  ;;  %1104 = vtanh.f32 %v604_v16  ;;  %v547_v16 = vmul.f32 %v515_v11, %v1304_v55 }
  0xfe   : > { %v699_v18 = vmul.f32 %v667_v13, %v443_v12  ;;  %v546_v14 = vmul.f32 %v514_v9, %v1301_v53 }
  0xff   : > { %v541_v19 = vmul.f32 %v509_v15, %v385_v6 }
 0x100   : > { %v387_v20 = vpop.f32.mrf.mxu0  ;;  %v725_v21 = vpack.c.bf16 %v699_v18, %v698_v17  ;;  %v409_v17 = vpop.f32.mrf.mxu3  ;;  %v1314_v18 = vadd.f32 %v1268_v45, %v402_v27  ;;  %v1326_v27 = vld [vmem:[%s1514_s4] ss:$0 sm:$0xff] }
 0x101   : > { %v388_v22 = vadd.f32 %v1268_v45, %v387_v20  ;;  %v573_v23 = vadd.f32 %v541_v19, %v385_v6  ;;  %v578_v19 = vadd.f32 %v546_v14, %v1301_v53 }
 0x102   : > { %837 = vmatmul.bf16.gmra.mxu1 %v725_v21  ;;  %v1318_v21 = vadd.f32 %v1268_v45, %v404_v47 }
 0x103   : > { %v478_v24 = vmul.f32 0.044715, %v388_v22  ;;  %v605_v25 = vmul.f32 0.7978846, %v573_v23  ;;  %v1105_v28 = vpop.eup %1104  ;;  %v446_v3 = vmul.f32 0.5, %v388_v22 }
 0x104   : > { %v668_v33 = vadd.f32 1.0, %v1105_v28  ;;  %v484_v23 = vmul.f32 0.044715, %v1314_v18  ;;  %v485_v28 = vmul.f32 0.044715, %v1318_v21 }
 0x105   : > { %1106 = vtanh.f32 %v605_v25  ;;  %v510_v26 = vmul.f32 %v478_v24, %v388_v22  ;;  %v610_v25 = vmul.f32 0.7978846, %v578_v19 }
 0x106   : > { %v700_v41 = vmul.f32 %v668_v33, %v444_v36  ;;  %v516_v36 = vmul.f32 %v484_v23, %v1314_v18 }
 0x107   : > { %v542_v29 = vmul.f32 %v510_v26, %v388_v22 }
 0x108   : > { %v389_v30 = vpop.f32.mrf.mxu0 }
 0x109   : > { %v390_v31 = vadd.f32 %v1268_v45, %v389_v30  ;;  %v574_v32 = vadd.f32 %v542_v29, %v388_v22  ;;  %v579_v22 = vadd.f32 %v547_v16, %v1304_v55  ;;  %v453_v16 = vmul.f32 0.5, %v1318_v21 }
 0x10b   : > { %v1107_v34 = vpop.eup %1106  ;;  %v479_v35 = vmul.f32 0.044715, %v390_v31  ;;  %v606_v40 = vmul.f32 0.7978846, %v574_v32  ;;  %v447_v63 = vmul.f32 0.5, %v390_v31 }
 0x10c   : > { %v669_v38 = vadd.f32 1.0, %v1107_v34  ;;  %v611_v29 = vmul.f32 0.7978846, %v579_v22 }
 0x10d   : > { %v511_v39 = vmul.f32 %v479_v35, %v390_v31  ;;  %1108 = vtanh.f32 %v606_v40  ;;  %v412_v35 = vpop.f32.mrf.mxu3 }
 0x10e   : > { %v701_v42 = vmul.f32 %v669_v38, %v445_v37  ;;  %v517_v38 = vmul.f32 %v485_v28, %v1318_v21  ;;  %v1365_v9 = vadd.f32 %v1268_v45, %v412_v35 }
 0x10f   : > { %v543_v43 = vmul.f32 %v511_v39, %v390_v31 }
 0x110   : > { %v392_v44 = vpop.f32.mrf.mxu0  ;;  %v726_v46 = vpack.c.bf16 %v701_v42, %v700_v41  ;;  %v548_v41 = vmul.f32 %v516_v36, %v1314_v18  ;;  %v549_v42 = vmul.f32 %v517_v38, %v1318_v21 }
 0x111   : > { %v393_v48 = vadd.f32 %v1268_v45, %v392_v44  ;;  %v575_v49 = vadd.f32 %v543_v43, %v390_v31 }
 0x112   : > { %842 = vmatmul.bf16.gmra.mxu1 %v726_v46  ;;  %v1343_v46 = vadd.f32 %v1268_v45, %v407_v62  ;;  %v580_v47 = vadd.f32 %v548_v41, %v1314_v18 }
 0x113   : > { %v480_v50 = vmul.f32 0.044715, %v393_v48  ;;  %v607_v51 = vmul.f32 0.7978846, %v575_v49  ;;  %v1109_v54 = vpop.eup %1108  ;;  %v448_v30 = vmul.f32 0.5, %v393_v48 }
 0x114   : > { %v670_v61 = vadd.f32 1.0, %v1109_v54  ;;  %v612_v60 = vmul.f32 0.7978846, %v580_v47  ;;  %v454_v41 = vmul.f32 0.5, %v1343_v46 }
 0x115   : > { %1110 = vtanh.f32 %v607_v51  ;;  %v512_v52 = vmul.f32 %v480_v50, %v393_v48  ;;  %v450_v50 = vmul.f32 0.5, %v1301_v53  ;;  %v581_v51 = vadd.f32 %v549_v42, %v1318_v21  ;;  %v414_v54 = vpop.f32.mrf.mxu3 }
 0x116   : > { %v702_v7 = vmul.f32 %v670_v61, %v446_v3  ;;  %v1369_v11 = vadd.f32 %v1268_v45, %v414_v54 }
 0x117   : > { %v544_v56 = vmul.f32 %v512_v52, %v393_v48  ;;  %v613_v62 = vmul.f32 0.7978846, %v581_v51 }
 0x118   : > { %v394_v57 = vpop.f32.mrf.mxu0  ;;  %v489_v23 = vmul.f32 0.044715, %v1369_v11 }
 0x119   : > { %v395_v58 = vadd.f32 %v1268_v45, %v394_v57  ;;  %v576_v59 = vadd.f32 %v544_v56, %v393_v48  ;;  %v1347_v48 = vadd.f32 %v1268_v45, %v409_v17  ;;  %v451_v56 = vmul.f32 0.5, %v1304_v55 }
 0x11a   : > { %v521_v21 = vmul.f32 %v489_v23, %v1369_v11 }
 0x11b   : > { %v1111_v0 = vpop.eup %1110  ;;  %v481_v2 = vmul.f32 0.044715, %v395_v58  ;;  %v608_v6 = vmul.f32 0.7978846, %v576_v59  ;;  %v449_v31 = vmul.f32 0.5, %v395_v58 }
 0x11c   : > { %v671_v4 = vadd.f32 1.0, %v1111_v0  ;;  %v486_v59 = vmul.f32 0.044715, %v1343_v46  ;;  %v487_v61 = vmul.f32 0.044715, %v1347_v48 }
 0x11d   : > { %v513_v5 = vmul.f32 %v481_v2, %v395_v58  ;;  %1112 = vtanh.f32 %v608_v6 }
 0x11e   : > { %v703_v8 = vmul.f32 %v671_v4, %v447_v63  ;;  %v518_v1 = vmul.f32 %v486_v59, %v1343_v46  ;;  %v519_v55 = vmul.f32 %v487_v61, %v1347_v48  ;;  %v417_v4 = vpop.f32.mrf.mxu3 }
 0x11f   : > { %v545_v10 = vmul.f32 %v513_v5, %v395_v58  ;;  %v1387_v36 = vadd.f32 %v1268_v45, %v417_v4  ;;  %v456_v4 = vmul.f32 0.5, %v1365_v9 }
 0x120   : > { %v727_v12 = vpack.c.bf16 %v703_v8, %v702_v7  ;;  %v550_v5 = vmul.f32 %v518_v1, %v1343_v46  ;;  %v551_v6 = vmul.f32 %v519_v55, %v1347_v48 }
 0x121   : > { %v577_v13 = vadd.f32 %v545_v10, %v395_v58 }
 0x122   : > { %847 = vmatmul.bf16.gmra.mxu1 %v727_v12  ;;  %v582_v10 = vadd.f32 %v550_v5, %v1343_v46  ;;  %v583_v14 = vadd.f32 %v551_v6, %v1347_v48 }
 0x123   : > { %v609_v15 = vmul.f32 0.7978846, %v577_v13  ;;  %v1113_v20 = vpop.eup %1112  ;;  %v452_v13 = vmul.f32 0.5, %v1314_v18 }
 0x124   : > { %v672_v24 = vadd.f32 1.0, %v1113_v20  ;;  %v488_v20 = vmul.f32 0.044715, %v1365_v9  ;;  %v614_v22 = vmul.f32 0.7978846, %v582_v10 }
 0x125   : > { %1114 = vtanh.f32 %v609_v15 }
 0x126   : > { %v704_v33 = vmul.f32 %v672_v24, %v448_v30  ;;  %1116 = vtanh.f32 %v610_v25  ;;  %v615_v24 = vmul.f32 0.7978846, %v583_v14  ;;  %v419_v25 = vpop.f32.mrf.mxu3  ;;  %v520_v28 = vmul.f32 %v488_v20, %v1365_v9 }
 0x127   : > { %1118 = vtanh.f32 %v611_v29 }
 0x128   : > { %1120 = vtanh.f32 %v612_v60 }
 0x129   : > { %1122 = vtanh.f32 %v613_v62 }
 0x12a   : > { %1124 = vtanh.f32 %v614_v22 }
 0x12b   : > { %v1115_v26 = vpop.eup %1114  ;;  %1126 = vtanh.f32 %v615_v24 }
 0x12c   : > { %v673_v32 = vadd.f32 1.0, %v1115_v26  ;;  %v1117_v43 = vpop.eup %1116 }
 0x12d   : > { %v1119_v44 = vpop.eup %1118  ;;  %v674_v57 = vadd.f32 1.0, %v1117_v43 }
 0x12e   : > { %v705_v34 = vmul.f32 %v673_v32, %v449_v31  ;;  %v675_v58 = vadd.f32 1.0, %v1119_v44  ;;  %v1121_v7 = vpop.eup %1120  ;;  %v552_v32 = vmul.f32 %v520_v28, %v1365_v9  ;;  %v455_v44 = vmul.f32 0.5, %v1347_v48 }
 0x12f   : > { %v813_v37 = vpop.f32.mrf.mxu1  ;;  %v706_v0 = vmul.f32 %v674_v57, %v450_v50  ;;  %v1123_v8 = vpop.eup %1122  ;;  %v676_v17 = vadd.f32 1.0, %v1121_v7  ;;  %v490_v50 = vmul.f32 0.044715, %v1387_v36  ;;  %v457_v7 = vmul.f32 0.5, %v1369_v11 }
 0x130   : > { %v814_v39 = vadd.f32 %v1326_v27, %v813_v37  ;;  %v728_v40 = vpack.c.bf16 %v705_v34, %v704_v33  ;;  %v707_v53 = vmul.f32 %v675_v58, %v451_v56  ;;  %v677_v19 = vadd.f32 1.0, %v1123_v8  ;;  %v1125_v34 = vpop.eup %1124  ;;  %v422_v37 = vpop.f32.mrf.mxu3 }
 0x131   : > { %v708_v26 = vmul.f32 %v676_v17, %v452_v13  ;;  %v553_v33 = vmul.f32 %v521_v21, %v1369_v11  ;;  %v1127_v35 = vpop.eup %1126  ;;  %v584_v38 = vadd.f32 %v552_v32, %v1365_v9  ;;  %v678_v47 = vadd.f32 1.0, %v1125_v34 }
 0x132   : > { %894 = vst.msk [vmem:[%s1334_s28] sm:$0xff] %vm893_vm1, %v814_v39  ;;  %852 = vmatmul.bf16.vlgmr.msra.gmra.mxu2 %v728_v40  ;;  %v729_v63 = vpack.c.bf16 %v707_v53, %v706_v0  ;;  %v709_v18 = vmul.f32 %v677_v19, %v453_v16  ;;  %v1391_v39 = vadd.f32 %v1268_v45, %v419_v25  ;;  %v458_v32 = vmul.f32 0.5, %v1387_v36 }
 0x133   : > { %v585_v42 = vadd.f32 %v553_v33, %v1369_v11  ;;  %v616_v51 = vmul.f32 0.7978846, %v584_v38  ;;  %v710_v56 = vmul.f32 %v678_v47, %v454_v41  ;;  %v522_v46 = vmul.f32 %v490_v50, %v1387_v36 }
 0x134   : > { %v730_v31 = vpack.c.bf16 %v709_v18, %v708_v26 }
 0x135   : > { %v617_v54 = vmul.f32 0.7978846, %v585_v42  ;;  %1128 = vtanh.f32 %v616_v51  ;;  %v554_v62 = vmul.f32 %v522_v46, %v1387_v36 }
 0x137   : > { %v815_v49 = vpop.f32.mrf.mxu1  ;;  %1130 = vtanh.f32 %v617_v54  ;;  %v586_v55 = vadd.f32 %v554_v62, %v1387_v36 }
 0x138   : > { %v816_v52 = vadd.f32 %v1326_v27, %v815_v49  ;;  %v679_v49 = vadd.f32 1.0, %v1127_v35  ;;  %v424_v59 = vpop.f32.mrf.mxu3  ;;  %v459_v35 = vmul.f32 0.5, %v1391_v39 }
 0x139   : > { %v618_v14 = vmul.f32 0.7978846, %v586_v55 }
 0x13a   : > { %895 = vst.msk [vmem:[%s1334_s28 + $0x8] sm:$0xff] %vm893_vm1, %v816_v52  ;;  %v491_v52 = vmul.f32 0.044715, %v1391_v39  ;;  %v711_v57 = vmul.f32 %v679_v49, %v455_v44 }
 0x13b   : > { %v1129_v53 = vpop.eup %1128  ;;  %1132 = vtanh.f32 %v618_v14 }
 0x13c   : > { %v523_v48 = vmul.f32 %v491_v52, %v1391_v39  ;;  %v731_v61 = vpack.c.bf16 %v711_v57, %v710_v56  ;;  %v680_v8 = vadd.f32 1.0, %v1129_v53 }
 0x13d   : > { %v1131_v1 = vpop.eup %1130 }
 0x13e   : > { %v555_v0 = vmul.f32 %v523_v48, %v1391_v39  ;;  %v681_v10 = vadd.f32 1.0, %v1131_v1  ;;  %v712_v17 = vmul.f32 %v680_v8, %v456_v4 }
 0x13f   : > { %v818_v2 = vpop.f32.mrf.mxu1 }
 0x140   : > { %v819_v3 = vadd.f32 %v1326_v27, %v818_v2  ;;  %v1409_v2 = vadd.f32 %v1268_v45, %v422_v37  ;;  %v587_v5 = vadd.f32 %v555_v0, %v1391_v39  ;;  %v427_v13 = vpop.f32.mrf.mxu3  ;;  %v713_v9 = vmul.f32 %v681_v10, %v457_v7 }
 0x141   : > { %v1133_v26 = vpop.eup %1132 }
 0x142   : > { %896 = vst.msk [vmem:[%s1334_s28 + $0x10] sm:$0xff] %vm893_vm1, %v819_v3  ;;  %857 = vmatmul.bf16.gmra.mxu2 %v729_v63  ;;  %v1413_v3 = vadd.f32 %v1268_v45, %v424_v59  ;;  %v619_v16 = vmul.f32 0.7978846, %v587_v5  ;;  %v732_v23 = vpack.c.bf16 %v713_v9, %v712_v17  ;;  %v682_v37 = vadd.f32 1.0, %v1133_v26 }
 0x144   : > { %1134 = vtanh.f32 %v619_v16  ;;  %v714_v44 = vmul.f32 %v682_v37, %v458_v32 }
 0x147   : > { %v820_v12 = vpop.f32.mrf.mxu1 }
 0x148   : > { %v821_v15 = vadd.f32 %v1326_v27, %v820_v12  ;;  %v492_v12 = vmul.f32 0.044715, %v1409_v2  ;;  %v429_v18 = vpop.f32.mrf.mxu3 }
 0x14a   : > { %897 = vst.msk [vmem:[%s1334_s28 + $0x18] sm:$0xff] %vm893_vm1, %v821_v15  ;;  %v493_v15 = vmul.f32 0.044715, %v1413_v3  ;;  %v524_v19 = vmul.f32 %v492_v12, %v1409_v2  ;;  %v1135_v28 = vpop.eup %1134 }
 0x14b   : > { %v683_v38 = vadd.f32 1.0, %v1135_v28 }
 0x14c   : > { %v525_v11 = vmul.f32 %v493_v15, %v1413_v3  ;;  %v556_v24 = vmul.f32 %v524_v19, %v1409_v2 }
 0x14e   : > { %v557_v25 = vmul.f32 %v525_v11, %v1413_v3  ;;  %v588_v21 = vadd.f32 %v556_v24, %v1409_v2 }
 0x14f   : > { %v823_v29 = vpop.f32.mrf.mxu1 }
 0x150   : > { %v824_v30 = vadd.f32 %v1326_v27, %v823_v29  ;;  %v428_v29 = vadd.f32 %v1268_v45, %v427_v13  ;;  %v589_v33 = vadd.f32 %v557_v25, %v1413_v3  ;;  %v620_v41 = vmul.f32 0.7978846, %v588_v21 }
 0x152   : > { %898 = vst.msk [vmem:[%s1334_s28 + $0x20] sm:$0xff] %vm893_vm1, %v824_v30  ;;  %862 = vmatmul.bf16.gmra.mxu2 %v730_v31  ;;  %v430_v30 = vadd.f32 %v1268_v45, %v429_v18  ;;  %v715_v45 = vmul.f32 %v683_v38, %v459_v35  ;;  %1136 = vtanh.f32 %v620_v41  ;;  %v462_v7 = vmul.f32 0.5, %v428_v29 }
 0x154   : > { %v495_v42 = vmul.f32 0.044715, %v430_v30  ;;  %v733_v39 = vpack.c.bf16 %v715_v45, %v714_v44  ;;  %v463_v10 = vmul.f32 0.5, %v430_v30 }
 0x156   : > { %v527_v49 = vmul.f32 %v495_v42, %v430_v30 }
 0x157   : > { %v825_v40 = vpop.f32.mrf.mxu1 }
 0x158   : > { %v826_v43 = vadd.f32 %v1326_v27, %v825_v40  ;;  %v494_v40 = vmul.f32 0.044715, %v428_v29  ;;  %v559_v52 = vmul.f32 %v527_v49, %v430_v30  ;;  %v1137_v54 = vpop.eup %1136 }
 0x15a   : > { %899 = vst.msk [vmem:[%s1334_s28 + $0x28] sm:$0xff] %vm893_vm1, %v826_v43  ;;  %v621_v43 = vmul.f32 0.7978846, %v589_v33  ;;  %v526_v47 = vmul.f32 %v494_v40, %v428_v29  ;;  %v591_v48 = vadd.f32 %v559_v52, %v430_v30 }
 0x15c   : > { %1138 = vtanh.f32 %v621_v43  ;;  %v558_v51 = vmul.f32 %v526_v47, %v428_v29  ;;  %v623_v53 = vmul.f32 0.7978846, %v591_v48 }
 0x15e   : > { %v590_v57 = vadd.f32 %v558_v51, %v428_v29 }
 0x15f   : > { %v828_v58 = vpop.f32.mrf.mxu1 }
 0x160   : > { %v829_v60 = vadd.f32 %v1326_v27, %v828_v58  ;;  %v460_v58 = vmul.f32 0.5, %v1409_v2  ;;  %v622_v0 = vmul.f32 0.7978846, %v590_v57 }
 0x162   : > { %900 = vst.msk [vmem:[%s1334_s28 + $0x30] sm:$0xff] %vm893_vm1, %v829_v60  ;;  %867 = vmatmul.bf16.gmra.mxu2 %v731_v61  ;;  %v1139_v56 = vpop.eup %1138  ;;  %v461_v60 = vmul.f32 0.5, %v1413_v3  ;;  %v684_v61 = vadd.f32 1.0, %v1137_v54  ;;  %1140 = vtanh.f32 %v622_v0 }
 0x163   : > { %v685_v62 = vadd.f32 1.0, %v1139_v56  ;;  %1142 = vtanh.f32 %v623_v53 }
 0x164   : > { %v716_v1 = vmul.f32 %v684_v61, %v460_v58 }
 0x165   : > { %v717_v55 = vmul.f32 %v685_v62, %v461_v60 }
 0x167   : > { %v830_v63 = vpop.f32.mrf.mxu1  ;;  %v734_v4 = vpack.c.bf16 %v717_v55, %v716_v1 }
 0x168   : > { %v831_v6 = vadd.f32 %v1326_v27, %v830_v63  ;;  %v1141_v3 = vpop.eup %1140 }
 0x169   : > { %v1143_v5 = vpop.eup %1142  ;;  %v686_v12 = vadd.f32 1.0, %v1141_v3 }
 0x16a   : > { %901 = vst.msk [vmem:[%s1334_s28 + $0x38] sm:$0xff] %vm893_vm1, %v831_v6  ;;  %v687_v13 = vadd.f32 1.0, %v1143_v5 }
 0x16b   : > { %v718_v14 = vmul.f32 %v686_v12, %v462_v7 }
 0x16c   : > { %v719_v15 = vmul.f32 %v687_v13, %v463_v10 }
 0x16e   : > { %v735_v9 = vpack.c.bf16 %v719_v15, %v718_v14 }
 0x16f   : > { %v833_v20 = vpop.f32.mrf.mxu1 }
 0x170   : > { %v834_v22 = vadd.f32 %v1326_v27, %v833_v20 }
 0x172   : > { %902 = vst.msk [vmem:[%s1334_s28 + $0x40] sm:$0xff] %vm893_vm1, %v834_v22  ;;  %872 = vmatmul.bf16.gmra.mxu2 %v732_v23 }
 0x177   : > { %v835_v31 = vpop.f32.mrf.mxu1 }
 0x178   : > { %v836_v34 = vadd.f32 %v1326_v27, %v835_v31 }
 0x17a   : > { %903 = vst.msk [vmem:[%s1334_s28 + $0x48] sm:$0xff] %vm893_vm1, %v836_v34 }
 0x17f   : > { %v838_v36 = vpop.f32.mrf.mxu1 }
 0x180   : > { %v839_v50 = vadd.f32 %v1326_v27, %v838_v36 }
 0x182   : > { %904 = vst.msk [vmem:[%s1334_s28 + $0x50] sm:$0xff] %vm893_vm1, %v839_v50  ;;  %877 = vmatmul.bf16.gmra.mxu2 %v733_v39 }
 0x187   : > { %v840_v46 = vpop.f32.mrf.mxu1 }
 0x188   : > { %v841_v59 = vadd.f32 %v1326_v27, %v840_v46 }
 0x18a   : > { %905 = vst.msk [vmem:[%s1334_s28 + $0x58] sm:$0xff] %vm893_vm1, %v841_v59 }
 0x18f   : > { %v843_v63 = vpop.f32.mrf.mxu1 }
 0x190   : > { %v844_v2 = vadd.f32 %v1326_v27, %v843_v63 }
 0x192   : > { %906 = vst.msk [vmem:[%s1334_s28 + $0x60] sm:$0xff] %vm893_vm1, %v844_v2  ;;  %882 = vmatmul.bf16.gmra.mxu2 %v734_v4 }
 0x197   : > { %v845_v6 = vpop.f32.mrf.mxu1 }
 0x198   : > { %v846_v8 = vadd.f32 %v1326_v27, %v845_v6 }
 0x19a   : > { %907 = vst.msk [vmem:[%s1334_s28 + $0x68] sm:$0xff] %vm893_vm1, %v846_v8 }
 0x19f   : > { %v848_v16 = vpop.f32.mrf.mxu1 }
 0x1a0   : > { %v849_v17 = vadd.f32 %v1326_v27, %v848_v16 }
 0x1a2   : > { %908 = vst.msk [vmem:[%s1334_s28 + $0x70] sm:$0xff] %vm893_vm1, %v849_v17  ;;  %887 = vmatmul.bf16.gmra.mxu2 %v735_v9 }
 0x1a7   : > { %v850_v19 = vpop.f32.mrf.mxu1 }
 0x1a8   : > { %v851_v20 = vadd.f32 %v1326_v27, %v850_v19 }
 0x1aa   : > { %909 = vst.msk [vmem:[%s1334_s28 + $0x78] sm:$0xff] %vm893_vm1, %v851_v20 }
 0x1b5   : > { %v853_v11 = vpop.f32.mrf.mxu2 }
 0x1b6   : > { %v854_v22 = vadd.f32 %v1326_v27, %v853_v11 }
 0x1b8   : > { %910 = vst.msk [vmem:[%s1334_s28 + $0x80] sm:$0xff] %vm893_vm1, %v854_v22 }
 0x1bd   : > { %v855_v23 = vpop.f32.mrf.mxu2 }
 0x1be   : > { %v856_v24 = vadd.f32 %v1326_v27, %v855_v23 }
 0x1c0   : > { %911 = vst.msk [vmem:[%s1334_s28 + $0x88] sm:$0xff] %vm893_vm1, %v856_v24 }
 0x1c5   : > { %v858_v25 = vpop.f32.mrf.mxu2 }
 0x1c6   : > { %v859_v26 = vadd.f32 %v1326_v27, %v858_v25 }
 0x1c8   : > { %912 = vst.msk [vmem:[%s1334_s28 + $0x90] sm:$0xff] %vm893_vm1, %v859_v26 }
 0x1cd   : > { %v860_v18 = vpop.f32.mrf.mxu2 }
 0x1ce   : > { %v861_v28 = vadd.f32 %v1326_v27, %v860_v18 }
 0x1d0   : > { %913 = vst.msk [vmem:[%s1334_s28 + $0x98] sm:$0xff] %vm893_vm1, %v861_v28 }
 0x1d5   : > { %v863_v29 = vpop.f32.mrf.mxu2 }
 0x1d6   : > { %v864_v21 = vadd.f32 %v1326_v27, %v863_v29 }
 0x1d8   : > { %914 = vst.msk [vmem:[%s1334_s28 + $0xa0] sm:$0xff] %vm893_vm1, %v864_v21 }
 0x1dd   : > { %v865_v30 = vpop.f32.mrf.mxu2 }
 0x1de   : > { %v866_v31 = vadd.f32 %v1326_v27, %v865_v30 }
 0x1e0   : > { %915 = vst.msk [vmem:[%s1334_s28 + $0xa8] sm:$0xff] %vm893_vm1, %v866_v31 }
 0x1e5   : > { %v868_v32 = vpop.f32.mrf.mxu2 }
 0x1e6   : > { %v869_v33 = vadd.f32 %v1326_v27, %v868_v32 }
 0x1e8   : > { %916 = vst.msk [vmem:[%s1334_s28 + $0xb0] sm:$0xff] %vm893_vm1, %v869_v33 }
 0x1ed   : > { %v870_v34 = vpop.f32.mrf.mxu2 }
 0x1ee   : > { %v871_v35 = vadd.f32 %v1326_v27, %v870_v34 }
 0x1f0   : > { %917 = vst.msk [vmem:[%s1334_s28 + $0xb8] sm:$0xff] %vm893_vm1, %v871_v35 }
 0x1f5   : > { %v873_v37 = vpop.f32.mrf.mxu2 }
 0x1f6   : > { %v874_v38 = vadd.f32 %v1326_v27, %v873_v37 }
 0x1f8   : > { %918 = vst.msk [vmem:[%s1334_s28 + $0xc0] sm:$0xff] %vm893_vm1, %v874_v38 }
 0x1fd   : > { %v875_v40 = vpop.f32.mrf.mxu2 }
 0x1fe   : > { %v876_v41 = vadd.f32 %v1326_v27, %v875_v40 }
 0x200   : > { %919 = vst.msk [vmem:[%s1334_s28 + $0xc8] sm:$0xff] %vm893_vm1, %v876_v41 }
 0x205   : > { %v878_v42 = vpop.f32.mrf.mxu2 }
 0x206   : > { %v879_v43 = vadd.f32 %v1326_v27, %v878_v42 }
 0x208   : > { %920 = vst.msk [vmem:[%s1334_s28 + $0xd0] sm:$0xff] %vm893_vm1, %v879_v43 }
 0x20d   : > { %v880_v44 = vpop.f32.mrf.mxu2 }
 0x20e   : > { %v881_v45 = vadd.f32 %v1326_v27, %v880_v44 }
 0x210   : > { %921 = vst.msk [vmem:[%s1334_s28 + $0xd8] sm:$0xff] %vm893_vm1, %v881_v45 }
 0x215   : > { %v883_v47 = vpop.f32.mrf.mxu2 }
 0x216   : > { %v884_v36 = vadd.f32 %v1326_v27, %v883_v47 }
 0x218   : > { %922 = vst.msk [vmem:[%s1334_s28 + $0xe0] sm:$0xff] %vm893_vm1, %v884_v36 }
 0x21d   : > { %v885_v49 = vpop.f32.mrf.mxu2 }
 0x21e   : > { %v886_v50 = vadd.f32 %v1326_v27, %v885_v49 }
 0x220   : > { %923 = vst.msk [vmem:[%s1334_s28 + $0xe8] sm:$0xff] %vm893_vm1, %v886_v50 }
 0x225   : > { %v888_v39 = vpop.f32.mrf.mxu2 }
 0x226   : > { %v889_v51 = vadd.f32 %v1326_v27, %v888_v39 }
 0x228   : > { %924 = vst.msk [vmem:[%s1334_s28 + $0xf0] sm:$0xff] %vm893_vm1, %v889_v51 }
 0x22d   : > { %v890_v52 = vpop.f32.mrf.mxu2 }
 0x22e   : > { %v891_v54 = vadd.f32 %v1326_v27, %v890_v52 }
 0x230   : > { %925 = vst.msk [vmem:[%s1334_s28 + $0xf8] sm:$0xff] %vm893_vm1, %v891_v54 }
 0x231 PF: > { %s15_s18 = sadd.s32 1, %s1150_s18  }
 0x232   : > { %p12_p4 = scmp.ge.s32.totalorder %s15_s18, 4  }
 0x234   :  { %14 = sbr.rel (!%p12_p4) target bundleno = 1 (0x1), region = 70 }

</bundles_post_ra>
